<compile_context>
chip_gen: v7x
topology: tpu7x:2x2x1
jax: 0.10.0
libtpu: 0.0.40
codegen_flags: <defaults>
</compile_context>

<pallas_src>
import functools
import math

import numpy as np
import jax
import jax.numpy as jnp
from jax import lax
from jax.experimental import pallas as pl
from jax.experimental.pallas import tpu as pltpu

EPS = 1e-5
INV_SQRT2 = 1.0 / math.sqrt(2.0)
HALF_PI = math.pi / 2.0


def _gelu(x):
    # PyTorch nn.GELU() default (exact erf form).
    return 0.5 * x * (1.0 + lax.erf(x * INV_SQRT2))


def _layer_norm(y, w, b):
    mu = jnp.mean(y, axis=-1, keepdims=True)
    var = jnp.mean((y - mu) ** 2, axis=-1, keepdims=True)
    return (y - mu) * lax.rsqrt(var + EPS) * w + b


def _mlp_block(x, w1T, w2T, lnw, lnb):
    # MLPBlock: LayerNorm(Linear(GELU(Linear(x))) + x), both linears bias-free.
    h = _gelu(jnp.dot(x, w1T, preferred_element_type=jnp.float32))
    y = jnp.dot(h, w2T, preferred_element_type=jnp.float32) + x
    return _layer_norm(y, lnw, lnb)


def tqc_kernel(ca_ref, pos_ref, acs_ref,          # (Bt, CA), (Bt, P), (Bt, ACD)
               wp_ref,                            # (P, P*NF)  2*pi*freqs scatter matrix
               wca_ref, wsin_ref, wcos_ref,       # split first-linear weight (.., F)
               wac_ref,                           # (ACD, F)
               wa_ref, wb_ref,                    # (3, F, 2F), (3, 2F, F) MLP-block weights
               wcmb_ref,                          # (2, F, F) combine-linear halves
               wq_ref,                            # (F, NQ)
               vec_ref,                           # (16, F) packed biases / LN params
               o_ref):                            # (Bt, NQ)
    f32 = jnp.float32
    nq = o_ref.shape[-1]

    vecs = vec_ref[...]
    b_ob, b_ac, b_cmb = vecs[0:1], vecs[1:2], vecs[2:3]
    b_q = vecs[3:4, :nq]
    ln1w, ln1b = vecs[4:5], vecs[5:6]
    ln2w, ln2b = vecs[6:7], vecs[7:8]
    ln3w, ln3b = vecs[8:9], vecs[9:10]

    # --- Embedder: sp[b, i*NF + f] = 2*pi * pos[b, i] * freqs[f]; sin / cos blocks ---
    sp = jnp.dot(pos_ref[...], wp_ref[...], preferred_element_type=f32)
    sin_sp = jnp.sin(sp)
    cos_sp = jnp.sin(sp + HALF_PI)

    # --- connect_network: Linear(+bias) -> GELU -> MLPBlock x2 ---
    # ob = cat([channel_angle, sin, cos]) expressed as split-weight matmul sum.
    h = (jnp.dot(ca_ref[...], wca_ref[...], preferred_element_type=f32)
         + jnp.dot(sin_sp, wsin_ref[...], preferred_element_type=f32)
         + jnp.dot(cos_sp, wcos_ref[...], preferred_element_type=f32)
         + b_ob)
    h = _gelu(h)
    h = _mlp_block(h, wa_ref[0], wb_ref[0], ln1w, ln1b)
    h = _mlp_block(h, wa_ref[1], wb_ref[1], ln2w, ln2b)

    # --- action_network: Linear(+bias) -> GELU -> MLPBlock ---
    a = _gelu(jnp.dot(acs_ref[...], wac_ref[...], preferred_element_type=f32) + b_ac)
    a = _mlp_block(a, wa_ref[2], wb_ref[2], ln3w, ln3b)

    # --- combine_network (split-weight instead of cat([h, a])) + combine_layer ---
    z = _gelu(jnp.dot(h, wcmb_ref[0], preferred_element_type=f32)
              + jnp.dot(a, wcmb_ref[1], preferred_element_type=f32)
              + b_cmb)
    q = jnp.dot(z, wq_ref[...], preferred_element_type=f32) + b_q
    o_ref[...] = q.astype(o_ref.dtype)


def tqc_forward(obs, acs, params, *, pos_dim, num_freqs,
                min_freq_exp=0.0, max_freq_exp=4.0, block_b=128):
    """obs: (B, CA + P) f32, acs: (B, ACD) f32. params: PyTorch-convention weights."""
    f32 = jnp.float32
    B, obs_dim = obs.shape
    CA = obs_dim - pos_dim
    PNF = pos_dim * num_freqs
    F = params["b_ob"].shape[0]
    NQ = params["b_q"].shape[0]

    bt = min(block_b, B)
    assert B % bt == 0, "batch must be divisible by the batch tile"

    ca = obs[:, :CA].astype(f32)
    pos = obs[:, CA:].astype(f32)
    acs = acs.astype(f32)

    # Embedder as a constant scatter matrix with 2*pi and the frequencies folded in.
    freqs = 2.0 ** np.linspace(min_freq_exp, max_freq_exp, num_freqs)
    wp = np.zeros((pos_dim, PNF), np.float32)
    for i in range(pos_dim):
        wp[i, i * num_freqs:(i + 1) * num_freqs] = 2.0 * np.pi * freqs
    wp = jnp.asarray(wp)

    # Pre-transpose Linear weights; split the ones that face a concatenation.
    wobT = params["w_ob"].T.astype(f32)                 # (CA + 2*PNF, F)
    wca_w = wobT[:CA]
    wsin_w = wobT[CA:CA + PNF]
    wcos_w = wobT[CA + PNF:]
    wac_w = params["w_ac"].T.astype(f32)                # (ACD, F)
    wa_stack = jnp.stack([params["a1"].T, params["a2"].T, params["a3"].T]).astype(f32)
    wb_stack = jnp.stack([params["bm1"].T, params["bm2"].T, params["bm3"].T]).astype(f32)
    wcmbT = params["w_cmb"].T.astype(f32)               # (2F, F)
    wcmb_stack = jnp.stack([wcmbT[:F], wcmbT[F:]])      # (2, F, F)
    wq_w = params["w_q"].T.astype(f32)                  # (F, NQ)

    # Pack all small vectors into a single (16, F) array (one DMA instead of ten).
    vecs = jnp.zeros((16, F), f32)
    rows = [params["b_ob"], params["b_ac"], params["b_cmb"], params["b_q"],
            params["ln1w"], params["ln1b"], params["ln2w"], params["ln2b"],
            params["ln3w"], params["ln3b"]]
    for i, r in enumerate(rows):
        vecs = vecs.at[i, :r.shape[0]].set(r.astype(f32))

    weights = (wp, wca_w, wsin_w, wcos_w, wac_w,
               wa_stack, wb_stack, wcmb_stack, wq_w, vecs)

    def batch_spec(n):
        return pl.BlockSpec((bt, n), lambda b: (b, 0))

    def full_spec(a):
        return pl.BlockSpec(a.shape, lambda b: (0,) * a.ndim)

    in_specs = [batch_spec(CA), batch_spec(pos_dim), batch_spec(acs.shape[1])]
    in_specs += [full_spec(a) for a in weights]

    return pl.pallas_call(
        tqc_kernel,
        out_shape=jax.ShapeDtypeStruct((B, NQ), f32),
        grid=(B // bt,),
        in_specs=in_specs,
        out_specs=pl.BlockSpec((bt, NQ), lambda b: (b, 0)),
        compiler_params=pltpu.CompilerParams(dimension_semantics=("parallel",)),
    )(ca, pos, acs, *weights)


def reference(obs, acs, params, pos_dim, num_freqs, min_freq_exp=0.0, max_freq_exp=4.0):
    """Pure-JAX reference mirroring the PyTorch TQC forward."""
    dot = functools.partial(jnp.dot, precision=jax.lax.Precision.HIGHEST)

    pos = obs[..., -pos_dim:]
    ca = obs[..., :-pos_dim]
    freqs = 2.0 ** jnp.linspace(min_freq_exp, max_freq_exp, num_freqs)
    si = (2.0 * jnp.pi * pos)[..., None] * freqs
    si = si.reshape(*si.shape[:-2], -1)
    enc = jnp.sin(jnp.concatenate([si, si + jnp.pi / 2.0], axis=-1))
    ob = jnp.concatenate([ca, enc], axis=-1)

    def gelu(x):
        return 0.5 * x * (1.0 + lax.erf(x * INV_SQRT2))

    def ln(y, w, b):
        mu = y.mean(-1, keepdims=True)
        var = ((y - mu) ** 2).mean(-1, keepdims=True)
        return (y - mu) / jnp.sqrt(var + EPS) * w + b

    def mlp_block(x, a, bm, lw, lb):
        return ln(dot(gelu(dot(x, a.T)), bm.T) + x, lw, lb)

    h = gelu(dot(ob, params["w_ob"].T) + params["b_ob"])
    h = mlp_block(h, params["a1"], params["bm1"], params["ln1w"], params["ln1b"])
    h = mlp_block(h, params["a2"], params["bm2"], params["ln2w"], params["ln2b"])
    a = gelu(dot(acs, params["w_ac"].T) + params["b_ac"])
    a = mlp_block(a, params["a3"], params["bm3"], params["ln3w"], params["ln3b"])
    z = gelu(dot(jnp.concatenate([h, a], -1), params["w_cmb"].T) + params["b_cmb"])
    return dot(z, params["w_q"].T) + params["b_q"]


if __name__ == "__main__":
    # Scaled-down TQC config (original: 400 / ff_dim=256 / n_quantiles=25).
    P, NF = 3, 5               # position dim, Embedder num_freqs -> 2*P*NF = 30 features
    CH, AN = 6, 4              # channel / angle feature dims
    CA = CH + AN               # channel_angle width = 10
    ACD = 4                    # action dim
    F = 128                    # hidden width (= ff_dim in this scaled config)
    NQ = 25                    # n_quantiles
    B = 256                    # batch (2 x 128-row grid steps)

    key = jax.random.PRNGKey(0)
    ks = jax.random.split(key, 24)
    obs = jax.random.normal(ks[0], (B, CA + P), jnp.float32)
    acs = jax.random.normal(ks[1], (B, ACD), jnp.float32)

    def w(k, shape, scale=0.1):
        return scale * jax.random.normal(k, shape, jnp.float32)

    params = {
        "w_ob": w(ks[2], (F, CA + 2 * P * NF)), "b_ob": w(ks[3], (F,)),
        "a1": w(ks[4], (2 * F, F)), "bm1": w(ks[5], (F, 2 * F)),
        "ln1w": 1.0 + w(ks[6], (F,), 0.05), "ln1b": w(ks[7], (F,), 0.05),
        "a2": w(ks[8], (2 * F, F)), "bm2": w(ks[9], (F, 2 * F)),
        "ln2w": 1.0 + w(ks[10], (F,), 0.05), "ln2b": w(ks[11], (F,), 0.05),
        "w_ac": w(ks[12], (F, ACD)), "b_ac": w(ks[13], (F,)),
        "a3": w(ks[14], (2 * F, F)), "bm3": w(ks[15], (F, 2 * F)),
        "ln3w": 1.0 + w(ks[16], (F,), 0.05), "ln3b": w(ks[17], (F,), 0.05),
        "w_cmb": w(ks[18], (F, 2 * F)), "b_cmb": w(ks[19], (F,)),
        "w_q": w(ks[20], (NQ, F)), "b_q": w(ks[21], (NQ,)),
    }

    out = jax.block_until_ready(tqc_forward(obs, acs, params, pos_dim=P, num_freqs=NF))
    ref = jax.block_until_ready(reference(obs, acs, params, P, NF))
    np.testing.assert_allclose(np.asarray(out), np.asarray(ref), rtol=1e-3, atol=5e-4)

    print("KERNEL_OK")
</pallas_src>

<mosaic_0001>
module attributes {stable_mosaic.version = 11 : i64} {
  func.func @tqc_kernel(%arg0: i32, %arg1: memref<128x10xf32, #tpu.memory_space<vmem>>, %arg2: memref<128x3xf32, #tpu.memory_space<vmem>>, %arg3: memref<128x4xf32, #tpu.memory_space<vmem>>, %arg4: memref<3x15xf32, #tpu.memory_space<vmem>>, %arg5: memref<10x128xf32, #tpu.memory_space<vmem>>, %arg6: memref<15x128xf32, #tpu.memory_space<vmem>>, %arg7: memref<15x128xf32, #tpu.memory_space<vmem>>, %arg8: memref<4x128xf32, #tpu.memory_space<vmem>>, %arg9: memref<3x128x256xf32, #tpu.memory_space<vmem>>, %arg10: memref<3x256x128xf32, #tpu.memory_space<vmem>>, %arg11: memref<2x128x128xf32, #tpu.memory_space<vmem>>, %arg12: memref<128x25xf32, #tpu.memory_space<vmem>>, %arg13: memref<16x128xf32, #tpu.memory_space<vmem>>, %arg14: memref<128x25xf32, #tpu.memory_space<vmem>>) attributes {dimension_semantics = [#tpu.dimension_semantics<parallel>], iteration_bounds = array<i64: 2>, scalar_prefetch = 0 : i64, scratch_operands = 0 : i64, tpu.core_type = #tpu.core_type<tc>, window_params = [{transform_indices = @transform_0, window_bounds = array<i64: 128, 10>}, {transform_indices = @transform_1, window_bounds = array<i64: 128, 3>}, {transform_indices = @transform_2, window_bounds = array<i64: 128, 4>}, {pipeline_mode = #tpu.pipeline_mode<synchronous>, transform_indices = @transform_3, window_bounds = array<i64: 3, 15>}, {pipeline_mode = #tpu.pipeline_mode<synchronous>, transform_indices = @transform_4, window_bounds = array<i64: 10, 128>}, {pipeline_mode = #tpu.pipeline_mode<synchronous>, transform_indices = @transform_5, window_bounds = array<i64: 15, 128>}, {pipeline_mode = #tpu.pipeline_mode<synchronous>, transform_indices = @transform_6, window_bounds = array<i64: 15, 128>}, {pipeline_mode = #tpu.pipeline_mode<synchronous>, transform_indices = @transform_7, window_bounds = array<i64: 4, 128>}, {pipeline_mode = #tpu.pipeline_mode<synchronous>, transform_indices = @transform_8, window_bounds = array<i64: 3, 128, 256>}, {pipeline_mode = #tpu.pipeline_mode<synchronous>, transform_indices = @transform_9, window_bounds = array<i64: 3, 256, 128>}, {pipeline_mode = #tpu.pipeline_mode<synchronous>, transform_indices = @transform_10, window_bounds = array<i64: 2, 128, 128>}, {pipeline_mode = #tpu.pipeline_mode<synchronous>, transform_indices = @transform_11, window_bounds = array<i64: 128, 25>}, {pipeline_mode = #tpu.pipeline_mode<synchronous>, transform_indices = @transform_12, window_bounds = array<i64: 16, 128>}, {transform_indices = @transform_13, window_bounds = array<i64: 128, 25>}]} {
    %c0 = arith.constant 0 : index
    %c0_0 = arith.constant 0 : index
    %0 = vector.load %arg13[%c0, %c0_0] : memref<16x128xf32, #tpu.memory_space<vmem>>, vector<16x128xf32>
    %1 = vector.extract_strided_slice %0 {offsets = [0, 0], sizes = [1, 128], strides = [1, 1]} : vector<16x128xf32> to vector<1x128xf32>
    %2 = vector.extract_strided_slice %0 {offsets = [1, 0], sizes = [1, 128], strides = [1, 1]} : vector<16x128xf32> to vector<1x128xf32>
    %3 = vector.extract_strided_slice %0 {offsets = [2, 0], sizes = [1, 128], strides = [1, 1]} : vector<16x128xf32> to vector<1x128xf32>
    %4 = vector.extract_strided_slice %0 {offsets = [3, 0], sizes = [1, 25], strides = [1, 1]} : vector<16x128xf32> to vector<1x25xf32>
    %5 = vector.extract_strided_slice %0 {offsets = [4, 0], sizes = [1, 128], strides = [1, 1]} : vector<16x128xf32> to vector<1x128xf32>
    %6 = vector.extract_strided_slice %0 {offsets = [5, 0], sizes = [1, 128], strides = [1, 1]} : vector<16x128xf32> to vector<1x128xf32>
    %7 = vector.extract_strided_slice %0 {offsets = [6, 0], sizes = [1, 128], strides = [1, 1]} : vector<16x128xf32> to vector<1x128xf32>
    %8 = vector.extract_strided_slice %0 {offsets = [7, 0], sizes = [1, 128], strides = [1, 1]} : vector<16x128xf32> to vector<1x128xf32>
    %9 = vector.extract_strided_slice %0 {offsets = [8, 0], sizes = [1, 128], strides = [1, 1]} : vector<16x128xf32> to vector<1x128xf32>
    %10 = vector.extract_strided_slice %0 {offsets = [9, 0], sizes = [1, 128], strides = [1, 1]} : vector<16x128xf32> to vector<1x128xf32>
    %c0_1 = arith.constant 0 : index
    %c0_2 = arith.constant 0 : index
    %11 = vector.load %arg2[%c0_1, %c0_2] : memref<128x3xf32, #tpu.memory_space<vmem>>, vector<128x3xf32>
    %c0_3 = arith.constant 0 : index
    %c0_4 = arith.constant 0 : index
    %12 = vector.load %arg4[%c0_3, %c0_4] : memref<3x15xf32, #tpu.memory_space<vmem>>, vector<3x15xf32>
    %cst = arith.constant dense<0.000000e+00> : vector<128x15xf32>
    %13 = tpu.matmul %11, %12, %cst {dimension_numbers = #tpu.dot_dimension_numbers<[1], [0], [0], [1], [0, 0, 1, 1], [], []>} : vector<128x3xf32>, vector<3x15xf32>, vector<128x15xf32> -> vector<128x15xf32>
    %14 = math.sin %13 : vector<128x15xf32>
    %cst_5 = arith.constant 1.57079637 : f32
    %15 = vector.broadcast %cst_5 : f32 to vector<128x15xf32>
    %16 = arith.addf %13, %15 : vector<128x15xf32>
    %17 = math.sin %16 : vector<128x15xf32>
    %c0_6 = arith.constant 0 : index
    %c0_7 = arith.constant 0 : index
    %18 = vector.load %arg1[%c0_6, %c0_7] : memref<128x10xf32, #tpu.memory_space<vmem>>, vector<128x10xf32>
    %c0_8 = arith.constant 0 : index
    %c0_9 = arith.constant 0 : index
    %19 = vector.load %arg5[%c0_8, %c0_9] : memref<10x128xf32, #tpu.memory_space<vmem>>, vector<10x128xf32>
    %cst_10 = arith.constant dense<0.000000e+00> : vector<128x128xf32>
    %20 = tpu.matmul %18, %19, %cst_10 {dimension_numbers = #tpu.dot_dimension_numbers<[1], [0], [0], [1], [0, 0, 1, 1], [], []>} : vector<128x10xf32>, vector<10x128xf32>, vector<128x128xf32> -> vector<128x128xf32>
    %c0_11 = arith.constant 0 : index
    %c0_12 = arith.constant 0 : index
    %21 = vector.load %arg6[%c0_11, %c0_12] : memref<15x128xf32, #tpu.memory_space<vmem>>, vector<15x128xf32>
    %cst_13 = arith.constant dense<0.000000e+00> : vector<128x128xf32>
    %22 = tpu.matmul %14, %21, %cst_13 {dimension_numbers = #tpu.dot_dimension_numbers<[1], [0], [0], [1], [0, 0, 1, 1], [], []>} : vector<128x15xf32>, vector<15x128xf32>, vector<128x128xf32> -> vector<128x128xf32>
    %23 = arith.addf %20, %22 : vector<128x128xf32>
    %c0_14 = arith.constant 0 : index
    %c0_15 = arith.constant 0 : index
    %24 = vector.load %arg7[%c0_14, %c0_15] : memref<15x128xf32, #tpu.memory_space<vmem>>, vector<15x128xf32>
    %cst_16 = arith.constant dense<0.000000e+00> : vector<128x128xf32>
    %25 = tpu.matmul %17, %24, %cst_16 {dimension_numbers = #tpu.dot_dimension_numbers<[1], [0], [0], [1], [0, 0, 1, 1], [], []>} : vector<128x15xf32>, vector<15x128xf32>, vector<128x128xf32> -> vector<128x128xf32>
    %26 = arith.addf %23, %25 : vector<128x128xf32>
    %27 = vector.broadcast %1 : vector<1x128xf32> to vector<128x128xf32>
    %28 = arith.addf %26, %27 : vector<128x128xf32>
    %cst_17 = arith.constant 5.000000e-01 : f32
    %29 = vector.broadcast %cst_17 : f32 to vector<128x128xf32>
    %30 = arith.mulf %29, %28 : vector<128x128xf32>
    %cst_18 = arith.constant 0.707106769 : f32
    %31 = vector.broadcast %cst_18 : f32 to vector<128x128xf32>
    %32 = arith.mulf %28, %31 : vector<128x128xf32>
    %33 = math.erf %32 : vector<128x128xf32>
    %cst_19 = arith.constant 1.000000e+00 : f32
    %34 = vector.broadcast %cst_19 : f32 to vector<128x128xf32>
    %35 = arith.addf %34, %33 : vector<128x128xf32>
    %36 = arith.mulf %30, %35 : vector<128x128xf32>
    %c0_20 = arith.constant 0 : index
    %c0_21 = arith.constant 0 : index
    %c0_22 = arith.constant 0 : index
    %37 = vector.load %arg9[%c0_20, %c0_21, %c0_22] : memref<3x128x256xf32, #tpu.memory_space<vmem>>, vector<1x128x256xf32>
    %38 = vector.shape_cast %37 : vector<1x128x256xf32> to vector<128x256xf32>
    %c0_23 = arith.constant 0 : index
    %c0_24 = arith.constant 0 : index
    %c0_25 = arith.constant 0 : index
    %39 = vector.load %arg10[%c0_23, %c0_24, %c0_25] : memref<3x256x128xf32, #tpu.memory_space<vmem>>, vector<1x256x128xf32>
    %40 = vector.shape_cast %39 : vector<1x256x128xf32> to vector<256x128xf32>
    %cst_26 = arith.constant dense<0.000000e+00> : vector<128x256xf32>
    %41 = tpu.matmul %36, %38, %cst_26 {dimension_numbers = #tpu.dot_dimension_numbers<[1], [0], [0], [1], [0, 0, 1, 1], [], []>} : vector<128x128xf32>, vector<128x256xf32>, vector<128x256xf32> -> vector<128x256xf32>
    %cst_27 = arith.constant 5.000000e-01 : f32
    %42 = vector.broadcast %cst_27 : f32 to vector<128x256xf32>
    %43 = arith.mulf %42, %41 : vector<128x256xf32>
    %cst_28 = arith.constant 0.707106769 : f32
    %44 = vector.broadcast %cst_28 : f32 to vector<128x256xf32>
    %45 = arith.mulf %41, %44 : vector<128x256xf32>
    %46 = math.erf %45 : vector<128x256xf32>
    %cst_29 = arith.constant 1.000000e+00 : f32
    %47 = vector.broadcast %cst_29 : f32 to vector<128x256xf32>
    %48 = arith.addf %47, %46 : vector<128x256xf32>
    %49 = arith.mulf %43, %48 : vector<128x256xf32>
    %cst_30 = arith.constant dense<0.000000e+00> : vector<128x128xf32>
    %50 = tpu.matmul %49, %40, %cst_30 {dimension_numbers = #tpu.dot_dimension_numbers<[1], [0], [0], [1], [0, 0, 1, 1], [], []>} : vector<128x256xf32>, vector<256x128xf32>, vector<128x128xf32> -> vector<128x128xf32>
    %51 = arith.addf %50, %36 : vector<128x128xf32>
    %cst_31 = arith.constant dense<0.000000e+00> : vector<128xf32>
    %52 = vector.multi_reduction <add>, %51, %cst_31 [1] : vector<128x128xf32> to vector<128xf32>
    %53 = vector.shape_cast %52 : vector<128xf32> to vector<128x1xf32>
    %cst_32 = arith.constant 1.280000e+02 : f32
    %54 = vector.broadcast %cst_32 : f32 to vector<128x1xf32>
    %55 = arith.divf %53, %54 : vector<128x1xf32>
    %56 = vector.broadcast %55 : vector<128x1xf32> to vector<128x128xf32>
    %57 = arith.subf %51, %56 : vector<128x128xf32>
    %58 = arith.mulf %57, %57 : vector<128x128xf32>
    %cst_33 = arith.constant dense<0.000000e+00> : vector<128xf32>
    %59 = vector.multi_reduction <add>, %58, %cst_33 [1] : vector<128x128xf32> to vector<128xf32>
    %60 = vector.shape_cast %59 : vector<128xf32> to vector<128x1xf32>
    %cst_34 = arith.constant 1.280000e+02 : f32
    %61 = vector.broadcast %cst_34 : f32 to vector<128x1xf32>
    %62 = arith.divf %60, %61 : vector<128x1xf32>
    %63 = vector.broadcast %55 : vector<128x1xf32> to vector<128x128xf32>
    %64 = arith.subf %51, %63 : vector<128x128xf32>
    %cst_35 = arith.constant 9.99999974E-6 : f32
    %65 = vector.broadcast %cst_35 : f32 to vector<128x1xf32>
    %66 = arith.addf %62, %65 : vector<128x1xf32>
    %67 = math.rsqrt %66 : vector<128x1xf32>
    %68 = vector.broadcast %67 : vector<128x1xf32> to vector<128x128xf32>
    %69 = arith.mulf %64, %68 : vector<128x128xf32>
    %70 = vector.broadcast %5 : vector<1x128xf32> to vector<128x128xf32>
    %71 = arith.mulf %69, %70 : vector<128x128xf32>
    %72 = vector.broadcast %6 : vector<1x128xf32> to vector<128x128xf32>
    %73 = arith.addf %71, %72 : vector<128x128xf32>
    %c1 = arith.constant 1 : index
    %c0_36 = arith.constant 0 : index
    %c0_37 = arith.constant 0 : index
    %74 = vector.load %arg9[%c1, %c0_36, %c0_37] : memref<3x128x256xf32, #tpu.memory_space<vmem>>, vector<1x128x256xf32>
    %75 = vector.shape_cast %74 : vector<1x128x256xf32> to vector<128x256xf32>
    %c1_38 = arith.constant 1 : index
    %c0_39 = arith.constant 0 : index
    %c0_40 = arith.constant 0 : index
    %76 = vector.load %arg10[%c1_38, %c0_39, %c0_40] : memref<3x256x128xf32, #tpu.memory_space<vmem>>, vector<1x256x128xf32>
    %77 = vector.shape_cast %76 : vector<1x256x128xf32> to vector<256x128xf32>
    %cst_41 = arith.constant dense<0.000000e+00> : vector<128x256xf32>
    %78 = tpu.matmul %73, %75, %cst_41 {dimension_numbers = #tpu.dot_dimension_numbers<[1], [0], [0], [1], [0, 0, 1, 1], [], []>} : vector<128x128xf32>, vector<128x256xf32>, vector<128x256xf32> -> vector<128x256xf32>
    %cst_42 = arith.constant 5.000000e-01 : f32
    %79 = vector.broadcast %cst_42 : f32 to vector<128x256xf32>
    %80 = arith.mulf %79, %78 : vector<128x256xf32>
    %cst_43 = arith.constant 0.707106769 : f32
    %81 = vector.broadcast %cst_43 : f32 to vector<128x256xf32>
    %82 = arith.mulf %78, %81 : vector<128x256xf32>
    %83 = math.erf %82 : vector<128x256xf32>
    %cst_44 = arith.constant 1.000000e+00 : f32
    %84 = vector.broadcast %cst_44 : f32 to vector<128x256xf32>
    %85 = arith.addf %84, %83 : vector<128x256xf32>
    %86 = arith.mulf %80, %85 : vector<128x256xf32>
    %cst_45 = arith.constant dense<0.000000e+00> : vector<128x128xf32>
    %87 = tpu.matmul %86, %77, %cst_45 {dimension_numbers = #tpu.dot_dimension_numbers<[1], [0], [0], [1], [0, 0, 1, 1], [], []>} : vector<128x256xf32>, vector<256x128xf32>, vector<128x128xf32> -> vector<128x128xf32>
    %88 = arith.addf %87, %73 : vector<128x128xf32>
    %cst_46 = arith.constant dense<0.000000e+00> : vector<128xf32>
    %89 = vector.multi_reduction <add>, %88, %cst_46 [1] : vector<128x128xf32> to vector<128xf32>
    %90 = vector.shape_cast %89 : vector<128xf32> to vector<128x1xf32>
    %cst_47 = arith.constant 1.280000e+02 : f32
    %91 = vector.broadcast %cst_47 : f32 to vector<128x1xf32>
    %92 = arith.divf %90, %91 : vector<128x1xf32>
    %93 = vector.broadcast %92 : vector<128x1xf32> to vector<128x128xf32>
    %94 = arith.subf %88, %93 : vector<128x128xf32>
    %95 = arith.mulf %94, %94 : vector<128x128xf32>
    %cst_48 = arith.constant dense<0.000000e+00> : vector<128xf32>
    %96 = vector.multi_reduction <add>, %95, %cst_48 [1] : vector<128x128xf32> to vector<128xf32>
    %97 = vector.shape_cast %96 : vector<128xf32> to vector<128x1xf32>
    %cst_49 = arith.constant 1.280000e+02 : f32
    %98 = vector.broadcast %cst_49 : f32 to vector<128x1xf32>
    %99 = arith.divf %97, %98 : vector<128x1xf32>
    %100 = vector.broadcast %92 : vector<128x1xf32> to vector<128x128xf32>
    %101 = arith.subf %88, %100 : vector<128x128xf32>
    %cst_50 = arith.constant 9.99999974E-6 : f32
    %102 = vector.broadcast %cst_50 : f32 to vector<128x1xf32>
    %103 = arith.addf %99, %102 : vector<128x1xf32>
    %104 = math.rsqrt %103 : vector<128x1xf32>
    %105 = vector.broadcast %104 : vector<128x1xf32> to vector<128x128xf32>
    %106 = arith.mulf %101, %105 : vector<128x128xf32>
    %107 = vector.broadcast %7 : vector<1x128xf32> to vector<128x128xf32>
    %108 = arith.mulf %106, %107 : vector<128x128xf32>
    %109 = vector.broadcast %8 : vector<1x128xf32> to vector<128x128xf32>
    %110 = arith.addf %108, %109 : vector<128x128xf32>
    %c0_51 = arith.constant 0 : index
    %c0_52 = arith.constant 0 : index
    %111 = vector.load %arg3[%c0_51, %c0_52] : memref<128x4xf32, #tpu.memory_space<vmem>>, vector<128x4xf32>
    %c0_53 = arith.constant 0 : index
    %c0_54 = arith.constant 0 : index
    %112 = vector.load %arg8[%c0_53, %c0_54] : memref<4x128xf32, #tpu.memory_space<vmem>>, vector<4x128xf32>
    %cst_55 = arith.constant dense<0.000000e+00> : vector<128x128xf32>
    %113 = tpu.matmul %111, %112, %cst_55 {dimension_numbers = #tpu.dot_dimension_numbers<[1], [0], [0], [1], [0, 0, 1, 1], [], []>} : vector<128x4xf32>, vector<4x128xf32>, vector<128x128xf32> -> vector<128x128xf32>
    %114 = vector.broadcast %2 : vector<1x128xf32> to vector<128x128xf32>
    %115 = arith.addf %113, %114 : vector<128x128xf32>
    %cst_56 = arith.constant 5.000000e-01 : f32
    %116 = vector.broadcast %cst_56 : f32 to vector<128x128xf32>
    %117 = arith.mulf %116, %115 : vector<128x128xf32>
    %cst_57 = arith.constant 0.707106769 : f32
    %118 = vector.broadcast %cst_57 : f32 to vector<128x128xf32>
    %119 = arith.mulf %115, %118 : vector<128x128xf32>
    %120 = math.erf %119 : vector<128x128xf32>
    %cst_58 = arith.constant 1.000000e+00 : f32
    %121 = vector.broadcast %cst_58 : f32 to vector<128x128xf32>
    %122 = arith.addf %121, %120 : vector<128x128xf32>
    %123 = arith.mulf %117, %122 : vector<128x128xf32>
    %c2 = arith.constant 2 : index
    %c0_59 = arith.constant 0 : index
    %c0_60 = arith.constant 0 : index
    %124 = vector.load %arg9[%c2, %c0_59, %c0_60] : memref<3x128x256xf32, #tpu.memory_space<vmem>>, vector<1x128x256xf32>
    %125 = vector.shape_cast %124 : vector<1x128x256xf32> to vector<128x256xf32>
    %c2_61 = arith.constant 2 : index
    %c0_62 = arith.constant 0 : index
    %c0_63 = arith.constant 0 : index
    %126 = vector.load %arg10[%c2_61, %c0_62, %c0_63] : memref<3x256x128xf32, #tpu.memory_space<vmem>>, vector<1x256x128xf32>
    %127 = vector.shape_cast %126 : vector<1x256x128xf32> to vector<256x128xf32>
    %cst_64 = arith.constant dense<0.000000e+00> : vector<128x256xf32>
    %128 = tpu.matmul %123, %125, %cst_64 {dimension_numbers = #tpu.dot_dimension_numbers<[1], [0], [0], [1], [0, 0, 1, 1], [], []>} : vector<128x128xf32>, vector<128x256xf32>, vector<128x256xf32> -> vector<128x256xf32>
    %cst_65 = arith.constant 5.000000e-01 : f32
    %129 = vector.broadcast %cst_65 : f32 to vector<128x256xf32>
    %130 = arith.mulf %129, %128 : vector<128x256xf32>
    %cst_66 = arith.constant 0.707106769 : f32
    %131 = vector.broadcast %cst_66 : f32 to vector<128x256xf32>
    %132 = arith.mulf %128, %131 : vector<128x256xf32>
    %133 = math.erf %132 : vector<128x256xf32>
    %cst_67 = arith.constant 1.000000e+00 : f32
    %134 = vector.broadcast %cst_67 : f32 to vector<128x256xf32>
    %135 = arith.addf %134, %133 : vector<128x256xf32>
    %136 = arith.mulf %130, %135 : vector<128x256xf32>
    %cst_68 = arith.constant dense<0.000000e+00> : vector<128x128xf32>
    %137 = tpu.matmul %136, %127, %cst_68 {dimension_numbers = #tpu.dot_dimension_numbers<[1], [0], [0], [1], [0, 0, 1, 1], [], []>} : vector<128x256xf32>, vector<256x128xf32>, vector<128x128xf32> -> vector<128x128xf32>
    %138 = arith.addf %137, %123 : vector<128x128xf32>
    %cst_69 = arith.constant dense<0.000000e+00> : vector<128xf32>
    %139 = vector.multi_reduction <add>, %138, %cst_69 [1] : vector<128x128xf32> to vector<128xf32>
    %140 = vector.shape_cast %139 : vector<128xf32> to vector<128x1xf32>
    %cst_70 = arith.constant 1.280000e+02 : f32
    %141 = vector.broadcast %cst_70 : f32 to vector<128x1xf32>
    %142 = arith.divf %140, %141 : vector<128x1xf32>
    %143 = vector.broadcast %142 : vector<128x1xf32> to vector<128x128xf32>
    %144 = arith.subf %138, %143 : vector<128x128xf32>
    %145 = arith.mulf %144, %144 : vector<128x128xf32>
    %cst_71 = arith.constant dense<0.000000e+00> : vector<128xf32>
    %146 = vector.multi_reduction <add>, %145, %cst_71 [1] : vector<128x128xf32> to vector<128xf32>
    %147 = vector.shape_cast %146 : vector<128xf32> to vector<128x1xf32>
    %cst_72 = arith.constant 1.280000e+02 : f32
    %148 = vector.broadcast %cst_72 : f32 to vector<128x1xf32>
    %149 = arith.divf %147, %148 : vector<128x1xf32>
    %150 = vector.broadcast %142 : vector<128x1xf32> to vector<128x128xf32>
    %151 = arith.subf %138, %150 : vector<128x128xf32>
    %cst_73 = arith.constant 9.99999974E-6 : f32
    %152 = vector.broadcast %cst_73 : f32 to vector<128x1xf32>
    %153 = arith.addf %149, %152 : vector<128x1xf32>
    %154 = math.rsqrt %153 : vector<128x1xf32>
    %155 = vector.broadcast %154 : vector<128x1xf32> to vector<128x128xf32>
    %156 = arith.mulf %151, %155 : vector<128x128xf32>
    %157 = vector.broadcast %9 : vector<1x128xf32> to vector<128x128xf32>
    %158 = arith.mulf %156, %157 : vector<128x128xf32>
    %159 = vector.broadcast %10 : vector<1x128xf32> to vector<128x128xf32>
    %160 = arith.addf %158, %159 : vector<128x128xf32>
    %c0_74 = arith.constant 0 : index
    %c0_75 = arith.constant 0 : index
    %c0_76 = arith.constant 0 : index
    %161 = vector.load %arg11[%c0_74, %c0_75, %c0_76] : memref<2x128x128xf32, #tpu.memory_space<vmem>>, vector<1x128x128xf32>
    %162 = vector.shape_cast %161 : vector<1x128x128xf32> to vector<128x128xf32>
    %cst_77 = arith.constant dense<0.000000e+00> : vector<128x128xf32>
    %163 = tpu.matmul %110, %162, %cst_77 {dimension_numbers = #tpu.dot_dimension_numbers<[1], [0], [0], [1], [0, 0, 1, 1], [], []>} : vector<128x128xf32>, vector<128x128xf32>, vector<128x128xf32> -> vector<128x128xf32>
    %c1_78 = arith.constant 1 : index
    %c0_79 = arith.constant 0 : index
    %c0_80 = arith.constant 0 : index
    %164 = vector.load %arg11[%c1_78, %c0_79, %c0_80] : memref<2x128x128xf32, #tpu.memory_space<vmem>>, vector<1x128x128xf32>
    %165 = vector.shape_cast %164 : vector<1x128x128xf32> to vector<128x128xf32>
    %cst_81 = arith.constant dense<0.000000e+00> : vector<128x128xf32>
    %166 = tpu.matmul %160, %165, %cst_81 {dimension_numbers = #tpu.dot_dimension_numbers<[1], [0], [0], [1], [0, 0, 1, 1], [], []>} : vector<128x128xf32>, vector<128x128xf32>, vector<128x128xf32> -> vector<128x128xf32>
    %167 = arith.addf %163, %166 : vector<128x128xf32>
    %168 = vector.broadcast %3 : vector<1x128xf32> to vector<128x128xf32>
    %169 = arith.addf %167, %168 : vector<128x128xf32>
    %cst_82 = arith.constant 5.000000e-01 : f32
    %170 = vector.broadcast %cst_82 : f32 to vector<128x128xf32>
    %171 = arith.mulf %170, %169 : vector<128x128xf32>
    %cst_83 = arith.constant 0.707106769 : f32
    %172 = vector.broadcast %cst_83 : f32 to vector<128x128xf32>
    %173 = arith.mulf %169, %172 : vector<128x128xf32>
    %174 = math.erf %173 : vector<128x128xf32>
    %cst_84 = arith.constant 1.000000e+00 : f32
    %175 = vector.broadcast %cst_84 : f32 to vector<128x128xf32>
    %176 = arith.addf %175, %174 : vector<128x128xf32>
    %177 = arith.mulf %171, %176 : vector<128x128xf32>
    %c0_85 = arith.constant 0 : index
    %c0_86 = arith.constant 0 : index
    %178 = vector.load %arg12[%c0_85, %c0_86] : memref<128x25xf32, #tpu.memory_space<vmem>>, vector<128x25xf32>
    %cst_87 = arith.constant dense<0.000000e+00> : vector<128x25xf32>
    %179 = tpu.matmul %177, %178, %cst_87 {dimension_numbers = #tpu.dot_dimension_numbers<[1], [0], [0], [1], [0, 0, 1, 1], [], []>} : vector<128x128xf32>, vector<128x25xf32>, vector<128x25xf32> -> vector<128x25xf32>
    %180 = vector.broadcast %4 : vector<1x25xf32> to vector<128x25xf32>
    %181 = arith.addf %179, %180 : vector<128x25xf32>
    %c0_88 = arith.constant 0 : index
    %c0_89 = arith.constant 0 : index
    %182 = vector.load %arg14[%c0_88, %c0_89] : memref<128x25xf32, #tpu.memory_space<vmem>>, vector<128x25xf32>
    tpu.vector_store %arg14[%c0_88, %c0_89], %181 {strides = array<i32>} : memref<128x25xf32, #tpu.memory_space<vmem>>, vector<128x25xf32>,
    return
  }
  func.func @transform_0(%arg0: i32) -> (i32, i32) {
    %c0_i32 = arith.constant 0 : i32
    %c0_i32_0 = arith.constant 0 : i32
    return %arg0, %c0_i32 : i32, i32
  }
  func.func @transform_1(%arg0: i32) -> (i32, i32) {
    %c0_i32 = arith.constant 0 : i32
    %c0_i32_0 = arith.constant 0 : i32
    return %arg0, %c0_i32 : i32, i32
  }
  func.func @transform_2(%arg0: i32) -> (i32, i32) {
    %c0_i32 = arith.constant 0 : i32
    %c0_i32_0 = arith.constant 0 : i32
    return %arg0, %c0_i32 : i32, i32
  }
  func.func @transform_3(%arg0: i32) -> (i32, i32) {
    %c0_i32 = arith.constant 0 : i32
    %c0_i32_0 = arith.constant 0 : i32
    %c0_i32_1 = arith.constant 0 : i32
    return %c0_i32, %c0_i32_0 : i32, i32
  }
  func.func @transform_4(%arg0: i32) -> (i32, i32) {
    %c0_i32 = arith.constant 0 : i32
    %c0_i32_0 = arith.constant 0 : i32
    %c0_i32_1 = arith.constant 0 : i32
    return %c0_i32, %c0_i32_0 : i32, i32
  }
  func.func @transform_5(%arg0: i32) -> (i32, i32) {
    %c0_i32 = arith.constant 0 : i32
    %c0_i32_0 = arith.constant 0 : i32
    %c0_i32_1 = arith.constant 0 : i32
    return %c0_i32, %c0_i32_0 : i32, i32
  }
  func.func @transform_6(%arg0: i32) -> (i32, i32) {
    %c0_i32 = arith.constant 0 : i32
    %c0_i32_0 = arith.constant 0 : i32
    %c0_i32_1 = arith.constant 0 : i32
    return %c0_i32, %c0_i32_0 : i32, i32
  }
  func.func @transform_7(%arg0: i32) -> (i32, i32) {
    %c0_i32 = arith.constant 0 : i32
    %c0_i32_0 = arith.constant 0 : i32
    %c0_i32_1 = arith.constant 0 : i32
    return %c0_i32, %c0_i32_0 : i32, i32
  }
  func.func @transform_8(%arg0: i32) -> (i32, i32, i32) {
    %c0_i32 = arith.constant 0 : i32
    %c0_i32_0 = arith.constant 0 : i32
    %c0_i32_1 = arith.constant 0 : i32
    %c0_i32_2 = arith.constant 0 : i32
    return %c0_i32, %c0_i32_0, %c0_i32_1 : i32, i32, i32
  }
  func.func @transform_9(%arg0: i32) -> (i32, i32, i32) {
    %c0_i32 = arith.constant 0 : i32
    %c0_i32_0 = arith.constant 0 : i32
    %c0_i32_1 = arith.constant 0 : i32
    %c0_i32_2 = arith.constant 0 : i32
    return %c0_i32, %c0_i32_0, %c0_i32_1 : i32, i32, i32
  }
  func.func @transform_10(%arg0: i32) -> (i32, i32, i32) {
    %c0_i32 = arith.constant 0 : i32
    %c0_i32_0 = arith.constant 0 : i32
    %c0_i32_1 = arith.constant 0 : i32
    %c0_i32_2 = arith.constant 0 : i32
    return %c0_i32, %c0_i32_0, %c0_i32_1 : i32, i32, i32
  }
  func.func @transform_11(%arg0: i32) -> (i32, i32) {
    %c0_i32 = arith.constant 0 : i32
    %c0_i32_0 = arith.constant 0 : i32
    %c0_i32_1 = arith.constant 0 : i32
    return %c0_i32, %c0_i32_0 : i32, i32
  }
  func.func @transform_12(%arg0: i32) -> (i32, i32) {
    %c0_i32 = arith.constant 0 : i32
    %c0_i32_0 = arith.constant 0 : i32
    %c0_i32_1 = arith.constant 0 : i32
    return %c0_i32, %c0_i32_0 : i32, i32
  }
  func.func @transform_13(%arg0: i32) -> (i32, i32) {
    %c0_i32 = arith.constant 0 : i32
    %c0_i32_0 = arith.constant 0 : i32
    return %arg0, %c0_i32 : i32, i32
  }
}

</mosaic_0001>

<bundles_post_ra>
// kernel: tpu_custom_call.1
= control target key start
LH: loop header
LB: loop body
LE: loop exit
PB: predicated region body
PF: predicated region fallthrough
CT: control target
= control target key end

     0   :  { %18 = vsyncpa [#allocation3], 0  ;;  %s15383_s0 = inlined_call_operand.vmem [shape: f32[256,10], index: 0, kind: input, shape index: {}]   ;;  %s15384_s1 = inlined_call_operand.vmem [shape: f32[256,3], index: 1, kind: input, shape index: {}]   ;;  %s15385_s2 = inlined_call_operand.vmem [shape: f32[256,4], index: 2, kind: input, shape index: {}]   ;;  %s15386_s3 = inlined_call_operand.vmem [shape: f32[3,15], index: 3, kind: input, shape index: {}]   ;;  %s15387_s4 = inlined_call_operand.vmem [shape: f32[10,128], index: 4, kind: input, shape index: {}]   ;;  %s15388_s5 = inlined_call_operand.vmem [shape: f32[15,128], index: 5, kind: input, shape index: {}]   ;;  %s15389_s6 = inlined_call_operand.vmem [shape: f32[15,128], index: 6, kind: input, shape index: {}]   ;;  %s15390_s7 = inlined_call_operand.vmem [shape: f32[4,128], index: 7, kind: input, shape index: {}]   ;;  %s15391_s8 = inlined_call_operand.vmem [shape: f32[3,128,256], index: 8, kind: input, shape index: {}]   ;;  %s15392_s9 = inlined_call_operand.hbm [shape: f32[3,256,128], index: 9, kind: input, shape index: {}]   ;;  %s15393_s10 = inlined_call_operand.hbm [shape: f32[2,128,128], index: 10, kind: input, shape index: {}]   ;;  %s15394_s11 = inlined_call_operand.vmem [shape: f32[128,25], index: 11, kind: input, shape index: {}]   ;;  %s15395_s12 = inlined_call_operand.vmem [shape: f32[16,128], index: 12, kind: input, shape index: {}]   ;;  %s15396_s13 = inlined_call_operand.vmem [shape: f32[256,25], index: 13, kind: output, shape index: {}]  }
   0x1   :  { %19 = vsyncpa [#allocation5], 0  ;;  %s10272_s25 = smov 0  }
   0x2 LB: > { %s15400_s26 = sadd.s32 4294967295, %s10188_s25   ;;  %p8060_p0 = scmp.ge.s32.totalorder %s10188_s25, 1  ;;  %s10188_s25 = sphi %s10272_s25, %s25_s25  }
   0x3   : > { %p344_p1 = scmp.lt.s32.totalorder %s10188_s25, 3  ;;  %s10190_s27 = smov [#allocation2]  }
   0x4   : > { %s374_s28 = sshll.u32 %s10190_s27, 4  ;;  %p10286_p3 = scmp.eq.s32.totalorder %s15400_s26, 0  ;;  %s375_s28 = int_to_ptr.vmem [resolvable:$true] %s374_s28 }
   0x5   : > { %p10280_p2 = pnand %p8060_p0, %p344_p1  ;;  %s10191_s14 = smov [#allocation4]  }
   0x6   : > { %s15585_s30 = scalar_select %p10286_p3, 1, 0 }
   0x7   : > { %s15584_s29 = scalar_select %p10280_p2, 1, 0 }
   0x8   : > { %p9572_p4 = pneg %p10280_p2  ;;  %s387_s15 = sshll.u32 %s10191_s14, 4  ;;  %s10298_s15 = int_to_ptr.vmem [resolvable:$true] %s387_s15 }
   0x9   : > { %s10118_s19 = scalar_lea.hbm %s15392_s9, 12288 }
   0xa   : > { %p10294_p5 = pnand %p10286_p3, %p9572_p4  ;;  %p10119_p6 = scmp.ne.s32.totalorder %s15392_s9, %s10118_s19 }
   0xb   : > { %p10125_p10 = scmp.lt.u32.totalorder %s10118_s19, %s15392_s9 }
   0xc   : > { %p10120_p7 = pneg %p10294_p5 }
   0xe   : > { %p10121_p8 = pnand %p10120_p7, %p10119_p6 }
  0x10   : > { %p10122_p9 = pneg %p10121_p8 }
  0x12   : > { %p10127_p11 = pnand %p10125_p10, %p10122_p9 }
  0x14   : > { %10130 = shalt.err (!%p10127_p11)
}
  0x15   : > { %s10131_s24 = scalar_lea.vmem %s375_s28, 12288  ;;  %p10139_p1 = scmp.lt.s32.totalorder %s375_s28, %s375_s28 }
  0x16   : > { %p10132_p12 = scmp.ne.s32.totalorder %s375_s28, %s10131_s24  ;;  %p10140_p4 = scmp.lt.s32.totalorder %s10131_s24, %s10131_s24 }
  0x18   : > { %p10134_p13 = pnand %p10132_p12, %p10120_p7  ;;  %p10141_p3 = por %p10140_p4, %p10139_p1 }
  0x1a   : > { %p10135_p0 = pneg %p10134_p13 }
  0x1c   : > { %p10142_p2 = pnand %p10141_p3, %p10135_p0 }
  0x1e   : > { %10145 = shalt.err (!%p10142_p2)
}
  0x1f   : > { %s10192_s27 = smov 128   ;;  %s10193_s14 = smov 8  }
  0x20   : > { %9575 = dma.hbm_to_vmem [thread:$0]  (!%p10294_p5), %s15392_s9, 12288, %s375_s28, [#allocation3], %s10192_s27, %s10192_s27, %s10193_s14  }
  0x21   : > { %s10146_s21 = scalar_lea.hbm %s15393_s10, 4096 }
  0x22   : > { %p10147_p6 = scmp.ne.s32.totalorder %s15393_s10, %s10146_s21  ;;  %p10153_p8 = scmp.lt.u32.totalorder %s10146_s21, %s15393_s10 }
  0x24   : > { %p10149_p2 = pnand %p10147_p6, %p10120_p7 }
  0x26   : > { %p10150_p3 = pneg %p10149_p2 }
  0x28   : > { %p10155_p9 = pnand %p10153_p8, %p10150_p3 }
  0x2a   : > { %10158 = shalt.err (!%p10155_p9)
}
  0x2b   : > { %s10159_s28 = scalar_lea.vmem %s10298_s15, 4096  ;;  %p10167_p13 = scmp.lt.s32.totalorder %s10298_s15, %s10298_s15 }
  0x2c   : > { %p10160_p10 = scmp.ne.s32.totalorder %s10298_s15, %s10159_s28  ;;  %p10168_p0 = scmp.lt.s32.totalorder %s10159_s28, %s10159_s28 }
  0x2e   : > { %p10162_p11 = pnand %p10160_p10, %p10120_p7  ;;  %p10169_p1 = por %p10168_p0, %p10167_p13 }
  0x30   : > { %p10163_p12 = pneg %p10162_p11 }
  0x32   : > { %p10170_p4 = pnand %p10169_p1, %p10163_p12 }
  0x34   : > { %10173 = shalt.err (!%p10170_p4)
}
  0x35   : > { %9578 = dma.hbm_to_vmem [thread:$0]  (!%p10294_p5), %s15393_s10, 4096, %s10298_s15, [#allocation5], %s10192_s27, %s10192_s27, %s10193_s14  }
  0x36   : > { %p15587_p6 = scmp.ne.s32.totalorder %s15584_s29, 0 }
  0x38   : > { %436 = sbr.rel (%p15587_p6) target bundleno = 3669 (0xe55), region = 72 }
  0x3f   : > { %p15588_p2 = scmp.ne.s32.totalorder %s15585_s30, 0 }
  0x41   : > { %10179 = dma.done.wait (%p15588_p2), [#allocation3], 12288  }
  0x42   : > { %10181 = vsyncadd (%p15588_p2), [#allocation3], 4294955008 }
  0x43   : > { %10183 = dma.done.wait (%p15588_p2), [#allocation5], 4096  }
  0x44   : > { %10185 = vsyncadd (%p15588_p2), [#allocation5], 4294963200  ;;  %s15589_s16 = sadd.s32 4294967295, %s10188_s25   ;;  %vm586_vm0 = vcmask 1042432   ;;  %vm537_vm1 = vcmask 23552  }
  0x45   : > { %s8067_s18 = sshll.u32 %s15589_s16, 4  ;;  %v536_v0 = vld [vmem:[%s15386_s3] sm:$0x7]  ;;  %v15407_v39 = vmov 683565275  }
  0x46   : > { %p495_p7 = scmp.lt.s32.totalorder %s8067_s18, 31  ;;  %8778 = vmatprep.subr.msk.mxu0 %vm586_vm0, %v536_v0  ;;  %v15427_v41 = vmov 2475754826   ;;  %v15405_v44 = vmov 2131351028  }
  0x47   : > { %8779 = vmatpush3.msk.msra.mxu0 %vm586_vm0, %v536_v0  ;;  %v15421_v47 = vmov 2102212464   ;;  %v15425_v51 = vmov 920167782   ;;  %v15409_v54 = vmov 1326507024  }
  0x48   : > { %s15949_s18 = smov (!%p495_p7, %s8067_s18), 31 }
  0x49   : > { %s10359_s29 = sshll.u32 %s15949_s18, 3 }
  0x4a   : > { %s10365_s14 = scalar_lea.vmem %s15384_s1, %s10359_s29  ;;  %s12187_s20 = scalar_lea.vmem %s15383_s0, %s10359_s29 }
  0x4b   : > { %v520_v1 = vld [vmem:[%s10365_s14] sm:$0xff]  ;;  %v521_v2 = vld [vmem:[%s10365_s14 + $0x8] sm:$0xff]  ;;  %v522_v3 = vld [vmem:[%s10365_s14 + $0x10] sm:$0xff]  ;;  %s14527_s21 = scalar_lea.vmem %s15385_s2, %s10359_s29 }
  0x4c   : > { %8780 = vmatprep.mubr.msk.f32.mxu0 %vm537_vm1, %v520_v1  ;;  %v523_v4 = vld [vmem:[%s10365_s14 + $0x18] sm:$0xff]  ;;  %v524_v5 = vld [vmem:[%s10365_s14 + $0x20] sm:$0xff]  ;;  %v525_v6 = vld [vmem:[%s10365_s14 + $0x28] sm:$0xff] }
  0x4d   : > { %8781 = vmatmul.mubr.msk.f32.vlgmr.msra.gmra.mrb[0].mxu0 %vm537_vm1, %v521_v2  ;;  %v526_v7 = vld [vmem:[%s10365_s14 + $0x30] sm:$0xff]  ;;  %v527_v8 = vld [vmem:[%s10365_s14 + $0x38] sm:$0xff]  ;;  %v528_v9 = vld [vmem:[%s10365_s14 + $0x40] sm:$0xff] }
  0x4e   : > { %8783 = vmatprep.mubr.msk.f32.mxu0 %vm537_vm1, %v522_v3  ;;  %v529_v10 = vld [vmem:[%s10365_s14 + $0x48] sm:$0xff]  ;;  %v530_v11 = vld [vmem:[%s10365_s14 + $0x50] sm:$0xff]  ;;  %v531_v12 = vld [vmem:[%s10365_s14 + $0x58] sm:$0xff] }
  0x4f   : > { %v532_v13 = vld [vmem:[%s10365_s14 + $0x60] sm:$0xff]  ;;  %v533_v14 = vld [vmem:[%s10365_s14 + $0x68] sm:$0xff]  ;;  %v534_v15 = vld [vmem:[%s10365_s14 + $0x70] sm:$0xff] }
  0x50   : > { %v535_v16 = vld [vmem:[%s10365_s14 + $0x78] sm:$0xff] }
  0x51   : > { %8784 = vmatmul.mubr.msk.f32.gmra.mrb[2].mxu0 %vm537_vm1, %v523_v4 }
  0x52   : > { %8786 = vmatprep.mubr.msk.f32.mxu0 %vm537_vm1, %v524_v5 }
  0x55   : > { %8787 = vmatmul.mubr.msk.f32.gmra.mrb[4].mxu0 %vm537_vm1, %v525_v6 }
  0x56   : > { %8789 = vmatprep.mubr.msk.f32.mxu0 %vm537_vm1, %v526_v7 }
  0x59   : > { %8790 = vmatmul.mubr.msk.f32.gmra.mrb[6].mxu0 %vm537_vm1, %v527_v8 }
  0x5a   : > { %8792 = vmatprep.mubr.msk.f32.mxu0 %vm537_vm1, %v528_v9 }
  0x5d   : > { %8793 = vmatmul.mubr.msk.f32.gmra.mrb[8].mxu0 %vm537_vm1, %v529_v10 }
  0x5e   : > { %8795 = vmatprep.mubr.msk.f32.mxu0 %vm537_vm1, %v530_v11 }
  0x61   : > { %8796 = vmatmul.mubr.msk.f32.gmra.mrb[10].mxu0 %vm537_vm1, %v531_v12 }
  0x62   : > { %8798 = vmatprep.mubr.msk.f32.mxu0 %vm537_vm1, %v532_v13 }
  0x65   : > { %8799 = vmatmul.mubr.msk.f32.gmra.mrb[12].mxu0 %vm537_vm1, %v533_v14 }
  0x66   : > { %8801 = vmatprep.mubr.msk.f32.mxu0 %vm537_vm1, %v534_v15 }
  0x69   : > { %8802 = vmatmul.mubr.msk.f32.gmra.mrb[14].mxu0 %vm537_vm1, %v535_v16 }
 0x120   : > { %v10402_v17 = vpop.f32.mrb[0].mxu0 }
 0x121   : > { %15590 = vst [vmem:[#allocation8_spill] sm:$0xff] %v10402_v17  ;;  %v842_v18 = vand.u32 2139095040, %v10402_v17  ;;  %v10405_v19 = vpop.f32.mrb[1].mxu0  ;;  %v839_v24 = vand.u32 2147483647, %v10402_v17 }
 0x122   : > { %15591 = vst [vmem:[#allocation9_spill] sm:$0xff] %v10405_v19  ;;  %v738_v21 = vand.u32 2139095040, %v10405_v19 }
 0x123   : > { %v843_v20 = vshrl.u32 %v842_v18, 23  ;;  %v846_v31 = vand.u32 8388607, %v839_v24 }
 0x124   : > { %v10408_v23 = vpop.f32.mrb[2].mxu0  ;;  %v739_v25 = vshrl.u32 %v738_v21, 23 }
 0x125   : > { %v8096_v22 = vadd.s32 4294967169, %v843_v20  ;;  %15592 = vst [vmem:[#allocation10_spill] sm:$0xff] %v10408_v23  ;;  %v10411_v27 = vpop.f32.mrb[3].mxu0  ;;  %v847_v38 = vor.u32 8388608, %v846_v31  ;;  %v15401_v20 = vand.u32 2147483647, %v10405_v19 }
 0x126   : > { %15593 = vst [vmem:[#allocation11_spill] sm:$0xff] %v10411_v27  ;;  %v8092_v28 = vadd.s32 4294967169, %v739_v25  ;;  %v1050_v21 = vand.u32 2139095040, %v10408_v23 }
 0x127   : > { %v849_v26 = vadd.s32 1, %v8096_v22  ;;  %v887_v4 = vshll.u32 %v847_v38, 8 }
 0x128   : > { %v10413_v29 = vpop.f32.mrb[4].mxu0  ;;  %v745_v33 = vadd.s32 1, %v8092_v28 }
 0x129   : > { %15594 = vst [vmem:[#allocation12_spill] sm:$0xff] %v10413_v29  ;;  %vm850_vm2 = vcmp.gt.s32.totalorder %v849_v26, 0  ;;  %v10415_v30 = vpop.f32.mrb[5].mxu0 }
 0x12a   : > { %v851_v32 = vsel %vm850_vm2, %v849_v26, 0  ;;  %vm746_vm3 = vcmp.gt.s32.totalorder %v745_v33, 0 }
 0x12b   : > { %v853_v34 = vand.u32 31, %v851_v32  ;;  %v852_v36 = vshrl.u32 %v851_v32, 5  ;;  %v747_v1 = vsel %vm746_vm3, %v745_v33, 0 }
 0x12c   : > { %v10419_v35 = vpop.f32.mrb[6].mxu0  ;;  %v749_v11 = vand.u32 31, %v747_v1  ;;  %v748_v22 = vshrl.u32 %v747_v1, 5 }
 0x12d   : > { %v854_v37 = vsub.s32 32, %v853_v34  ;;  %v856_v40 = vshll.u32 %v15407_v39, %v853_v34  ;;  %v859_v42 = vshll.u32 %v15427_v41, %v853_v34  ;;  %v862_v46 = vshll.u32 %v15405_v44, %v853_v34  ;;  %v10427_v49 = vpop.f32.mrb[7].mxu0 }
 0x12e   : > { %v865_v50 = vshll.u32 %v15421_v47, %v853_v34  ;;  %v868_v53 = vshll.u32 %v15425_v51, %v853_v34  ;;  %vm871_vm4 = vcmp.lt.s32.totalorder %v852_v36, 1  ;;  %vm874_vm5 = vcmp.lt.s32.totalorder %v852_v36, 4 }
 0x12f   : > { %v857_v43 = vshrl.u32 %v15427_v41, %v854_v37  ;;  %v860_v45 = vshrl.u32 %v15405_v44, %v854_v37  ;;  %v863_v48 = vshrl.u32 %v15421_v47, %v854_v37  ;;  %v866_v52 = vshrl.u32 %v15425_v51, %v854_v37 }
 0x130   : > { %v869_v55 = vshrl.u32 %v15409_v54, %v854_v37  ;;  %v855_v59 = vshrl.u32 %v15407_v39, %v854_v37  ;;  %vm873_vm6 = vcmp.lt.s32.totalorder %v852_v36, 3  ;;  %vm872_vm7 = vcmp.lt.s32.totalorder %v852_v36, 2 }
 0x131   : > { %v858_v56 = vor.u32 %v857_v43, %v856_v40  ;;  %v861_v57 = vor.u32 %v860_v45, %v859_v42  ;;  %v864_v58 = vor.u32 %v863_v48, %v862_v46  ;;  %v867_v60 = vor.u32 %v866_v52, %v865_v50 }
 0x132   : > { %v870_v61 = vor.u32 %v869_v55, %v868_v53  ;;  %v750_v16 = vsub.s32 32, %v749_v11  ;;  %v761_v28 = vshll.u32 %v15421_v47, %v749_v11  ;;  %v752_v36 = vshll.u32 %v15407_v39, %v749_v11 }
 0x133   : > { %v876_v62 = vsel %vm874_vm5, %v864_v58, 2102212464  ;;  %v879_v63 = vsel %vm871_vm4, %v858_v56, %v861_v57  ;;  %v883_v0 = vsel %vm871_vm4, %v861_v57, %v864_v58  ;;  %v880_v2 = vsel %vm874_vm5, %v867_v60, 920167782 }
 0x134   : > { %v884_v3 = vsel %vm874_vm5, %v870_v61, 1326507024  ;;  %v875_v5 = vsel %vm871_vm4, %v855_v59, %v858_v56  ;;  %v881_v6 = vsel %vm873_vm6, %v864_v58, %v880_v2  ;;  %v877_v8 = vsel %vm873_vm6, %v861_v57, %v876_v62 }
 0x135   : > { %v885_v7 = vsel %vm873_vm6, %v867_v60, %v884_v3  ;;  %v882_v9 = vsel %vm872_vm7, %v879_v63, %v881_v6  ;;  %v878_v18 = vsel %vm872_vm7, %v875_v5, %v877_v8  ;;  %v753_v25 = vshrl.u32 %v15427_v41, %v750_v16 }
 0x136   : > { %v886_v10 = vsel %vm872_vm7, %v883_v0, %v885_v7  ;;  %v10438_v14 = vmul.u32.u64.low %v887_v4, %v882_v9  ;;  %v10439_v15 = vmul.u32.u64.high %v887_v4, %v882_v9, %v10438_v14  ;;  %v756_v26 = vshrl.u32 %v15405_v44, %v750_v16 }
 0x137   : > { %v10435_v12 = vmul.u32.u64.low %v887_v4, %v886_v10  ;;  %v10436_v13 = vmul.u32.u64.high %v887_v4, %v886_v10, %v10435_v12  ;;  %v759_v32 = vshrl.u32 %v15421_v47, %v750_v16  ;;  %v762_v33 = vshrl.u32 %v15425_v51, %v750_v16 }
 0x138   : > { %v897_v31 = vadd.s32 1, %v10439_v15  ;;  %v894_v34 = vmul.u32 %v887_v4, %v878_v18  ;;  %v764_v37 = vshll.u32 %v15425_v51, %v749_v11  ;;  %v765_v38 = vshrl.u32 %v15409_v54, %v750_v16  ;;  %v10478_v18 = vpop.f32.mrb[8].mxu0 }
 0x139   : > { %vm896_vm8 = vc.u32 %v10436_v13, %v10438_v14  ;;  %v755_v42 = vshll.u32 %v15427_v41, %v749_v11  ;;  %v758_v43 = vshll.u32 %v15405_v44, %v749_v11  ;;  %v763_v45 = vor.u32 %v762_v33, %v761_v28  ;;  %15596 = vst [vmem:[#allocation14_spill] sm:$0xff] %v10478_v18 }
 0x13a   : > { %v898_v40 = vsel %vm896_vm8, %v897_v31, %v10439_v15  ;;  %v742_v48 = vand.u32 8388607, %v15401_v20  ;;  %v766_v50 = vor.u32 %v765_v38, %v764_v37  ;;  %v1051_v52 = vshrl.u32 %v1050_v21, 23 }
 0x13b   : > { %v899_v46 = vadd.s32 %v898_v40, %v894_v34  ;;  %v754_v53 = vor.u32 %v753_v25, %v752_v36  ;;  %v757_v55 = vor.u32 %v756_v26, %v755_v42  ;;  %v760_v56 = vor.u32 %v759_v32, %v758_v43 }
 0x13c   : > { %vm770_vm9 = vcmp.lt.s32.totalorder %v748_v22, 4  ;;  %vm767_vm10 = vcmp.lt.s32.totalorder %v748_v22, 1  ;;  %vm769_vm11 = vcmp.lt.s32.totalorder %v748_v22, 3  ;;  %v743_v60 = vor.u32 8388608, %v742_v48 }
 0x13d   : > { %v776_v57 = vsel %vm770_vm9, %v763_v45, 920167782  ;;  %v900_v58 = vadd.s32 536870912, %v899_v46  ;;  %v780_v59 = vsel %vm770_vm9, %v766_v50, 1326507024  ;;  %v775_v61 = vsel %vm767_vm10, %v754_v53, %v757_v55 }
 0x13e   : > { %v777_v62 = vsel %vm769_vm11, %v760_v56, %v776_v57  ;;  %v8104_v63 = vadd.s32 4294967169, %v1051_v52  ;;  %v779_v0 = vsel %vm767_vm10, %v757_v55, %v760_v56  ;;  %v781_v1 = vsel %vm769_vm11, %v763_v45, %v780_v59 }
 0x13f   : > { %v10466_v2 = vshrl.u32 %v900_v58, 30  ;;  %vm768_vm12 = vcmp.lt.s32.totalorder %v748_v22, 2  ;;  %v783_v6 = vshll.u32 %v743_v60, 8  ;;  %v772_v21 = vsel %vm770_vm9, %v760_v56, 2102212464 }
 0x140   : > { %v1057_v3 = vadd.s32 1, %v8104_v63  ;;  %v778_v4 = vsel %vm768_vm12, %v775_v61, %v777_v62  ;;  %v782_v5 = vsel %vm768_vm12, %v779_v0, %v781_v1  ;;  %v751_v25 = vshrl.u32 %v15407_v39, %v750_v16 }
 0x141   : > { %15595 = vst [vmem:[#allocation13_spill] sm:$0xff] %v10466_v2  ;;  %v902_v8 = vshll.u32 %v10466_v2, 30  ;;  %v10471_v9 = vmul.u32.u64.low %v783_v6, %v778_v4  ;;  %v10472_v10 = vmul.u32.u64.high %v783_v6, %v778_v4, %v10471_v9  ;;  %v773_v32 = vsel %vm769_vm11, %v757_v55, %v772_v21 }
 0x142   : > { %vm1058_vm13 = vcmp.gt.s32.totalorder %v1057_v3, 0  ;;  %v10475_v12 = vmul.u32.u64.low %v783_v6, %v782_v5  ;;  %v10476_v15 = vmul.u32.u64.high %v783_v6, %v782_v5, %v10475_v12  ;;  %v771_v31 = vsel %vm767_vm10, %v751_v25, %v754_v53 }
 0x143   : > { %v1059_v7 = vsel %vm1058_vm13, %v1057_v3, 0  ;;  %v10482_v28 = vsub.s32 %v899_v46, %v902_v8  ;;  %v15404_v33 = vand.u32 2147483647, %v10408_v23  ;;  %v774_v37 = vsel %vm768_vm12, %v771_v31, %v773_v32  ;;  %v10523_v12 = vpop.f32.mrb[9].mxu0 }
 0x144   : > { %v1061_v11 = vand.u32 31, %v1059_v7  ;;  %v793_v38 = vadd.s32 1, %v10472_v10  ;;  %vm792_vm14 = vc.u32 %v10476_v15, %v10471_v9  ;;  %v946_v42 = vand.u32 2139095040, %v10411_v27 }
 0x145   : > { %v905_v36 = vsub.s32 0, %v10482_v28  ;;  %v10496_v43 = vshrl.u32 %v1059_v7, 5  ;;  %v1054_v48 = vand.u32 8388607, %v15404_v33  ;;  %v790_v58 = vmul.u32 %v783_v6, %v774_v37 }
 0x146   : > { %v1062_v26 = vsub.s32 32, %v1061_v11  ;;  %v1073_v16 = vshll.u32 %v15421_v47, %v1061_v11  ;;  %v1076_v52 = vshll.u32 %v15425_v51, %v1061_v11  ;;  %v1064_v55 = vshll.u32 %v15407_v39, %v1061_v11 }
 0x147   : > { %v8097_v53 = vmin.u32 %v905_v36, %v10482_v28  ;;  %v1067_v56 = vshll.u32 %v15427_v41, %v1061_v11  ;;  %v1070_v57 = vshll.u32 %v15405_v44, %v1061_v11  ;;  %v794_v59 = vsel %vm792_vm14, %v793_v38, %v10472_v10 }
 0x148   : > { %v1074_v34 = vshrl.u32 %v15425_v51, %v1062_v26  ;;  %v1077_v40 = vshrl.u32 %v15409_v54, %v1062_v26  ;;  %v1065_v45 = vshrl.u32 %v15427_v41, %v1062_v26  ;;  %v1068_v46 = vshrl.u32 %v15405_v44, %v1062_v26 }
 0x149   : > { %v1071_v22 = vshrl.u32 %v15421_v47, %v1062_v26  ;;  %v947_v61 = vshrl.u32 %v946_v42, 23  ;;  %vm1082_vm15 = vcmp.lt.s32.totalorder %v10496_v43, 4  ;;  %v907_v3 = vclz %v8097_v53 }
 0x14a   : > { %v1075_v50 = vor.u32 %v1074_v34, %v1073_v16  ;;  %v1078_v60 = vor.u32 %v1077_v40, %v1076_v52  ;;  %v1066_v62 = vor.u32 %v1065_v45, %v1064_v55  ;;  %v1069_v63 = vor.u32 %v1068_v46, %v1067_v56 }
 0x14b   : > { %v1072_v0 = vor.u32 %v1071_v22, %v1070_v57  ;;  %v795_v4 = vadd.s32 %v794_v59, %v790_v58  ;;  %vm1079_vm0 = vcmp.lt.s32.totalorder %v10496_v43, 1  ;;  %vm1081_vm1 = vcmp.lt.s32.totalorder %v10496_v43, 3 }
 0x14c   : > { %v1088_v1 = vsel %vm1082_vm15, %v1075_v50, 920167782  ;;  %v1092_v5 = vsel %vm1082_vm15, %v1078_v60, 1326507024  ;;  %v8100_v6 = vadd.s32 4294967169, %v947_v61  ;;  %v1055_v7 = vor.u32 8388608, %v1054_v48 }
 0x14d   : > { %v1087_v8 = vsel %vm1079_vm0, %v1066_v62, %v1069_v63  ;;  %v1089_v10 = vsel %vm1081_vm1, %v1072_v0, %v1088_v1  ;;  %v796_v21 = vadd.s32 536870912, %v795_v4  ;;  %vm1080_vm2 = vcmp.lt.s32.totalorder %v10496_v43, 2 }
 0x14e   : > { %v953_v11 = vadd.s32 1, %v8100_v6  ;;  %v1091_v25 = vsel %vm1079_vm0, %v1069_v63, %v1072_v0  ;;  %v1093_v31 = vsel %vm1081_vm1, %v1075_v50, %v1092_v5  ;;  %v8098_v32 = vadd.s32 4294967294, %v907_v3 }
 0x14f   : > { %v1090_v34 = vsel %vm1080_vm2, %v1087_v8, %v1089_v10  ;;  %v10532_v36 = vshll.u32 %v1055_v7, 8  ;;  %v10535_v37 = vadd.f32 1.5707964, %v10402_v17  ;;  %v1094_v38 = vsel %vm1080_vm2, %v1091_v25, %v1093_v31 }
 0x150   : > { %vm954_vm3 = vcmp.gt.s32.totalorder %v953_v11, 0  ;;  %v15403_v16 = vand.u32 2147483647, %v10411_v27  ;;  %v10540_v40 = vshrl.u32 %v796_v21, 30  ;;  %vm8099_vm4 = vcmp.lt.s32.totalorder %v8098_v32, 0 }
 0x151   : > { %15597 = vst [vmem:[#allocation15_spill] sm:$0xff] %v10535_v37  ;;  %v10543_v42 = vmul.u32.u64.low %v10532_v36, %v1090_v34  ;;  %v10544_v45 = vmul.u32.u64.high %v10532_v36, %v1090_v34, %v10543_v42  ;;  %v955_v46 = vsel %vm954_vm3, %v953_v11, 0  ;;  %v1063_v22 = vshrl.u32 %v15407_v39, %v1062_v26 }
 0x152   : > { %15598 = vst [vmem:[#allocation16_spill] sm:$0xff] %v10540_v40  ;;  %v1084_v48 = vsel %vm1082_vm15, %v1072_v0, 2102212464  ;;  %v10551_v50 = vmul.u32.u64.low %v10532_v36, %v1094_v38  ;;  %v10552_v52 = vmul.u32.u64.high %v10532_v36, %v1094_v38, %v10551_v50  ;;  %v957_v53 = vand.u32 31, %v955_v46 }
 0x153   : > { %v2522_v55 = vand.u32 2139095040, %v10535_v37  ;;  %v950_v56 = vand.u32 8388607, %v15403_v16  ;;  %v10557_v57 = vsel %vm8099_vm4, 0, %v8098_v32  ;;  %v798_v58 = vshll.u32 %v10540_v40, 30 }
 0x154   : > { %v1083_v26 = vsel %vm1079_vm0, %v1063_v22, %v1066_v62  ;;  %v958_v59 = vsub.s32 32, %v957_v53  ;;  %v1085_v60 = vsel %vm1081_vm1, %v1069_v63, %v1084_v48  ;;  %v10564_v61 = vshrl.u32 %v955_v46, 5 }
 0x155   : > { %v960_v0 = vshll.u32 %v15407_v39, %v957_v53  ;;  %v963_v1 = vshll.u32 %v15427_v41, %v957_v53  ;;  %v966_v6 = vshll.u32 %v15405_v44, %v957_v53  ;;  %v969_v7 = vshll.u32 %v15421_v47, %v957_v53 }
 0x156   : > { %v961_v3 = vshrl.u32 %v15427_v41, %v958_v59  ;;  %v964_v5 = vshrl.u32 %v15405_v44, %v958_v59  ;;  %v967_v62 = vshrl.u32 %v15421_v47, %v958_v59  ;;  %v970_v8 = vshrl.u32 %v15425_v51, %v958_v59 }
 0x157   : > { %v972_v63 = vshll.u32 %v15425_v51, %v957_v53  ;;  %v973_v10 = vshrl.u32 %v15409_v54, %v958_v59  ;;  %v1105_v11 = vadd.s32 1, %v10544_v45  ;;  %v951_v21 = vor.u32 8388608, %v950_v56 }
 0x158   : > { %v962_v25 = vor.u32 %v961_v3, %v960_v0  ;;  %v965_v31 = vor.u32 %v964_v5, %v963_v1  ;;  %v968_v32 = vor.u32 %v967_v62, %v966_v6  ;;  %v971_v34 = vor.u32 %v970_v8, %v969_v7 }
 0x159   : > { %v974_v38 = vor.u32 %v973_v10, %v972_v63  ;;  %vm975_vm5 = vcmp.lt.s32.totalorder %v10564_v61, 1  ;;  %v10578_v46 = vsub.s32 %v795_v4, %v798_v58  ;;  %vm1104_vm6 = vc.u32 %v10552_v52, %v10543_v42 }
 0x15a   : > { %vm978_vm7 = vcmp.lt.s32.totalorder %v10564_v61, 4  ;;  %v983_v22 = vsel %vm975_vm5, %v962_v25, %v965_v31  ;;  %v1086_v48 = vsel %vm1080_vm2, %v1083_v26, %v1085_v60  ;;  %vm977_vm8 = vcmp.lt.s32.totalorder %v10564_v61, 3 }
 0x15b   : > { %v984_v50 = vsel %vm978_vm7, %v971_v34, 920167782  ;;  %v987_v4 = vsel %vm975_vm5, %v965_v31, %v968_v32  ;;  %vm976_vm9 = vcmp.lt.s32.totalorder %v10564_v61, 2  ;;  %v988_v56 = vsel %vm978_vm7, %v974_v38, 1326507024 }
 0x15c   : > { %v985_v53 = vsel %vm977_vm8, %v968_v32, %v984_v50  ;;  %v991_v58 = vshll.u32 %v951_v21, 8  ;;  %v10598_v43 = vadd.f32 1.5707964, %v10405_v19  ;;  %v1106_v26 = vsel %vm1104_vm6, %v1105_v11, %v10544_v45 }
 0x15d   : > { %v986_v60 = vsel %vm976_vm9, %v983_v22, %v985_v53  ;;  %v989_v0 = vsel %vm977_vm8, %v971_v34, %v988_v56  ;;  %v1102_v1 = vmul.u32 %v10532_v36, %v1086_v48  ;;  %v915_v7 = vsub.s32 4294967266, %v10557_v57 }
 0x15e   : > { %15599 = vst [vmem:[#allocation17_spill] sm:$0xff] %v10598_v43  ;;  %v990_v3 = vsel %vm976_vm9, %v987_v4, %v989_v0  ;;  %v10608_v5 = vmul.u32.u64.low %v991_v58, %v986_v60  ;;  %v10609_v6 = vmul.u32.u64.high %v991_v58, %v986_v60, %v10608_v5  ;;  %v801_v62 = vsub.s32 0, %v10578_v46 }
 0x15f   : > { %v10614_v45 = vmul.u32.u64.low %v991_v58, %v990_v3  ;;  %v10615_v8 = vmul.u32.u64.high %v991_v58, %v990_v3, %v10614_v45  ;;  %v10617_v63 = vadd.s32 %v1106_v26, %v1102_v1  ;;  %v1258_v10 = vand.u32 2139095040, %v10413_v29 }
 0x160   : > { %v2523_v11 = vshrl.u32 %v2522_v55, 23  ;;  %v2418_v36 = vand.u32 2139095040, %v10598_v43  ;;  %v10622_v21 = vadd.f32 1.5707964, %v10408_v23  ;;  %v980_v34 = vsel %vm978_vm7, %v968_v32, 2102212464 }
 0x161   : > { %v1259_v38 = vshrl.u32 %v1258_v10, 23  ;;  %v911_v22 = vsub.s32 32, %v10557_v57  ;;  %v916_v48 = vadd.s32 127, %v915_v7  ;;  %v8093_v50 = vmin.u32 %v801_v62, %v10578_v46 }
 0x162   : > { %15600 = vst [vmem:[#allocation18_spill] sm:$0xff] %v10622_v21  ;;  %v959_v4 = vshrl.u32 %v15407_v39, %v958_v59  ;;  %v1108_v53 = vadd.s32 536870912, %v10617_v63  ;;  %v895_v55 = vadd.s32 %v10438_v14, %v10436_v13  ;;  %v8160_v26 = vadd.s32 4294967169, %v2523_v11  ;;  %v10638_v59 = vpop.f32.mrb[10].mxu0 }
 0x163   : > { %v8112_v56 = vadd.s32 4294967169, %v1259_v38  ;;  %v981_v32 = vsel %vm977_vm8, %v965_v31, %v980_v34  ;;  %v2419_v0 = vshrl.u32 %v2418_v36, 23  ;;  %v2730_v1 = vand.u32 2139095040, %v10622_v21 }
 0x164   : > { %v979_v60 = vsel %vm975_vm5, %v959_v4, %v962_v25  ;;  %v1001_v3 = vadd.s32 1, %v10609_v6  ;;  %v913_v62 = vshrl.u32 %v895_v55, %v911_v22  ;;  %v917_v45 = vshll.u32 %v916_v48, 23 }
 0x165   : > { %v1265_v7 = vadd.s32 1, %v8112_v56  ;;  %v803_v10 = vclz %v8093_v50  ;;  %vm1000_vm10 = vc.u32 %v10615_v8, %v10608_v5  ;;  %v10642_v13 = vshrl.u32 %v1108_v53, 30 }
 0x166   : > { %v982_v14 = vsel %vm976_vm9, %v979_v60, %v981_v32  ;;  %v15402_v25 = vand.u32 2147483647, %v10413_v29  ;;  %v912_v31 = vshll.u32 %v10482_v28, %v10557_v57  ;;  %v10649_v36 = vadd.s32 1, %v8160_v26 }
 0x167   : > { %15601 = vst [vmem:[#allocation19_spill] sm:$0xff] %v10642_v13  ;;  %vm1266_vm11 = vcmp.gt.s32.totalorder %v1265_v7, 0  ;;  %v8156_v34 = vadd.s32 4294967169, %v2419_v0  ;;  %v1002_v38 = vsel %vm1000_vm10, %v1001_v3, %v10609_v6  ;;  %v918_v50 = vor.u32 4788187, %v917_v45 }
 0x168   : > { %v1267_v11 = vsel %vm1266_vm11, %v1265_v7, 0  ;;  %v914_v48 = vor.u32 %v913_v62, %v912_v31  ;;  %v2731_v4 = vshrl.u32 %v2730_v1, 23  ;;  %v998_v53 = vmul.u32 %v991_v58, %v982_v14 }
 0x169   : > { %v1269_v22 = vand.u32 31, %v1267_v11  ;;  %v8094_v56 = vadd.s32 4294967294, %v803_v10  ;;  %v1110_v61 = vshll.u32 %v10642_v13, 30  ;;  %v1262_v55 = vand.u32 8388607, %v15402_v25 }
 0x16a   : > { %v10655_v32 = vadd.s32 %v1002_v38, %v998_v53  ;;  %v10657_v28 = vshrl.u32 %v1267_v11, 5  ;;  %v1154_v11 = vand.u32 2139095040, %v10415_v30  ;;  %v921_v38 = vcvt.s32.f32 %v914_v48 }
 0x16b   : > { %v1270_v60 = vsub.s32 32, %v1269_v22  ;;  %v1272_v57 = vshll.u32 %v15407_v39, %v1269_v22  ;;  %v1275_v6 = vshll.u32 %v15427_v41, %v1269_v22  ;;  %v1278_v58 = vshll.u32 %v15405_v44, %v1269_v22 }
 0x16c   : > { %v1281_v1 = vshll.u32 %v15421_v47, %v1269_v22  ;;  %v1284_v62 = vshll.u32 %v15425_v51, %v1269_v22  ;;  %v1263_v10 = vor.u32 8388608, %v1262_v55  ;;  %v919_v16 = vand.u32 2147483647, %v918_v50 }
 0x16d   : > { %v1273_v26 = vshrl.u32 %v15427_v41, %v1270_v60  ;;  %v1276_v0 = vshrl.u32 %v15405_v44, %v1270_v60  ;;  %v1279_v3 = vshrl.u32 %v15421_v47, %v1270_v60  ;;  %v1282_v7 = vshrl.u32 %v15425_v51, %v1270_v60 }
 0x16e   : > { %v1285_v45 = vshrl.u32 %v15409_v54, %v1270_v60  ;;  %v10671_v33 = vsub.s32 %v10617_v63, %v1110_v61  ;;  %v8168_v44 = vadd.s32 4294967169, %v2731_v4  ;;  %vm1287_vm12 = vcmp.lt.s32.totalorder %v10657_v28, 1 }
 0x16f   : > { %v1274_v14 = vor.u32 %v1273_v26, %v1272_v57  ;;  %v1277_v31 = vor.u32 %v1276_v0, %v1275_v6  ;;  %v1280_v53 = vor.u32 %v1279_v3, %v1278_v58  ;;  %v1283_v20 = vor.u32 %v1282_v7, %v1281_v1 }
 0x170   : > { %v1286_v25 = vor.u32 %v1285_v45, %v1284_v62  ;;  %vm8095_vm13 = vcmp.lt.s32.totalorder %v8094_v56, 0  ;;  %v1004_v22 = vadd.s32 536870912, %v10655_v32  ;;  %vm1290_vm14 = vcmp.lt.s32.totalorder %v10657_v28, 4 }
 0x171   : > { %v1295_v55 = vsel %vm1287_vm12, %v1274_v14, %v1277_v31  ;;  %vm1289_vm15 = vcmp.lt.s32.totalorder %v10657_v28, 3  ;;  %v1296_v48 = vsel %vm1290_vm14, %v1283_v20, 920167782  ;;  %v10681_v50 = vshll.u32 %v1263_v10, 8 }
 0x172   : > { %v1155_v63 = vshrl.u32 %v1154_v11, 23  ;;  %vm1288_vm0 = vcmp.lt.s32.totalorder %v10657_v28, 2  ;;  %v1297_v4 = vsel %vm1289_vm15, %v1280_v53, %v1296_v48  ;;  %v1299_v61 = vsel %vm1287_vm12, %v1277_v31, %v1280_v53  ;;  %v10711_v48 = vpop.f32.mrb[11].mxu0 }
 0x173   : > { %v1300_v57 = vsel %vm1290_vm14, %v1286_v25, 1326507024  ;;  %v806_v6 = vsel %vm8095_vm13, 0, %v8094_v56  ;;  %v1113_v26 = vsub.s32 0, %v10671_v33  ;;  %v1298_v0 = vsel %vm1288_vm0, %v1295_v55, %v1297_v4 }
 0x174   : > { %v1301_v58 = vsel %vm1289_vm15, %v1283_v20, %v1300_v57  ;;  %v10695_v1 = vshrl.u32 %v1004_v22, 30  ;;  %v10700_v7 = vmul.u32.u64.low %v10681_v50, %v1298_v0  ;;  %v10701_v62 = vmul.u32.u64.high %v10681_v50, %v1298_v0, %v10700_v7 }
 0x175   : > { %v1302_v3 = vsel %vm1288_vm0, %v1299_v61, %v1301_v58  ;;  %v2425_v25 = vadd.s32 1, %v8156_v34  ;;  %v922_v10 = vmul.f32 %v921_v38, %v919_v16  ;;  %vm2530_vm1 = vcmp.gt.s32.totalorder %v10649_v36, 0 }
 0x176   : > { %15602 = vst [vmem:[#allocation20_spill] sm:$0xff] %v10695_v1  ;;  %v10705_v56 = vmul.u32.u64.low %v10681_v50, %v1302_v3  ;;  %v10706_v45 = vmul.u32.u64.high %v10681_v50, %v1302_v3, %v10705_v56  ;;  %v8108_v11 = vadd.s32 4294967169, %v1155_v63  ;;  %v811_v20 = vsub.s32 4294967266, %v806_v6 }
 0x177   : > { %v2737_v22 = vadd.s32 1, %v8168_v44  ;;  %v1292_v55 = vsel %vm1290_vm14, %v1280_v53, 2102212464  ;;  %v8105_v4 = vmin.u32 %v1113_v26, %v10671_v33  ;;  %v1006_v61 = vshll.u32 %v10695_v1, 30 }
 0x178   : > { %v1271_v34 = vshrl.u32 %v15407_v39, %v1270_v60  ;;  %v1161_v57 = vadd.s32 1, %v8108_v11  ;;  %v2531_v0 = vsel %vm2530_vm1, %v10649_v36, 0  ;;  %v807_v16 = vsub.s32 32, %v806_v6 }
 0x179   : > { %vm2426_vm2 = vcmp.gt.s32.totalorder %v2425_v25, 0  ;;  %v923_v38 = vxor.u32 2147483648, %v922_v10  ;;  %v1293_v53 = vsel %vm1289_vm15, %v1277_v31, %v1292_v55  ;;  %v812_v63 = vadd.s32 127, %v811_v20 }
 0x17a   : > { %v1291_v44 = vsel %vm1287_vm12, %v1271_v34, %v1274_v14  ;;  %vm1162_vm3 = vcmp.gt.s32.totalorder %v1161_v57, 0  ;;  %vm2738_vm4 = vcmp.gt.s32.totalorder %v2737_v22, 0  ;;  %v1313_v26 = vadd.s32 1, %v10701_v62 }
 0x17b   : > { %v1163_v58 = vsel %vm1162_vm3, %v1161_v57, 0  ;;  %v791_v60 = vadd.s32 %v10471_v9, %v10476_v15  ;;  %v1115_v3 = vclz %v8105_v4  ;;  %v10725_v36 = vsub.s32 %v10655_v32, %v1006_v61 }
 0x17c   : > { %vm1312_vm5 = vc.u32 %v10706_v45, %v10700_v7  ;;  %vm15530_vm6 = vcmp.lt.s32.totalorder %v10402_v17, 0  ;;  %v10730_v14 = vand.u32 31, %v2531_v0  ;;  %v1294_v31 = vsel %vm1288_vm0, %v1291_v44, %v1293_v53 }
 0x17d   : > { %v809_v56 = vshrl.u32 %v791_v60, %v807_v16  ;;  %v2427_v11 = vsel %vm2426_vm2, %v2425_v25, 0  ;;  %v2739_v20 = vsel %vm2738_vm4, %v2737_v22, 0  ;;  %v1165_v55 = vand.u32 31, %v1163_v58 }
 0x17e   : > { %15603 = vst [vmem:[#allocation21_spill] sm:$0xff] %v10730_v14  ;;  %v924_v9 = vsel %vm15530_vm6, %v923_v38, %v922_v10  ;;  %v813_v15 = vshll.u32 %v812_v63, 23  ;;  %v10738_v32 = vadd.f32 1.5707964, %v10411_v27  ;;  %v1314_v4 = vsel %vm1312_vm5, %v1313_v26, %v10701_v62 }
 0x17f   : > { %v808_v61 = vshll.u32 %v10578_v46, %v806_v6  ;;  %v8106_v34 = vadd.s32 4294967294, %v1115_v3  ;;  %v1009_v28 = vsub.s32 0, %v10725_v36  ;;  %v1310_v57 = vmul.u32 %v10681_v50, %v1294_v31 }
 0x180   : > { %15604 = vst [vmem:[#allocation22_spill] sm:$0xff] %v10738_v32  ;;  %vm10746_vm7 = vcmp.le.f32.partialorder %v839_v24, 0.7853982  ;;  %v15605_v25 = vmov 0  ;;  %v10750_v10 = vand.u32 31, %v2427_v11  ;;  %v10752_v22 = vand.u32 31, %v2739_v20 }
 0x181   : > { %v15606_v25 = vsel %vm10746_vm7, 4294967295, %v15605_v25  ;;  %v10757_v62 = vsel %vm10746_vm7, %v10402_v17, %v924_v9  ;;  %v810_v46 = vor.u32 %v809_v56, %v808_v61  ;;  %v10759_v6 = vadd.s32 %v1314_v4, %v1310_v57 }
 0x182   : > { %15607 = vst [vmem:[#allocation23_spill] sm:$0xff] %v15606_v25  ;;  %15608 = vst [vmem:[#allocation24_spill] sm:$0xff] %v10750_v10  ;;  %v10761_v16 = vsub.s32 32, %v1165_v55  ;;  %v10763_v50 = vshrl.u32 %v2531_v0, 5  ;;  %v814_v24 = vor.u32 4788187, %v813_v15  ;;  %v8101_v63 = vmin.u32 %v1009_v28, %v10725_v36 }
 0x183   : > { %15609 = vst [vmem:[#allocation25_spill] sm:$0xff] %v10752_v22  ;;  %v2626_v38 = vand.u32 2139095040, %v10738_v32  ;;  %v10767_v44 = vsub.s32 32, %v10730_v14  ;;  %v10769_v53 = vshrl.u32 %v2427_v11, 5  ;;  %vm8107_vm8 = vcmp.lt.s32.totalorder %v8106_v34, 0 }
 0x184   : > { %15610 = vst [vmem:[#allocation26_spill] sm:$0xff] %v10763_v50  ;;  %9603 = vcosq.f32 %v10757_v62  ;;  %v10774_v26 = vsub.s32 32, %v10750_v10  ;;  %v1103_v0 = vadd.s32 %v10543_v42, %v10552_v52  ;;  %v10778_v60 = vshrl.u32 %v2739_v20, 5 }
 0x185   : > { %15611 = vst [vmem:[#allocation27_spill] sm:$0xff] %v10767_v44  ;;  %15612 = vst [vmem:[#allocation28_spill] sm:$0xff] %v10769_v53  ;;  %v817_v3 = vcvt.s32.f32 %v810_v46  ;;  %v10781_v31 = vsub.s32 32, %v10752_v22  ;;  %v1316_v56 = vadd.s32 536870912, %v10759_v6  ;;  %v1178_v11 = vshrl.u32 %v15425_v51, %v10761_v16 }
 0x186   : > { %15613 = vst [vmem:[#allocation29_spill] sm:$0xff] %v10774_v26  ;;  %15614 = vst [vmem:[#allocation30_spill] sm:$0xff] %v10778_v60  ;;  %v815_v9 = vand.u32 2147483647, %v814_v24  ;;  %v1118_v15 = vsel %vm8107_vm8, 0, %v8106_v34  ;;  %v2627_v4 = vshrl.u32 %v2626_v38, 23  ;;  %v1181_v61 = vshrl.u32 %v15409_v54, %v10761_v16 }
 0x187   : > { %15615 = vst [vmem:[#allocation31_spill] sm:$0xff] %v10781_v31  ;;  %v1011_v28 = vclz %v8101_v63  ;;  %v10789_v52 = vshrl.u32 %v1163_v58, 5  ;;  %v1177_v20 = vshll.u32 %v15421_v47, %v1165_v55  ;;  %v1169_v57 = vshrl.u32 %v15427_v41, %v10761_v16 }
 0x188   : > { %v15616_v46 = vmov 2131351028   ;;  %v1175_v34 = vshrl.u32 %v15421_v47, %v10761_v16  ;;  %v1180_v24 = vshll.u32 %v15425_v51, %v1165_v55  ;;  %v1123_v38 = vsub.s32 4294967266, %v1118_v15 }
 0x189   : > { %v1172_v39 = vshrl.u32 %v15616_v46, %v10761_v16  ;;  %v10799_v54 = vshrl.u32 %v1316_v56, 30  ;;  %v1179_v63 = vor.u32 %v1178_v11, %v1177_v20  ;;  %v1466_v58 = vand.u32 2139095040, %v10419_v35 }
 0x18a   : > { %v15618_v42 = vmov 683565275   ;;  %v1171_v31 = vshll.u32 %v15427_v41, %v1165_v55  ;;  %v1174_v22 = vshll.u32 %v15616_v46, %v1165_v55  ;;  %v1182_v21 = vor.u32 %v1181_v61, %v1180_v24 }
 0x18b   : > { %15617 = vst [vmem:[#allocation32_spill] sm:$0xff] %v10799_v54  ;;  %v1168_v60 = vshll.u32 %v15618_v42, %v1165_v55  ;;  %v1119_v32 = vsub.s32 32, %v1118_v15  ;;  %v8102_v50 = vadd.s32 4294967294, %v1011_v28  ;;  %v15619_v44 = vand.u32 2147483647, %v10415_v30 }
 0x18c   : > { %v1467_v14 = vshrl.u32 %v1466_v58, 23  ;;  %v10809_v56 = vor.u32 %v1172_v39, %v1171_v31  ;;  %v1176_v11 = vor.u32 %v1175_v34, %v1174_v22  ;;  %vm1186_vm9 = vcmp.lt.s32.totalorder %v10789_v52, 4 }
 0x18d   : > { %v1158_v47 = vand.u32 8388607, %v15619_v44  ;;  %v10807_v51 = vor.u32 %v1169_v57, %v1168_v60  ;;  %v10812_v20 = vmul.f32 %v817_v3, %v815_v9  ;;  %v1318_v41 = vshll.u32 %v10799_v54, 30 }
 0x18e   : > { %v1192_v55 = vsel %vm1186_vm9, %v1179_v63, 920167782  ;;  %v8120_v61 = vadd.s32 4294967169, %v1467_v14  ;;  %v10817_v28 = vpop.eup %9603  ;;  %v1124_v24 = vadd.s32 127, %v1123_v38  ;;  %v8164_v44 = vadd.s32 4294967169, %v2627_v4 }
 0x18f   : > { %15620 = vst [vmem:[#allocation33_spill] sm:$0xff] %v10817_v28  ;;  %v10820_v60 = vadd.f32 1.5707964, %v10413_v29  ;;  %v1196_v39 = vsel %vm1186_vm9, %v1182_v21, 1326507024  ;;  %vm8103_vm10 = vcmp.lt.s32.totalorder %v8102_v50, 0  ;;  %v1121_v3 = vshrl.u32 %v1103_v0, %v1119_v32 }
 0x190   : > { %vm1183_vm11 = vcmp.lt.s32.totalorder %v10789_v52, 1  ;;  %vm1185_vm12 = vcmp.lt.s32.totalorder %v10789_v52, 3  ;;  %v1473_v22 = vadd.s32 1, %v8120_v61  ;;  %v1159_v31 = vor.u32 8388608, %v1158_v47  ;;  %v10840_v47 = vpop.f32.mrb[12].mxu0 }
 0x191   : > { %15621 = vst [vmem:[#allocation34_spill] sm:$0xff] %v10820_v60  ;;  %v1191_v14 = vsel %vm1183_vm11, %v10807_v51, %v10809_v56  ;;  %v1193_v9 = vsel %vm1185_vm12, %v1176_v11, %v1192_v55  ;;  %v10833_v4 = vsub.s32 %v10759_v6, %v1318_v41  ;;  %v1195_v21 = vsel %vm1183_vm11, %v10809_v56, %v1176_v11 }
 0x192   : > { %v1197_v57 = vsel %vm1185_vm12, %v1179_v63, %v1196_v39  ;;  %vm1474_vm13 = vcmp.gt.s32.totalorder %v1473_v22, 0  ;;  %15622 = vst [vmem:[#allocation35_spill] sm:$0xff] %v10840_v47  ;;  %v1125_v32 = vshll.u32 %v1124_v24, 23  ;;  %v10842_v0 = vsel %vm8103_vm10, 0, %v8102_v50 }
 0x193   : > { %vm1184_vm14 = vcmp.lt.s32.totalorder %v10789_v52, 2  ;;  %v1475_v34 = vsel %vm1474_vm13, %v1473_v22, 0  ;;  %v1120_v38 = vshll.u32 %v10671_v33, %v1118_v15  ;;  %v10846_v41 = vadd.s32 1, %v8164_v44 }
 0x194   : > { %v1194_v6 = vsel %vm1184_vm14, %v1191_v14, %v1193_v9  ;;  %v1477_v58 = vand.u32 31, %v1475_v34  ;;  %v999_v63 = vadd.s32 %v10608_v5, %v10615_v8  ;;  %v2938_v55 = vand.u32 2139095040, %v10820_v60 }
 0x195   : > { %v1198_v50 = vsel %vm1184_vm14, %v1195_v21, %v1197_v57  ;;  %v10855_v61 = vshll.u32 %v1159_v31, 8  ;;  %v1122_v24 = vor.u32 %v1121_v3, %v1120_v38  ;;  %v1019_v39 = vsub.s32 4294967266, %v10842_v0 }
 0x196   : > { %v1321_v33 = vsub.s32 0, %v10833_v4  ;;  %v10859_v15 = vsub.s32 32, %v1477_v58  ;;  %v1126_v44 = vor.u32 4788187, %v1125_v32  ;;  %v10871_v31 = vshrl.u32 %v1475_v34, 5 }
 0x197   : > { %v10862_v22 = vmul.u32.u64.low %v10855_v61, %v1194_v6  ;;  %v10863_v14 = vmul.u32.u64.high %v10855_v61, %v1194_v6, %v10862_v22  ;;  %v10868_v8 = vmul.u32.u64.low %v10855_v61, %v1198_v50  ;;  %v10869_v9 = vmul.u32.u64.high %v10855_v61, %v1198_v50, %v10868_v8 }
 0x198   : > { %v15623_v3 = vmov 2102212464   ;;  %v15624_v57 = vmov 2475754826   ;;  %v1484_v32 = vshrl.u32 %v15616_v46, %v10859_v15  ;;  %v15625_v60 = vmov 920167782  }
 0x199   : > { %v1489_v21 = vshll.u32 %v15623_v3, %v1477_v58  ;;  %v1481_v38 = vshrl.u32 %v15624_v57, %v10859_v15  ;;  %v1487_v6 = vshrl.u32 %v15623_v3, %v10859_v15  ;;  %v1490_v5 = vshrl.u32 %v15625_v60, %v10859_v15 }
 0x19a   : > { %v1015_v37 = vsub.s32 32, %v10842_v0  ;;  %v1020_v50 = vadd.s32 127, %v1019_v39  ;;  %v8113_v34 = vmin.u32 %v1321_v33, %v10833_v4  ;;  %v15626_v8 = vmov 1326507024  }
 0x19b   : > { %v1493_v53 = vshrl.u32 %v15626_v8, %v10859_v15  ;;  %v1480_v10 = vshll.u32 %v15618_v42, %v1477_v58  ;;  %v1483_v26 = vshll.u32 %v15624_v57, %v1477_v58  ;;  %v1486_v43 = vshll.u32 %v15616_v46, %v1477_v58 }
 0x19c   : > { %v1491_v54 = vor.u32 %v1490_v5, %v1489_v21  ;;  %v1167_v13 = vshrl.u32 %v15618_v42, %v10761_v16  ;;  %v1188_v28 = vsel %vm1186_vm9, %v1176_v11, 2102212464  ;;  %v15627_v39 = vand.u32 2147483647, %v10419_v35 }
 0x19d   : > { %v1492_v33 = vshll.u32 %v15625_v60, %v1477_v58  ;;  %v10896_v25 = vor.u32 %v1481_v38, %v1480_v10  ;;  %v10898_v17 = vor.u32 %v1484_v32, %v1483_v26  ;;  %v1488_v2 = vor.u32 %v1487_v6, %v1486_v43 }
 0x19e   : > { %v1470_v1 = vand.u32 8388607, %v15627_v39  ;;  %vm1498_vm15 = vcmp.lt.s32.totalorder %v10871_v31, 4  ;;  %v1129_v40 = vcvt.s32.f32 %v1122_v24  ;;  %v1323_v5 = vclz %v8113_v34 }
 0x19f   : > { %v1494_v21 = vor.u32 %v1493_v53, %v1492_v33  ;;  %v1504_v16 = vsel %vm1498_vm15, %v1491_v54, 920167782  ;;  %v1127_v47 = vand.u32 2147483647, %v1126_v44  ;;  %v1017_v11 = vshrl.u32 %v999_v63, %v1015_v37 }
 0x1a0   : > { %v1187_v39 = vsel %vm1183_vm11, %v1167_v13, %v10807_v51  ;;  %v1189_v10 = vsel %vm1185_vm12, %v10809_v56, %v1188_v28  ;;  %v1021_v26 = vshll.u32 %v1020_v50, 23  ;;  %v1209_v43 = vadd.s32 1, %v10863_v14 }
 0x1a1   : > { %vm1495_vm0 = vcmp.lt.s32.totalorder %v10871_v31, 1  ;;  %vm1497_vm1 = vcmp.lt.s32.totalorder %v10871_v31, 3  ;;  %vm1208_vm2 = vc.u32 %v10869_v9, %v10862_v22  ;;  %v1471_v53 = vor.u32 8388608, %v1470_v1 }
 0x1a2   : > { %v1503_v51 = vsel %vm1495_vm0, %v10896_v25, %v10898_v17  ;;  %v1505_v37 = vsel %vm1497_vm1, %v1488_v2, %v1504_v16  ;;  %v8114_v13 = vadd.s32 4294967294, %v1323_v5  ;;  %v1190_v56 = vsel %vm1184_vm14, %v1187_v39, %v1189_v10  ;;  %v10961_v39 = vpop.f32.mrb[13].mxu0 }
 0x1a3   : > { %v1508_v28 = vsel %vm1498_vm15, %v1494_v21, 1326507024  ;;  %v1362_v58 = vand.u32 2139095040, %v10427_v49  ;;  %v1130_v63 = vmul.f32 %v1129_v40, %v1127_v47  ;;  %vm2634_vm3 = vcmp.gt.s32.totalorder %v10846_v41, 0  ;;  %15628 = vst [vmem:[#allocation36_spill] sm:$0xff] %v10961_v39 }
 0x1a4   : > { %v2939_v1 = vshrl.u32 %v2938_v55, 23  ;;  %vm1496_vm4 = vcmp.lt.s32.totalorder %v10871_v31, 2  ;;  %vm15531_vm5 = vcmp.lt.s32.totalorder %v10405_v19, 0  ;;  %vm15528_vm8 = vcmp.lt.s32.totalorder %v10408_v23, 0 }
 0x1a5   : > { %v1016_v24 = vshll.u32 %v10725_v36, %v10842_v0  ;;  %v1210_v52 = vsel %vm1208_vm2, %v1209_v43, %v10863_v14  ;;  %v1506_v44 = vsel %vm1496_vm4, %v1503_v51, %v1505_v37  ;;  %v1363_v38 = vshrl.u32 %v1362_v58, 23 }
 0x1a6   : > { %v1206_v40 = vmul.u32 %v10855_v61, %v1190_v56  ;;  %v1507_v47 = vsel %vm1495_vm0, %v10898_v17, %v1488_v2  ;;  %v1509_v55 = vsel %vm1497_vm1, %v1491_v54, %v1508_v28  ;;  %v10940_v32 = vshll.u32 %v1471_v53, 8 }
 0x1a7   : > { %9605 = vsinq.f32 %v10757_v62  ;;  %v1018_v36 = vor.u32 %v1017_v11, %v1016_v24  ;;  %v1022_v0 = vor.u32 4788187, %v1021_v26  ;;  %vm8115_vm9 = vcmp.lt.s32.totalorder %v8114_v13, 0 }
 0x1a8   : > { %v10943_v14 = vadd.s32 %v1210_v52, %v1206_v40  ;;  %v10946_v6 = vmul.u32.u64.low %v10940_v32, %v1506_v44  ;;  %v10947_v50 = vmul.u32.u64.high %v10940_v32, %v1506_v44, %v10946_v6  ;;  %v8116_v61 = vadd.s32 4294967169, %v1363_v38 }
 0x1a9   : > { %v819_v34 = vxor.u32 2147483648, %v10812_v20  ;;  %v10954_v54 = vsel %vm2634_vm3, %v10846_v41, 0  ;;  %v1510_v62 = vsel %vm1496_vm4, %v1507_v47, %v1509_v55  ;;  %v15454_v33 = vand.u32 2147483647, %v10427_v49 }
 0x1aa   : > { %v1131_v5 = vxor.u32 2147483648, %v1130_v63  ;;  %v8176_v21 = vadd.s32 4294967169, %v2939_v1  ;;  %v1500_v16 = vsel %vm1498_vm15, %v1488_v2, 2102212464  ;;  %v1369_v11 = vadd.s32 1, %v8116_v61 }
 0x1ab   : > { %v1023_v10 = vand.u32 2147483647, %v1022_v0  ;;  %v1025_v26 = vcvt.s32.f32 %v1018_v36  ;;  %v10963_v43 = vsel %vm8115_vm9, 0, %v8114_v13  ;;  %v1479_v41 = vshrl.u32 %v15618_v42, %v10859_v15 }
 0x1ac   : > { %v1212_v53 = vadd.s32 536870912, %v10943_v14  ;;  %v10969_v51 = vmul.u32.u64.low %v10940_v32, %v1510_v62  ;;  %v10970_v37 = vmul.u32.u64.high %v10940_v32, %v1510_v62, %v10969_v51  ;;  %vm1370_vm10 = vcmp.gt.s32.totalorder %v1369_v11, 0 }
 0x1ad   : > { %v1499_v2 = vsel %vm1495_vm0, %v1479_v41, %v10896_v25  ;;  %v1501_v56 = vsel %vm1497_vm1, %v10898_v17, %v1500_v16  ;;  %v1366_v13 = vand.u32 8388607, %v15454_v33  ;;  %v1371_v28 = vsel %vm1370_vm10, %v1369_v11, 0 }
 0x1ae   : > { %v10983_v15 = vsel %vm15531_vm5, %v819_v34, %v10812_v20  ;;  %v10987_v58 = vsel %vm15528_vm8, %v1131_v5, %v1130_v63  ;;  %v10990_v1 = vand.u32 31, %v10954_v54  ;;  %v1373_v25 = vand.u32 31, %v1371_v28 }
 0x1af   : > { %15629 = vst [vmem:[#allocation37_spill] sm:$0xff] %v10983_v15  ;;  %v10992_v24 = vmul.f32 %v1025_v26, %v1023_v10  ;;  %v1331_v17 = vsub.s32 4294967266, %v10963_v43  ;;  %v10995_v52 = vadd.s32 1, %v8176_v21  ;;  %v10998_v44 = vadd.f32 1.5707964, %v10415_v30 }
 0x1b0   : > { %15630 = vst [vmem:[#allocation38_spill] sm:$0xff] %v10990_v1  ;;  %v11000_v38 = vshrl.u32 %v1212_v53, 30  ;;  %v1502_v20 = vsel %vm1496_vm4, %v1499_v2, %v1501_v56  ;;  %v1521_v63 = vadd.s32 1, %v10947_v50  ;;  %v1374_v40 = vsub.s32 32, %v1373_v25 }
 0x1b1   : > { %15631 = vst [vmem:[#allocation39_spill] sm:$0xff] %v10998_v44  ;;  %v11005_v47 = vpop.eup %9605  ;;  %v1367_v55 = vor.u32 8388608, %v1366_v13  ;;  %v11007_v36 = vshrl.u32 %v1371_v28, 5  ;;  %v1376_v0 = vshll.u32 %v15618_v42, %v1373_v25  ;;  %v1379_v61 = vshll.u32 %v15624_v57, %v1373_v25 }
 0x1b2   : > { %15632 = vst [vmem:[#allocation40_spill] sm:$0xff] %v11000_v38  ;;  %15633 = vst [vmem:[#allocation41_spill] sm:$0xff] %v11005_v47  ;;  %v1377_v34 = vshrl.u32 %v15624_v57, %v1374_v40  ;;  %v1380_v62 = vshrl.u32 %v15616_v46, %v1374_v40  ;;  %v1382_v5 = vshll.u32 %v15616_v46, %v1373_v25  ;;  %v1674_v53 = vand.u32 2139095040, %v10478_v18 }
 0x1b3   : > { %v1385_v31 = vshll.u32 %v15623_v3, %v1373_v25  ;;  %v1383_v21 = vshrl.u32 %v15623_v3, %v1374_v40  ;;  %v1386_v16 = vshrl.u32 %v15625_v60, %v1374_v40  ;;  %v1388_v11 = vshll.u32 %v15625_v60, %v1373_v25 }
 0x1b4   : > { %v1389_v10 = vshrl.u32 %v15626_v8, %v1374_v40  ;;  %vm1520_vm11 = vc.u32 %v10970_v37, %v10946_v6  ;;  %v1378_v26 = vor.u32 %v1377_v34, %v1376_v0  ;;  %v1381_v41 = vor.u32 %v1380_v62, %v1379_v61 }
 0x1b5   : > { %v15634_v51 = vand.u32 2147483647, %v10408_v23  ;;  %v15635_v2 = vmov 0  ;;  %v2834_v56 = vand.u32 2139095040, %v10998_v44  ;;  %v1384_v13 = vor.u32 %v1383_v21, %v1382_v5 }
 0x1b6   : > { %v1387_v28 = vor.u32 %v1386_v16, %v1385_v31  ;;  %v1390_v25 = vor.u32 %v1389_v10, %v1388_v11  ;;  %vm15529_vm13 = vcmp.lt.s32.totalorder %v10411_v27, 0  ;;  %v1027_v33 = vxor.u32 2147483648, %v10992_v24 }
 0x1b7   : > { %vm11024_vm12 = vcmp.le.f32.partialorder %v15634_v51, 0.7853982  ;;  %v1332_v47 = vadd.s32 127, %v1331_v17  ;;  %v1214_v0 = vshll.u32 %v11000_v38, 30  ;;  %vm1391_vm14 = vcmp.lt.s32.totalorder %v11007_v36, 1 }
 0x1b8   : > { %v15636_v2 = vsel %vm11024_vm12, 4294967295, %v15635_v2  ;;  %v1518_v61 = vmul.u32 %v10940_v32, %v1502_v20  ;;  %v1522_v34 = vsel %vm1520_vm11, %v1521_v63, %v10947_v50  ;;  %vm1394_vm15 = vcmp.lt.s32.totalorder %v11007_v36, 4 }
 0x1b9   : > { %15637 = vst [vmem:[#allocation42_spill] sm:$0xff] %v15636_v2  ;;  %v1399_v62 = vsel %vm1391_vm14, %v1378_v26, %v1381_v41  ;;  %vm1393_vm0 = vcmp.lt.s32.totalorder %v11007_v36, 3  ;;  %v1400_v5 = vsel %vm1394_vm15, %v1387_v28, 920167782  ;;  %v1407_v31 = vshll.u32 %v1367_v55, 8 }
 0x1ba   : > { %v1675_v21 = vshrl.u32 %v1674_v53, 23  ;;  %vm1392_vm1 = vcmp.lt.s32.totalorder %v11007_v36, 2  ;;  %v1401_v17 = vsel %vm1393_vm0, %v1384_v13, %v1400_v5  ;;  %v1403_v32 = vsel %vm1391_vm14, %v1381_v41, %v1384_v13 }
 0x1bb   : > { %v1404_v20 = vsel %vm1394_vm15, %v1390_v25, 1326507024  ;;  %v11044_v50 = vadd.s32 %v1522_v34, %v1518_v61  ;;  %v1396_v63 = vsel %vm1394_vm15, %v1384_v13, 2102212464  ;;  %v1402_v16 = vsel %vm1392_vm1, %v1399_v62, %v1401_v17 }
 0x1bc   : > { %v1405_v11 = vsel %vm1393_vm0, %v1387_v28, %v1404_v20  ;;  %v15638_v55 = vand.u32 2147483647, %v10411_v27  ;;  %v15639_v10 = vmov 0  ;;  %v1375_v53 = vshrl.u32 %v15618_v42, %v1374_v40 }
 0x1bd   : > { %v1406_v51 = vsel %vm1392_vm1, %v1403_v32, %v1405_v11  ;;  %v11059_v25 = vmul.u32.u64.low %v1407_v31, %v1402_v16  ;;  %v11060_v61 = vmul.u32.u64.high %v1407_v31, %v1402_v16, %v11059_v25  ;;  %v1327_v13 = vsub.s32 32, %v10963_v43 }
 0x1be   : > { %vm11052_vm2 = vcmp.le.f32.partialorder %v15638_v55, 0.7853982  ;;  %v1333_v34 = vshll.u32 %v1332_v47, 23  ;;  %v11064_v62 = vmul.u32.u64.low %v1407_v31, %v1406_v51  ;;  %v11065_v28 = vmul.u32.u64.high %v1407_v31, %v1406_v51, %v11064_v62 }
 0x1bf   : > { %v15640_v10 = vsel %vm11052_vm2, 4294967295, %v15639_v10  ;;  %v11068_v5 = vsub.s32 %v10943_v14, %v1214_v0  ;;  %v1395_v17 = vsel %vm1391_vm14, %v1375_v53, %v1378_v26  ;;  %v1397_v40 = vsel %vm1393_vm0, %v1381_v41, %v1396_v63 }
 0x1c0   : > { %15641 = vst [vmem:[#allocation43_spill] sm:$0xff] %v15640_v10  ;;  %v8128_v32 = vadd.s32 4294967169, %v1675_v21  ;;  %v11078_v20 = vsel %vm11024_vm12, %v10408_v23, %v10987_v58  ;;  %v1311_v47 = vadd.s32 %v10700_v7, %v10706_v45  ;;  %v1524_v16 = vadd.s32 536870912, %v11044_v50  ;;  %v11093_v7 = vpop.f32.mrb[14].mxu0 }
 0x1c1   : > { %v15456_v14 = vand.u32 2147483647, %v10478_v18  ;;  %v1028_v26 = vsel %vm15529_vm13, %v1027_v33, %v10992_v24  ;;  %vm2946_vm3 = vcmp.gt.s32.totalorder %v10995_v52, 0  ;;  %v1417_v41 = vadd.s32 1, %v11060_v61 }
 0x1c2   : > { %v1681_v0 = vadd.s32 1, %v8128_v32  ;;  %v1329_v21 = vshrl.u32 %v1311_v47, %v1327_v13  ;;  %v2835_v63 = vshrl.u32 %v2834_v56, 23  ;;  %v1398_v58 = vsel %vm1392_vm1, %v1395_v17, %v1397_v40 }
 0x1c3   : > { %vm1416_vm4 = vc.u32 %v11065_v28, %v11059_v25  ;;  %v1328_v45 = vshll.u32 %v10833_v4, %v10963_v43  ;;  %v1334_v11 = vor.u32 4788187, %v1333_v34  ;;  %v1217_v33 = vsub.s32 0, %v11068_v5 }
 0x1c4   : > { %vm1682_vm9 = vcmp.gt.s32.totalorder %v1681_v0, 0  ;;  %v11098_v24 = vshrl.u32 %v1524_v16, 30  ;;  %v1418_v55 = vsel %vm1416_vm4, %v1417_v41, %v11060_v61  ;;  %v1678_v36 = vand.u32 8388607, %v15456_v14 }
 0x1c5   : > { %v1683_v56 = vsel %vm1682_vm9, %v1681_v0, 0  ;;  %9607 = vcosq.f32 %v11078_v20  ;;  %v11107_v53 = vsel %vm2946_vm3, %v10995_v52, 0  ;;  %v1414_v4 = vmul.u32 %v1407_v31, %v1398_v58 }
 0x1c6   : > { %15642 = vst [vmem:[#allocation44_spill] sm:$0xff] %v11098_v24  ;;  %v1685_v43 = vand.u32 31, %v1683_v56  ;;  %v11112_v51 = vsel %vm11052_vm2, %v10411_v27, %v1028_v26  ;;  %v1330_v13 = vor.u32 %v1329_v21, %v1328_v45  ;;  %v8172_v61 = vadd.s32 4294967169, %v2835_v63 }
 0x1c7   : > { %v11115_v34 = vadd.f32 1.5707964, %v10419_v35  ;;  %v1335_v62 = vand.u32 2147483647, %v1334_v11  ;;  %v8109_v17 = vmin.u32 %v1217_v33, %v11068_v5  ;;  %v11118_v40 = vadd.s32 %v1418_v55, %v1414_v4 }
 0x1c8   : > { %v1686_v32 = vsub.s32 32, %v1685_v43  ;;  %v1526_v52 = vshll.u32 %v11098_v24, 30  ;;  %v1679_v31 = vor.u32 8388608, %v1678_v36  ;;  %v1684_v47 = vshrl.u32 %v1683_v56, 5 }
 0x1c9   : > { %15643 = vst [vmem:[#allocation45_spill] sm:$0xff] %v11115_v34  ;;  %v1688_v16 = vshll.u32 %v15618_v42, %v1685_v43  ;;  %v1691_v41 = vshll.u32 %v15624_v57, %v1685_v43  ;;  %v1694_v63 = vshll.u32 %v15616_v46, %v1685_v43  ;;  %v1697_v58 = vshll.u32 %v15623_v3, %v1685_v43 }
 0x1ca   : > { %v1689_v26 = vshrl.u32 %v15624_v57, %v1686_v32  ;;  %v1692_v0 = vshrl.u32 %v15616_v46, %v1686_v32  ;;  %v1695_v21 = vshrl.u32 %v15623_v3, %v1686_v32  ;;  %v1698_v45 = vshrl.u32 %v15625_v60, %v1686_v32 }
 0x1cb   : > { %v1701_v11 = vshrl.u32 %v15626_v8, %v1686_v32  ;;  %v1420_v33 = vadd.s32 536870912, %v11118_v40  ;;  %v1700_v56 = vshll.u32 %v15625_v60, %v1685_v43  ;;  %v1337_v4 = vcvt.s32.f32 %v1330_v13 }
 0x1cc   : > { %v1690_v55 = vor.u32 %v1689_v26, %v1688_v16  ;;  %v1693_v36 = vor.u32 %v1692_v0, %v1691_v41  ;;  %v2841_v14 = vadd.s32 1, %v8172_v61  ;;  %v1696_v44 = vor.u32 %v1695_v21, %v1694_v63 }
 0x1cd   : > { %v1699_v24 = vor.u32 %v1698_v45, %v1697_v58  ;;  %v1219_v38 = vclz %v8109_v17  ;;  %v3146_v2 = vand.u32 2139095040, %v11115_v34  ;;  %v1702_v23 = vor.u32 %v1701_v11, %v1700_v56 }
 0x1ce   : > { %vm1703_vm10 = vcmp.lt.s32.totalorder %v1684_v47, 1  ;;  %v1338_v10 = vmul.f32 %v1337_v4, %v1335_v62  ;;  %v11134_v27 = vsub.s32 %v11044_v50, %v1526_v52  ;;  %vm1706_vm11 = vcmp.lt.s32.totalorder %v1684_v47, 4 }
 0x1cf   : > { %v1711_v15 = vsel %vm1703_vm10, %v1690_v55, %v1693_v36  ;;  %v11137_v16 = vpop.eup %9607  ;;  %v11139_v26 = vshrl.u32 %v1420_v33, 30  ;;  %vm1705_vm14 = vcmp.lt.s32.totalorder %v1684_v47, 3  ;;  %v1712_v43 = vsel %vm1706_vm11, %v1699_v24, 920167782 }
 0x1d0   : > { %15644 = vst [vmem:[#allocation46_spill] sm:$0xff] %v11137_v16  ;;  %v1719_v13 = vshll.u32 %v1679_v31, 8  ;;  %vm1704_vm15 = vcmp.lt.s32.totalorder %v1684_v47, 2  ;;  %v1708_v61 = vsel %vm1706_vm11, %v1696_v44, 2102212464  ;;  %v1713_v17 = vsel %vm1705_vm14, %v1696_v44, %v1712_v43 }
 0x1d1   : > { %15645 = vst [vmem:[#allocation47_spill] sm:$0xff] %v11139_v26  ;;  %v1715_v41 = vsel %vm1703_vm10, %v1693_v36, %v1696_v44  ;;  %v8110_v62 = vadd.s32 4294967294, %v1219_v38  ;;  %v1687_v50 = vshrl.u32 %v15618_v42, %v1686_v32  ;;  %v1714_v52 = vsel %vm1704_vm15, %v1711_v15, %v1713_v17 }
 0x1d2   : > { %v1716_v0 = vsel %vm1706_vm11, %v1702_v23, 1326507024  ;;  %v1339_v21 = vxor.u32 2147483648, %v1338_v10  ;;  %v11146_v58 = vmul.u32.u64.low %v1719_v13, %v1714_v52  ;;  %v11147_v45 = vmul.u32.u64.high %v1719_v13, %v1714_v52, %v11146_v58 }
 0x1d3   : > { %v1717_v63 = vsel %vm1705_vm14, %v1699_v24, %v1716_v0  ;;  %v15646_v31 = vand.u32 2147483647, %v10413_v29  ;;  %v15647_v11 = vmov 0  ;;  %v1529_v44 = vsub.s32 0, %v11134_v27 }
 0x1d4   : > { %v1707_v38 = vsel %vm1703_vm10, %v1687_v50, %v1690_v55  ;;  %v1709_v15 = vsel %vm1705_vm14, %v1693_v36, %v1708_v61  ;;  %v1718_v23 = vsel %vm1704_vm15, %v1715_v41, %v1717_v63  ;;  %v1422_v24 = vshll.u32 %v11139_v26, 30 }
 0x1d5   : > { %vm11152_vm0 = vcmp.le.f32.partialorder %v15646_v31, 0.7853982  ;;  %v11161_v32 = vmul.u32.u64.low %v1719_v13, %v1718_v23  ;;  %v11162_v33 = vmul.u32.u64.high %v1719_v13, %v1718_v23, %v11161_v32  ;;  %v1570_v56 = vand.u32 2139095040, %v10523_v12 }
 0x1d6   : > { %v15648_v11 = vsel %vm11152_vm0, 4294967295, %v15647_v11  ;;  %9609 = vsinq.f32 %v11078_v20  ;;  %v11167_v4 = vshrl.u32 %v10954_v54, 5  ;;  %vm15509_vm1 = vcmp.lt.s32.totalorder %v10413_v29, 0 }
 0x1d7   : > { %15649 = vst [vmem:[#allocation48_spill] sm:$0xff] %v15648_v11  ;;  %vm8111_vm3 = vcmp.lt.s32.totalorder %v8110_v62, 0  ;;  %v11171_v55 = vand.u32 31, %v11107_v53  ;;  %v1710_v36 = vsel %vm1704_vm15, %v1707_v38, %v1709_v15  ;;  %v1729_v43 = vadd.s32 1, %v11147_v45  ;;  %v11205_v15 = vpop.f32.mrb[15].mxu0 }
 0x1d8   : > { %15650 = vst [vmem:[#allocation49_spill] sm:$0xff] %v11167_v4  ;;  %v1571_v61 = vshrl.u32 %v1570_v56, 23  ;;  %9611 = vcosq.f32 %v11112_v51  ;;  %v11177_v17 = vsub.s32 32, %v10990_v1  ;;  %vm2842_vm4 = vcmp.gt.s32.totalorder %v2841_v14, 0 }
 0x1d9   : > { %15651 = vst [vmem:[#allocation50_spill] sm:$0xff] %v11171_v55  ;;  %v3147_v20 = vshrl.u32 %v3146_v2, 23  ;;  %v1340_v54 = vsel %vm15509_vm1, %v1339_v21, %v1338_v10  ;;  %v11181_v41 = vsel %vm8111_vm3, 0, %v8110_v62  ;;  %v8121_v50 = vmin.u32 %v1529_v44, %v11134_v27 }
 0x1da   : > { %15652 = vst [vmem:[#allocation51_spill] sm:$0xff] %v11177_v17  ;;  %v11185_v47 = vsub.s32 %v11118_v40, %v1422_v24  ;;  %v1726_v52 = vmul.u32 %v1719_v13, %v1710_v36  ;;  %vm1728_vm9 = vc.u32 %v11162_v33, %v11146_v58  ;;  %v15469_v0 = vand.u32 2147483647, %v10523_v12 }
 0x1db   : > { %v8124_v63 = vadd.s32 4294967169, %v1571_v61  ;;  %9613 = vsinq.f32 %v11112_v51  ;;  %v11192_v2 = vshrl.u32 %v11107_v53, 5  ;;  %v11195_v10 = vsub.s32 32, %v11171_v55 }
 0x1dc   : > { %v1730_v62 = vsel %vm1728_vm9, %v1729_v43, %v11147_v45  ;;  %v2843_v21 = vsel %vm2842_vm4, %v2841_v14, 0  ;;  %v8184_v40 = vadd.s32 4294967169, %v3147_v20  ;;  %v11201_v44 = vsel %vm11152_vm0, %v10413_v29, %v1340_v54 }
 0x1dd   : > { %15653 = vst [vmem:[#allocation52_spill] sm:$0xff] %v11192_v2  ;;  %15654 = vst [vmem:[#allocation53_spill] sm:$0xff] %v11195_v10  ;;  %v1731_v31 = vadd.s32 %v1730_v62, %v1726_v52  ;;  %v1577_v13 = vadd.s32 1, %v8124_v63  ;;  %v1227_v38 = vsub.s32 4294967266, %v11181_v41  ;;  %v1531_v51 = vclz %v8121_v50 }
 0x1de   : > { %v1425_v53 = vsub.s32 0, %v11185_v47  ;;  %v1574_v45 = vand.u32 8388607, %v15469_v0  ;;  %v1882_v14 = vand.u32 2139095040, %v10638_v59  ;;  %v1207_v24 = vadd.s32 %v10862_v22, %v10869_v9 }
 0x1df   : > { %v1732_v23 = vadd.s32 536870912, %v1731_v31  ;;  %vm1578_vm10 = vcmp.gt.s32.totalorder %v1577_v13, 0  ;;  %v11212_v32 = vshrl.u32 %v2843_v21, 5  ;;  %v11214_v56 = vand.u32 31, %v2843_v21 }
 0x1e0   : > { %v1579_v36 = vsel %vm1578_vm10, %v1577_v13, 0  ;;  %v11216_v43 = vpop.eup %9609  ;;  %9615 = vcosq.f32 %v11201_v44  ;;  %v11219_v61 = vadd.s32 1, %v8184_v40  ;;  %v1223_v50 = vsub.s32 32, %v11181_v41 }
 0x1e1   : > { %15655 = vst [vmem:[#allocation54_spill] sm:$0xff] %v11212_v32  ;;  %15656 = vst [vmem:[#allocation55_spill] sm:$0xff] %v11214_v56  ;;  %v11221_v20 = vshrl.u32 %v1732_v23, 30  ;;  %v1581_v54 = vand.u32 31, %v1579_v36  ;;  %v1228_v52 = vadd.s32 127, %v1227_v38  ;;  %v8122_v63 = vadd.s32 4294967294, %v1531_v51 }
 0x1e2   : > { %15657 = vst [vmem:[#allocation56_spill] sm:$0xff] %v11216_v43  ;;  %v11225_v22 = vadd.f32 1.5707964, %v10427_v49  ;;  %v11227_v9 = vpop.eup %9611  ;;  %v8117_v62 = vmin.u32 %v1425_v53, %v11185_v47  ;;  %v1575_v21 = vor.u32 8388608, %v1574_v45  ;;  %v1883_v0 = vshrl.u32 %v1882_v14, 23 }
 0x1e3   : > { %15658 = vst [vmem:[#allocation57_spill] sm:$0xff] %v11221_v20  ;;  %15660 = vst [vmem:[#allocation59_spill] sm:$0xff] %v11227_v9  ;;  %v1582_v13 = vsub.s32 32, %v1581_v54  ;;  %v1734_v40 = vshll.u32 %v11221_v20, 30  ;;  %v1580_v34 = vshrl.u32 %v1579_v36, 5  ;;  %v1584_v23 = vshll.u32 %v15618_v42, %v1581_v54 }
 0x1e4   : > { %15659 = vst [vmem:[#allocation58_spill] sm:$0xff] %v11225_v22  ;;  %v1587_v2 = vshll.u32 %v15624_v57, %v1581_v54  ;;  %v1590_v55 = vshll.u32 %v15616_v46, %v1581_v54  ;;  %v1593_v10 = vshll.u32 %v15623_v3, %v1581_v54  ;;  %v1596_v14 = vshll.u32 %v15625_v60, %v1581_v54 }
 0x1e5   : > { %v1585_v38 = vshrl.u32 %v15624_v57, %v1582_v13  ;;  %v1588_v51 = vshrl.u32 %v15616_v46, %v1582_v13  ;;  %v11237_v32 = vpop.eup %9613  ;;  %v1591_v53 = vshrl.u32 %v15623_v3, %v1582_v13  ;;  %v1594_v45 = vshrl.u32 %v15625_v60, %v1582_v13 }
 0x1e6   : > { %15661 = vst [vmem:[#allocation60_spill] sm:$0xff] %v11237_v32  ;;  %v1597_v36 = vshrl.u32 %v15626_v8, %v1582_v13  ;;  %v1225_v4 = vshrl.u32 %v1207_v24, %v1223_v50  ;;  %vm3154_vm11 = vcmp.gt.s32.totalorder %v11219_v61, 0  ;;  %v1229_v20 = vshll.u32 %v1228_v52, 23 }
 0x1e7   : > { %v1586_v1 = vor.u32 %v1585_v38, %v1584_v23  ;;  %v1589_v17 = vor.u32 %v1588_v51, %v1587_v2  ;;  %v1592_v11 = vor.u32 %v1591_v53, %v1590_v55  ;;  %v1595_v26 = vor.u32 %v1594_v45, %v1593_v10 }
 0x1e8   : > { %v1598_v29 = vor.u32 %v1597_v36, %v1596_v14  ;;  %vm8123_vm14 = vcmp.lt.s32.totalorder %v8122_v63, 0  ;;  %v1427_v16 = vclz %v8117_v62  ;;  %vm1599_vm15 = vcmp.lt.s32.totalorder %v1580_v34, 1 }
 0x1e9   : > { %v1615_v43 = vshll.u32 %v1575_v21, 8  ;;  %v11244_v9 = vsub.s32 %v1731_v31, %v1734_v40  ;;  %vm1602_vm3 = vcmp.lt.s32.totalorder %v1580_v34, 4  ;;  %v1607_v32 = vsel %vm1599_vm15, %v1586_v1, %v1589_v17 }
 0x1ea   : > { %v8136_v54 = vadd.s32 4294967169, %v1883_v0  ;;  %v11246_v19 = vpop.eup %9615  ;;  %v1583_v24 = vshrl.u32 %v15618_v42, %v1582_v13  ;;  %vm1601_vm4 = vcmp.lt.s32.totalorder %v1580_v34, 3  ;;  %v1604_v50 = vsel %vm1602_vm3, %v1592_v11, 2102212464 }
 0x1eb   : > { %15662 = vst [vmem:[#allocation61_spill] sm:$0xff] %v11246_v19  ;;  %v1608_v2 = vsel %vm1602_vm3, %v1595_v26, 920167782  ;;  %vm1600_vm9 = vcmp.lt.s32.totalorder %v1580_v34, 2  ;;  %v1611_v10 = vsel %vm1599_vm15, %v1589_v17, %v1592_v11  ;;  %v1612_v52 = vsel %vm1602_vm3, %v1598_v29, 1326507024 }
 0x1ec   : > { %v1609_v55 = vsel %vm1601_vm4, %v1592_v11, %v1608_v2  ;;  %v1603_v23 = vsel %vm1599_vm15, %v1583_v24, %v1586_v1  ;;  %v1605_v62 = vsel %vm1601_vm4, %v1589_v17, %v1604_v50  ;;  %v1613_v21 = vsel %vm1601_vm4, %v1595_v26, %v1612_v52 }
 0x1ed   : > { %v1610_v38 = vsel %vm1600_vm9, %v1607_v32, %v1609_v55  ;;  %v1224_v31 = vshll.u32 %v11068_v5, %v11181_v41  ;;  %v1614_v40 = vsel %vm1600_vm9, %v1611_v10, %v1613_v21  ;;  %v1230_v13 = vor.u32 4788187, %v1229_v20 }
 0x1ee   : > { %v11251_v0 = vmul.u32.u64.low %v1615_v43, %v1610_v38  ;;  %v11252_v51 = vmul.u32.u64.high %v1615_v43, %v1610_v38, %v11251_v0  ;;  %v11256_v53 = vsel %vm8123_vm14, 0, %v8122_v63  ;;  %v1737_v29 = vsub.s32 0, %v11244_v9 }
 0x1ef   : > { %v11258_v34 = vmul.u32.u64.low %v1615_v43, %v1614_v40  ;;  %v11259_v45 = vmul.u32.u64.high %v1615_v43, %v1614_v40, %v11258_v34  ;;  %v1606_v1 = vsel %vm1600_vm9, %v1603_v23, %v1605_v62  ;;  %v15494_v26 = vand.u32 2147483647, %v10638_v59 }
 0x1f0   : > { %v1889_v11 = vadd.s32 1, %v8136_v54  ;;  %9617 = vsinq.f32 %v11201_v44  ;;  %v1226_v5 = vor.u32 %v1225_v4, %v1224_v31  ;;  %v11265_v17 = vsub.s32 32, %v11214_v56 }
 0x1f1   : > { %v8118_v41 = vadd.s32 4294967294, %v1427_v16  ;;  %v3155_v32 = vsel %vm3154_vm11, %v11219_v61, 0  ;;  %v3042_v20 = vand.u32 2139095040, %v11225_v22  ;;  %v1625_v63 = vadd.s32 1, %v11252_v51 }
 0x1f2   : > { %15663 = vst [vmem:[#allocation62_spill] sm:$0xff] %v11265_v17  ;;  %vm1890_vm10 = vcmp.gt.s32.totalorder %v1889_v11, 0  ;;  %v1231_v14 = vand.u32 2147483647, %v1230_v13  ;;  %v1539_v36 = vsub.s32 4294967266, %v11256_v53  ;;  %v1622_v54 = vmul.u32 %v1615_v43, %v1606_v1 }
 0x1f3   : > { %vm1624_vm14 = vc.u32 %v11259_v45, %v11251_v0  ;;  %v8129_v4 = vmin.u32 %v1737_v29, %v11244_v9  ;;  %v1886_v44 = vand.u32 8388607, %v15494_v26  ;;  %v1891_v61 = vsel %vm1890_vm10, %v1889_v11, 0 }
 0x1f4   : > { %v1626_v16 = vsel %vm1624_vm14, %v1625_v63, %v11252_v51  ;;  %v1233_v24 = vcvt.s32.f32 %v1226_v5  ;;  %v11279_v50 = vshrl.u32 %v3155_v32, 5  ;;  %vm8119_vm11 = vcmp.lt.s32.totalorder %v8118_v41, 0 }
 0x1f5   : > { %v1627_v2 = vadd.s32 %v1626_v16, %v1622_v54  ;;  %v1519_v55 = vadd.s32 %v10946_v6, %v10970_v37  ;;  %v11283_v43 = vand.u32 31, %v3155_v32  ;;  %v11285_v10 = vshrl.u32 %v3042_v20, 23 }
 0x1f6   : > { %15664 = vst [vmem:[#allocation63_spill] sm:$0xff] %v11279_v50  ;;  %v1893_v52 = vand.u32 31, %v1891_v61  ;;  %v11287_v23 = vmul.f32 %v1233_v24, %v1231_v14  ;;  %v1535_v62 = vsub.s32 32, %v11256_v53  ;;  %v1540_v38 = vadd.s32 127, %v1539_v36 }
 0x1f7   : > { %15665 = vst [vmem:[#allocation64_spill] sm:$0xff] %v11283_v43  ;;  %v1628_v21 = vadd.s32 536870912, %v1627_v2  ;;  %v11290_v31 = vsel %vm8119_vm11, 0, %v8118_v41  ;;  %v1739_v40 = vclz %v8129_v4  ;;  %v1887_v51 = vor.u32 8388608, %v1886_v44 }
 0x1f8   : > { %v1894_v13 = vsub.s32 32, %v1893_v52  ;;  %v1892_v29 = vshrl.u32 %v1891_v61, 5  ;;  %v1896_v6 = vshll.u32 %v15618_v42, %v1893_v52  ;;  %v1899_v37 = vshll.u32 %v15624_v57, %v1893_v52 }
 0x1f9   : > { %v11292_v34 = vshrl.u32 %v1628_v21, 30  ;;  %v1902_v5 = vshll.u32 %v15616_v46, %v1893_v52  ;;  %v1905_v20 = vshll.u32 %v15623_v3, %v1893_v52  ;;  %v1908_v14 = vshll.u32 %v15625_v60, %v1893_v52 }
 0x1fa   : > { %v1897_v1 = vshrl.u32 %v15624_v57, %v1894_v13  ;;  %v1900_v11 = vshrl.u32 %v15616_v46, %v1894_v13  ;;  %v1903_v32 = vshrl.u32 %v15623_v3, %v1894_v13  ;;  %v11300_v41 = vpop.eup %9617  ;;  %v1906_v63 = vshrl.u32 %v15625_v60, %v1894_v13 }
 0x1fb   : > { %15666 = vst [vmem:[#allocation65_spill] sm:$0xff] %v11292_v34  ;;  %v1909_v36 = vshrl.u32 %v15626_v8, %v1894_v13  ;;  %v1630_v54 = vshll.u32 %v11292_v34, 30  ;;  %vm15515_vm15 = vcmp.lt.s32.totalorder %v10415_v30, 0  ;;  %v1536_v61 = vshll.u32 %v11134_v27, %v11256_v53 }
 0x1fc   : > { %v1898_v4 = vor.u32 %v1897_v1, %v1896_v6  ;;  %v1901_v16 = vor.u32 %v1900_v11, %v1899_v37  ;;  %v1904_v44 = vor.u32 %v1903_v32, %v1902_v5  ;;  %v1537_v24 = vshrl.u32 %v1519_v55, %v1535_v62 }
 0x1fd   : > { %v1907_v21 = vor.u32 %v1906_v63, %v1905_v20  ;;  %vm1911_vm3 = vcmp.lt.s32.totalorder %v1892_v29, 1  ;;  %v1541_v26 = vshll.u32 %v1540_v38, 23  ;;  %v1910_v50 = vor.u32 %v1909_v36, %v1908_v14 }
 0x1fe   : > { %vm1914_vm4 = vcmp.lt.s32.totalorder %v1892_v29, 4  ;;  %v1919_v52 = vsel %vm1911_vm3, %v1898_v4, %v1901_v16  ;;  %v1435_v22 = vsub.s32 4294967266, %v11290_v31  ;;  %v8130_v56 = vadd.s32 4294967294, %v1739_v40 }
 0x1ff   : > { %vm1913_vm9 = vcmp.lt.s32.totalorder %v1892_v29, 3  ;;  %v1920_v6 = vsel %vm1914_vm4, %v1907_v21, 920167782  ;;  %v15667_v37 = vand.u32 2147483647, %v10415_v30  ;;  %v11319_v27 = vsub.s32 %v1627_v2, %v1630_v54 }
 0x200   : > { %vm1912_vm14 = vcmp.lt.s32.totalorder %v1892_v29, 2  ;;  %v1921_v53 = vsel %vm1913_vm9, %v1904_v44, %v1920_v6  ;;  %v1927_v55 = vshll.u32 %v1887_v51, 8  ;;  %v1895_v62 = vshrl.u32 %v15618_v42, %v1894_v13 }
 0x201   : > { %vm11315_vm10 = vcmp.le.f32.partialorder %v15667_v37, 0.7853982  ;;  %v1916_v38 = vsel %vm1914_vm4, %v1904_v44, 2102212464  ;;  %v1922_v40 = vsel %vm1912_vm14, %v1919_v52, %v1921_v53  ;;  %v1923_v11 = vsel %vm1911_vm3, %v1901_v16, %v1904_v44 }
 0x202   : > { %v1235_v5 = vxor.u32 2147483648, %v11287_v23  ;;  %v1924_v32 = vsel %vm1914_vm4, %v1910_v50, 1326507024  ;;  %v11328_v20 = vmul.u32.u64.low %v1927_v55, %v1922_v40  ;;  %v11329_v63 = vmul.u32.u64.high %v1927_v55, %v1922_v40, %v11328_v20 }
 0x203   : > { %v1538_v2 = vor.u32 %v1537_v24, %v1536_v61  ;;  %v1436_v14 = vadd.s32 127, %v1435_v22  ;;  %v1915_v51 = vsel %vm1911_vm3, %v1895_v62, %v1898_v4  ;;  %v1925_v13 = vsel %vm1913_vm9, %v1907_v21, %v1924_v32 }
 0x204   : > { %v1633_v36 = vsub.s32 0, %v11319_v27  ;;  %v1917_v54 = vsel %vm1913_vm9, %v1901_v16, %v1916_v38  ;;  %v1926_v44 = vsel %vm1912_vm14, %v1923_v11, %v1925_v13  ;;  %v1778_v52 = vand.u32 2139095040, %v10711_v48 }
 0x205   : > { %v1542_v6 = vor.u32 4788187, %v1541_v26  ;;  %vm8131_vm11 = vcmp.lt.s32.totalorder %v8130_v56, 0  ;;  %v11338_v50 = vmul.u32.u64.low %v1927_v55, %v1926_v44  ;;  %v11339_v37 = vmul.u32.u64.high %v1927_v55, %v1926_v44, %v11338_v50 }
 0x206   : > { %v1236_v22 = vsel %vm15515_vm15, %v1235_v5, %v11287_v23  ;;  %v11345_v4 = vsub.s32 32, %v11283_v43  ;;  %v1431_v61 = vsub.s32 32, %v11290_v31  ;;  %v1779_v24 = vshrl.u32 %v1778_v52, 23 }
 0x207   : > { %v1437_v16 = vshll.u32 %v1436_v14, 23  ;;  %v11349_v21 = vadd.s32 4294967169, %v11285_v10  ;;  %v1918_v26 = vsel %vm1912_vm14, %v1915_v51, %v1917_v54  ;;  %v1937_v53 = vadd.s32 1, %v11329_v63 }
 0x208   : > { %15670 = vst [vmem:[#allocation66_spill] sm:$0xff] %v11345_v4  ;;  %v1415_v62 = vadd.s32 %v11059_v25, %v11065_v28  ;;  %v11355_v38 = vsel %vm8131_vm11, 0, %v8130_v56  ;;  %v8125_v23 = vmin.u32 %v1633_v36, %v11319_v27  ;;  %v8132_v40 = vadd.s32 4294967169, %v1779_v24 }
 0x209   : > { %v11361_v11 = vsel %vm11315_vm10, %v10415_v30, %v1236_v22  ;;  %v1543_v5 = vand.u32 2147483647, %v1542_v6  ;;  %v1545_v10 = vcvt.s32.f32 %v1538_v2  ;;  %v11364_v29 = vadd.f32 1.5707964, %v10478_v18 }
 0x20a   : > { %v1433_v32 = vshrl.u32 %v1415_v62, %v1431_v61  ;;  %v1934_v14 = vmul.u32 %v1927_v55, %v1918_v26  ;;  %vm1936_vm3 = vc.u32 %v11339_v37, %v11328_v20  ;;  %v1785_v25 = vadd.s32 1, %v8132_v40  ;;  %v15673_v40 = vld [vmem:[#allocation35_spill] sm:$0xff] }
 0x20b   : > { %15671 = vst [vmem:[#allocation67_spill] sm:$0xff] %v11364_v29  ;;  %v11368_v28 = vor.u32 4788187, %v1437_v16  ;;  %v1743_v56 = vsub.s32 32, %v11355_v38  ;;  %v1747_v51 = vsub.s32 4294967266, %v11355_v38  ;;  %v1938_v13 = vsel %vm1936_vm3, %v1937_v53, %v11329_v63 }
 0x20c   : > { %v1635_v36 = vclz %v8125_v23  ;;  %v1939_v54 = vadd.s32 %v1938_v13, %v1934_v14  ;;  %v15500_v2 = vand.u32 2147483647, %v10711_v48  ;;  %vm1786_vm4 = vcmp.gt.s32.totalorder %v1785_v25, 0 }
 0x20d   : > { %9619 = vcosq.f32 %v11361_v11  ;;  %v1432_v55 = vshll.u32 %v11185_v47, %v11290_v31  ;;  %v1727_v44 = vadd.s32 %v11146_v58, %v11162_v33  ;;  %v1787_v52 = vsel %vm1786_vm4, %v1785_v25, 0 }
 0x20e   : > { %v11379_v6 = vmul.f32 %v1545_v10, %v1543_v5  ;;  %v1940_v22 = vadd.s32 536870912, %v1939_v54  ;;  %v1789_v63 = vand.u32 31, %v1787_v52  ;;  %v1748_v26 = vadd.s32 127, %v1747_v51 }
 0x20f   : > { %v11382_v61 = vor.u32 %v1433_v32, %v1432_v55  ;;  %v1745_v16 = vshrl.u32 %v1727_v44, %v1743_v56  ;;  %v8126_v53 = vadd.s32 4294967294, %v1635_v36  ;;  %v1782_v47 = vand.u32 8388607, %v15500_v2 }
 0x210   : > { %v11385_v62 = vshrl.u32 %v1940_v22, 30  ;;  %v1790_v58 = vsub.s32 32, %v1789_v63  ;;  %v1788_v33 = vshrl.u32 %v1787_v52, 5  ;;  %v1792_v31 = vshll.u32 %v15618_v42, %v1789_v63 }
 0x211   : > { %v1795_v23 = vshll.u32 %v15624_v57, %v1789_v63  ;;  %v2090_v5 = vand.u32 2139095040, %v15673_v40  ;;  %v1798_v25 = vshll.u32 %v15616_v46, %v1789_v63  ;;  %v1801_v51 = vshll.u32 %v15623_v3, %v1789_v63 }
 0x212   : > { %15672 = vst [vmem:[#allocation68_spill] sm:$0xff] %v11385_v62  ;;  %v1942_v10 = vshll.u32 %v11385_v62, 30  ;;  %v1793_v32 = vshrl.u32 %v15624_v57, %v1790_v58  ;;  %v1796_v14 = vshrl.u32 %v15616_v46, %v1790_v58  ;;  %v1799_v56 = vshrl.u32 %v15623_v3, %v1790_v58 }
 0x213   : > { %v1802_v13 = vshrl.u32 %v15625_v60, %v1790_v58  ;;  %v1805_v36 = vshrl.u32 %v15626_v8, %v1790_v58  ;;  %v1804_v22 = vshll.u32 %v15625_v60, %v1789_v63  ;;  %v1749_v2 = vshll.u32 %v1748_v26, 23 }
 0x214   : > { %v11400_v55 = vsub.s32 %v1939_v54, %v1942_v10  ;;  %v1794_v44 = vor.u32 %v1793_v32, %v1792_v31  ;;  %v1797_v52 = vor.u32 %v1796_v14, %v1795_v23  ;;  %v1783_v50 = vor.u32 8388608, %v1782_v47 }
 0x215   : > { %v1800_v24 = vor.u32 %v1799_v56, %v1798_v25  ;;  %v1803_v43 = vor.u32 %v1802_v13, %v1801_v51  ;;  %v1806_v17 = vor.u32 %v1805_v36, %v1804_v22  ;;  %vm1807_vm9 = vcmp.lt.s32.totalorder %v1788_v33, 1 }
 0x216   : > { %v1945_v4 = vsub.s32 0, %v11400_v55  ;;  %vm1810_vm14 = vcmp.lt.s32.totalorder %v1788_v33, 4  ;;  %vm8127_vm11 = vcmp.lt.s32.totalorder %v8126_v53, 0  ;;  %v1815_v54 = vsel %vm1807_vm9, %v1794_v44, %v1797_v52 }
 0x217   : > { %v11404_v62 = vpop.eup %9619  ;;  %v1812_v34 = vsel %vm1810_vm14, %v1800_v24, 2102212464  ;;  %v2091_v31 = vshrl.u32 %v2090_v5, 23  ;;  %v1791_v63 = vshrl.u32 %v15618_v42, %v1790_v58  ;;  %vm1809_vm3 = vcmp.lt.s32.totalorder %v1788_v33, 3 }
 0x218   : > { %v8137_v23 = vmin.u32 %v1945_v4, %v11400_v55  ;;  %v1816_v26 = vsel %vm1810_vm14, %v1803_v43, 920167782  ;;  %vm1808_vm4 = vcmp.lt.s32.totalorder %v1788_v33, 2  ;;  %v1819_v10 = vsel %vm1807_vm9, %v1797_v52, %v1800_v24 }
 0x219   : > { %v1817_v47 = vsel %vm1809_vm3, %v1800_v24, %v1816_v26  ;;  %v1823_v32 = vshll.u32 %v1783_v50, 8  ;;  %vm15514_vm1 = vcmp.lt.s32.totalorder %v10419_v35, 0  ;;  %v1811_v14 = vsel %vm1807_vm9, %v1791_v63, %v1794_v44 }
 0x21a   : > { %v1813_v25 = vsel %vm1809_vm3, %v1797_v52, %v1812_v34  ;;  %v1818_v56 = vsel %vm1808_vm4, %v1815_v54, %v1817_v47  ;;  %v1820_v5 = vsel %vm1810_vm14, %v1806_v17, 1326507024  ;;  %v1947_v4 = vclz %v8137_v23 }
 0x21b   : > { %v1821_v51 = vsel %vm1809_vm3, %v1803_v43, %v1820_v5  ;;  %v11416_v58 = vmul.u32.u64.low %v1823_v32, %v1818_v56  ;;  %v11417_v13 = vmul.u32.u64.high %v1823_v32, %v1818_v56, %v11416_v58  ;;  %v1744_v36 = vshll.u32 %v11244_v9, %v11355_v38 }
 0x21c   : > { %v1750_v24 = vor.u32 4788187, %v1749_v2  ;;  %v1822_v50 = vsel %vm1808_vm4, %v1819_v10, %v1821_v51  ;;  %v8144_v22 = vadd.s32 4294967169, %v2091_v31  ;;  %v11424_v44 = vsel %vm8127_vm11, 0, %v8126_v53 }
 0x21d   : > { %v11426_v34 = vmul.u32.u64.low %v1823_v32, %v1822_v50  ;;  %v11427_v52 = vmul.u32.u64.high %v1823_v32, %v1822_v50, %v11426_v34  ;;  %v15510_v17 = vand.u32 2147483647, %v15673_v40  ;;  %v1441_v43 = vcvt.s32.f32 %v11382_v61 }
 0x21e   : > { %v1746_v54 = vor.u32 %v1745_v16, %v1744_v36  ;;  %v1814_v23 = vsel %vm1808_vm4, %v1811_v14, %v1813_v25  ;;  %v2097_v63 = vadd.s32 1, %v8144_v22  ;;  %9621 = vsinq.f32 %v11361_v11 }
 0x21f   : > { %v1547_v9 = vxor.u32 2147483648, %v11379_v6  ;;  %v8138_v38 = vadd.s32 4294967294, %v1947_v4  ;;  %v1833_v2 = vadd.s32 1, %v11417_v13  ;;  %v15674_v53 = vand.u32 2147483647, %v11368_v28 }
 0x220   : > { %v11440_v26 = vadd.s32 1, %v11349_v21  ;;  %v1751_v47 = vand.u32 2147483647, %v1750_v24  ;;  %v1643_v61 = vsub.s32 4294967266, %v11424_v44  ;;  %v1830_v16 = vmul.u32 %v1823_v32, %v1814_v23 }
 0x221   : > { %v11437_v31 = vmul.f32 %v1441_v43, %v15674_v53  ;;  %vm1832_vm9 = vc.u32 %v11427_v52, %v11416_v58  ;;  %v2094_v11 = vand.u32 8388607, %v15510_v17  ;;  %vm2098_vm14 = vcmp.gt.s32.totalorder %v2097_v63, 0 }
 0x222   : > { %v1753_v33 = vcvt.s32.f32 %v1746_v54  ;;  %v15675_v10 = vand.u32 2139095040, %v11364_v29  ;;  %v1834_v14 = vsel %vm1832_vm9, %v1833_v2, %v11417_v13  ;;  %v2099_v21 = vsel %vm2098_vm14, %v2097_v63, 0 }
 0x223   : > { %v11455_v25 = vsel %vm15514_vm1, %v1547_v9, %v11379_v6  ;;  %vm8139_vm11 = vcmp.lt.s32.totalorder %v8138_v38, 0  ;;  %v1835_v32 = vadd.s32 %v1834_v14, %v1830_v16  ;;  %v2101_v56 = vand.u32 31, %v2099_v21 }
 0x224   : > { %v11449_v28 = vshrl.u32 %v15675_v10, 23  ;;  %v11458_v4 = vmul.f32 %v1753_v33, %v1751_v47  ;;  %v1623_v51 = vadd.s32 %v11251_v0, %v11259_v45  ;;  %v1639_v36 = vsub.s32 32, %v11424_v44 }
 0x225   : > { %v1644_v24 = vadd.s32 127, %v1643_v61  ;;  %v1836_v13 = vadd.s32 536870912, %v1835_v32  ;;  %v2095_v50 = vor.u32 8388608, %v2094_v11  ;;  %v2102_v22 = vsub.s32 32, %v2101_v56 }
 0x226   : > { %v11463_v34 = vsel %vm8139_vm11, 0, %v8138_v38  ;;  %v2100_v6 = vshrl.u32 %v2099_v21, 5  ;;  %v2104_v43 = vshll.u32 %v15618_v42, %v2101_v56  ;;  %v2107_v54 = vshll.u32 %v15624_v57, %v2101_v56 }
 0x227   : > { %v11467_v23 = vshrl.u32 %v1836_v13, 30  ;;  %v2105_v63 = vshrl.u32 %v15624_v57, %v2102_v22  ;;  %v2108_v9 = vshrl.u32 %v15616_v46, %v2102_v22  ;;  %v2110_v0 = vshll.u32 %v15616_v46, %v2101_v56 }
 0x228   : > { %v2111_v45 = vshrl.u32 %v15623_v3, %v2102_v22  ;;  %v2113_v2 = vshll.u32 %v15623_v3, %v2101_v56  ;;  %v2114_v38 = vshrl.u32 %v15625_v60, %v2102_v22  ;;  %v2116_v53 = vshll.u32 %v15625_v60, %v2101_v56  ;;  %v11476_v47 = vpop.eup %9621 }
 0x229   : > { %15676 = vst [vmem:[#allocation69_spill] sm:$0xff] %v11467_v23  ;;  %v1838_v61 = vshll.u32 %v11467_v23, 30  ;;  %v2106_v16 = vor.u32 %v2105_v63, %v2104_v43  ;;  %v2109_v11 = vor.u32 %v2108_v9, %v2107_v54  ;;  %v2117_v33 = vshrl.u32 %v15626_v8, %v2102_v22 }
 0x22a   : > { %v1641_v10 = vshrl.u32 %v1623_v51, %v1639_v36  ;;  %v1645_v14 = vshll.u32 %v1644_v24, 23  ;;  %v2112_v21 = vor.u32 %v2111_v45, %v2110_v0  ;;  %v2115_v13 = vor.u32 %v2114_v38, %v2113_v2 }
 0x22b   : > { %v15677_v17 = vand.u32 2147483647, %v10419_v35  ;;  %v1955_v56 = vsub.s32 4294967266, %v11463_v34  ;;  %v11487_v29 = vsub.s32 %v1835_v32, %v1838_v61  ;;  %v2118_v19 = vor.u32 %v2117_v33, %v2116_v53 }
 0x22c   : > { %vm2119_vm4 = vcmp.lt.s32.totalorder %v2100_v6, 1  ;;  %vm15527_vm9 = vcmp.lt.s32.totalorder %v10427_v49, 0  ;;  %v2103_v43 = vshrl.u32 %v15618_v42, %v2102_v22  ;;  %vm2122_vm14 = vcmp.lt.s32.totalorder %v2100_v6, 4 }
 0x22d   : > { %vm11482_vm3 = vcmp.le.f32.partialorder %v15677_v17, 0.7853982  ;;  %v2127_v51 = vsel %vm2119_vm4, %v2106_v16, %v2109_v11  ;;  %v2135_v36 = vshll.u32 %v2095_v50, 8  ;;  %v1841_v24 = vsub.s32 0, %v11487_v29 }
 0x22e   : > { %vm2121_vm11 = vcmp.lt.s32.totalorder %v2100_v6, 3  ;;  %v2124_v17 = vsel %vm2122_vm14, %v2112_v21, 2102212464  ;;  %v2128_v54 = vsel %vm2122_vm14, %v2115_v13, 920167782  ;;  %vm2120_vm1 = vcmp.lt.s32.totalorder %v2100_v6, 2 }
 0x22f   : > { %v2129_v63 = vsel %vm2121_vm11, %v2112_v21, %v2128_v54  ;;  %v2131_v32 = vsel %vm2119_vm4, %v2109_v11, %v2112_v21  ;;  %v2132_v9 = vsel %vm2122_vm14, %v2118_v19, 1326507024  ;;  %v1956_v0 = vadd.s32 127, %v1955_v56 }
 0x230   : > { %v8133_v45 = vmin.u32 %v1841_v24, %v11487_v29  ;;  %v2123_v2 = vsel %vm2119_vm4, %v2103_v43, %v2106_v16  ;;  %v2130_v22 = vsel %vm2120_vm1, %v2127_v51, %v2129_v63  ;;  %v15680_v38 = vand.u32 2147483647, %v10427_v49 }
 0x231   : > { %v2125_v53 = vsel %vm2121_vm11, %v2109_v11, %v2124_v17  ;;  %v2133_v61 = vsel %vm2121_vm11, %v2115_v13, %v2132_v9  ;;  %v11503_v33 = vmul.u32.u64.low %v2135_v36, %v2130_v22  ;;  %v11504_v54 = vmul.u32.u64.high %v2135_v36, %v2130_v22, %v11503_v33 }
 0x232   : > { %vm11499_vm15 = vcmp.le.f32.partialorder %v15680_v38, 0.7853982  ;;  %v1640_v19 = vshll.u32 %v11319_v27, %v11424_v44  ;;  %v1951_v21 = vsub.s32 32, %v11463_v34  ;;  %v1843_v16 = vclz %v8133_v45 }
 0x233   : > { %v2134_v56 = vsel %vm2120_vm1, %v2131_v32, %v2133_v61  ;;  %vm15526_vm4 = vcmp.lt.s32.totalorder %v10478_v18, 0  ;;  %v1646_v43 = vor.u32 4788187, %v1645_v14  ;;  %v1935_v51 = vadd.s32 %v11328_v20, %v11339_v37 }
 0x234   : > { %v11514_v11 = vmul.u32.u64.low %v2135_v36, %v2134_v56  ;;  %v11515_v13 = vmul.u32.u64.high %v2135_v36, %v2134_v56, %v11514_v11  ;;  %v1957_v24 = vshll.u32 %v1956_v0, 23  ;;  %v8134_v17 = vadd.s32 4294967294, %v1843_v16 }
 0x235   : > { %v2126_v63 = vsel %vm2120_vm1, %v2123_v2, %v2125_v53  ;;  %v1986_v27 = vand.u32 2139095040, %v10961_v39  ;;  %v1551_v44 = vsel %vm11482_vm3, %v10419_v35, %v11455_v25  ;;  %v8192_v32 = vadd.s32 4294967169, %v11449_v28 }
 0x236   : > { %v1642_v14 = vor.u32 %v1641_v10, %v1640_v19  ;;  %v2145_v9 = vadd.s32 1, %v11504_v54  ;;  %v15683_v20 = vxor.u32 2147483648, %v11437_v31  ;;  %v15684_v6 = vand.u32 2147483647, %v10478_v18 }
 0x237   : > { %v15685_v0 = vmov 0  ;;  %v1755_v45 = vxor.u32 2147483648, %v11458_v4  ;;  %v1953_v25 = vshrl.u32 %v1935_v51, %v1951_v21  ;;  %v1987_v2 = vshrl.u32 %v1986_v27, 23 }
 0x238   : > { %v1444_v37 = vsel %vm15527_vm9, %v15683_v20, %v11437_v31  ;;  %vm11532_vm1 = vcmp.le.f32.partialorder %v15684_v6, 0.7853982  ;;  %v1647_v28 = vand.u32 2147483647, %v1646_v43  ;;  %vm8135_vm14 = vcmp.lt.s32.totalorder %v8134_v17, 0 }
 0x239   : > { %v15686_v0 = vsel %vm11532_vm1, 4294967295, %v15685_v0  ;;  %v2142_v10 = vmul.u32 %v2135_v36, %v2126_v63  ;;  %vm2144_vm11 = vc.u32 %v11515_v13, %v11503_v33  ;;  %v1952_v22 = vshll.u32 %v11400_v55, %v11463_v34 }
 0x23a   : > { %15687 = vst [vmem:[#allocation70_spill] sm:$0xff] %v15686_v0  ;;  %v1958_v31 = vor.u32 4788187, %v1957_v24  ;;  %v2146_v38 = vsel %vm2144_vm11, %v2145_v9, %v11504_v54  ;;  %v15516_v53 = vand.u32 2147483647, %v10961_v39  ;;  %9623 = vcosq.f32 %v1551_v44 }
 0x23b   : > { %v1649_v61 = vcvt.s32.f32 %v1642_v14  ;;  %v2147_v19 = vadd.s32 %v2146_v38, %v2142_v10  ;;  %v8140_v16 = vadd.s32 4294967169, %v1987_v2  ;;  %v1447_v21 = vsel %vm11499_vm15, %v10427_v49, %v1444_v37 }
 0x23c   : > { %v11547_v36 = vadd.f32 1.5707964, %v10523_v12  ;;  %v1954_v56 = vor.u32 %v1953_v25, %v1952_v22  ;;  %v11549_v43 = vsel %vm8135_vm14, 0, %v8134_v17  ;;  %9625 = vsinq.f32 %v1551_v44 }
 0x23d   : > { %v11551_v55 = vmul.f32 %v1649_v61, %v1647_v28  ;;  %v2148_v34 = vadd.s32 536870912, %v2147_v19  ;;  %v1993_v54 = vadd.s32 1, %v8140_v16  ;;  %v1756_v51 = vsel %vm15526_vm4, %v1755_v45, %v11458_v4 }
 0x23e   : > { %15688 = vst [vmem:[#allocation71_spill] sm:$0xff] %v11547_v36  ;;  %v11556_v11 = vadd.s32 1, %v8192_v32  ;;  %v1959_v24 = vand.u32 2147483647, %v1958_v31  ;;  %v1990_v63 = vand.u32 8388607, %v15516_v53  ;;  %9627 = vcosq.f32 %v1447_v21 }
 0x23f   : > { %v1851_v27 = vsub.s32 4294967266, %v11549_v43  ;;  %v11561_v17 = vshrl.u32 %v2148_v34, 30  ;;  %vm1994_vm14 = vcmp.gt.s32.totalorder %v1993_v54, 0  ;;  %9629 = vsinq.f32 %v1447_v21 }
 0x240   : > { %v1961_v14 = vcvt.s32.f32 %v1954_v56  ;;  %v1995_v9 = vsel %vm1994_vm14, %v1993_v54, 0  ;;  %v11567_v4 = vsel %vm11532_vm1, %v10478_v18, %v1756_v51  ;;  %v1831_v45 = vadd.s32 %v11416_v58, %v11427_v52 }
 0x241   : > { %15689 = vst [vmem:[#allocation72_spill] sm:$0xff] %v11561_v17  ;;  %v2150_v20 = vshll.u32 %v11561_v17, 30  ;;  %v1997_v37 = vand.u32 31, %v1995_v9  ;;  %v1847_v25 = vsub.s32 32, %v11549_v43  ;;  %v1991_v2 = vor.u32 8388608, %v1990_v63 }
 0x242   : > { %v11571_v6 = vmul.f32 %v1961_v14, %v1959_v24  ;;  %v1852_v28 = vadd.s32 127, %v1851_v27  ;;  %v2298_v31 = vand.u32 2139095040, %v11093_v7  ;;  %v11579_v38 = vshrl.u32 %v1995_v9, 5 }
 0x243   : > { %v11576_v10 = vsub.s32 %v2147_v19, %v2150_v20  ;;  %v1998_v22 = vsub.s32 32, %v1997_v37  ;;  %v2000_v61 = vshll.u32 %v15618_v42, %v1997_v37  ;;  %v2003_v16 = vshll.u32 %v15624_v57, %v1997_v37 }
 0x244   : > { %v2006_v21 = vshll.u32 %v15616_v46, %v1997_v37  ;;  %v11584_v56 = vpop.eup %9623  ;;  %v2009_v34 = vshll.u32 %v15623_v3, %v1997_v37  ;;  %v2012_v24 = vshll.u32 %v15625_v60, %v1997_v37  ;;  %v11597_v53 = vshll.u32 %v1991_v2, 8 }
 0x245   : > { %15690 = vst [vmem:[#allocation73_spill] sm:$0xff] %v11584_v56  ;;  %v2153_v58 = vsub.s32 0, %v11576_v10  ;;  %v2001_v52 = vshrl.u32 %v15624_v57, %v1998_v22  ;;  %v2004_v19 = vshrl.u32 %v15616_v46, %v1998_v22  ;;  %v2007_v54 = vshrl.u32 %v15623_v3, %v1998_v22 }
 0x246   : > { %v2010_v51 = vshrl.u32 %v15625_v60, %v1998_v22  ;;  %v2013_v63 = vshrl.u32 %v15626_v8, %v1998_v22  ;;  %v11594_v27 = vpop.eup %9625  ;;  %v1849_v44 = vshrl.u32 %v1831_v45, %v1847_v25  ;;  %vm15533_vm11 = vcmp.lt.s32.totalorder %v10523_v12, 0 }
 0x247   : > { %15691 = vst [vmem:[#allocation74_spill] sm:$0xff] %v11594_v27  ;;  %v8145_v14 = vmin.u32 %v2153_v58, %v11576_v10  ;;  %v2002_v9 = vor.u32 %v2001_v52, %v2000_v61  ;;  %v2005_v20 = vor.u32 %v2004_v19, %v2003_v16  ;;  %v2008_v32 = vor.u32 %v2007_v54, %v2006_v21 }
 0x248   : > { %v2011_v17 = vor.u32 %v2010_v51, %v2009_v34  ;;  %v2014_v23 = vor.u32 %v2013_v63, %v2012_v24  ;;  %v11599_v0 = vpop.eup %9627  ;;  %v1853_v18 = vshll.u32 %v1852_v28, 23  ;;  %vm2015_vm14 = vcmp.lt.s32.totalorder %v11579_v38, 1 }
 0x249   : > { %v2155_v37 = vclz %v8145_v14  ;;  %v2299_v56 = vshrl.u32 %v2298_v31, 23  ;;  %v11603_v27 = vpop.eup %9629  ;;  %v1999_v61 = vshrl.u32 %v15618_v42, %v1998_v22  ;;  %vm2016_vm4 = vcmp.lt.s32.totalorder %v11579_v38, 2 }
 0x24a   : > { %vm2018_vm9 = vcmp.lt.s32.totalorder %v11579_v38, 4  ;;  %v2023_v45 = vsel %vm2015_vm14, %v2002_v9, %v2005_v20  ;;  %vm2017_vm8 = vcmp.lt.s32.totalorder %v11579_v38, 3  ;;  %v2027_v58 = vsel %vm2015_vm14, %v2005_v20, %v2008_v32 }
 0x24b   : > { %v8146_v25 = vadd.s32 4294967294, %v2155_v37  ;;  %v2020_v2 = vsel %vm2018_vm9, %v2008_v32, 2102212464  ;;  %v2024_v16 = vsel %vm2018_vm9, %v2011_v17, 920167782  ;;  %v2019_v21 = vsel %vm2015_vm14, %v1999_v61, %v2002_v9 }
 0x24c   : > { %v2025_v28 = vsel %vm2017_vm8, %v2008_v32, %v2024_v16  ;;  %v2028_v52 = vsel %vm2018_vm9, %v2014_v23, 1326507024  ;;  %v2021_v31 = vsel %vm2017_vm8, %v2005_v20, %v2020_v2  ;;  %v15692_v34 = vand.u32 2147483647, %v10523_v12 }
 0x24d   : > { %vm8147_vm13 = vcmp.lt.s32.totalorder %v8146_v25, 0  ;;  %v2026_v19 = vsel %vm2016_vm4, %v2023_v45, %v2025_v28  ;;  %v2029_v22 = vsel %vm2017_vm8, %v2011_v17, %v2028_v52  ;;  %vm15532_vm5 = vcmp.lt.s32.totalorder %v10638_v59, 0 }
 0x24e   : > { %vm11613_vm6 = vcmp.le.f32.partialorder %v15692_v34, 0.7853982  ;;  %v2158_v51 = vsel %vm8147_vm13, 0, %v8146_v25  ;;  %v2030_v24 = vsel %vm2016_vm4, %v2027_v58, %v2029_v22  ;;  %v1848_v17 = vshll.u32 %v11487_v29, %v11549_v43 }
 0x24f   : > { %v11621_v23 = vmul.u32.u64.low %v11597_v53, %v2026_v19  ;;  %v11622_v32 = vmul.u32.u64.high %v11597_v53, %v2026_v19, %v11621_v23  ;;  %v1854_v63 = vor.u32 4788187, %v1853_v18  ;;  %v2163_v14 = vsub.s32 4294967266, %v2158_v51 }
 0x250   : > { %v15537_v9 = vand.u32 2147483647, %v11093_v7  ;;  %v2159_v20 = vsub.s32 32, %v2158_v51  ;;  %v11629_v37 = vmul.u32.u64.low %v11597_v53, %v2030_v24  ;;  %v11630_v61 = vmul.u32.u64.high %v11597_v53, %v2030_v24, %v11629_v37 }
 0x251   : > { %v8152_v45 = vadd.s32 4294967169, %v2299_v56  ;;  %9631 = vcosq.f32 %v11567_v4  ;;  %v1850_v25 = vor.u32 %v1849_v44, %v1848_v17  ;;  %v2164_v2 = vadd.s32 127, %v2163_v14 }
 0x252   : > { %v2022_v16 = vsel %vm2016_vm4, %v2019_v21, %v2021_v31  ;;  %v15695_v29 = vxor.u32 2147483648, %v11551_v55  ;;  %v2143_v43 = vadd.s32 %v11503_v33, %v11515_v13  ;;  %v2041_v28 = vadd.s32 1, %v11622_v32 }
 0x253   : > { %v2305_v58 = vadd.s32 1, %v8152_v45  ;;  %v1963_v56 = vxor.u32 2147483648, %v11571_v6  ;;  %v1855_v52 = vand.u32 2147483647, %v1854_v63  ;;  %v2165_v44 = vshll.u32 %v2164_v2, 23 }
 0x254   : > { %v1652_v18 = vsel %vm15533_vm11, %v15695_v29, %v11551_v55  ;;  %v2302_v38 = vand.u32 8388607, %v15537_v9  ;;  %v2161_v21 = vshrl.u32 %v2143_v43, %v2159_v20  ;;  %v2038_v31 = vmul.u32 %v11597_v53, %v2022_v16 }
 0x255   : > { %vm2040_vm8 = vc.u32 %v11630_v61, %v11621_v23  ;;  %vm2306_vm13 = vcmp.gt.s32.totalorder %v2305_v58, 0  ;;  %v1857_v55 = vcvt.s32.f32 %v1850_v25  ;;  %v2166_v19 = vor.u32 4788187, %v2165_v44 }
 0x256   : > { %v2042_v33 = vsel %vm2040_vm8, %v2041_v28, %v11622_v32  ;;  %v2307_v13 = vsel %vm2306_vm13, %v2305_v58, 0  ;;  %9633 = vsinq.f32 %v11567_v4  ;;  %v2160_v22 = vshll.u32 %v11576_v10, %v2158_v51 }
 0x257   : > { %v2043_v34 = vadd.s32 %v2042_v33, %v2038_v31  ;;  %v2309_v24 = vand.u32 31, %v2307_v13  ;;  %v11655_v17 = vsel %vm11613_vm6, %v10523_v12, %v1652_v18  ;;  %v11660_v53 = vsel %vm15532_vm5, %v1963_v56, %v11571_v6 }
 0x258   : > { %v11662_v63 = vmul.f32 %v1857_v55, %v1855_v52  ;;  %v2303_v32 = vor.u32 8388608, %v2302_v38  ;;  %v2162_v14 = vor.u32 %v2161_v21, %v2160_v22  ;;  %v2308_v4 = vshrl.u32 %v2307_v13, 5 }
 0x259   : > { %v2044_v20 = vadd.s32 536870912, %v2043_v34  ;;  %v2310_v37 = vsub.s32 32, %v2309_v24  ;;  %v2167_v10 = vand.u32 2147483647, %v2166_v19  ;;  %v2312_v51 = vshll.u32 %v15618_v42, %v2309_v24 }
 0x25a   : > { %v2315_v45 = vshll.u32 %v15624_v57, %v2309_v24  ;;  %v2318_v25 = vshll.u32 %v15616_v46, %v2309_v24  ;;  %v2321_v29 = vshll.u32 %v15623_v3, %v2309_v24  ;;  %v2324_v58 = vshll.u32 %v15625_v60, %v2309_v24 }
 0x25b   : > { %v11667_v2 = vshrl.u32 %v2044_v20, 30  ;;  %v2313_v16 = vshrl.u32 %v15624_v57, %v2310_v37  ;;  %v2316_v6 = vshrl.u32 %v15616_v46, %v2310_v37  ;;  %v11672_v18 = vpop.eup %9631  ;;  %v2319_v43 = vshrl.u32 %v15623_v3, %v2310_v37 }
 0x25c   : > { %v2322_v28 = vshrl.u32 %v15625_v60, %v2310_v37  ;;  %v2325_v56 = vshrl.u32 %v15626_v8, %v2310_v37  ;;  %v2169_v52 = vcvt.s32.f32 %v2162_v14  ;;  %v11679_v33 = vshll.u32 %v2303_v32, 8 }
 0x25d   : > { %15696 = vst [vmem:[#allocation75_spill] sm:$0xff] %v11667_v2  ;;  %v2046_v44 = vshll.u32 %v11667_v2, 30  ;;  %v2314_v38 = vor.u32 %v2313_v16, %v2312_v51  ;;  %v2317_v21 = vor.u32 %v2316_v6, %v2315_v45  ;;  %v2320_v31 = vor.u32 %v2319_v43, %v2318_v25 }
 0x25e   : > { %v2323_v55 = vor.u32 %v2322_v28, %v2321_v29  ;;  %v2326_v19 = vor.u32 %v2325_v56, %v2324_v58  ;;  %v15697_v13 = vand.u32 2147483647, %v10638_v59  ;;  %v15698_v22 = vmov 0 }
 0x25f   : > { %v2170_v20 = vmul.f32 %v2169_v52, %v2167_v10  ;;  %v11687_v24 = vsub.s32 %v2043_v34, %v2046_v44  ;;  %vm2327_vm4 = vcmp.lt.s32.totalorder %v2308_v4, 1  ;;  %v2194_v14 = vand.u32 2139095040, %v11205_v15 }
 0x260   : > { %vm11683_vm9 = vcmp.le.f32.partialorder %v15697_v13, 0.7853982  ;;  %v2311_v51 = vshrl.u32 %v15618_v42, %v2310_v37  ;;  %vm2330_vm13 = vcmp.lt.s32.totalorder %v2308_v4, 4  ;;  %v2335_v32 = vsel %vm2327_vm4, %v2314_v38, %v2317_v21  ;;  %v11692_v45 = vpop.eup %9633 }
 0x261   : > { %v15699_v22 = vsel %vm11683_vm9, 4294967295, %v15698_v22  ;;  %v2049_v25 = vsub.s32 0, %v11687_v24  ;;  %vm2329_vm5 = vcmp.lt.s32.totalorder %v2308_v4, 3  ;;  %v2332_v16 = vsel %vm2330_vm13, %v2320_v31, 2102212464 }
 0x262   : > { %v2336_v6 = vsel %vm2330_vm13, %v2323_v55, 920167782  ;;  %v2331_v34 = vsel %vm2327_vm4, %v2311_v51, %v2314_v38  ;;  %v2339_v29 = vsel %vm2327_vm4, %v2317_v21, %v2320_v31  ;;  %v2340_v43 = vsel %vm2330_vm13, %v2326_v19, 1326507024  ;;  %v4097_v38 = vld [vmem:[%s15388_s5] sm:$0xff] }
 0x263   : > { %v2337_v10 = vsel %vm2329_vm5, %v2320_v31, %v2336_v6  ;;  %v15700_v37 = vand.u32 2147483647, %v10711_v48  ;;  %v15701_v28 = vmov 0  ;;  %v8141_v58 = vmin.u32 %v2049_v25, %v11687_v24  ;;  %v4098_v31 = vld [vmem:[%s15388_s5 + $0x8] sm:$0x7f] }
 0x264   : > { %v2333_v56 = vsel %vm2329_vm5, %v2317_v21, %v2332_v16  ;;  %vm15703_vm1 = vcmp.lt.s32.totalorder %v2308_v4, 2  ;;  %v2341_v44 = vsel %vm2329_vm5, %v2323_v55, %v2340_v43  ;;  %v1859_v19 = vxor.u32 2147483648, %v11662_v63 }
 0x265   : > { %vm11699_vm8 = vcmp.le.f32.partialorder %v15700_v37, 0.7853982  ;;  %v2338_v52 = vsel %vm15703_vm1, %v2335_v32, %v2337_v10  ;;  %vm15704_vm4 = vmmov %vm15703_vm1  ;;  %v15705_v21 = vand.u32 2147483647, %v15673_v40  ;;  %v15706_v55 = vmov 0 }
 0x266   : > { %v15702_v28 = vsel %vm11699_vm8, 4294967295, %v15701_v28  ;;  %v2342_v13 = vsel %vm15704_vm4, %v2339_v29, %v2341_v44  ;;  %v11714_v51 = vmul.u32.u64.low %v11679_v33, %v2338_v52  ;;  %v11715_v6 = vmul.u32.u64.high %v11679_v33, %v2338_v52, %v11714_v51  ;;  %vm15709_vm4 = vmmov %vm15703_vm1 }
 0x267   : > { %vm11721_vm5 = vcmp.le.f32.partialorder %v15705_v21, 0.7853982  ;;  %v2051_v32 = vclz %v8141_v58  ;;  %v11726_v25 = vmul.u32.u64.low %v11679_v33, %v2342_v13  ;;  %v11727_v16 = vmul.u32.u64.high %v11679_v33, %v2342_v13, %v11726_v25 }
 0x268   : > { %v15707_v55 = vsel %vm11721_vm5, 4294967295, %v15706_v55  ;;  %vm4148_vm13 = vcmask 1046528   ;;  %9635 = vcosq.f32 %v11655_v17  ;;  %v2334_v10 = vsel %vm15709_vm4, %v2331_v34, %v2333_v56 }
 0x269   : > { %15708 = vst [vmem:[#allocation76_spill] sm:$0xff] %v15707_v55  ;;  %v2195_v29 = vshrl.u32 %v2194_v14, 23  ;;  %v9082_v43 = vpack.c.bf16 %v4098_v31, %v4097_v38  ;;  %9637 = vsinq.f32 %v11655_v17  ;;  %v2171_v37 = vxor.u32 2147483648, %v2170_v20  ;;  %v15756_v55 = vld [vmem:[#allocation59_spill] sm:$0xff] }
 0x26a   : > { %v8142_v52 = vadd.s32 4294967294, %v2051_v32  ;;  %v1967_v58 = vsel %vm11683_vm9, %v10638_v59, %v11660_v53  ;;  %v2353_v44 = vadd.s32 1, %v11715_v6  ;;  %v15536_v13 = vand.u32 2147483647, %v11205_v15 }
 0x26b   : > { %v8148_v21 = vadd.s32 4294967169, %v2195_v29  ;;  %vm15545_vm1 = vmmov 1   ;;  %v15710_v4 = vmov 0  ;;  %vm15713_vm14 = vcmp.lt.s32.totalorder %v10711_v48, 0 }
 0x26c   : > { %vm11740_vm4 = vmpackc.low %vm4148_vm13, %vm15545_vm1  ;;  %v1860_v17 = vsel %vm15713_vm14, %v1859_v19, %v11662_v63  ;;  %vm8143_vm11 = vcmp.lt.s32.totalorder %v8142_v52, 0  ;;  %v2350_v14 = vmul.u32 %v11679_v33, %v2334_v10  ;;  %vm2352_vm9 = vc.u32 %v11727_v16, %v11714_v51 }
 0x26d   : > { %v15711_v4 = vsel %vm11740_vm4, 4294967295, %v15710_v4  ;;  %9084 = vmatprep.subr.msk.bf16.mxu1 %vm11740_vm4, %v9082_v43  ;;  %v2039_v53 = vadd.s32 %v11621_v23, %v11630_v61  ;;  %v2054_v34 = vsel %vm8143_vm11, 0, %v8142_v52  ;;  %v2354_v56 = vsel %vm2352_vm9, %v2353_v44, %v11715_v6 }
 0x26e   : > { %15712 = vst [vmem:[#allocation77_spill] sm:$0xff] %v15711_v4  ;;  %v2201_v38 = vadd.s32 1, %v8148_v21  ;;  %9087 = vmatpush3.bf16.msk.msra.mxu1 %vm11740_vm4, %v9082_v43  ;;  %vm15714_vm14 = vcmp.lt.s32.totalorder %v15673_v40, 0  ;;  %v2055_v33 = vsub.s32 32, %v2054_v34  ;;  %v2059_v31 = vsub.s32 4294967266, %v2054_v34 }
 0x26f   : > { %v2172_v63 = vsel %vm15714_vm14, %v2171_v37, %v2170_v20  ;;  %v2355_v19 = vadd.s32 %v2354_v56, %v2350_v14  ;;  %9639 = vcosq.f32 %v1967_v58  ;;  %v1863_v32 = vsel %vm11699_vm8, %v10711_v48, %v1860_v17 }
 0x270   : > { %v2198_v23 = vand.u32 8388607, %v15536_v13  ;;  %vm2202_vm11 = vcmp.gt.s32.totalorder %v2201_v38, 0  ;;  %v2056_v61 = vshll.u32 %v11687_v24, %v2054_v34  ;;  %v2057_v6 = vshrl.u32 %v2039_v53, %v2055_v33 }
 0x271   : > { %v2060_v25 = vadd.s32 127, %v2059_v31  ;;  %v2356_v10 = vadd.s32 536870912, %v2355_v19  ;;  %vm15715_vm9 = vcmp.gt.s32.totalorder %v11440_v26, 0  ;;  %9641 = vsinq.f32 %v1967_v58 }
 0x272   : > { %v11768_v20 = vsel %vm15715_vm9, %v11440_v26, 0  ;;  %v11773_v29 = vsel %vm11721_vm5, %v15673_v40, %v2172_v63  ;;  %v2203_v43 = vsel %vm2202_vm11, %v2201_v38, 0  ;;  %9643 = vcosq.f32 %v1863_v32  ;;  %v11777_v24 = vpop.eup %9635 }
 0x273   : > { %15716 = vst [vmem:[#allocation78_spill] sm:$0xff] %v11768_v20  ;;  %v2058_v37 = vor.u32 %v2057_v6, %v2056_v61  ;;  %v2061_v52 = vshll.u32 %v2060_v25, 23  ;;  %v11775_v44 = vshrl.u32 %v2356_v10, 30  ;;  %vm15718_vm13 = vcmp.gt.s32.totalorder %v11556_v11, 0  ;;  %v11788_v14 = vpop.eup %9637 }
 0x274   : > { %v11782_v21 = vsel %vm15718_vm13, %v11556_v11, 0  ;;  %v15720_v26 = vand.u32 2139095040, %v11547_v36  ;;  %9645 = vsinq.f32 %v1863_v32  ;;  %v2205_v17 = vand.u32 31, %v2203_v43 }
 0x275   : > { %15717 = vst [vmem:[#allocation79_spill] sm:$0xff] %v11775_v44  ;;  %15719 = vst [vmem:[#allocation80_spill] sm:$0xff] %v11782_v21  ;;  %9647 = vcosq.f32 %v11773_v29  ;;  %v2062_v53 = vor.u32 4788187, %v2061_v52  ;;  %v2358_v34 = vshll.u32 %v11775_v44, 30  ;;  %v2199_v56 = vor.u32 8388608, %v2198_v23 }
 0x276   : > { %v11786_v58 = vshrl.u32 %v15720_v26, 23  ;;  %v2065_v38 = vcvt.s32.f32 %v2058_v37  ;;  %v11792_v63 = vshrl.u32 %v2203_v43, 5  ;;  %v2206_v33 = vsub.s32 32, %v2205_v17 }
 0x277   : > { %v2208_v11 = vshll.u32 %v15618_v42, %v2205_v17  ;;  %v2063_v31 = vand.u32 2147483647, %v2062_v53  ;;  %v11795_v61 = vsub.s32 %v2355_v19, %v2358_v34  ;;  %v2211_v32 = vshll.u32 %v15624_v57, %v2205_v17 }
 0x278   : > { %v2214_v6 = vshll.u32 %v15616_v46, %v2205_v17  ;;  %v2209_v25 = vshrl.u32 %v15624_v57, %v2206_v33  ;;  %v2212_v10 = vshrl.u32 %v15616_v46, %v2206_v33  ;;  %v2215_v52 = vshrl.u32 %v15623_v3, %v2206_v33 }
 0x279   : > { %v2217_v23 = vshll.u32 %v15623_v3, %v2205_v17  ;;  %v2361_v43 = vsub.s32 0, %v11795_v61  ;;  %v2218_v37 = vshrl.u32 %v15625_v60, %v2206_v33  ;;  %v2220_v26 = vshll.u32 %v15625_v60, %v2205_v17  ;;  %v11807_v53 = vpop.eup %9639 }
 0x27a   : > { %v2221_v19 = vshrl.u32 %v15626_v8, %v2206_v33  ;;  %15721 = vst [vmem:[#allocation81_spill] sm:$0xff] %v11807_v53  ;;  %v2066_v34 = vmul.f32 %v2065_v38, %v2063_v31  ;;  %v2210_v13 = vor.u32 %v2209_v25, %v2208_v11  ;;  %v2213_v9 = vor.u32 %v2212_v10, %v2211_v32 }
 0x27b   : > { %v2216_v36 = vor.u32 %v2215_v52, %v2214_v6  ;;  %v8153_v21 = vmin.u32 %v2361_v43, %v11795_v61  ;;  %v2219_v20 = vor.u32 %v2218_v37, %v2217_v23  ;;  %vm2223_vm11 = vcmp.lt.s32.totalorder %v11792_v63, 1  ;;  %v11814_v46 = vpop.eup %9641  ;;  %v15726_v23 = vld [vmem:[#allocation16_spill] sm:$0xff] }
 0x27c   : > { %v11812_v3 = vshll.u32 %v2199_v56, 8  ;;  %v2207_v17 = vshrl.u32 %v15618_v42, %v2206_v33  ;;  %v2222_v8 = vor.u32 %v2221_v19, %v2220_v26  ;;  %vm2226_vm9 = vcmp.lt.s32.totalorder %v11792_v63, 4  ;;  %v11820_v11 = vpop.eup %9643 }
 0x27d   : > { %v2231_v38 = vsel %vm2223_vm11, %v2210_v13, %v2213_v9  ;;  %v15722_v31 = vand.u32 2147483647, %v10961_v39  ;;  %v15723_v32 = vmov 0  ;;  %v2363_v56 = vclz %v8153_v21 }
 0x27e   : > { %vm2225_vm1 = vcmp.lt.s32.totalorder %v11792_v63, 3  ;;  %v2228_v33 = vsel %vm2226_vm9, %v2216_v36, 2102212464  ;;  %v2232_v6 = vsel %vm2226_vm9, %v2219_v20, 920167782  ;;  %v11833_v25 = vpop.eup %9645  ;;  %v2067_v10 = vxor.u32 2147483648, %v2066_v34 }
 0x27f   : > { %vm11824_vm13 = vcmp.le.f32.partialorder %v15722_v31, 0.7853982  ;;  %vm2224_vm14 = vcmp.lt.s32.totalorder %v11792_v63, 2  ;;  %v2233_v52 = vsel %vm2225_vm1, %v2216_v36, %v2232_v6  ;;  %v821_v43 = vsub.s32 4, %v15726_v23  ;;  %v11839_v37 = vpop.eup %9647 }
 0x280   : > { %v15724_v32 = vsel %vm11824_vm13, 4294967295, %v15723_v32  ;;  %15727 = vst [vmem:[#allocation16_spill] sm:$0xff] %v11839_v37  ;;  %v8154_v21 = vadd.s32 4294967294, %v2363_v56  ;;  %v2227_v26 = vsel %vm2223_vm11, %v2207_v17, %v2210_v13  ;;  %v2234_v19 = vsel %vm2224_vm14, %v2231_v38, %v2233_v52  ;;  %v15728_v17 = vld [vmem:[#allocation9_spill] sm:$0xff] }
 0x281   : > { %15725 = vst [vmem:[#allocation82_spill] sm:$0xff] %v15724_v32  ;;  %v2235_v31 = vsel %vm2223_vm11, %v2213_v9, %v2216_v36  ;;  %v2229_v60 = vsel %vm2225_vm1, %v2213_v9, %v2228_v33  ;;  %v2236_v6 = vsel %vm2226_vm9, %v2222_v8, 1326507024  ;;  %v2351_v56 = vadd.s32 %v11714_v51, %v11727_v16  ;;  %v15733_v52 = vld [vmem:[#allocation37_spill] sm:$0xff] }
 0x282   : > { %v11852_v42 = vmul.u32.u64.low %v11812_v3, %v2234_v19  ;;  %v11853_v4 = vmul.u32.u64.high %v11812_v3, %v2234_v19, %v11852_v42  ;;  %vm8155_vm4 = vcmp.lt.s32.totalorder %v8154_v21, 0  ;;  %v2237_v13 = vsel %vm2225_vm1, %v2219_v20, %v2236_v6 }
 0x283   : > { %v15729_v38 = vand.u32 2147483647, %v15728_v17  ;;  %v2366_v9 = vsel %vm8155_vm4, 0, %v8154_v21  ;;  %v2238_v8 = vsel %vm2224_vm14, %v2235_v31, %v2237_v13  ;;  %vm15732_vm9 = vcmp.lt.s32.totalorder %v15728_v17, 0 }
 0x284   : > { %v822_v33 = vsel %vm15732_vm9, %v821_v43, %v15726_v23  ;;  %vm15734_vm1 = vcmp.lt.s32.totalorder %v10961_v39, 0  ;;  %v2367_v20 = vsub.s32 32, %v2366_v9  ;;  %v2371_v19 = vsub.s32 4294967266, %v2366_v9 }
 0x285   : > { %vm11861_vm11 = vcmp.le.f32.partialorder %v15729_v38, 0.7853982  ;;  %v2068_v16 = vsel %vm15734_vm1, %v2067_v10, %v2066_v34  ;;  %v2230_v21 = vsel %vm2224_vm14, %v2227_v26, %v2229_v60  ;;  %v2368_v6 = vshll.u32 %v11795_v61, %v2366_v9  ;;  %v4095_v34 = vld [vmem:[%s15387_s4] sm:$0xff]  ;;  %v4096_v60 = vld [vmem:[%s15387_s4 + $0x8] sm:$0x3] }
 0x286   : > { %v823_v51 = vsel %vm11861_vm11, %v15728_v17, %v15733_v52  ;;  %v11880_v31 = vmul.u32.u64.low %v11812_v3, %v2238_v8  ;;  %v11881_v13 = vmul.u32.u64.high %v11812_v3, %v2238_v8, %v11880_v31  ;;  %v2249_v23 = vadd.s32 1, %v11853_v4 }
 0x287   : > { %v2369_v43 = vshrl.u32 %v2351_v56, %v2367_v20  ;;  %v2372_v38 = vadd.s32 127, %v2371_v19  ;;  %v824_v52 = vsel %vm11861_vm11, 0, %v822_v33  ;;  %9649 = vcosq.f32 %v823_v51 }
 0x288   : > { %v11893_v63 = vadd.s32 4294967169, %v11786_v58  ;;  %v2071_v61 = vsel %vm11824_vm13, %v10961_v39, %v2068_v16  ;;  %9651 = vsinq.f32 %v823_v51  ;;  %v828_v10 = vadd.s32 3, %v824_v52  ;;  %v15758_v39 = vld [vmem:[#allocation10_spill] sm:$0xff] }
 0x289   : > { %9653 = vsinq.f32 %v11773_v29  ;;  %v2370_v26 = vor.u32 %v2369_v43, %v2368_v6  ;;  %v2373_v56 = vshll.u32 %v2372_v38, 23  ;;  %vm4346_vm4 = vcmask 1041408   ;;  %v15739_v29 = vld [vmem:[#allocation13_spill] sm:$0xff]  ;;  %v15740_v6 = vld [vmem:[#allocation8_spill] sm:$0xff] }
 0x28a   : > { %15735 = vst [vmem:[#allocation9_spill] sm:$0xff] %v11893_v63  ;;  %v2246_v36 = vmul.u32 %v11812_v3, %v2230_v21  ;;  %vm2248_vm14 = vc.u32 %v11881_v13, %v11852_v42  ;;  %v829_v9 = vand.u32 3, %v828_v10  ;;  %v11901_v8 = vpack.c.bf16 %v4096_v60, %v4095_v34  ;;  %v15746_v38 = vld [vmem:[#allocation20_spill] sm:$0xff]  ;;  %v15748_v10 = vld [vmem:[#allocation41_spill] sm:$0xff] }
 0x28b   : > { %vm15736_vm11 = vmmov 1   ;;  %9655 = vcosq.f32 %v2071_v61  ;;  %v2374_v33 = vor.u32 4788187, %v2373_v56  ;;  %v2250_v51 = vsel %vm2248_vm14, %v2249_v23, %v11853_v4  ;;  %v15749_v56 = vld [vmem:[#allocation33_spill] sm:$0xff] }
 0x28c   : > { %vm11904_vm9 = vmpackc.low %vm4346_vm4, %vm15736_vm11  ;;  %v925_v16 = vsub.s32 4, %v15739_v29  ;;  %9657 = vsinq.f32 %v2071_v61  ;;  %v11912_v3 = vadd.s32 %v11852_v42, %v11881_v13  ;;  %v2251_v20 = vadd.s32 %v2250_v51, %v2246_v36 }
 0x28d   : > { %9090 = vmatprep.subr.msk.bf16.mxu1 %vm11904_vm9, %v11901_v8  ;;  %v2375_v19 = vand.u32 2147483647, %v2374_v33  ;;  %v2377_v21 = vcvt.s32.f32 %v2370_v26  ;;  %vm15741_vm14 = vcmp.lt.s32.totalorder %v15740_v6, 0  ;;  %v15742_v31 = vand.u32 2147483647, %v11093_v7  ;;  %v15750_v33 = vld [vmem:[#allocation11_spill] sm:$0xff] }
 0x28e   : > { %v926_v4 = vsel %vm15741_vm14, %v925_v16, %v15739_v29  ;;  %v2252_v42 = vadd.s32 536870912, %v2251_v20  ;;  %vm831_vm13 = vcmp.eq.s32.totalorder %v829_v9, 0  ;;  %v1029_v52 = vsub.s32 4, %v15746_v38 }
 0x28f   : > { %vm11922_vm5 = vcmp.le.f32.partialorder %v15742_v31, 0.7853982  ;;  %v928_v43 = vsel %vm10746_vm7, 0, %v926_v4  ;;  %v2378_v34 = vmul.f32 %v2377_v21, %v2375_v19  ;;  %vm834_vm11 = vcmp.eq.s32.totalorder %v829_v9, 2  ;;  %v15753_v21 = vld [vmem:[#allocation19_spill] sm:$0xff] }
 0x290   : > { %v932_v60 = vadd.s32 3, %v928_v43  ;;  %v11931_v61 = vshrl.u32 %v2252_v42, 30  ;;  %v936_v26 = vxor.u32 2147483648, %v15748_v10  ;;  %v939_v36 = vxor.u32 2147483648, %v15749_v56 }
 0x291   : > { %vm15751_vm14 = vcmp.lt.s32.totalorder %v15750_v33, 0  ;;  %v9650_v29 = vpop.eup %9649  ;;  %v2379_v16 = vxor.u32 2147483648, %v2378_v34  ;;  %v1133_v13 = vsub.s32 4, %v15753_v21  ;;  %vm15759_vm7 = vcmp.lt.s32.totalorder %v15758_v39, 0 }
 0x292   : > { %15747 = vst [vmem:[#allocation37_spill] sm:$0xff] %v11931_v61  ;;  %v1030_v51 = vsel %vm15751_vm14, %v1029_v52, %v15746_v38  ;;  %v933_v4 = vand.u32 3, %v932_v60  ;;  %v9652_v63 = vpop.eup %9651  ;;  %v2254_v42 = vshll.u32 %v11931_v61, 30  ;;  %v835_v43 = vxor.u32 2147483648, %v9650_v29  ;;  %v15755_v38 = vld [vmem:[#allocation60_spill] sm:$0xff] }
 0x293   : > { %v1032_v19 = vsel %vm11052_vm2, 0, %v1030_v51  ;;  %v11943_v44 = vpop.eup %9653  ;;  %v832_v37 = vxor.u32 2147483648, %v9652_v63  ;;  %v1040_v52 = vxor.u32 2147483648, %v15755_v38  ;;  %v1043_v60 = vxor.u32 2147483648, %v15756_v55 }
 0x294   : > { %v1036_v57 = vadd.s32 3, %v1032_v19  ;;  %15754 = vst [vmem:[#allocation13_spill] sm:$0xff] %v11943_v44  ;;  %vm935_vm4 = vcmp.eq.s32.totalorder %v933_v4, 0  ;;  %vm15757_vm14 = vcmp.lt.s32.totalorder %v11093_v7, 0  ;;  %v11949_v31 = vsub.s32 %v2251_v20, %v2254_v42 }
 0x295   : > { %v2380_v51 = vsel %vm15757_vm14, %v2379_v16, %v2378_v34  ;;  %v836_v40 = vsel %vm834_vm11, %v835_v43, %v9652_v63  ;;  %v937_v61 = vsel %vm935_vm4, %v15749_v56, %v936_v26  ;;  %v11953_v32 = vpop.eup %9655  ;;  %v833_v19 = vsel %vm831_vm13, %v9650_v29, %v832_v37  ;;  %v15766_v16 = vld [vmem:[#allocation40_spill] sm:$0xff] }
 0x296   : > { %vm938_vm2 = vcmp.eq.s32.totalorder %v933_v4, 2  ;;  %v1037_v44 = vand.u32 3, %v1036_v57  ;;  %v1134_v2 = vsel %vm15759_vm7, %v1133_v13, %v15753_v21  ;;  %v11959_v53 = vpop.eup %9657  ;;  %v2257_v34 = vsub.s32 0, %v11949_v31  ;;  %v15769_v13 = vld [vmem:[#allocation46_spill] sm:$0xff] }
 0x297   : > { %vm15760_vm14 = vcmp.lt.s32.totalorder %v829_v9, 2  ;;  %vm934_vm1 = vcmp.lt.s32.totalorder %v933_v4, 2  ;;  %v940_v63 = vsel %vm938_vm2, %v939_v36, %v15748_v10  ;;  %v11967_v26 = vsel %vm11922_vm5, %v11093_v7, %v2380_v51  ;;  %v15768_v4 = vld [vmem:[#allocation56_spill] sm:$0xff] }
 0x298   : > { %v837_v20 = vsel %vm15760_vm14, %v833_v19, %v836_v40  ;;  %vm15761_vm13 = vweird.f32 %v15728_v17  ;;  %v941_v37 = vsel %vm934_vm1, %v937_v61, %v940_v63  ;;  %vm1039_vm4 = vcmp.eq.s32.totalorder %v1037_v44, 0  ;;  %v15774_v36 = vld [vmem:[#allocation12_spill] sm:$0xff] }
 0x299   : > { %v838_v57 = vsel %vm15761_vm13, nan, %v837_v20  ;;  %v8149_v56 = vmin.u32 %v2257_v34, %v11949_v31  ;;  %vm15762_vm11 = vcmask 121856   ;;  %vm15763_vm7 = vweird.f32 %v15740_v6 }
 0x29a   : > { %8808 = vmatprep.mubr.msk.f32.mxu1 %vm15762_vm11, %v838_v57  ;;  %v942_v40 = vsel %vm15763_vm7, nan, %v941_v37  ;;  %v1041_v9 = vsel %vm1039_vm4, %v15756_v55, %v1040_v52  ;;  %vm1042_vm2 = vcmp.eq.s32.totalorder %v1037_v44, 2  ;;  %vm15764_vm14 = vmmov %vm15762_vm11  ;;  %vm1038_vm8 = vcmp.lt.s32.totalorder %v1037_v44, 2  ;;  %v15772_v52 = vld [vmem:[#allocation32_spill] sm:$0xff] }
 0x29b   : > { %8809 = vmatmul.mubr.msk.f32.vlgmr.msra.gmra.mrb[0].mxu1 %vm15764_vm14, %v942_v40  ;;  %v1044_v10 = vsel %vm1042_vm2, %v1043_v60, %v15755_v38  ;;  %v1136_v17 = vsel %vm11024_vm12, 0, %v1134_v2  ;;  %vm1139_vm1 = vweird.f32 %v15758_v39  ;;  %v2259_v61 = vclz %v8149_v56  ;;  %vm15770_vm12 = vmmov %vm15762_vm11  ;;  %v15773_v56 = vld [vmem:[#allocation61_spill] sm:$0xff] }
 0x29c   : > { %9093 = vmatpush3.bf16.msk.msra.mxu1 %vm11904_vm9, %v11901_v8  ;;  %v1045_v6 = vsel %vm1038_vm8, %v1041_v9, %v1044_v10  ;;  %v1140_v29 = vadd.s32 3, %v1136_v17  ;;  %v1237_v55 = vsub.s32 4, %v15766_v16  ;;  %9659 = vcosq.f32 %v11967_v26  ;;  %vm15777_vm14 = vmmov %vm15770_vm12 }
 0x29d   : > { %vm15767_vm13 = vweird.f32 %v15750_v33  ;;  %v1144_v21 = vxor.u32 2147483648, %v15768_v4  ;;  %v1147_v2 = vxor.u32 2147483648, %v15769_v13  ;;  %v8150_v42 = vadd.s32 4294967294, %v2259_v61  ;;  %v15776_v61 = vld [vmem:[#allocation47_spill] sm:$0xff] }
 0x29e   : > { %v1046_v44 = vsel %vm15767_vm13, nan, %v1045_v6  ;;  %v1141_v43 = vand.u32 3, %v1140_v29  ;;  %vm15771_vm9 = vcmp.lt.s32.totalorder %v10415_v30, 0  ;;  %v1248_v58 = vxor.u32 2147483648, %v11476_v47 }
 0x29f   : > { %8811 = vmatprep.mubr.msk.f32.mxu1 %vm15770_vm12, %v1046_v44  ;;  %v1238_v8 = vsel %vm15771_vm9, %v1237_v55, %v15766_v16  ;;  %vm1243_vm8 = vweird.f32 %v10415_v30  ;;  %v1251_v33 = vxor.u32 2147483648, %v11404_v62  ;;  %v1341_v60 = vsub.s32 4, %v15772_v52 }
 0x2a0   : > { %v1240_v38 = vsel %vm11315_vm10, 0, %v1238_v8  ;;  %v1352_v51 = vxor.u32 2147483648, %v11300_v41  ;;  %vm8151_vm4 = vcmp.lt.s32.totalorder %v8150_v42, 0  ;;  %vm1142_vm11 = vcmp.lt.s32.totalorder %v1141_v43, 2 }
 0x2a1   : > { %vm1143_vm7 = vcmp.eq.s32.totalorder %v1141_v43, 0  ;;  %vm1146_vm2 = vcmp.eq.s32.totalorder %v1141_v43, 2  ;;  %v2262_v19 = vsel %vm8151_vm4, 0, %v8150_v42  ;;  %v1244_v63 = vadd.s32 3, %v1240_v38 }
 0x2a2   : > { %v1145_v34 = vsel %vm1143_vm7, %v15769_v13, %v1144_v21  ;;  %v1148_v20 = vsel %vm1146_vm2, %v1147_v2, %v15768_v4  ;;  %v2263_v1 = vsub.s32 32, %v2262_v19  ;;  %v2267_v57 = vsub.s32 4294967266, %v2262_v19 }
 0x2a3   : > { %v1149_v37 = vsel %vm1142_vm11, %v1145_v34, %v1148_v20  ;;  %v1355_v40 = vxor.u32 2147483648, %v15773_v56  ;;  %v1245_v10 = vand.u32 3, %v1244_v63  ;;  %vm15775_vm10 = vcmp.lt.s32.totalorder %v15774_v36, 0 }
 0x2a4   : > { %v1150_v9 = vsel %vm1139_vm1, nan, %v1149_v37  ;;  %v1342_v17 = vsel %vm15775_vm10, %v1341_v60, %v15772_v52  ;;  %v1445_v6 = vsub.s32 4, %v15776_v61  ;;  %v2264_v29 = vshll.u32 %v11949_v31, %v2262_v19 }
 0x2a5   : > { %v2265_v16 = vshrl.u32 %v11912_v3, %v2263_v1  ;;  %v2268_v55 = vadd.s32 127, %v2267_v57  ;;  %8812 = vmatmul.mubr.msk.f32.gmra.mrb[2].mxu1 %vm15777_vm14, %v1150_v9  ;;  %v1344_v4 = vsel %vm11152_vm0, 0, %v1342_v17  ;;  %vm1246_vm13 = vcmp.lt.s32.totalorder %v1245_v10, 2  ;;  %vm15780_vm0 = vmmov %vm15777_vm14  ;;  %v15781_v1 = vld [vmem:[#allocation44_spill] sm:$0xff] }
 0x2a6   : > { %vm1247_vm12 = vcmp.eq.s32.totalorder %v1245_v10, 0  ;;  %vm1250_vm1 = vcmp.eq.s32.totalorder %v1245_v10, 2  ;;  %v1348_v39 = vadd.s32 3, %v1344_v4  ;;  %v12017_v43 = vpop.eup %9659  ;;  %vm2193_vm9 = vcmp.lt.s32.totalorder %v11205_v15, 0  ;;  %v15789_v4 = vld [vmem:[#allocation73_spill] sm:$0xff] }
 0x2a7   : > { %v2266_v21 = vor.u32 %v2265_v16, %v2264_v29  ;;  %v2269_v13 = vshll.u32 %v2268_v55, 23  ;;  %v1249_v2 = vsel %vm1247_vm12, %v11404_v62, %v1248_v58  ;;  %v1252_v42 = vsel %vm1250_vm1, %v1251_v33, %v11476_v47  ;;  %v15788_v55 = vld [vmem:[#allocation74_spill] sm:$0xff] }
 0x2a8   : > { %v1253_v3 = vsel %vm1246_vm13, %v1249_v2, %v1252_v42  ;;  %v1349_v31 = vand.u32 3, %v1348_v39  ;;  %vm15779_vm4 = vcmp.lt.s32.totalorder %v10427_v49, 0  ;;  %v1456_v38 = vxor.u32 2147483648, %v11603_v27 }
 0x2a9   : > { %v1446_v8 = vsel %vm15779_vm4, %v1445_v6, %v15776_v61  ;;  %v2270_v52 = vor.u32 4788187, %v2269_v13  ;;  %v2273_v60 = vcvt.s32.f32 %v2266_v21  ;;  %v1254_v19 = vsel %vm1243_vm8, nan, %v1253_v3  ;;  %vm15785_vm8 = vmmov %vm15780_vm0  ;;  %v15787_v61 = vld [vmem:[#allocation65_spill] sm:$0xff] }
 0x2aa   : > { %v1448_v62 = vsel %vm11499_vm15, 0, %v1446_v8  ;;  %8814 = vmatprep.mubr.msk.f32.mxu1 %vm15780_vm0, %v1254_v19  ;;  %vm1350_vm11 = vcmp.lt.s32.totalorder %v1349_v31, 2  ;;  %vm1351_vm7 = vcmp.eq.s32.totalorder %v1349_v31, 0  ;;  %vm1354_vm2 = vcmp.eq.s32.totalorder %v1349_v31, 2 }
 0x2ab   : > { %v1452_v47 = vadd.s32 3, %v1448_v62  ;;  %v2271_v58 = vand.u32 2147483647, %v2270_v52  ;;  %v1353_v33 = vsel %vm1351_vm7, %v15773_v56, %v1352_v51  ;;  %v1356_v34 = vsel %vm1354_vm2, %v1355_v40, %v11300_v41  ;;  %v15796_v62 = vld [vmem:[#allocation69_spill] sm:$0xff] }
 0x2ac   : > { %v1459_v20 = vxor.u32 2147483648, %v11599_v0  ;;  %vm1347_vm10 = vweird.f32 %v15774_v36  ;;  %v1357_v30 = vsel %vm1350_vm11, %v1353_v33, %v1356_v34  ;;  %v1549_v50 = vsub.s32 4, %v15781_v1 }
 0x2ad   : > { %v1453_v63 = vand.u32 3, %v1452_v47  ;;  %9661 = vsinq.f32 %v11967_v26  ;;  %v15782_v57 = vand.u32 2147483647, %v11205_v15  ;;  %v2274_v9 = vmul.f32 %v2273_v60, %v2271_v58  ;;  %v15794_v60 = vld [vmem:[#allocation70_spill] sm:$0xff] }
 0x2ae   : > { %v1358_v51 = vsel %vm1347_vm10, nan, %v1357_v30  ;;  %vm15786_vm1 = vcmp.lt.s32.totalorder %v10419_v35, 0  ;;  %vm1451_vm4 = vweird.f32 %v10427_v49  ;;  %v1653_v6 = vsub.s32 4, %v15787_v61 }
 0x2af   : > { %vm12037_vm15 = vcmp.le.f32.partialorder %v15782_v57, 0.7853982  ;;  %8815 = vmatmul.mubr.msk.f32.gmra.mrb[4].mxu1 %vm15785_vm8, %v1358_v51  ;;  %vm1454_vm14 = vcmp.lt.s32.totalorder %v1453_v63, 2  ;;  %vm1455_vm13 = vcmp.eq.s32.totalorder %v1453_v63, 0  ;;  %vm1458_vm12 = vcmp.eq.s32.totalorder %v1453_v63, 2 }
 0x2b0   : > { %v1550_v41 = vsel %vm15786_vm1, %v1549_v50, %v15781_v1  ;;  %v2275_v56 = vxor.u32 2147483648, %v2274_v9  ;;  %v1457_v26 = vsel %vm1455_vm13, %v11599_v0, %v1456_v38  ;;  %v1460_v40 = vsel %vm1458_vm12, %v1459_v20, %v11603_v27  ;;  %v15791_v0 = vld [vmem:[#allocation57_spill] sm:$0xff]  ;;  %v15792_v38 = vld [vmem:[#allocation14_spill] sm:$0xff]  ;;  %vm15797_vm12 = vmmov %vm15780_vm0 }
 0x2b1   : > { %v1552_v10 = vsel %vm11482_vm3, 0, %v1550_v41  ;;  %v1461_v36 = vsel %vm1454_vm14, %v1457_v26, %v1460_v40  ;;  %v1560_v44 = vxor.u32 2147483648, %v15788_v55  ;;  %v1563_v39 = vxor.u32 2147483648, %v15789_v4  ;;  %v15799_v50 = vld [vmem:[#allocation68_spill] sm:$0xff] }
 0x2b2   : > { %v1556_v17 = vadd.s32 3, %v1552_v10  ;;  %v2276_v29 = vsel %vm2193_vm9, %v2275_v56, %v2274_v9  ;;  %v1462_v16 = vsel %vm1451_vm4, nan, %v1461_v36  ;;  %vm1555_vm11 = vweird.f32 %v10419_v35 }
 0x2b3   : > { %8817 = vmatprep.mubr.msk.f32.mxu1 %vm15780_vm0, %v1462_v16  ;;  %vm15790_vm3 = vcmp.lt.s32.totalorder %v10523_v12, 0  ;;  %v1757_v27 = vsub.s32 4, %v15791_v0  ;;  %v2279_v21 = vsel %vm12037_vm15, %v11205_v15, %v2276_v29  ;;  %vm1659_vm7 = vweird.f32 %v10523_v12 }
 0x2b4   : > { %v1557_v5 = vand.u32 3, %v1556_v17  ;;  %v1654_v49 = vsel %vm15790_vm3, %v1653_v6, %v15787_v61  ;;  %v1664_v2 = vxor.u32 2147483648, %v11788_v14  ;;  %v1667_v42 = vxor.u32 2147483648, %v11777_v24 }
 0x2b5   : > { %v1656_v13 = vsel %vm11613_vm6, 0, %v1654_v49  ;;  %vm15793_vm14 = vcmp.lt.s32.totalorder %v15792_v38, 0  ;;  %9663 = vcosq.f32 %v2279_v21  ;;  %vm15795_vm6 = vnez %v15794_v60  ;;  %v15807_v49 = vld [vmem:[#allocation36_spill] sm:$0xff] }
 0x2b6   : > { %vm1558_vm2 = vcmp.lt.s32.totalorder %v1557_v5, 2  ;;  %vm1559_vm10 = vcmp.eq.s32.totalorder %v1557_v5, 0  ;;  %vm1562_vm8 = vcmp.eq.s32.totalorder %v1557_v5, 2  ;;  %v1660_v8 = vadd.s32 3, %v1656_v13 }
 0x2b7   : > { %v1561_v3 = vsel %vm1559_vm10, %v15789_v4, %v1560_v44  ;;  %v1564_v31 = vsel %vm1562_vm8, %v1563_v39, %v15788_v55  ;;  %v1758_v52 = vsel %vm15793_vm14, %v1757_v27, %v15791_v0  ;;  %v1861_v47 = vsub.s32 4, %v15796_v62  ;;  %v12077_v58 = vpop.eup %9661  ;;  %v15806_v55 = vld [vmem:[#allocation75_spill] sm:$0xff]  ;;  %v15809_v27 = vld [vmem:[#allocation72_spill] sm:$0xff] }
 0x2b8   : > { %v1565_v54 = vsel %vm1558_vm2, %v1561_v3, %v1564_v31  ;;  %v1760_v19 = vsel %vm15795_vm6, 0, %v1758_v52  ;;  %v1661_v34 = vand.u32 3, %v1660_v8  ;;  %vm1763_vm13 = vweird.f32 %v15792_v38  ;;  %vm15802_vm6 = vmmov %vm15797_vm12  ;;  %v15813_v38 = vld [vmem:[#allocation35_spill] sm:$0xff] }
 0x2b9   : > { %v1566_v33 = vsel %vm1555_vm11, nan, %v1565_v54  ;;  %v1764_v20 = vadd.s32 3, %v1760_v19  ;;  %v1768_v30 = vxor.u32 2147483648, %v11692_v45  ;;  %v1771_v63 = vxor.u32 2147483648, %v11672_v18 }
 0x2ba   : > { %8818 = vmatmul.mubr.msk.f32.gmra.mrb[6].mxu1 %vm15797_vm12, %v1566_v33  ;;  %vm15798_vm1 = vcmp.lt.s32.totalorder %v10711_v48, 0  ;;  %v1965_v57 = vsub.s32 4, %v15799_v50  ;;  %vm1662_vm4 = vcmp.lt.s32.totalorder %v1661_v34, 2  ;;  %vm1663_vm0 = vcmp.eq.s32.totalorder %v1661_v34, 0 }
 0x2bb   : > { %v1862_v1 = vsel %vm15798_vm1, %v1861_v47, %v15796_v62  ;;  %vm1666_vm3 = vcmp.eq.s32.totalorder %v1661_v34, 2  ;;  %v1765_v35 = vand.u32 3, %v1764_v20  ;;  %v1665_v9 = vsel %vm1663_vm0, %v11777_v24, %v1664_v2  ;;  %v15815_v62 = vld [vmem:[#allocation76_spill] sm:$0xff]  ;;  %v15818_v34 = vld [vmem:[#allocation37_spill] sm:$0xff] }
 0x2bc   : > { %v1668_v51 = vsel %vm1666_vm3, %v1667_v42, %v11788_v14  ;;  %vm15800_vm11 = vnez %v15702_v28  ;;  %vm15801_vm2 = vcmp.lt.s32.totalorder %v10638_v59, 0  ;;  %v1872_v14 = vxor.u32 2147483648, %v11833_v25 }
 0x2bd   : > { %v1864_v41 = vsel %vm15800_vm11, 0, %v1862_v1  ;;  %v1966_v56 = vsel %vm15801_vm2, %v1965_v57, %v15799_v50  ;;  %v1669_v26 = vsel %vm1662_vm4, %v1665_v9, %v1668_v51  ;;  %vm1766_vm10 = vcmp.lt.s32.totalorder %v1765_v35, 2  ;;  %v15820_v1 = vld [vmem:[#allocation16_spill] sm:$0xff]  ;;  %v15821_v57 = vld [vmem:[#allocation79_spill] sm:$0xff] }
 0x2be   : > { %vm1767_vm8 = vcmp.eq.s32.totalorder %v1765_v35, 0  ;;  %vm1770_vm14 = vcmp.eq.s32.totalorder %v1765_v35, 2  ;;  %v1670_v40 = vsel %vm1659_vm7, nan, %v1669_v26  ;;  %v1868_v36 = vadd.s32 3, %v1864_v41  ;;  %vm15804_vm7 = vmmov %vm15802_vm6 }
 0x2bf   : > { %v1769_v10 = vsel %vm1767_vm8, %v11672_v18, %v1768_v30  ;;  %v1772_v24 = vsel %vm1770_vm14, %v1771_v63, %v11692_v45  ;;  %8820 = vmatprep.mubr.msk.f32.mxu1 %vm15802_vm6, %v1670_v40  ;;  %v1875_v17 = vxor.u32 2147483648, %v11820_v11  ;;  %vm15803_vm12 = vnez %v15699_v22  ;;  %v15805_v45 = vld [vmem:[#allocation81_spill] sm:$0xff]  ;;  %v12112_v4 = vpop.eup %9663  ;;  %vm15812_vm14 = vmmov %vm15802_vm6 }
 0x2c0   : > { %v1773_v28 = vsel %vm1766_vm10, %v1769_v10, %v1772_v24  ;;  %v1968_v61 = vsel %vm15803_vm12, 0, %v1966_v56  ;;  %9665 = vsinq.f32 %v2279_v21  ;;  %v1869_v6 = vand.u32 3, %v1868_v36  ;;  %v15819_v30 = vld [vmem:[#allocation13_spill] sm:$0xff] }
 0x2c1   : > { %v1774_v12 = vsel %vm1763_vm13, nan, %v1773_v28  ;;  %v1972_v29 = vadd.s32 3, %v1968_v61  ;;  %vm1867_vm1 = vweird.f32 %v10711_v48  ;;  %v1976_v18 = vxor.u32 2147483648, %v11814_v46  ;;  %v4495_v28 = vld [vmem:[%s15389_s6] sm:$0xff] }
 0x2c2   : > { %8821 = vmatmul.mubr.msk.f32.gmra.mrb[8].mxu1 %vm15804_vm7, %v1774_v12  ;;  %v1979_v16 = vxor.u32 2147483648, %v15805_v45  ;;  %v2069_v44 = vsub.s32 4, %v15806_v55  ;;  %vm1870_vm4 = vcmp.lt.s32.totalorder %v1869_v6, 2  ;;  %vm1871_vm0 = vcmp.eq.s32.totalorder %v1869_v6, 0 }
 0x2c3   : > { %vm1874_vm3 = vcmp.eq.s32.totalorder %v1869_v6, 2  ;;  %v1973_v22 = vand.u32 3, %v1972_v29  ;;  %v1873_v39 = vsel %vm1871_vm0, %v11820_v11, %v1872_v14  ;;  %vm15808_vm13 = vcmp.lt.s32.totalorder %v15807_v49, 0  ;;  %v15810_v11 = vld [vmem:[#allocation82_spill] sm:$0xff]  ;;  %v4496_v14 = vld [vmem:[%s15389_s6 + $0x8] sm:$0x7f] }
 0x2c4   : > { %v1876_v5 = vsel %vm1874_vm3, %v1875_v17, %v11833_v25  ;;  %v2070_v0 = vsel %vm15808_vm13, %v2069_v44, %v15806_v55  ;;  %v2173_v21 = vsub.s32 4, %v15809_v27  ;;  %vm15811_vm8 = vnez %v15810_v11  ;;  %v15825_v44 = vld [vmem:[#allocation17_spill] sm:$0xff] }
 0x2c5   : > { %v1877_v13 = vsel %vm1870_vm4, %v1873_v39, %v1876_v5  ;;  %vm1974_vm11 = vcmp.lt.s32.totalorder %v1973_v22, 2  ;;  %vm1975_vm2 = vcmp.eq.s32.totalorder %v1973_v22, 0  ;;  %vm1978_vm10 = vcmp.eq.s32.totalorder %v1973_v22, 2  ;;  %v15826_v5 = vld [vmem:[#allocation29_spill] sm:$0xff] }
 0x2c6   : > { %v1878_v2 = vsel %vm1867_vm1, nan, %v1877_v13  ;;  %v1977_v42 = vsel %vm1975_vm2, %v15805_v45, %v1976_v18  ;;  %v1980_v3 = vsel %vm1978_vm10, %v1979_v16, %v11814_v46  ;;  %v2072_v25 = vsel %vm15811_vm8, 0, %v2070_v0  ;;  %vm15817_vm1 = vmmov %vm15812_vm14 }
 0x2c7   : > { %8823 = vmatprep.mubr.msk.f32.mxu1 %vm15812_vm14, %v1878_v2  ;;  %vm1971_vm6 = vweird.f32 %v10638_v59  ;;  %v1981_v31 = vsel %vm1974_vm11, %v1977_v42, %v1980_v3  ;;  %v2076_v8 = vadd.s32 3, %v2072_v25  ;;  %vm15814_vm12 = vcmp.lt.s32.totalorder %v15813_v38, 0  ;;  %v15831_v42 = vld [vmem:[#allocation24_spill] sm:$0xff] }
 0x2c8   : > { %v2174_v52 = vsel %vm15814_vm12, %v2173_v21, %v15809_v27  ;;  %v1982_v54 = vsel %vm1971_vm6, nan, %v1981_v31  ;;  %v2080_v60 = vxor.u32 2147483648, %v11959_v53  ;;  %v2083_v19 = vxor.u32 2147483648, %v11953_v32  ;;  %vm15824_vm12 = vmmov %vm15817_vm1  ;;  %v15828_v21 = vld [vmem:[#allocation77_spill] sm:$0xff] }
 0x2c9   : > { %vm15816_vm7 = vnez %v15815_v62  ;;  %8824 = vmatmul.mubr.msk.f32.gmra.mrb[10].mxu1 %vm15817_vm1, %v1982_v54  ;;  %vm2075_vm4 = vweird.f32 %v15807_v49  ;;  %v2077_v47 = vand.u32 3, %v2076_v8  ;;  %v2277_v20 = vsub.s32 4, %v15818_v34  ;;  %v4079_v62 = vld [vmem:[%s12187_s20] sm:$0xff] }
 0x2ca   : > { %v2176_v46 = vsel %vm15816_vm7, 0, %v2174_v52  ;;  %vm2179_vm0 = vweird.f32 %v15813_v38  ;;  %v2184_v63 = vxor.u32 2147483648, %v15819_v30  ;;  %v2187_v50 = vxor.u32 2147483648, %v15820_v1  ;;  %v9666_v9 = vpop.eup %9665 }
 0x2cb   : > { %v2180_v33 = vadd.s32 3, %v2176_v46  ;;  %v2381_v35 = vsub.s32 4, %v15821_v57  ;;  %vm2078_vm3 = vcmp.lt.s32.totalorder %v2077_v47, 2  ;;  %vm2079_vm13 = vcmp.eq.s32.totalorder %v2077_v47, 0 }
 0x2cc   : > { %vm2082_vm11 = vcmp.eq.s32.totalorder %v2077_v47, 2  ;;  %v2081_v41 = vsel %vm2079_vm13, %v11953_v32, %v2080_v60  ;;  %v2278_v26 = vsel %vm2193_vm9, %v2277_v20, %v15818_v34  ;;  %vm15822_vm2 = vcmp.lt.s32.totalorder %v11093_v7, 0  ;;  %vm15823_vm9 = vmmov %vm15817_vm1 }
 0x2cd   : > { %v2181_v51 = vand.u32 3, %v2180_v33  ;;  %v2084_v56 = vsel %vm2082_vm11, %v2083_v19, %v11959_v53  ;;  %v2382_v40 = vsel %vm15822_vm2, %v2381_v35, %v15821_v57  ;;  %vm2283_vm6 = vweird.f32 %v11205_v15  ;;  %vm15832_vm2 = vmmov %vm15823_vm9 }
 0x2ce   : > { %v2085_v10 = vsel %vm2078_vm3, %v2081_v41, %v2084_v56  ;;  %v2280_v36 = vsel %vm12037_vm15, 0, %v2278_v26  ;;  %v2288_v12 = vxor.u32 2147483648, %v9666_v9  ;;  %v2384_v6 = vsel %vm11922_vm5, 0, %v2382_v40  ;;  %v4080_v41 = vld [vmem:[%s12187_s20 + $0x8] sm:$0xff]  ;;  %v15838_v40 = vld [vmem:[#allocation28_spill] sm:$0xff] }
 0x2cf   : > { %vm2182_vm10 = vcmp.lt.s32.totalorder %v2181_v51, 2  ;;  %vm2183_vm8 = vcmp.eq.s32.totalorder %v2181_v51, 0  ;;  %vm2186_vm14 = vcmp.eq.s32.totalorder %v2181_v51, 2  ;;  %v2086_v24 = vsel %vm2075_vm4, nan, %v2085_v10  ;;  %v4081_v10 = vld [vmem:[%s12187_s20 + $0x10] sm:$0xff] }
 0x2d0   : > { %v2185_v32 = vsel %vm2183_vm8, %v15820_v1, %v2184_v63  ;;  %v2188_v53 = vsel %vm2186_vm14, %v2187_v50, %v15819_v30  ;;  %8826 = vmatprep.mubr.msk.f32.mxu1 %vm15823_vm9, %v2086_v24  ;;  %v2284_v61 = vadd.s32 3, %v2280_v36  ;;  %v2291_v29 = vxor.u32 2147483648, %v12112_v4 }
 0x2d1   : > { %v2189_v17 = vsel %vm2182_vm10, %v2185_v32, %v2188_v53  ;;  %vm2387_vm15 = vweird.f32 %v11093_v7  ;;  %v2388_v18 = vadd.s32 3, %v2384_v6  ;;  %v2392_v16 = vxor.u32 2147483648, %v12077_v58  ;;  %vm15836_vm10 = vmmov %vm15832_vm2 }
 0x2d2   : > { %v2190_v37 = vsel %vm2179_vm0, nan, %v2189_v17  ;;  %v2285_v45 = vand.u32 3, %v2284_v61  ;;  %v9094_v55 = vpack.c.bf16 %v4496_v14, %v4495_v28  ;;  %v2415_v22 = vand.u32 2147483647, %v15825_v44 }
 0x2d3   : > { %8827 = vmatmul.mubr.msk.f32.gmra.mrb[12].mxu1 %vm15824_vm12, %v2190_v37  ;;  %v2389_v39 = vand.u32 3, %v2388_v18  ;;  %v2395_v23 = vxor.u32 2147483648, %v12017_v43  ;;  %vm4297_vm5 = vcmask 80896   ;;  %v15827_v0 = vmov 2475754826   ;;  %v15839_v37 = vld [vmem:[#allocation78_spill] sm:$0xff] }
 0x2d4   : > { %v2433_v27 = vshrl.u32 %v15827_v0, %v15826_v5  ;;  %vm2287_vm7 = vcmp.eq.s32.totalorder %v2285_v45, 0  ;;  %vm2290_vm1 = vcmp.eq.s32.totalorder %v2285_v45, 2  ;;  %vm15829_vm4 = vnez %v15828_v21  ;;  %v4082_v18 = vld [vmem:[%s12187_s20 + $0x18] sm:$0xff] }
 0x2d5   : > { %9096 = vmatprep.subr.msk.bf16.mxu1 %vm15829_vm4, %v9094_v55  ;;  %v15830_v13 = vmov 683565275   ;;  %vm2286_vm0 = vcmp.lt.s32.totalorder %v2285_v45, 2  ;;  %v2289_v11 = vsel %vm2287_vm7, %v12112_v4, %v2288_v12  ;;  %v2292_v25 = vsel %vm2290_vm1, %v2291_v29, %v9666_v9 }
 0x2d6   : > { %v2431_v2 = vshrl.u32 %v15830_v13, %v15826_v5  ;;  %v2432_v3 = vshll.u32 %v15830_v13, %v15831_v42  ;;  %vm2391_vm3 = vcmp.eq.s32.totalorder %v2389_v39, 0  ;;  %v2293_v31 = vsel %vm2286_vm0, %v2289_v11, %v2292_v25 }
 0x2d7   : > { %v2393_v8 = vsel %vm2391_vm3, %v12017_v43, %v2392_v16  ;;  %vm2394_vm13 = vcmp.eq.s32.totalorder %v2389_v39, 2  ;;  %v2422_v52 = vand.u32 8388607, %v2415_v22  ;;  %v2294_v54 = vsel %vm2283_vm6, nan, %v2293_v31 }
 0x2d8   : > { %vm2390_vm11 = vcmp.lt.s32.totalorder %v2389_v39, 2  ;;  %v2396_v4 = vsel %vm2394_vm13, %v2395_v23, %v12077_v58  ;;  %v2434_v60 = vor.u32 %v2433_v27, %v2432_v3  ;;  %8829 = vmatprep.mubr.msk.f32.mxu1 %vm15832_vm2, %v2294_v54  ;;  %v2435_v46 = vshll.u32 %v15827_v0, %v15831_v42  ;;  %v15840_v39 = vld [vmem:[#allocation15_spill] sm:$0xff]  ;;  %v4083_v27 = vld [vmem:[%s12187_s20 + $0x20] sm:$0xff]  ;;  %v15843_v54 = vld [vmem:[#allocation21_spill] sm:$0xff] }
 0x2d9   : > { %v2397_v19 = vsel %vm2390_vm11, %v2393_v8, %v2396_v4  ;;  %v15833_v43 = vmov 2131351028   ;;  %v15834_v58 = vmov 2102212464   ;;  %v15835_v63 = vmov 920167782  }
 0x2da   : > { %v2436_v47 = vshrl.u32 %v15833_v43, %v15826_v5  ;;  %v2438_v33 = vshll.u32 %v15833_v43, %v15831_v42  ;;  %v2398_v34 = vsel %vm2387_vm15, nan, %v2397_v19  ;;  %v2439_v20 = vshrl.u32 %v15834_v58, %v15826_v5 }
 0x2db   : > { %v2441_v30 = vshll.u32 %v15834_v58, %v15831_v42  ;;  %v2442_v1 = vshrl.u32 %v15835_v63, %v15826_v5  ;;  %8830 = vmatmul.mubr.msk.f32.gmra.mrb[14].mxu1 %vm15836_vm10, %v2398_v34  ;;  %v2423_v50 = vor.u32 8388608, %v2422_v52  ;;  %v2444_v35 = vshll.u32 %v15835_v63, %v15831_v42  ;;  %v15841_v42 = vld [vmem:[#allocation80_spill] sm:$0xff] }
 0x2dc   : > { %v2437_v57 = vor.u32 %v2436_v47, %v2435_v46  ;;  %v15837_v9 = vmov 1326507024   ;;  %8836 = vmatprep.mubr.msk.f32.mxu1 %vm4297_vm5, %v4079_v62  ;;  %v2440_v56 = vor.u32 %v2439_v20, %v2438_v33  ;;  %vm2447_vm8 = vcmp.lt.s32.totalorder %v15838_v40, 1  ;;  %v4084_v62 = vld [vmem:[%s12187_s20 + $0x28] sm:$0xff] }
 0x2dd   : > { %v2445_v51 = vshrl.u32 %v15837_v9, %v15826_v5  ;;  %v2443_v26 = vor.u32 %v2442_v1, %v2441_v30  ;;  %vm2448_vm14 = vcmp.lt.s32.totalorder %v15838_v40, 2  ;;  %vm2449_vm6 = vcmp.lt.s32.totalorder %v15838_v40, 3  ;;  %v4085_v30 = vld [vmem:[%s12187_s20 + $0x30] sm:$0xff] }
 0x2de   : > { %vm2450_vm9 = vcmp.lt.s32.totalorder %v15838_v40, 4  ;;  %v2455_v32 = vsel %vm2447_vm8, %v2434_v60, %v2437_v57  ;;  %v2451_v53 = vsel %vm2447_vm8, %v2431_v2, %v2434_v60  ;;  %v2459_v14 = vsel %vm2447_vm8, %v2437_v57, %v2440_v56  ;;  %v15844_v60 = vld [vmem:[#allocation27_spill] sm:$0xff] }
 0x2df   : > { %v2446_v24 = vor.u32 %v2445_v51, %v2444_v35  ;;  %v2452_v36 = vsel %vm2450_vm9, %v2440_v56, 2102212464  ;;  %v2456_v28 = vsel %vm2450_vm9, %v2443_v26, 920167782  ;;  %8837 = vmatmul.mubr.msk.f32.vlgmr.msra.gmra.mrb[0].mxu1 %vm4297_vm5, %v4080_v41  ;;  %v2463_v6 = vshll.u32 %v2423_v50, 8 }
 0x2e0   : > { %v2453_v17 = vsel %vm2449_vm6, %v2437_v57, %v2452_v36  ;;  %v2457_v61 = vsel %vm2449_vm6, %v2440_v56, %v2456_v28  ;;  %v12229_v29 = vand.u32 31, %v15839_v37  ;;  %9099 = vmatpush3.bf16.msk.msra.mxu1 %vm15829_vm4, %v9094_v55  ;;  %8839 = vmatprep.mubr.msk.f32.mxu1 %vm4297_vm5, %v4081_v10  ;;  %v2519_v23 = vand.u32 2147483647, %v15840_v39  ;;  %v15845_v36 = vld [vmem:[#allocation26_spill] sm:$0xff]  ;;  %v4087_v28 = vld [vmem:[%s12187_s20 + $0x40] sm:$0xff] }
 0x2e1   : > { %v2460_v12 = vsel %vm2450_vm9, %v2446_v24, 1326507024  ;;  %v2458_v45 = vsel %vm2448_vm14, %v2455_v32, %v2457_v61  ;;  %v12241_v5 = vadd.f32 1.5707964, %v10638_v59  ;;  %v12251_v3 = vand.u32 31, %v15841_v42  ;;  %v15842_v59 = vld [vmem:[#allocation9_spill] sm:$0xff] }
 0x2e2   : > { %v2461_v16 = vsel %vm2449_vm6, %v2443_v26, %v2460_v12  ;;  %v12246_v55 = vmul.u32.u64.low %v2463_v6, %v2458_v45  ;;  %v12247_v2 = vmul.u32.u64.high %v2463_v6, %v2458_v45, %v12246_v55  ;;  %v2454_v11 = vsel %vm2448_vm14, %v2451_v53, %v2453_v17  ;;  %v4086_v24 = vld [vmem:[%s12187_s20 + $0x38] sm:$0xff] }
 0x2e3   : > { %v2462_v21 = vsel %vm2448_vm14, %v2459_v14, %v2461_v16  ;;  %v3257_v8 = vadd.s32 1, %v15842_v59  ;;  %8840 = vmatmul.mubr.msk.f32.gmra.mrb[2].mxu1 %vm4297_vm5, %v4082_v18  ;;  %v2526_v52 = vand.u32 8388607, %v2519_v23  ;;  %v2536_v4 = vshll.u32 %v15830_v13, %v15843_v54 }
 0x2e4   : > { %v12255_v25 = vmul.u32.u64.low %v2463_v6, %v2462_v21  ;;  %v12256_v31 = vmul.u32.u64.high %v2463_v6, %v2462_v21, %v12255_v25  ;;  %v2537_v19 = vshrl.u32 %v15827_v0, %v15844_v60  ;;  %8842 = vmatprep.mubr.msk.f32.mxu1 %vm4297_vm5, %v4083_v27  ;;  %v2539_v46 = vshll.u32 %v15827_v0, %v15843_v54  ;;  %v4088_v21 = vld [vmem:[%s12187_s20 + $0x48] sm:$0xff] }
 0x2e5   : > { %v2540_v47 = vshrl.u32 %v15833_v43, %v15844_v60  ;;  %v2542_v33 = vshll.u32 %v15833_v43, %v15843_v54  ;;  %v2543_v34 = vshrl.u32 %v15834_v58, %v15844_v60  ;;  %v3562_v20 = vand.u32 2139095040, %v12241_v5 }
 0x2e6   : > { %v2470_v1 = vmul.u32 %v2463_v6, %v2454_v11  ;;  %v2473_v50 = vadd.s32 1, %v12247_v2  ;;  %v2538_v57 = vor.u32 %v2537_v19, %v2536_v4  ;;  %vm2472_vm15 = vc.u32 %v12256_v31, %v12246_v55 }
 0x2e7   : > { %v2541_v35 = vor.u32 %v2540_v47, %v2539_v46  ;;  %v2544_v51 = vor.u32 %v2543_v34, %v2542_v33  ;;  %v2545_v41 = vshll.u32 %v15834_v58, %v15843_v54  ;;  %8843 = vmatmul.mubr.msk.f32.gmra.mrb[4].mxu1 %vm4297_vm5, %v4084_v62  ;;  %v2546_v26 = vshrl.u32 %v15835_v63, %v15844_v60 }
 0x2e8   : > { %v2474_v56 = vsel %vm2472_vm15, %v2473_v50, %v12247_v2  ;;  %v2548_v40 = vshll.u32 %v15835_v63, %v15843_v54  ;;  %v2549_v10 = vshrl.u32 %v15837_v9, %v15844_v60  ;;  %vm3258_vm12 = vcmp.gt.s32.totalorder %v3257_v8, 0  ;;  %8845 = vmatprep.mubr.msk.f32.mxu1 %vm4297_vm5, %v4085_v30  ;;  %v4089_v54 = vld [vmem:[%s12187_s20 + $0x50] sm:$0xff] }
 0x2e9   : > { %v2475_v32 = vadd.s32 %v2474_v56, %v2470_v1  ;;  %v2527_v53 = vor.u32 8388608, %v2526_v52  ;;  %vm2551_vm7 = vcmp.lt.s32.totalorder %v15845_v36, 1  ;;  %v2547_v14 = vor.u32 %v2546_v26, %v2545_v41 }
 0x2ea   : > { %v2550_v17 = vor.u32 %v2549_v10, %v2548_v40  ;;  %vm2552_vm1 = vcmp.lt.s32.totalorder %v15845_v36, 2  ;;  %vm2553_vm4 = vcmp.lt.s32.totalorder %v15845_v36, 3  ;;  %vm2554_vm0 = vcmp.lt.s32.totalorder %v15845_v36, 4  ;;  %v15849_v36 = vld [vmem:[#allocation51_spill] sm:$0xff] }
 0x2eb   : > { %v2476_v61 = vadd.s32 536870912, %v2475_v32  ;;  %v2559_v12 = vsel %vm2551_vm7, %v2538_v57, %v2541_v35  ;;  %v2563_v6 = vsel %vm2551_vm7, %v2541_v35, %v2544_v51  ;;  %8846 = vmatmul.mubr.msk.f32.gmra.mrb[6].mxu1 %vm4297_vm5, %v4086_v24  ;;  %v2535_v18 = vshrl.u32 %v15830_v13, %v15844_v60  ;;  %v15846_v24 = vld [vmem:[#allocation22_spill] sm:$0xff] }
 0x2ec   : > { %v2556_v45 = vsel %vm2554_vm0, %v2544_v51, 2102212464  ;;  %v2560_v16 = vsel %vm2554_vm0, %v2547_v14, 920167782  ;;  %v2564_v27 = vsel %vm2554_vm0, %v2550_v17, 1326507024  ;;  %8848 = vmatprep.mubr.msk.f32.mxu1 %vm4297_vm5, %v4087_v28  ;;  %v2641_v28 = vshrl.u32 %v15827_v0, %v15849_v36 }
 0x2ed   : > { %v2477_v2 = vshrl.u32 %v2476_v61, 30  ;;  %v2561_v11 = vsel %vm2553_vm4, %v2544_v51, %v2560_v16  ;;  %v2565_v25 = vsel %vm2553_vm4, %v2547_v14, %v2564_v27  ;;  %v2567_v59 = vshll.u32 %v2527_v53, 8  ;;  %v4092_v14 = vld [vmem:[%s12187_s20 + $0x68] sm:$0xff] }
 0x2ee   : > { %v12312_v52 = vsel %vm3258_vm12, %v3257_v8, 0  ;;  %v2555_v4 = vsel %vm2551_vm7, %v2535_v18, %v2538_v57  ;;  %v2562_v60 = vsel %vm2552_vm1, %v2559_v12, %v2561_v11  ;;  %v2566_v19 = vsel %vm2552_vm1, %v2563_v6, %v2565_v25  ;;  %v4093_v6 = vld [vmem:[%s12187_s20 + $0x70] sm:$0xff] }
 0x2ef   : > { %v2478_v62 = vshll.u32 %v2477_v2, 30  ;;  %v2557_v46 = vsel %vm2553_vm4, %v2541_v35, %v2556_v45  ;;  %v12323_v47 = vmul.u32.u64.low %v2567_v59, %v2566_v19  ;;  %v12324_v33 = vmul.u32.u64.high %v2567_v59, %v2566_v19, %v12323_v47  ;;  %8849 = vmatmul.mubr.msk.f32.gmra.mrb[8].mxu1 %vm4297_vm5, %v4088_v21  ;;  %v4090_v35 = vld [vmem:[%s12187_s20 + $0x58] sm:$0xff] }
 0x2f0   : > { %v12327_v8 = vshrl.u32 %v15839_v37, 5  ;;  %v12330_v34 = vsub.s32 32, %v12229_v29  ;;  %v12333_v30 = vmul.u32.u64.low %v2567_v59, %v2562_v60  ;;  %v12334_v1 = vmul.u32.u64.high %v2567_v59, %v2562_v60, %v12333_v30  ;;  %8851 = vmatprep.mubr.msk.f32.mxu1 %vm4297_vm5, %v4089_v54  ;;  %v4094_v60 = vld [vmem:[%s12187_s20 + $0x78] sm:$0xff] }
 0x2f1   : > { %v12338_v50 = vshrl.u32 %v15841_v42, 5  ;;  %v12341_v57 = vsub.s32 32, %v12251_v3  ;;  %v12345_v37 = vsub.s32 %v2475_v32, %v2478_v62  ;;  %v2501_v51 = vsub.s32 4, %v2477_v2  ;;  %v4091_v42 = vld [vmem:[%s12187_s20 + $0x60] sm:$0xff] }
 0x2f2   : > { %v12348_v41 = vand.u32 31, %v12312_v52  ;;  %v12350_v56 = vshrl.u32 %v3562_v20, 23  ;;  %v12353_v26 = vadd.f32 1.5707964, %v10711_v48  ;;  %v2558_v40 = vsel %vm2552_vm1, %v2555_v4, %v2557_v46 }
 0x2f3   : > { %vm2417_vm3 = vcmp.lt.s32.totalorder %v15825_v44, 0  ;;  %v2481_v10 = vsub.s32 0, %v12345_v37  ;;  %vm2576_vm13 = vc.u32 %v12324_v33, %v12333_v30  ;;  %v2623_v32 = vand.u32 2147483647, %v15846_v24  ;;  %8852 = vmatmul.mubr.msk.f32.gmra.mrb[10].mxu1 %vm4297_vm5, %v4090_v35 }
 0x2f4   : > { %vm12366_vm11 = vcmp.le.f32.partialorder %v2415_v22, 0.7853982  ;;  %v2471_v20 = vadd.s32 %v12246_v55, %v12256_v31  ;;  %v2577_v53 = vadd.s32 1, %v12334_v1  ;;  %8854 = vmatprep.mubr.msk.f32.mxu1 %vm4297_vm5, %v4091_v42  ;;  %v2502_v61 = vsel %vm2417_vm3, %v2501_v51, %v2477_v2  ;;  %v15850_v31 = vld [vmem:[#allocation38_spill] sm:$0xff] }
 0x2f5   : > { %v8157_v17 = vmin.u32 %v2481_v10, %v12345_v37  ;;  %v2574_v22 = vmul.u32 %v2567_v59, %v2558_v40  ;;  %v2644_v12 = vshrl.u32 %v15833_v43, %v15849_v36  ;;  %v2640_v18 = vshll.u32 %v15830_v13, %v15850_v31 }
 0x2f6   : > { %v2578_v55 = vsel %vm2576_vm13, %v2577_v53, %v12334_v1  ;;  %v2647_v45 = vshrl.u32 %v15834_v58, %v15849_v36  ;;  %v2650_v16 = vshrl.u32 %v15835_v63, %v15849_v36  ;;  %vm2521_vm2 = vcmp.lt.s32.totalorder %v15840_v39, 0  ;;  %v15851_v53 = vld [vmem:[#allocation49_spill] sm:$0xff] }
 0x2f7   : > { %v2483_v27 = vclz %v8157_v17  ;;  %v2630_v21 = vand.u32 8388607, %v2623_v32  ;;  %v2639_v2 = vshrl.u32 %v15830_v13, %v15849_v36  ;;  %v2643_v11 = vshll.u32 %v15827_v0, %v15850_v31  ;;  %8855 = vmatmul.mubr.msk.f32.gmra.mrb[12].mxu1 %vm4297_vm5, %v4092_v14 }
 0x2f8   : > { %v2579_v25 = vadd.s32 %v2578_v55, %v2574_v22  ;;  %v2642_v59 = vor.u32 %v2641_v28, %v2640_v18  ;;  %v2646_v54 = vshll.u32 %v15833_v43, %v15850_v31  ;;  %v2649_v4 = vshll.u32 %v15834_v58, %v15850_v31  ;;  %8857 = vmatprep.mubr.msk.f32.mxu1 %vm4297_vm5, %v4093_v6 }
 0x2f9   : > { %v8158_v19 = vadd.s32 4294967294, %v2483_v27  ;;  %v2645_v62 = vor.u32 %v2644_v12, %v2643_v11  ;;  %v2652_v46 = vshll.u32 %v15835_v63, %v15850_v31  ;;  %v2653_v47 = vshrl.u32 %v15837_v9, %v15849_v36 }
 0x2fa   : > { %v2504_v1 = vsel %vm12366_vm11, 0, %v2502_v61  ;;  %v2580_v35 = vadd.s32 536870912, %v2579_v25  ;;  %v2648_v51 = vor.u32 %v2647_v45, %v2646_v54  ;;  %v2651_v42 = vor.u32 %v2650_v16, %v2649_v4 }
 0x2fb   : > { %vm8159_vm10 = vcmp.lt.s32.totalorder %v8158_v19, 0  ;;  %v2631_v40 = vor.u32 8388608, %v2630_v21  ;;  %v2654_v10 = vor.u32 %v2653_v47, %v2652_v46  ;;  %vm2655_vm8 = vcmp.lt.s32.totalorder %v15851_v53, 1  ;;  %8858 = vmatmul.mubr.msk.f32.gmra.mrb[14].mxu1 %vm4297_vm5, %v4094_v60 }
 0x2fc   : > { %v2486_v28 = vsel %vm8159_vm10, 0, %v8158_v19  ;;  %v2581_v14 = vshrl.u32 %v2580_v35, 30  ;;  %vm2657_vm14 = vcmp.lt.s32.totalorder %v15851_v53, 3  ;;  %vm2658_vm6 = vcmp.lt.s32.totalorder %v15851_v53, 4 }
 0x2fd   : > { %v2487_v36 = vsub.s32 32, %v2486_v28  ;;  %v2488_v17 = vshll.u32 %v12345_v37, %v2486_v28  ;;  %v2491_v61 = vsub.s32 4294967266, %v2486_v28  ;;  %v2663_v22 = vsel %vm2655_vm8, %v2642_v59, %v2645_v62 }
 0x2fe   : > { %v2582_v12 = vshll.u32 %v2581_v14, 30  ;;  %v2605_v6 = vsub.s32 4, %v2581_v14  ;;  %v2664_v55 = vsel %vm2658_vm6, %v2651_v42, 920167782  ;;  %v2667_v31 = vsel %vm2655_vm8, %v2645_v62, %v2648_v51 }
 0x2ff   : > { %v2489_v18 = vshrl.u32 %v2471_v20, %v2487_v36  ;;  %v2492_v45 = vadd.s32 127, %v2491_v61  ;;  %v2665_v16 = vsel %vm2657_vm14, %v2648_v51, %v2664_v55  ;;  %v2668_v37 = vsel %vm2658_vm6, %v2654_v10, 1326507024 }
 0x300   : > { %v12425_v27 = vsub.s32 %v2579_v25, %v2582_v12  ;;  %v2606_v21 = vsel %vm2521_vm2, %v2605_v6, %v2581_v14  ;;  %vm2656_vm5 = vcmp.lt.s32.totalorder %v15851_v53, 2  ;;  %v2669_v11 = vsel %vm2657_vm14, %v2651_v42, %v2668_v37 }
 0x301   : > { %v2490_v54 = vor.u32 %v2489_v18, %v2488_v17  ;;  %v2493_v4 = vshll.u32 %v2492_v45, 23  ;;  %v2660_v20 = vsel %vm2658_vm6, %v2648_v51, 2102212464  ;;  %v2670_v60 = vsel %vm2656_vm5, %v2667_v31, %v2669_v11 }
 0x302   : > { %vm12438_vm9 = vcmp.le.f32.partialorder %v2519_v23, 0.7853982  ;;  %v2585_v19 = vsub.s32 0, %v12425_v27  ;;  %v2666_v46 = vsel %vm2656_vm5, %v2663_v22, %v2665_v16  ;;  %v2671_v47 = vshll.u32 %v2631_v40, 8 }
 0x303   : > { %v2494_v35 = vor.u32 4788187, %v2493_v4  ;;  %v2508_v42 = vadd.s32 3, %v2504_v1  ;;  %v2608_v51 = vsel %vm12438_vm9, 0, %v2606_v21  ;;  %v2659_v10 = vsel %vm2655_vm8, %v2639_v2, %v2642_v59  ;;  %v15854_v2 = vld [vmem:[#allocation18_spill] sm:$0xff] }
 0x304   : > { %v8161_v28 = vmin.u32 %v2585_v19, %v12425_v27  ;;  %v2661_v23 = vsel %vm2657_vm14, %v2645_v62, %v2660_v20  ;;  %v12452_v14 = vmul.u32.u64.low %v2671_v47, %v2670_v60  ;;  %v12453_v36 = vmul.u32.u64.high %v2671_v47, %v2670_v60, %v12452_v14  ;;  %v15855_v19 = vld [vmem:[#allocation25_spill] sm:$0xff] }
 0x305   : > { %v2495_v17 = vand.u32 2147483647, %v2494_v35  ;;  %v2497_v61 = vcvt.s32.f32 %v2490_v54  ;;  %v12455_v22 = vmul.u32.u64.low %v2671_v47, %v2666_v46  ;;  %v12456_v40 = vmul.u32.u64.high %v2671_v47, %v2666_v46, %v12455_v22 }
 0x306   : > { %v12460_v1 = vshrl.u32 %v12312_v52, 5  ;;  %v2587_v12 = vclz %v8161_v28  ;;  %v2612_v6 = vadd.s32 3, %v2608_v51  ;;  %v2727_v59 = vand.u32 2147483647, %v15854_v2 }
 0x307   : > { %v12464_v55 = vsub.s32 32, %v12348_v41  ;;  %v12467_v62 = vadd.s32 4294967169, %v12350_v56  ;;  %v2498_v31 = vmul.f32 %v2497_v61, %v2495_v17  ;;  %v2662_v18 = vsel %vm2656_vm5, %v2659_v10, %v2661_v23 }
 0x308   : > { %v3458_v45 = vand.u32 2139095040, %v12353_v26  ;;  %v12473_v16 = vadd.f32 1.5707964, %v15813_v38  ;;  %v8162_v52 = vadd.s32 4294967294, %v2587_v12  ;;  %vm2680_vm15 = vc.u32 %v12453_v36, %v12455_v22 }
 0x309   : > { %v2499_v37 = vxor.u32 2147483648, %v2498_v31  ;;  %v12477_v21 = vand.u32 3, %v2508_v42  ;;  %v2575_v56 = vadd.s32 %v12333_v30, %v12324_v33  ;;  %v2681_v11 = vadd.s32 1, %v12456_v40 }
 0x30a   : > { %vm8163_vm12 = vcmp.lt.s32.totalorder %v8162_v52, 0  ;;  %v12482_v53 = vand.u32 3, %v2612_v6  ;;  %v2678_v54 = vmul.u32 %v2671_v47, %v2662_v18  ;;  %v12486_v38 = vand.u32 8388607, %v2727_v59  ;;  %v15856_v47 = vld [vmem:[#allocation31_spill] sm:$0xff] }
 0x30b   : > { %v2500_v4 = vsel %vm2417_vm3, %v2499_v37, %v2498_v31  ;;  %v2590_v20 = vsel %vm8163_vm12, 0, %v8162_v52  ;;  %v2682_v60 = vsel %vm2680_vm15, %v2681_v11, %v12456_v40  ;;  %v2744_v46 = vshll.u32 %v15830_v13, %v15855_v19 }
 0x30c   : > { %v2503_v33 = vsel %vm12366_vm11, %v15825_v44, %v2500_v4  ;;  %v2591_v30 = vsub.s32 32, %v2590_v20  ;;  %v2595_v35 = vsub.s32 4294967266, %v2590_v20  ;;  %v2745_v42 = vshrl.u32 %v15827_v0, %v15856_v47 }
 0x30d   : > { %9667 = vcosq.f32 %v2503_v33  ;;  %v2592_v51 = vshll.u32 %v12425_v27, %v2590_v20  ;;  %vm2625_vm7 = vcmp.lt.s32.totalorder %v15846_v24, 0  ;;  %v2683_v10 = vadd.s32 %v2682_v60, %v2678_v54 }
 0x30e   : > { %v2748_v28 = vshrl.u32 %v15833_v43, %v15856_v47  ;;  %9669 = vsinq.f32 %v2503_v33  ;;  %v2593_v23 = vshrl.u32 %v2575_v56, %v2591_v30  ;;  %v2596_v14 = vadd.s32 127, %v2595_v35 }
 0x30f   : > { %v2751_v48 = vshrl.u32 %v15834_v58, %v15856_v47  ;;  %v2684_v17 = vadd.s32 536870912, %v2683_v10  ;;  %v2747_v61 = vshll.u32 %v15827_v0, %v15855_v19  ;;  %v2753_v40 = vshll.u32 %v15834_v58, %v15855_v19 }
 0x310   : > { %v2754_v27 = vshrl.u32 %v15835_v63, %v15856_v47  ;;  %v2594_v12 = vor.u32 %v2593_v23, %v2592_v51  ;;  %v2597_v6 = vshll.u32 %v2596_v14, 23  ;;  %vm12512_vm1 = vcmp.le.f32.partialorder %v2623_v32, 0.7853982  ;;  %v15859_v51 = vld [vmem:[#allocation30_spill] sm:$0xff] }
 0x311   : > { %v2750_v18 = vshll.u32 %v15833_v43, %v15855_v19  ;;  %v2757_v52 = vshrl.u32 %v15837_v9, %v15856_v47  ;;  %vm2514_vm4 = vcmp.eq.s32.totalorder %v12477_v21, 2  ;;  %v2685_v37 = vshrl.u32 %v2684_v17, 30 }
 0x312   : > { %v2743_v56 = vshrl.u32 %v15830_v13, %v15856_v47  ;;  %v2755_v11 = vor.u32 %v2754_v27, %v2753_v40  ;;  %v2756_v54 = vshll.u32 %v15835_v63, %v15855_v19  ;;  %vm2511_vm0 = vcmp.eq.s32.totalorder %v12477_v21, 0 }
 0x313   : > { %v2598_v32 = vor.u32 4788187, %v2597_v6  ;;  %v2746_v4 = vor.u32 %v2745_v42, %v2744_v46  ;;  %v2749_v20 = vor.u32 %v2748_v28, %v2747_v61  ;;  %v2752_v60 = vor.u32 %v2751_v48, %v2750_v18 }
 0x314   : > { %vm2510_vm3 = vcmp.lt.s32.totalorder %v12477_v21, 2  ;;  %v2686_v33 = vshll.u32 %v2685_v37, 30  ;;  %v2709_v30 = vsub.s32 4, %v2685_v37  ;;  %v2758_v35 = vor.u32 %v2757_v52, %v2756_v54 }
 0x315   : > { %vm2762_vm13 = vcmp.lt.s32.totalorder %v15859_v51, 4  ;;  %vm2507_vm11 = vweird.f32 %v15825_v44  ;;  %v2599_v47 = vand.u32 2147483647, %v2598_v32  ;;  %v2601_v23 = vcvt.s32.f32 %v2594_v12 }
 0x316   : > { %v2735_v14 = vor.u32 8388608, %v12486_v38  ;;  %v2768_v19 = vsel %vm2762_vm13, %v2755_v11, 920167782  ;;  %v12532_v17 = vsub.s32 %v2683_v10, %v2686_v33  ;;  %vm2759_vm10 = vcmp.lt.s32.totalorder %v15859_v51, 1 }
 0x317   : > { %vm2760_vm8 = vcmp.lt.s32.totalorder %v15859_v51, 2  ;;  %vm2761_vm14 = vcmp.lt.s32.totalorder %v15859_v51, 3  ;;  %v2602_v46 = vmul.f32 %v2601_v23, %v2599_v47  ;;  %v2710_v42 = vsel %vm2625_vm7, %v2709_v30, %v2685_v37  ;;  %v9668_v48 = vpop.eup %9667 }
 0x318   : > { %v2764_v28 = vsel %vm2762_vm13, %v2752_v60, 2102212464  ;;  %v2771_v38 = vsel %vm2759_vm10, %v2749_v20, %v2752_v60  ;;  %v2689_v10 = vsub.s32 0, %v12532_v17  ;;  %v2767_v61 = vsel %vm2759_vm10, %v2746_v4, %v2749_v20  ;;  %v9670_v12 = vpop.eup %9669 }
 0x319   : > { %v2769_v40 = vsel %vm2761_vm14, %v2752_v60, %v2768_v19  ;;  %v2772_v27 = vsel %vm2762_vm13, %v2758_v35, 1326507024  ;;  %v2515_v6 = vxor.u32 2147483648, %v9668_v48  ;;  %v2603_v18 = vxor.u32 2147483648, %v2602_v46 }
 0x31a   : > { %v2773_v52 = vsel %vm2761_vm14, %v2755_v11, %v2772_v27  ;;  %v2775_v37 = vshll.u32 %v2735_v14, 8  ;;  %v2512_v54 = vxor.u32 2147483648, %v9670_v12  ;;  %v8165_v32 = vmin.u32 %v2689_v10, %v12532_v17 }
 0x31b   : > { %v2712_v33 = vsel %vm12512_vm1, 0, %v2710_v42  ;;  %v2774_v30 = vsel %vm2760_vm8, %v2771_v38, %v2773_v52  ;;  %v2516_v60 = vsel %vm2514_vm4, %v2515_v6, %v9670_v12  ;;  %v2604_v35 = vsel %vm2521_vm2, %v2603_v18, %v2602_v46  ;;  %v15862_v12 = vld [vmem:[#allocation62_spill] sm:$0xff] }
 0x31c   : > { %v12561_v47 = vmul.u32.u64.low %v2775_v37, %v2774_v30  ;;  %v12562_v23 = vmul.u32.u64.high %v2775_v37, %v2774_v30, %v12561_v47  ;;  %v2513_v11 = vsel %vm2511_vm0, %v9668_v48, %v2512_v54  ;;  %v2607_v14 = vsel %vm12438_vm9, %v15840_v39, %v2604_v35 }
 0x31d   : > { %v2691_v19 = vclz %v8165_v32  ;;  %v2770_v42 = vsel %vm2760_vm8, %v2767_v61, %v2769_v40  ;;  %v2517_v38 = vsel %vm2510_vm3, %v2513_v11, %v2516_v60  ;;  %9671 = vcosq.f32 %v2607_v14 }
 0x31e   : > { %v2763_v46 = vsel %vm2759_vm10, %v2743_v56, %v2746_v4  ;;  %v2765_v10 = vsel %vm2761_vm14, %v2749_v20, %v2764_v28  ;;  %v12578_v48 = vadd.s32 1, %v12467_v62  ;;  %v2518_v25 = vsel %vm2507_vm11, nan, %v2517_v38  ;;  %v15861_v62 = vld [vmem:[#allocation39_spill] sm:$0xff] }
 0x31f   : > { %9673 = vsinq.f32 %v2607_v14  ;;  %v8166_v27 = vadd.s32 4294967294, %v2691_v19  ;;  %v12584_v61 = vshrl.u32 %v3458_v45, 23  ;;  %vm15860_vm2 = vcmask 121856  }
 0x320   : > { %8864 = vmatprep.mubr.msk.f32.mxu1 %vm15860_vm2, %v2518_v25  ;;  %v2716_v21 = vadd.s32 3, %v2712_v33  ;;  %v12587_v40 = vmul.u32.u64.low %v2775_v37, %v2770_v42  ;;  %v12588_v56 = vmul.u32.u64.high %v2775_v37, %v2770_v42, %v12587_v40  ;;  %v2766_v44 = vsel %vm2760_vm8, %v2763_v46, %v2765_v10  ;;  %v15863_v33 = vld [vmem:[#allocation55_spill] sm:$0xff]  ;;  %vm15865_vm10 = vmmov %vm15860_vm2 }
 0x321   : > { %vm8167_vm6 = vcmp.lt.s32.totalorder %v8166_v27, 0  ;;  %v15570_v20 = vand.u32 2147483647, %v15861_v62  ;;  %v12596_v28 = vadd.f32 1.5707964, %v15807_v49  ;;  %vm2618_vm5 = vcmp.eq.s32.totalorder %v12482_v53, 2 }
 0x322   : > { %v2694_v45 = vsel %vm8167_vm6, 0, %v8166_v27  ;;  %v2849_v6 = vshrl.u32 %v15827_v0, %v15862_v12  ;;  %vm2615_vm9 = vcmp.eq.s32.totalorder %v12482_v53, 0  ;;  %v2679_v18 = vadd.s32 %v12455_v22, %v12453_v36 }
 0x323   : > { %v2695_v52 = vsub.s32 32, %v2694_v45  ;;  %v2699_v54 = vsub.s32 4294967266, %v2694_v45  ;;  %vm2784_vm15 = vc.u32 %v12562_v23, %v12587_v40  ;;  %vm2614_vm12 = vcmp.lt.s32.totalorder %v12482_v53, 2 }
 0x324   : > { %v12607_v49 = vand.u32 3, %v2716_v21  ;;  %v2782_v51 = vmul.u32 %v2775_v37, %v2766_v44  ;;  %v2785_v32 = vadd.s32 1, %v12588_v56  ;;  %v2848_v30 = vshll.u32 %v15830_v13, %v15863_v33 }
 0x325   : > { %vm2611_vm4 = vweird.f32 %v15840_v39  ;;  %v2696_v60 = vshll.u32 %v12532_v17, %v2694_v45  ;;  %v2697_v36 = vshrl.u32 %v2679_v18, %v2695_v52  ;;  %v2700_v22 = vadd.s32 127, %v2699_v54 }
 0x326   : > { %v2838_v35 = vand.u32 8388607, %v15570_v20  ;;  %v2786_v47 = vsel %vm2784_vm15, %v2785_v32, %v12588_v56  ;;  %v2847_v11 = vshrl.u32 %v15830_v13, %v15862_v12  ;;  %v2850_v37 = vor.u32 %v2849_v6, %v2848_v30 }
 0x327   : > { %v2851_v14 = vshll.u32 %v15827_v0, %v15863_v33  ;;  %v2698_v19 = vor.u32 %v2697_v36, %v2696_v60  ;;  %v2701_v42 = vshll.u32 %v2700_v22, 23  ;;  %v2787_v38 = vadd.s32 %v2786_v47, %v2782_v51  ;;  %v9672_v46 = vpop.eup %9671 }
 0x328   : > { %v2858_v17 = vshrl.u32 %v15835_v63, %v15862_v12  ;;  %v2852_v10 = vshrl.u32 %v15833_v43, %v15862_v12  ;;  %v2855_v25 = vshrl.u32 %v15834_v58, %v15862_v12  ;;  %v2857_v27 = vshll.u32 %v15834_v58, %v15863_v33 }
 0x329   : > { %v2861_v21 = vshrl.u32 %v15837_v9, %v15862_v12  ;;  %v9674_v56 = vpop.eup %9673  ;;  %v2619_v44 = vxor.u32 2147483648, %v9672_v46  ;;  %v2702_v45 = vor.u32 4788187, %v2701_v42  ;;  %vm2729_vm0 = vcmp.lt.s32.totalorder %v15854_v2, 0 }
 0x32a   : > { %v2788_v6 = vadd.s32 536870912, %v2787_v38  ;;  %v2839_v18 = vor.u32 8388608, %v2838_v35  ;;  %vm3570_vm3 = vcmp.gt.s32.totalorder %v12578_v48, 0  ;;  %v2616_v52 = vxor.u32 2147483648, %v9674_v56 }
 0x32b   : > { %v2854_v54 = vshll.u32 %v15833_v43, %v15863_v33  ;;  %v2859_v51 = vor.u32 %v2858_v17, %v2857_v27  ;;  %v2860_v32 = vshll.u32 %v15835_v63, %v15863_v33  ;;  %v2620_v12 = vsel %vm2618_vm5, %v2619_v44, %v9674_v56  ;;  %v15864_v27 = vld [vmem:[#allocation54_spill] sm:$0xff] }
 0x32c   : > { %v2703_v30 = vand.u32 2147483647, %v2702_v45  ;;  %v2705_v60 = vcvt.s32.f32 %v2698_v19  ;;  %v2789_v36 = vshrl.u32 %v2788_v6, 30  ;;  %v2617_v22 = vsel %vm2615_vm9, %v9672_v46, %v2616_v52 }
 0x32d   : > { %v2853_v35 = vor.u32 %v2852_v10, %v2851_v14  ;;  %v2856_v47 = vor.u32 %v2855_v25, %v2854_v54  ;;  %v2862_v42 = vor.u32 %v2861_v21, %v2860_v32  ;;  %v2621_v20 = vsel %vm2614_vm12, %v2617_v22, %v2620_v12 }
 0x32e   : > { %v2706_v4 = vmul.f32 %v2705_v60, %v2703_v30  ;;  %v2790_v17 = vshll.u32 %v2789_v36, 30  ;;  %vm2866_vm13 = vcmp.lt.s32.totalorder %v15864_v27, 4  ;;  %v2622_v33 = vsel %vm2611_vm4, nan, %v2621_v20 }
 0x32f   : > { %v2813_v56 = vsub.s32 4, %v2789_v36  ;;  %vm2863_vm11 = vcmp.lt.s32.totalorder %v15864_v27, 1  ;;  %v2872_v19 = vsel %vm2866_vm13, %v2859_v51, 920167782  ;;  %8865 = vmatmul.mubr.msk.f32.vlgmr.msra.gmra.mrb[0].mxu1 %vm15865_vm10, %v2622_v33  ;;  %vm2864_vm8 = vcmp.lt.s32.totalorder %v15864_v27, 2  ;;  %v15870_v33 = vld [vmem:[#allocation53_spill] sm:$0xff] }
 0x330   : > { %v2707_v14 = vxor.u32 2147483648, %v2706_v4  ;;  %v12650_v46 = vsub.s32 %v2787_v38, %v2790_v17  ;;  %vm2865_vm14 = vcmp.lt.s32.totalorder %v15864_v27, 3  ;;  %v2871_v53 = vsel %vm2863_vm11, %v2850_v37, %v2853_v35  ;;  %v15871_v27 = vld [vmem:[#allocation50_spill] sm:$0xff] }
 0x331   : > { %v2873_v39 = vsel %vm2865_vm14, %v2856_v47, %v2872_v19  ;;  %v2875_v20 = vsel %vm2863_vm11, %v2853_v35, %v2856_v47  ;;  %v2876_v10 = vsel %vm2866_vm13, %v2862_v42, 1326507024  ;;  %v2867_v44 = vsel %vm2863_vm11, %v2847_v11, %v2850_v37 }
 0x332   : > { %v2708_v25 = vsel %vm2625_vm7, %v2707_v14, %v2706_v4  ;;  %v2793_v21 = vsub.s32 0, %v12650_v46  ;;  %v2868_v38 = vsel %vm2866_vm13, %v2856_v47, 2102212464  ;;  %v2814_v6 = vsel %vm2729_vm0, %v2813_v56, %v2789_v36 }
 0x333   : > { %v2711_v45 = vsel %vm12512_vm1, %v15846_v24, %v2708_v25  ;;  %v2877_v52 = vsel %vm2865_vm14, %v2859_v51, %v2876_v10  ;;  %v2879_v54 = vshll.u32 %v2839_v18, 8  ;;  %v2874_v11 = vsel %vm2864_vm8, %v2871_v53, %v2873_v39 }
 0x334   : > { %9675 = vcosq.f32 %v2711_v45  ;;  %v8169_v4 = vmin.u32 %v2793_v21, %v12650_v46  ;;  %v2878_v37 = vsel %vm2864_vm8, %v2875_v20, %v2877_v52  ;;  %v2869_v31 = vsel %vm2865_vm14, %v2853_v35, %v2868_v38 }
 0x335   : > { %9677 = vsinq.f32 %v2711_v45  ;;  %v12677_v32 = vmul.u32.u64.low %v2879_v54, %v2878_v37  ;;  %v12678_v12 = vmul.u32.u64.high %v2879_v54, %v2878_v37, %v12677_v32  ;;  %v12683_v18 = vsel %vm3570_vm3, %v12578_v48, 0  ;;  %vm15873_vm3 = vmmov %vm15865_vm10 }
 0x336   : > { %v12686_v51 = vadd.s32 4294967169, %v12584_v61  ;;  %vm12690_vm7 = vcmp.le.f32.partialorder %v2727_v59, 0.7853982  ;;  %v2795_v60 = vclz %v8169_v4  ;;  %v15868_v36 = vand.u32 2139095040, %v12473_v16  ;;  %v15869_v59 = vld [vmem:[#allocation34_spill] sm:$0xff] }
 0x337   : > { %v2816_v35 = vsel %vm12690_vm7, 0, %v2814_v6  ;;  %v12700_v47 = vmul.u32.u64.low %v2879_v54, %v2874_v11  ;;  %v12701_v48 = vmul.u32.u64.high %v2879_v54, %v2874_v11, %v12700_v47  ;;  %v2870_v42 = vsel %vm2864_vm8, %v2867_v44, %v2869_v31 }
 0x338   : > { %v12696_v22 = vshrl.u32 %v15868_v36, 23  ;;  %v8170_v61 = vadd.s32 4294967294, %v2795_v60  ;;  %v15571_v17 = vand.u32 2147483647, %v15869_v59  ;;  %v2953_v56 = vshrl.u32 %v15827_v0, %v15870_v33 }
 0x339   : > { %v3666_v19 = vand.u32 2139095040, %v12596_v28  ;;  %vm2719_vm1 = vcmp.eq.s32.totalorder %v12607_v49, 0  ;;  %vm2722_vm2 = vcmp.eq.s32.totalorder %v12607_v49, 2  ;;  %v2783_v14 = vadd.s32 %v12587_v40, %v12562_v23 }
 0x33a   : > { %vm2718_vm6 = vcmp.lt.s32.totalorder %v12607_v49, 2  ;;  %vm8171_vm5 = vcmp.lt.s32.totalorder %v8170_v61, 0  ;;  %v12715_v53 = vadd.s32 3, %v2816_v35  ;;  %vm2888_vm9 = vc.u32 %v12678_v12, %v12700_v47 }
 0x33b   : > { %v2952_v39 = vshll.u32 %v15830_v13, %v15871_v27  ;;  %vm2715_vm15 = vweird.f32 %v15846_v24  ;;  %v2798_v20 = vsel %vm8171_vm5, 0, %v8170_v61  ;;  %v2886_v10 = vmul.u32 %v2879_v54, %v2870_v42 }
 0x33c   : > { %v2889_v25 = vadd.s32 1, %v12701_v48  ;;  %v2951_v23 = vshrl.u32 %v15830_v13, %v15870_v33  ;;  %v2799_v40 = vsub.s32 32, %v2798_v20  ;;  %v2803_v21 = vsub.s32 4294967266, %v2798_v20 }
 0x33d   : > { %v2942_v44 = vand.u32 8388607, %v15571_v17  ;;  %v2954_v38 = vor.u32 %v2953_v56, %v2952_v39  ;;  %v2955_v6 = vshll.u32 %v15827_v0, %v15871_v27  ;;  %v2956_v52 = vshrl.u32 %v15833_v43, %v15870_v33 }
 0x33e   : > { %v2890_v45 = vsel %vm2888_vm9, %v2889_v25, %v12701_v48  ;;  %v2962_v54 = vshrl.u32 %v15835_v63, %v15870_v33  ;;  %v9676_v4 = vpop.eup %9675  ;;  %v2800_v11 = vshll.u32 %v12650_v46, %v2798_v20  ;;  %v2801_v37 = vshrl.u32 %v2783_v14, %v2799_v40 }
 0x33f   : > { %v2804_v31 = vadd.s32 127, %v2803_v21  ;;  %v2891_v32 = vadd.s32 %v2890_v45, %v2886_v10  ;;  %v9678_v60 = vpop.eup %9677  ;;  %v2723_v36 = vxor.u32 2147483648, %v9676_v4  ;;  %v2959_v35 = vshrl.u32 %v15834_v58, %v15870_v33 }
 0x340   : > { %v2961_v48 = vshll.u32 %v15834_v58, %v15871_v27  ;;  %v2965_v61 = vshrl.u32 %v15837_v9, %v15870_v33  ;;  %v2720_v42 = vxor.u32 2147483648, %v9678_v60  ;;  %v2802_v56 = vor.u32 %v2801_v37, %v2800_v11 }
 0x341   : > { %v2805_v39 = vshll.u32 %v2804_v31, 23  ;;  %vm2833_vm12 = vcmp.lt.s32.totalorder %v15861_v62, 0  ;;  %v2892_v46 = vadd.s32 536870912, %v2891_v32  ;;  %v2724_v14 = vsel %vm2722_vm2, %v2723_v36, %v9678_v60 }
 0x342   : > { %v2958_v20 = vshll.u32 %v15833_v43, %v15871_v27  ;;  %v2963_v10 = vor.u32 %v2962_v54, %v2961_v48  ;;  %v2964_v25 = vshll.u32 %v15835_v63, %v15871_v27  ;;  %v2721_v40 = vsel %vm2719_vm1, %v9676_v4, %v2720_v42  ;;  %v15872_v48 = vld [vmem:[#allocation52_spill] sm:$0xff] }
 0x343   : > { %v2806_v33 = vor.u32 4788187, %v2805_v39  ;;  %v2893_v21 = vshrl.u32 %v2892_v46, 30  ;;  %v2957_v45 = vor.u32 %v2956_v52, %v2955_v6  ;;  %v2725_v11 = vsel %vm2718_vm6, %v2721_v40, %v2724_v14 }
 0x344   : > { %v2809_v37 = vcvt.s32.f32 %v2802_v56  ;;  %v2960_v31 = vor.u32 %v2959_v35, %v2958_v20  ;;  %v2966_v17 = vor.u32 %v2965_v61, %v2964_v25  ;;  %v2726_v60 = vsel %vm2715_vm15, nan, %v2725_v11 }
 0x345   : > { %v2807_v36 = vand.u32 2147483647, %v2806_v33  ;;  %v2894_v54 = vshll.u32 %v2893_v21, 30  ;;  %vm2970_vm4 = vcmp.lt.s32.totalorder %v15872_v48, 4  ;;  %8867 = vmatprep.mubr.msk.f32.mxu1 %vm15873_vm3, %v2726_v60  ;;  %v2917_v27 = vsub.s32 4, %v2893_v21 }
 0x346   : > { %v2943_v4 = vor.u32 8388608, %v2942_v44  ;;  %vm2967_vm13 = vcmp.lt.s32.totalorder %v15872_v48, 1  ;;  %v2976_v49 = vsel %vm2970_vm4, %v2963_v10, 920167782  ;;  %vm2969_vm11 = vcmp.lt.s32.totalorder %v15872_v48, 3 }
 0x347   : > { %v2810_v6 = vmul.f32 %v2809_v37, %v2807_v36  ;;  %v12759_v52 = vsub.s32 %v2891_v32, %v2894_v54  ;;  %v2975_v24 = vsel %vm2967_vm13, %v2954_v38, %v2957_v45  ;;  %vm2968_vm10 = vcmp.lt.s32.totalorder %v15872_v48, 2 }
 0x348   : > { %v2977_v35 = vsel %vm2969_vm11, %v2960_v31, %v2976_v49  ;;  %v2979_v61 = vsel %vm2967_vm13, %v2957_v45, %v2960_v31  ;;  %v2980_v44 = vsel %vm2970_vm4, %v2966_v17, 1326507024  ;;  %v2971_v39 = vsel %vm2967_vm13, %v2951_v23, %v2954_v38  ;;  %v15874_v38 = vld [vmem:[#allocation58_spill] sm:$0xff] }
 0x349   : > { %v2811_v42 = vxor.u32 2147483648, %v2810_v6  ;;  %v2897_v56 = vsub.s32 0, %v12759_v52  ;;  %v2972_v32 = vsel %vm2970_vm4, %v2960_v31, 2102212464  ;;  %v2918_v46 = vsel %vm2833_vm12, %v2917_v27, %v2893_v21 }
 0x34a   : > { %v2978_v14 = vsel %vm2968_vm10, %v2975_v24, %v2977_v35  ;;  %v2981_v20 = vsel %vm2969_vm11, %v2963_v10, %v2980_v44  ;;  %v2983_v25 = vshll.u32 %v2943_v4, 8  ;;  %v15572_v33 = vand.u32 2147483647, %v15874_v38 }
 0x34b   : > { %v2812_v17 = vsel %vm2729_vm0, %v2811_v42, %v2810_v6  ;;  %v8173_v40 = vmin.u32 %v2897_v56, %v12759_v52  ;;  %v2982_v23 = vsel %vm2968_vm10, %v2979_v61, %v2981_v20  ;;  %v2973_v11 = vsel %vm2969_vm11, %v2957_v45, %v2972_v32 }
 0x34c   : > { %v2815_v21 = vsel %vm12690_vm7, %v15854_v2, %v2812_v17  ;;  %v12787_v37 = vmul.u32.u64.low %v2983_v25, %v2982_v23  ;;  %v12788_v10 = vmul.u32.u64.high %v2983_v25, %v2982_v23, %v12787_v37  ;;  %v12791_v31 = vand.u32 3, %v12715_v53 }
 0x34d   : > { %9679 = vcosq.f32 %v2815_v21  ;;  %v15875_v60 = vand.u32 2147483647, %v15861_v62  ;;  %v2899_v54 = vclz %v8173_v40  ;;  %v12806_v4 = vshrl.u32 %v12683_v18, 5 }
 0x34e   : > { %9681 = vsinq.f32 %v2815_v21  ;;  %v12801_v27 = vmul.u32.u64.low %v2983_v25, %v2978_v14  ;;  %v12802_v45 = vmul.u32.u64.high %v2983_v25, %v2978_v14, %v12801_v27  ;;  %v2974_v49 = vsel %vm2968_vm10, %v2971_v39, %v2973_v11 }
 0x34f   : > { %vm12795_vm0 = vcmp.le.f32.partialorder %v15875_v60, 0.7853982  ;;  %v8174_v53 = vadd.s32 4294967294, %v2899_v54  ;;  %v12812_v6 = vand.u32 8388607, %v15572_v33  ;;  %v12815_v24 = vand.u32 31, %v12683_v18 }
 0x350   : > { %v2920_v30 = vsel %vm12795_vm0, 0, %v2918_v46  ;;  %v12818_v35 = vadd.s32 1, %v12686_v51  ;;  %v12821_v61 = vadd.s32 4294967169, %v12696_v22  ;;  %v12825_v44 = vshrl.u32 %v3666_v19, 23 }
 0x351   : > { %vm2826_vm8 = vcmp.eq.s32.totalorder %v12791_v31, 2  ;;  %v2887_v48 = vadd.s32 %v12700_v47, %v12678_v12  ;;  %vm8175_vm14 = vcmp.lt.s32.totalorder %v8174_v53, 0  ;;  %v12830_v42 = vadd.s32 3, %v2920_v30 }
 0x352   : > { %vm2992_vm7 = vc.u32 %v12788_v10, %v12801_v27  ;;  %vm2823_vm1 = vcmp.eq.s32.totalorder %v12791_v31, 0  ;;  %v2902_v18 = vsel %vm8175_vm14, 0, %v8174_v53  ;;  %v2990_v51 = vmul.u32 %v2983_v25, %v2974_v49 }
 0x353   : > { %v2993_v22 = vadd.s32 1, %v12802_v45  ;;  %v3055_v19 = vshrl.u32 %v15830_v13, %v12330_v34  ;;  %vm2822_vm2 = vcmp.lt.s32.totalorder %v12791_v31, 2  ;;  %v2903_v56 = vsub.s32 32, %v2902_v18 }
 0x354   : > { %v2907_v39 = vsub.s32 4294967266, %v2902_v18  ;;  %v3047_v12 = vor.u32 8388608, %v12812_v6  ;;  %v3056_v47 = vshll.u32 %v15830_v13, %v12229_v29  ;;  %vm2819_vm6 = vweird.f32 %v15854_v2 }
 0x355   : > { %v2904_v32 = vshll.u32 %v12759_v52, %v2902_v18  ;;  %v2994_v46 = vsel %vm2992_vm7, %v2993_v22, %v12802_v45  ;;  %v3057_v14 = vshrl.u32 %v15827_v0, %v12330_v34  ;;  %v3063_v20 = vshrl.u32 %v15834_v58, %v12330_v34 }
 0x356   : > { %v2905_v25 = vshrl.u32 %v2887_v48, %v2903_v56  ;;  %v2908_v17 = vadd.s32 127, %v2907_v39  ;;  %v2995_v40 = vadd.s32 %v2994_v46, %v2990_v51  ;;  %v3066_v23 = vshrl.u32 %v15835_v63, %v12330_v34 }
 0x357   : > { %v3059_v21 = vshll.u32 %v15827_v0, %v12229_v29  ;;  %v3060_v52 = vshrl.u32 %v15833_v43, %v12330_v34  ;;  %v3065_v11 = vshll.u32 %v15834_v58, %v12229_v29  ;;  %v3069_v37 = vshrl.u32 %v15837_v9, %v12330_v34  ;;  %v9680_v60 = vpop.eup %9679 }
 0x358   : > { %v2906_v54 = vor.u32 %v2905_v25, %v2904_v32  ;;  %v2909_v30 = vshll.u32 %v2908_v17, 23  ;;  %v2996_v45 = vadd.s32 536870912, %v2995_v40  ;;  %v3062_v53 = vshll.u32 %v15833_v43, %v12229_v29  ;;  %v9682_v49 = vpop.eup %9681 }
 0x359   : > { %v2827_v6 = vxor.u32 2147483648, %v9680_v60  ;;  %v3058_v48 = vor.u32 %v3057_v14, %v3056_v47  ;;  %v3067_v18 = vor.u32 %v3066_v23, %v3065_v11  ;;  %v3068_v51 = vshll.u32 %v15835_v63, %v12229_v29 }
 0x35a   : > { %v2824_v22 = vxor.u32 2147483648, %v9682_v49  ;;  %v2910_v56 = vor.u32 4788187, %v2909_v30  ;;  %v2997_v39 = vshrl.u32 %v2996_v45, 30  ;;  %v3064_v46 = vor.u32 %v3063_v20, %v3062_v53 }
 0x35b   : > { %vm3466_vm5 = vcmp.gt.s32.totalorder %v12818_v35, 0  ;;  %v2828_v34 = vsel %vm2826_vm8, %v2827_v6, %v9682_v49  ;;  %v2913_v32 = vcvt.s32.f32 %v2906_v54  ;;  %v3061_v25 = vor.u32 %v3060_v52, %v3059_v21 }
 0x35c   : > { %v3070_v17 = vor.u32 %v3069_v37, %v3068_v51  ;;  %v2825_v33 = vsel %vm2823_vm1, %v9680_v60, %v2824_v22  ;;  %v2911_v47 = vand.u32 2147483647, %v2910_v56  ;;  %v2998_v14 = vshll.u32 %v2997_v39, 30 }
 0x35d   : > { %vm3074_vm9 = vcmp.lt.s32.totalorder %v12327_v8, 4  ;;  %v2829_v29 = vsel %vm2822_vm2, %v2825_v33, %v2828_v34  ;;  %vm3071_vm15 = vcmp.lt.s32.totalorder %v12327_v8, 1  ;;  %vm3073_vm4 = vcmp.lt.s32.totalorder %v12327_v8, 3 }
 0x35e   : > { %v3080_v20 = vsel %vm3074_vm9, %v3067_v18, 920167782  ;;  %v2830_v23 = vsel %vm2819_vm6, nan, %v2829_v29  ;;  %v2914_v21 = vmul.f32 %v2913_v32, %v2911_v47  ;;  %v12875_v52 = vsub.s32 %v2995_v40, %v2998_v14  ;;  %v15878_v14 = vld [vmem:[#allocation45_spill] sm:$0xff] }
 0x35f   : > { %v3076_v11 = vsel %vm3074_vm9, %v3064_v46, 2102212464  ;;  %8868 = vmatmul.mubr.msk.f32.gmra.mrb[2].mxu1 %vm15873_vm3, %v2830_v23  ;;  %v3079_v37 = vsel %vm3071_vm15, %v3058_v48, %v3061_v25  ;;  %v3081_v33 = vsel %vm3073_vm4, %v3064_v46, %v3080_v20  ;;  %v3083_v31 = vsel %vm3071_vm15, %v3061_v25, %v3064_v46 }
 0x360   : > { %v3084_v60 = vsel %vm3074_vm9, %v3070_v17, 1326507024  ;;  %v2915_v54 = vxor.u32 2147483648, %v2914_v21  ;;  %v3001_v2 = vsub.s32 0, %v12875_v52  ;;  %v3021_v30 = vsub.s32 4, %v2997_v39 }
 0x361   : > { %vm3072_vm13 = vcmp.lt.s32.totalorder %v12327_v8, 2  ;;  %v3075_v40 = vsel %vm3071_vm15, %v3055_v19, %v3058_v48  ;;  %v3077_v45 = vsel %vm3073_vm4, %v3061_v25, %v3076_v11  ;;  %v3085_v53 = vsel %vm3073_vm4, %v3067_v18, %v3084_v60 }
 0x362   : > { %v3087_v49 = vshll.u32 %v3047_v12, 8  ;;  %v2916_v6 = vsel %vm2833_vm12, %v2915_v54, %v2914_v21  ;;  %v8177_v51 = vmin.u32 %v3001_v2, %v12875_v52  ;;  %v3082_v22 = vsel %vm3072_vm13, %v3079_v37, %v3081_v33 }
 0x363   : > { %v3086_v56 = vsel %vm3072_vm13, %v3083_v31, %v3085_v53  ;;  %v2919_v19 = vsel %vm12795_vm0, %v15861_v62, %v2916_v6  ;;  %vm2937_vm11 = vcmp.lt.s32.totalorder %v15869_v59, 0  ;;  %v12907_v12 = vand.u32 3, %v12830_v42 }
 0x364   : > { %v12903_v48 = vmul.u32.u64.low %v3087_v49, %v3086_v56  ;;  %v12904_v18 = vmul.u32.u64.high %v3087_v49, %v3086_v56, %v12903_v48  ;;  %9683 = vcosq.f32 %v2919_v19  ;;  %v3003_v46 = vclz %v8177_v51 }
 0x365   : > { %v12911_v34 = vsel %vm2937_vm11, %v3021_v30, %v2997_v39  ;;  %9685 = vsinq.f32 %v2919_v19  ;;  %v3078_v32 = vsel %vm3072_vm13, %v3075_v40, %v3077_v45  ;;  %v12922_v17 = vsel %vm3466_vm5, %v12818_v35, 0  ;;  %v15882_v35 = vld [vmem:[#allocation66_spill] sm:$0xff] }
 0x366   : > { %v12915_v36 = vmul.u32.u64.low %v3087_v49, %v3082_v22  ;;  %v12916_v25 = vmul.u32.u64.high %v3087_v49, %v3082_v22, %v12915_v36  ;;  %v12925_v42 = vadd.s32 1, %v12821_v61  ;;  %v8178_v47 = vadd.s32 4294967294, %v3003_v46 }
 0x367   : > { %v3143_v39 = vand.u32 2147483647, %v15878_v14  ;;  %v12929_v29 = vadd.s32 4294967169, %v12825_v44  ;;  %v15879_v8 = vand.u32 2147483647, %v15869_v59  ;;  %v2991_v23 = vadd.s32 %v12801_v27, %v12788_v10  ;;  %v15883_v27 = vld [vmem:[#allocation64_spill] sm:$0xff] }
 0x368   : > { %v3161_v21 = vshrl.u32 %v15827_v0, %v15882_v35  ;;  %vm2930_vm10 = vcmp.eq.s32.totalorder %v12907_v12, 2  ;;  %vm8179_vm0 = vcmp.lt.s32.totalorder %v8178_v47, 0  ;;  %v3094_v44 = vmul.u32 %v3087_v49, %v3078_v32 }
 0x369   : > { %vm12933_vm12 = vcmp.le.f32.partialorder %v15879_v8, 0.7853982  ;;  %vm3096_vm8 = vc.u32 %v12904_v18, %v12915_v36  ;;  %vm2927_vm14 = vcmp.eq.s32.totalorder %v12907_v12, 0  ;;  %v3006_v11 = vsel %vm8179_vm0, 0, %v8178_v47 }
 0x36a   : > { %v3024_v61 = vsel %vm12933_vm12, 0, %v12911_v34  ;;  %v3097_v37 = vadd.s32 1, %v12916_v25  ;;  %v12951_v10 = vand.u32 8388607, %v3143_v39  ;;  %v3160_v33 = vshll.u32 %v15830_v13, %v15883_v27 }
 0x36b   : > { %vm2926_vm7 = vcmp.lt.s32.totalorder %v12907_v12, 2  ;;  %v3007_v31 = vsub.s32 32, %v3006_v11  ;;  %v3011_v60 = vsub.s32 4294967266, %v3006_v11  ;;  %v3159_v54 = vshrl.u32 %v15830_v13, %v15882_v35 }
 0x36c   : > { %v3163_v2 = vshll.u32 %v15827_v0, %v15883_v27  ;;  %vm2923_vm1 = vweird.f32 %v15861_v62  ;;  %v3008_v30 = vshll.u32 %v12875_v52, %v3006_v11  ;;  %v3098_v40 = vsel %vm3096_vm8, %v3097_v37, %v12916_v25 }
 0x36d   : > { %v3162_v45 = vor.u32 %v3161_v21, %v3160_v33  ;;  %v3164_v53 = vshrl.u32 %v15833_v43, %v15882_v35  ;;  %v3009_v49 = vshrl.u32 %v2991_v23, %v3007_v31  ;;  %v3012_v6 = vadd.s32 127, %v3011_v60 }
 0x36e   : > { %v3099_v51 = vadd.s32 %v3098_v40, %v3094_v44  ;;  %v3167_v22 = vshrl.u32 %v15834_v58, %v15882_v35  ;;  %v3151_v56 = vor.u32 8388608, %v12951_v10  ;;  %v3169_v19 = vshll.u32 %v15834_v58, %v15883_v27  ;;  %v9684_v46 = vpop.eup %9683 }
 0x36f   : > { %v3170_v52 = vshrl.u32 %v15835_v63, %v15882_v35  ;;  %v3173_v48 = vshrl.u32 %v15837_v9, %v15882_v35  ;;  %v3010_v34 = vor.u32 %v3009_v49, %v3008_v30  ;;  %v3013_v32 = vshll.u32 %v3012_v6, 23  ;;  %v9686_v8 = vpop.eup %9685 }
 0x370   : > { %vm3041_vm2 = vcmp.lt.s32.totalorder %v15874_v38, 0  ;;  %v3100_v25 = vadd.s32 536870912, %v3099_v51  ;;  %v3166_v47 = vshll.u32 %v15833_v43, %v15883_v27  ;;  %v2931_v23 = vxor.u32 2147483648, %v9684_v46 }
 0x371   : > { %v3165_v21 = vor.u32 %v3164_v53, %v3163_v2  ;;  %v3171_v44 = vor.u32 %v3170_v52, %v3169_v19  ;;  %v3172_v11 = vshll.u32 %v15835_v63, %v15883_v27  ;;  %v2928_v37 = vxor.u32 2147483648, %v9686_v8  ;;  %v15887_v2 = vld [vmem:[#allocation63_spill] sm:$0xff] }
 0x372   : > { %v3014_v10 = vor.u32 4788187, %v3013_v32  ;;  %v3101_v33 = vshrl.u32 %v3100_v25, 30  ;;  %v3168_v35 = vor.u32 %v3167_v22, %v3166_v47  ;;  %v2932_v31 = vsel %vm2930_vm10, %v2931_v23, %v9686_v8 }
 0x373   : > { %v3017_v60 = vcvt.s32.f32 %v3010_v34  ;;  %v15884_v30 = vand.u32 2147483647, %v15874_v38  ;;  %v3174_v49 = vor.u32 %v3173_v48, %v3172_v11  ;;  %vm3175_vm5 = vcmp.lt.s32.totalorder %v15887_v2, 1 }
 0x374   : > { %vm3778_vm9 = vcmp.gt.s32.totalorder %v12925_v42, 0  ;;  %v2929_v27 = vsel %vm2927_vm14, %v9684_v46, %v2928_v37  ;;  %v3015_v53 = vand.u32 2147483647, %v3014_v10  ;;  %v3102_v6 = vshll.u32 %v3101_v33, 30 }
 0x375   : > { %vm12983_vm6 = vcmp.le.f32.partialorder %v15884_v30, 0.7853982  ;;  %vm3178_vm15 = vcmp.lt.s32.totalorder %v15887_v2, 4  ;;  %v2933_v22 = vsel %vm2926_vm7, %v2929_v27, %v2932_v31  ;;  %v3125_v19 = vsub.s32 4, %v3101_v33 }
 0x376   : > { %vm3177_vm4 = vcmp.lt.s32.totalorder %v15887_v2, 3  ;;  %v3184_v52 = vsel %vm3178_vm15, %v3171_v44, 920167782  ;;  %v2934_v48 = vsel %vm2923_vm1, nan, %v2933_v22  ;;  %v3018_v34 = vmul.f32 %v3017_v60, %v3015_v53 }
 0x377   : > { %v12999_v32 = vsub.s32 %v3099_v51, %v3102_v6  ;;  %v3183_v46 = vsel %vm3175_vm5, %v3162_v45, %v3165_v21  ;;  %8870 = vmatprep.mubr.msk.f32.mxu1 %vm15873_vm3, %v2934_v48  ;;  %v3028_v25 = vadd.s32 3, %v3024_v61  ;;  %vm3176_vm13 = vcmp.lt.s32.totalorder %v15887_v2, 2 }
 0x378   : > { %v3180_v12 = vsel %vm3178_vm15, %v3168_v35, 2102212464  ;;  %v3185_v47 = vsel %vm3177_vm4, %v3168_v35, %v3184_v52  ;;  %v3019_v8 = vxor.u32 2147483648, %v3018_v34  ;;  %v3179_v51 = vsel %vm3175_vm5, %v3159_v54, %v3162_v45 }
 0x379   : > { %v3105_v62 = vsub.s32 0, %v12999_v32  ;;  %v3187_v23 = vsel %vm3175_vm5, %v3165_v21, %v3168_v35  ;;  %v3126_v61 = vsel %vm3041_vm2, %v3125_v19, %v3101_v33  ;;  %v3186_v11 = vsel %vm3176_vm13, %v3183_v46, %v3185_v47  ;;  %vm15891_vm5 = vmmov %vm15873_vm3 }
 0x37a   : > { %v3188_v37 = vsel %vm3178_vm15, %v3174_v49, 1326507024  ;;  %v3191_v10 = vshll.u32 %v3151_v56, 8  ;;  %v3020_v31 = vsel %vm2937_vm11, %v3019_v8, %v3018_v34  ;;  %v3181_v54 = vsel %vm3177_vm4, %v3165_v21, %v3180_v12 }
 0x37b   : > { %v8181_v60 = vmin.u32 %v3105_v62, %v12999_v32  ;;  %v3189_v45 = vsel %vm3177_vm4, %v3171_v44, %v3188_v37  ;;  %v3023_v33 = vsel %vm12933_vm12, %v15869_v59, %v3020_v31  ;;  %v13037_v49 = vadd.f32 1.5707964, %v11205_v15 }
 0x37c   : > { %v3190_v35 = vsel %vm3176_vm13, %v3187_v23, %v3189_v45  ;;  %v13032_v30 = vmul.u32.u64.low %v3191_v10, %v3186_v11  ;;  %v13033_v56 = vmul.u32.u64.high %v3191_v10, %v3186_v11, %v13032_v30  ;;  %9687 = vcosq.f32 %v3023_v33 }
 0x37d   : > { %v3107_v27 = vclz %v8181_v60  ;;  %v3128_v21 = vsel %vm12983_vm6, 0, %v3126_v61  ;;  %9689 = vsinq.f32 %v3023_v33  ;;  %v13041_v44 = vand.u32 3, %v3028_v25 }
 0x37e   : > { %v13043_v20 = vmul.u32.u64.low %v3191_v10, %v3190_v35  ;;  %v13044_v53 = vmul.u32.u64.high %v3191_v10, %v3190_v35, %v13043_v20  ;;  %v13047_v6 = vsub.s32 32, %v12815_v24  ;;  %v13050_v22 = vshrl.u32 %v12922_v17, 5 }
 0x37f   : > { %v8182_v19 = vadd.s32 4294967294, %v3107_v27  ;;  %v3182_v15 = vsel %vm3176_vm13, %v3179_v51, %v3181_v54  ;;  %v13055_v52 = vand.u32 31, %v12922_v17  ;;  %v13060_v48 = vsel %vm3778_vm9, %v12925_v42, 0  ;;  %v15888_v42 = vld [vmem:[#allocation71_spill] sm:$0xff] }
 0x380   : > { %v3132_v34 = vadd.s32 3, %v3128_v21  ;;  %v3201_v46 = vadd.s32 1, %v13033_v56  ;;  %v13064_v25 = vadd.s32 1, %v12929_v29  ;;  %v3874_v12 = vand.u32 2139095040, %v13037_v49 }
 0x381   : > { %v3095_v2 = vadd.s32 %v12915_v36, %v12904_v18  ;;  %vm8183_vm11 = vcmp.lt.s32.totalorder %v8182_v19, 0  ;;  %vm3031_vm12 = vcmp.eq.s32.totalorder %v13041_v44, 0  ;;  %v3198_v47 = vmul.u32 %v3191_v10, %v3182_v15 }
 0x382   : > { %v3110_v17 = vsel %vm8183_vm11, 0, %v8182_v19  ;;  %vm3200_vm10 = vc.u32 %v13044_v53, %v13032_v30  ;;  %v3247_v8 = vand.u32 2147483647, %v15888_v42  ;;  %vm3030_vm0 = vcmp.lt.s32.totalorder %v13041_v44, 2 }
 0x383   : > { %v3111_v62 = vsub.s32 32, %v3110_v17  ;;  %v3115_v29 = vsub.s32 4294967266, %v3110_v17  ;;  %v3202_v51 = vsel %vm3200_vm10, %v3201_v46, %v13033_v56  ;;  %v3265_v23 = vshrl.u32 %v15827_v0, %v12464_v55 }
 0x384   : > { %vm3027_vm8 = vweird.f32 %v15869_v59  ;;  %vm3034_vm14 = vcmp.eq.s32.totalorder %v13041_v44, 2  ;;  %v13079_v18 = vand.u32 3, %v3132_v34  ;;  %v3203_v36 = vadd.s32 %v3202_v51, %v3198_v47 }
 0x385   : > { %v3264_v61 = vshll.u32 %v15830_v13, %v12348_v41  ;;  %v3112_v11 = vshll.u32 %v12999_v32, %v3110_v17  ;;  %v3113_v37 = vshrl.u32 %v3095_v2, %v3111_v62  ;;  %v3116_v10 = vadd.s32 127, %v3115_v29 }
 0x386   : > { %v3268_v31 = vshrl.u32 %v15833_v43, %v12464_v55  ;;  %v3204_v60 = vadd.s32 536870912, %v3203_v36  ;;  %v3254_v54 = vand.u32 8388607, %v3247_v8  ;;  %v3267_v45 = vshll.u32 %v15827_v0, %v12348_v41  ;;  %v9688_v35 = vpop.eup %9687 }
 0x387   : > { %v3271_v33 = vshrl.u32 %v15834_v58, %v12464_v55  ;;  %v3114_v56 = vor.u32 %v3113_v37, %v3112_v11  ;;  %v3117_v27 = vshll.u32 %v3116_v10, 23  ;;  %v3266_v21 = vor.u32 %v3265_v23, %v3264_v61  ;;  %v9690_v20 = vpop.eup %9689 }
 0x388   : > { %v3274_v32 = vshrl.u32 %v15835_v63, %v12464_v55  ;;  %v3035_v19 = vxor.u32 2147483648, %v9688_v35  ;;  %vm3145_vm7 = vcmp.lt.s32.totalorder %v15878_v14, 0  ;;  %v3205_v15 = vshrl.u32 %v3204_v60, 30 }
 0x389   : > { %v3270_v34 = vshll.u32 %v15833_v43, %v12348_v41  ;;  %v3277_v46 = vshrl.u32 %v15837_v9, %v12464_v55  ;;  %v3032_v2 = vxor.u32 2147483648, %v9690_v20  ;;  %v3118_v17 = vor.u32 4788187, %v3117_v27 }
 0x38a   : > { %v3269_v47 = vor.u32 %v3268_v31, %v3267_v45  ;;  %v3273_v62 = vshll.u32 %v15834_v58, %v12348_v41  ;;  %v3036_v29 = vsel %vm3034_vm14, %v3035_v19, %v9690_v20  ;;  %v3206_v51 = vshll.u32 %v3205_v15, 30 }
 0x38b   : > { %v3272_v23 = vor.u32 %v3271_v33, %v3270_v34  ;;  %v3276_v61 = vshll.u32 %v15835_v63, %v12348_v41  ;;  %v3033_v11 = vsel %vm3031_vm12, %v9688_v35, %v3032_v2  ;;  %v3119_v37 = vand.u32 2147483647, %v3118_v17 }
 0x38c   : > { %v3121_v10 = vcvt.s32.f32 %v3114_v56  ;;  %v3275_v60 = vor.u32 %v3274_v32, %v3273_v62  ;;  %v3037_v31 = vsel %vm3030_vm0, %v3033_v11, %v3036_v29  ;;  %vm13111_vm1 = vcmp.le.f32.partialorder %v3143_v39, 0.7853982 }
 0x38d   : > { %v13115_v27 = vsub.s32 %v3203_v36, %v3206_v51  ;;  %v3263_v41 = vshrl.u32 %v15830_v13, %v12464_v55  ;;  %v3278_v33 = vor.u32 %v3277_v46, %v3276_v61  ;;  %v3038_v35 = vsel %vm3027_vm8, nan, %v3037_v31 }
 0x38e   : > { %v3122_v56 = vmul.f32 %v3121_v10, %v3119_v37  ;;  %v3229_v32 = vsub.s32 4, %v3205_v15  ;;  %v3255_v20 = vor.u32 8388608, %v3254_v54  ;;  %8871 = vmatmul.mubr.msk.f32.gmra.mrb[4].mxu1 %vm15891_vm5, %v3038_v35  ;;  %vm3279_vm9 = vcmp.lt.s32.totalorder %v12460_v1, 1 }
 0x38f   : > { %v3209_v44 = vsub.s32 0, %v13115_v27  ;;  %vm3281_vm15 = vcmp.lt.s32.totalorder %v12460_v1, 3  ;;  %vm3282_vm4 = vcmp.lt.s32.totalorder %v12460_v1, 4  ;;  %v3287_v55 = vsel %vm3279_vm9, %v3266_v21, %v3269_v47 }
 0x390   : > { %v3123_v39 = vxor.u32 2147483648, %v3122_v56  ;;  %v3284_v36 = vsel %vm3282_vm4, %v3272_v23, 2102212464  ;;  %v3288_v59 = vsel %vm3282_vm4, %v3275_v60, 920167782  ;;  %v3291_v34 = vsel %vm3279_vm9, %v3269_v47, %v3272_v23 }
 0x391   : > { %v8185_v19 = vmin.u32 %v3209_v44, %v13115_v27  ;;  %v3289_v54 = vsel %vm3281_vm15, %v3272_v23, %v3288_v59  ;;  %v3292_v46 = vsel %vm3282_vm4, %v3278_v33, 1326507024  ;;  %v3230_v17 = vsel %vm3145_vm7, %v3229_v32, %v3205_v15 }
 0x392   : > { %v3124_v2 = vsel %vm3041_vm2, %v3123_v39, %v3122_v56  ;;  %vm3280_vm3 = vcmp.lt.s32.totalorder %v12460_v1, 2  ;;  %v3293_v62 = vsel %vm3281_vm15, %v3275_v60, %v3292_v46  ;;  %v3295_v61 = vshll.u32 %v3255_v20, 8  ;;  %v15892_v56 = vld [vmem:[#allocation67_spill] sm:$0xff] }
 0x393   : > { %v3127_v29 = vsel %vm12983_vm6, %v15874_v38, %v3124_v2  ;;  %v3211_v51 = vclz %v8185_v19  ;;  %v3290_v23 = vsel %vm3280_vm3, %v3287_v55, %v3289_v54  ;;  %v3283_v11 = vsel %vm3279_vm9, %v3263_v41, %v3266_v21 }
 0x394   : > { %9691 = vcosq.f32 %v3127_v29  ;;  %v3285_v15 = vsel %vm3281_vm15, %v3269_v47, %v3284_v36  ;;  %v3294_v37 = vsel %vm3280_vm3, %v3291_v34, %v3293_v62  ;;  %v3232_v31 = vsel %vm13111_vm1, 0, %v3230_v17 }
 0x395   : > { %9693 = vsinq.f32 %v3127_v29  ;;  %v8186_v10 = vadd.s32 4294967294, %v3211_v51  ;;  %v13151_v60 = vmul.u32.u64.low %v3295_v61, %v3294_v37  ;;  %v13152_v40 = vmul.u32.u64.high %v3295_v61, %v3294_v37, %v13151_v60 }
 0x396   : > { %v13156_v33 = vmul.u32.u64.low %v3295_v61, %v3290_v23  ;;  %v13157_v35 = vmul.u32.u64.high %v3295_v61, %v3290_v23, %v13156_v33  ;;  %v3351_v21 = vand.u32 2147483647, %v15892_v56  ;;  %v13162_v41 = vadd.f32 1.5707964, %v11093_v7 }
 0x397   : > { %v13166_v47 = vshrl.u32 %v3874_v12, 23  ;;  %vm8187_vm2 = vcmp.lt.s32.totalorder %v8186_v10, 0  ;;  %v3286_v32 = vsel %vm3280_vm3, %v3283_v11, %v3285_v15  ;;  %vm3138_vm6 = vcmp.eq.s32.totalorder %v13079_v18, 2 }
 0x398   : > { %v3214_v20 = vsel %vm8187_vm2, 0, %v8186_v10  ;;  %v13173_v44 = vand.u32 8388607, %v3351_v21  ;;  %v3369_v39 = vshrl.u32 %v15827_v0, %v12341_v57  ;;  %vm3135_vm13 = vcmp.eq.s32.totalorder %v13079_v18, 0 }
 0x399   : > { %v3199_v7 = vadd.s32 %v13032_v30, %v13044_v53  ;;  %v3215_v12 = vsub.s32 32, %v3214_v20  ;;  %v3219_v36 = vsub.s32 4294967266, %v3214_v20  ;;  %v3236_v55 = vadd.s32 3, %v3232_v31 }
 0x39a   : > { %vm3134_vm11 = vcmp.lt.s32.totalorder %v13079_v18, 2  ;;  %v3302_v1 = vmul.u32 %v3295_v61, %v3286_v32  ;;  %vm3304_vm12 = vc.u32 %v13152_v40, %v13156_v33  ;;  %v3305_v59 = vadd.s32 1, %v13157_v35 }
 0x39b   : > { %v3368_v19 = vshll.u32 %v15830_v13, %v12251_v3  ;;  %vm3131_vm10 = vweird.f32 %v15874_v38  ;;  %v3216_v54 = vshll.u32 %v13115_v27, %v3214_v20  ;;  %v3217_v34 = vshrl.u32 %v3199_v7, %v3215_v12 }
 0x39c   : > { %v3220_v30 = vadd.s32 127, %v3219_v36  ;;  %v3367_v53 = vshrl.u32 %v15830_v13, %v12341_v57  ;;  %v3306_v46 = vsel %vm3304_vm12, %v3305_v59, %v13157_v35  ;;  %v3359_v2 = vor.u32 8388608, %v13173_v44 }
 0x39d   : > { %v3370_v17 = vor.u32 %v3369_v39, %v3368_v19  ;;  %v3372_v62 = vshrl.u32 %v15833_v43, %v12341_v57  ;;  %v3218_v29 = vor.u32 %v3217_v34, %v3216_v54  ;;  %v3307_v23 = vadd.s32 %v3306_v46, %v3302_v1 }
 0x39e   : > { %v3221_v51 = vshll.u32 %v3220_v30, 23  ;;  %v3371_v61 = vshll.u32 %v15827_v0, %v12251_v3  ;;  %v9692_v27 = vpop.eup %9691  ;;  %v3375_v11 = vshrl.u32 %v15834_v58, %v12341_v57  ;;  %v3377_v15 = vshll.u32 %v15834_v58, %v12251_v3 }
 0x39f   : > { %v3378_v37 = vshrl.u32 %v15835_v63, %v12341_v57  ;;  %v3381_v10 = vshrl.u32 %v15837_v9, %v12341_v57  ;;  %v9694_v60 = vpop.eup %9693  ;;  %v3139_v31 = vxor.u32 2147483648, %v9692_v27  ;;  %vm3249_vm0 = vcmp.lt.s32.totalorder %v15888_v42, 0 }
 0x3a0   : > { %v3222_v35 = vor.u32 4788187, %v3221_v51  ;;  %v3308_v32 = vadd.s32 536870912, %v3307_v23  ;;  %v3374_v20 = vshll.u32 %v15833_v43, %v12251_v3  ;;  %v3136_v44 = vxor.u32 2147483648, %v9694_v60 }
 0x3a1   : > { %v3373_v39 = vor.u32 %v3372_v62, %v3371_v61  ;;  %v3379_v7 = vor.u32 %v3378_v37, %v3377_v15  ;;  %v3380_v12 = vshll.u32 %v15835_v63, %v12251_v3  ;;  %v3140_v36 = vsel %vm3138_vm6, %v3139_v31, %v9694_v60 }
 0x3a2   : > { %v3223_v1 = vand.u32 2147483647, %v3222_v35  ;;  %v3225_v57 = vcvt.s32.f32 %v3218_v29  ;;  %v3309_v59 = vshrl.u32 %v3308_v32, 30  ;;  %vm3674_vm8 = vcmp.gt.s32.totalorder %v13064_v25, 0 }
 0x3a3   : > { %v3137_v19 = vsel %vm3135_vm13, %v9692_v27, %v3136_v44  ;;  %v3376_v54 = vor.u32 %v3375_v11, %v3374_v20  ;;  %v3382_v34 = vor.u32 %v3381_v10, %v3380_v12  ;;  %vm3383_vm14 = vcmp.lt.s32.totalorder %v12338_v50, 1 }
 0x3a4   : > { %v3141_v30 = vsel %vm3134_vm11, %v3137_v19, %v3140_v36  ;;  %v3226_v46 = vmul.f32 %v3225_v57, %v3223_v1  ;;  %v3310_v3 = vshll.u32 %v3309_v59, 30  ;;  %vm3386_vm5 = vcmp.lt.s32.totalorder %v12338_v50, 4 }
 0x3a5   : > { %v3142_v62 = vsel %vm3131_vm10, nan, %v3141_v30  ;;  %v3333_v29 = vsub.s32 4, %v3309_v59  ;;  %v3391_v51 = vsel %vm3383_vm14, %v3370_v17, %v3373_v39  ;;  %v3392_v61 = vsel %vm3386_vm5, %v3379_v7, 920167782 }
 0x3a6   : > { %vm15893_vm9 = vcmask 121856   ;;  %v3227_v27 = vxor.u32 2147483648, %v3226_v46  ;;  %v13225_v11 = vand.u32 3, %v3236_v55  ;;  %v13227_v18 = vsub.s32 %v3307_v23, %v3310_v3 }
 0x3a7   : > { %8873 = vmatprep.mubr.msk.f32.mxu1 %vm15893_vm9, %v3142_v62  ;;  %vm3385_vm15 = vcmp.lt.s32.totalorder %v12338_v50, 3  ;;  %vm3384_vm4 = vcmp.lt.s32.totalorder %v12338_v50, 2  ;;  %v3387_v38 = vsel %vm3383_vm14, %v3367_v53, %v3370_v17  ;;  %v3388_v15 = vsel %vm3386_vm5, %v3376_v54, 2102212464 }
 0x3a8   : > { %v3393_v37 = vsel %vm3385_vm15, %v3376_v54, %v3392_v61  ;;  %v3228_v10 = vsel %vm3145_vm7, %v3227_v27, %v3226_v46  ;;  %v3313_v55 = vsub.s32 0, %v13227_v18  ;;  %v3395_v60 = vsel %vm3383_vm14, %v3373_v39, %v3376_v54 }
 0x3a9   : > { %v3394_v23 = vsel %vm3384_vm4, %v3391_v51, %v3393_v37  ;;  %v3231_v53 = vsel %vm13111_vm1, %v15878_v14, %v3228_v10  ;;  %v3334_v17 = vsel %vm3249_vm0, %v3333_v29, %v3309_v59  ;;  %v3396_v31 = vsel %vm3386_vm5, %v3382_v34, 1326507024 }
 0x3aa   : > { %v3399_v35 = vshll.u32 %v3359_v2, 8  ;;  %9695 = vcosq.f32 %v3231_v53  ;;  %v8189_v32 = vmin.u32 %v3313_v55, %v13227_v18  ;;  %v3389_v20 = vsel %vm3385_vm15, %v3373_v39, %v3388_v15 }
 0x3ab   : > { %v3397_v44 = vsel %vm3385_vm15, %v3379_v7, %v3396_v31  ;;  %9697 = vsinq.f32 %v3231_v53  ;;  %v13263_v1 = vsub.s32 32, %v13055_v52  ;;  %v13266_v2 = vand.u32 31, %v13060_v48 }
 0x3ac   : > { %v3398_v45 = vsel %vm3384_vm4, %v3395_v60, %v3397_v44  ;;  %v13258_v12 = vmul.u32.u64.low %v3399_v35, %v3394_v23  ;;  %v13259_v36 = vmul.u32.u64.high %v3399_v35, %v3394_v23, %v13258_v12  ;;  %vm13270_vm7 = vcmp.le.f32.partialorder %v3247_v8, 0.7853982 }
 0x3ad   : > { %v3315_v7 = vclz %v8189_v32  ;;  %v3336_v57 = vsel %vm13270_vm7, 0, %v3334_v17  ;;  %v3390_v59 = vsel %vm3384_vm4, %v3387_v38, %v3389_v20  ;;  %v13284_v34 = vsel %vm3674_vm8, %v13064_v25, 0  ;;  %vm15898_vm8 = vmmov %vm15893_vm9 }
 0x3ae   : > { %v13278_v19 = vmul.u32.u64.low %v3399_v35, %v3398_v45  ;;  %v13279_v54 = vmul.u32.u64.high %v3399_v35, %v3398_v45, %v13278_v19  ;;  %v3978_v8 = vand.u32 2139095040, %v13162_v41  ;;  %v13288_v30 = vadd.s32 4294967169, %v13166_v47 }
 0x3af   : > { %v8190_v46 = vadd.s32 4294967294, %v3315_v7  ;;  %vm3239_vm1 = vcmp.eq.s32.totalorder %v13225_v11, 0  ;;  %vm3242_vm3 = vcmp.eq.s32.totalorder %v13225_v11, 2  ;;  %v3409_v50 = vadd.s32 1, %v13259_v36 }
 0x3b0   : > { %v3455_v3 = vand.u32 2147483647, %v12353_v26  ;;  %vm3238_vm2 = vcmp.lt.s32.totalorder %v13225_v11, 2  ;;  %v3303_v25 = vadd.s32 %v13156_v33, %v13152_v40  ;;  %v3340_v62 = vadd.s32 3, %v3336_v57 }
 0x3b1   : > { %vm8191_vm6 = vcmp.lt.s32.totalorder %v8190_v46, 0  ;;  %v3406_v29 = vmul.u32 %v3399_v35, %v3390_v59  ;;  %vm3235_vm13 = vweird.f32 %v15878_v14  ;;  %vm3408_vm11 = vc.u32 %v13279_v54, %v13258_v12 }
 0x3b2   : > { %v3318_v47 = vsel %vm8191_vm6, 0, %v8190_v46  ;;  %v3472_v51 = vshll.u32 %v15830_v13, %v13055_v52  ;;  %v3473_v61 = vshrl.u32 %v15827_v0, %v13263_v1  ;;  %v3410_v15 = vsel %vm3408_vm11, %v3409_v50, %v13259_v36 }
 0x3b3   : > { %v3319_v27 = vsub.s32 32, %v3318_v47  ;;  %v3323_v38 = vsub.s32 4294967266, %v3318_v47  ;;  %v3476_v40 = vshrl.u32 %v15833_v43, %v13263_v1  ;;  %v3411_v33 = vadd.s32 %v3410_v15, %v3406_v29 }
 0x3b4   : > { %v3462_v37 = vand.u32 8388607, %v3455_v3  ;;  %v3475_v10 = vshll.u32 %v15827_v0, %v13055_v52  ;;  %v3478_v55 = vshll.u32 %v15833_v43, %v13055_v52  ;;  %v9696_v23 = vpop.eup %9695  ;;  %v3320_v60 = vshll.u32 %v13227_v18, %v3318_v47 }
 0x3b5   : > { %v3321_v53 = vshrl.u32 %v3303_v25, %v3319_v27  ;;  %v3324_v17 = vadd.s32 127, %v3323_v38  ;;  %vm3353_vm12 = vcmp.lt.s32.totalorder %v15892_v56, 0  ;;  %v3479_v31 = vshrl.u32 %v15834_v58, %v13263_v1  ;;  %v9698_v35 = vpop.eup %9697 }
 0x3b6   : > { %v3243_v32 = vxor.u32 2147483648, %v9696_v23  ;;  %v3412_v20 = vadd.s32 536870912, %v3411_v33  ;;  %v3474_v44 = vor.u32 %v3473_v61, %v3472_v51  ;;  %v3482_v45 = vshrl.u32 %v15835_v63, %v13263_v1 }
 0x3b7   : > { %v3240_v36 = vxor.u32 2147483648, %v9698_v35  ;;  %v3322_v7 = vor.u32 %v3321_v53, %v3320_v60  ;;  %v3325_v57 = vshll.u32 %v3324_v17, 23  ;;  %v3477_v59 = vor.u32 %v3476_v40, %v3475_v10 }
 0x3b8   : > { %v3244_v18 = vsel %vm3242_vm3, %v3243_v32, %v9698_v35  ;;  %v3413_v19 = vshrl.u32 %v3412_v20, 30  ;;  %v3481_v46 = vshll.u32 %v15834_v58, %v13055_v52  ;;  %v3485_v50 = vshrl.u32 %v15837_v9, %v13263_v1 }
 0x3b9   : > { %v3241_v25 = vsel %vm3239_vm1, %v9696_v23, %v3240_v36  ;;  %v3326_v29 = vor.u32 4788187, %v3325_v57  ;;  %vm13329_vm10 = vcmp.le.f32.partialorder %v3351_v21, 0.7853982  ;;  %v3480_v51 = vor.u32 %v3479_v31, %v3478_v55 }
 0x3ba   : > { %v3484_v61 = vshll.u32 %v15835_v63, %v13055_v52  ;;  %v3245_v27 = vsel %vm3238_vm2, %v3241_v25, %v3244_v18  ;;  %v3414_v38 = vshll.u32 %v3413_v19, 30  ;;  %v3437_v15 = vsub.s32 4, %v3413_v19 }
 0x3bb   : > { %v3483_v40 = vor.u32 %v3482_v45, %v3481_v46  ;;  %v3246_v10 = vsel %vm3235_vm13, nan, %v3245_v27  ;;  %v3327_v23 = vand.u32 2147483647, %v3326_v29  ;;  %v3329_v60 = vcvt.s32.f32 %v3322_v7 }
 0x3bc   : > { %v3486_v53 = vor.u32 %v3485_v50, %v3484_v61  ;;  %8874 = vmatmul.mubr.msk.f32.gmra.mrb[6].mxu1 %vm15898_vm8, %v3246_v10  ;;  %v13340_v21 = vand.u32 3, %v3340_v62  ;;  %v13342_v55 = vsub.s32 %v3411_v33, %v3414_v38  ;;  %v3463_v17 = vor.u32 8388608, %v3462_v37 }
 0x3bd   : > { %v3471_v52 = vshrl.u32 %v15830_v13, %v13263_v1  ;;  %v3330_v11 = vmul.f32 %v3329_v60, %v3327_v23  ;;  %vm3487_vm14 = vcmp.lt.s32.totalorder %v13050_v22, 1  ;;  %vm3489_vm5 = vcmp.lt.s32.totalorder %v13050_v22, 3 }
 0x3be   : > { %vm3490_vm9 = vcmp.lt.s32.totalorder %v13050_v22, 4  ;;  %v3417_v14 = vsub.s32 0, %v13342_v55  ;;  %v3438_v31 = vsel %vm3353_vm12, %v3437_v15, %v3413_v19  ;;  %v3495_v62 = vsel %vm3487_vm14, %v3474_v44, %v3477_v59 }
 0x3bf   : > { %v3496_v33 = vsel %vm3490_vm9, %v3483_v40, 920167782  ;;  %v3331_v37 = vxor.u32 2147483648, %v3330_v11  ;;  %v3499_v35 = vsel %vm3487_vm14, %v3477_v59, %v3480_v51  ;;  %v3500_v32 = vsel %vm3490_vm9, %v3486_v53, 1326507024 }
 0x3c0   : > { %v3497_v1 = vsel %vm3489_vm5, %v3480_v51, %v3496_v33  ;;  %v8193_v20 = vmin.u32 %v3417_v14, %v13342_v55  ;;  %vm3488_vm15 = vcmp.lt.s32.totalorder %v13050_v22, 2  ;;  %v3492_v45 = vsel %vm3490_vm9, %v3480_v51, 2102212464 }
 0x3c1   : > { %v3501_v36 = vsel %vm3489_vm5, %v3483_v40, %v3500_v32  ;;  %v3332_v7 = vsel %vm3249_vm0, %v3331_v37, %v3330_v11  ;;  %v3498_v57 = vsel %vm3488_vm15, %v3495_v62, %v3497_v1  ;;  %v3503_v19 = vshll.u32 %v3463_v17, 8 }
 0x3c2   : > { %v3502_v18 = vsel %vm3488_vm15, %v3499_v35, %v3501_v36  ;;  %v3335_v46 = vsel %vm13270_vm7, %v15888_v42, %v3332_v7  ;;  %v3419_v50 = vclz %v8193_v20  ;;  %v3440_v25 = vsel %vm13329_vm10, 0, %v3438_v31 }
 0x3c3   : > { %v3491_v29 = vsel %vm3487_vm14, %v3471_v52, %v3474_v44  ;;  %9699 = vcosq.f32 %v3335_v46  ;;  %v3493_v51 = vsel %vm3489_vm5, %v3477_v59, %v3492_v45  ;;  %v13385_v39 = vshrl.u32 %v13060_v48, 5 }
 0x3c4   : > { %v13377_v61 = vmul.u32.u64.low %v3503_v19, %v3502_v18  ;;  %v13378_v27 = vmul.u32.u64.high %v3503_v19, %v3502_v18, %v13377_v61  ;;  %9701 = vsinq.f32 %v3335_v46  ;;  %v8194_v38 = vadd.s32 4294967294, %v3419_v50 }
 0x3c5   : > { %v13380_v15 = vmul.u32.u64.low %v3503_v19, %v3498_v57  ;;  %v13381_v40 = vmul.u32.u64.high %v3503_v19, %v3498_v57, %v13380_v15  ;;  %v13388_v10 = vsub.s32 32, %v13266_v2  ;;  %v13391_v44 = vand.u32 31, %v13284_v34 }
 0x3c6   : > { %v3559_v59 = vand.u32 2147483647, %v12241_v5  ;;  %v13396_v23 = vshrl.u32 %v3978_v8, 23  ;;  %v13399_v60 = vadd.s32 1, %v13288_v30  ;;  %vm8195_vm0 = vcmp.lt.s32.totalorder %v8194_v38, 0 }
 0x3c7   : > { %v3494_v48 = vsel %vm3488_vm15, %v3491_v29, %v3493_v51  ;;  %vm3346_vm4 = vcmp.eq.s32.totalorder %v13340_v21, 2  ;;  %v3407_v53 = vadd.s32 %v13258_v12, %v13279_v54  ;;  %v3422_v17 = vsel %vm8195_vm0, 0, %v8194_v38 }
 0x3c8   : > { %v13406_v52 = vadd.s32 3, %v3440_v25  ;;  %vm3512_vm7 = vc.u32 %v13378_v27, %v13380_v15  ;;  %vm3343_vm1 = vcmp.eq.s32.totalorder %v13340_v21, 0  ;;  %v3423_v8 = vsub.s32 32, %v3422_v17 }
 0x3c9   : > { %v3427_v30 = vsub.s32 4294967266, %v3422_v17  ;;  %v3513_v11 = vadd.s32 1, %v13381_v40  ;;  %v3577_v22 = vshrl.u32 %v15827_v0, %v13047_v6  ;;  %vm3342_vm3 = vcmp.lt.s32.totalorder %v13340_v21, 2 }
 0x3ca   : > { %v3424_v14 = vshll.u32 %v13342_v55, %v3422_v17  ;;  %v3510_v12 = vmul.u32 %v3503_v19, %v3494_v48  ;;  %v3566_v54 = vand.u32 8388607, %v3559_v59  ;;  %v3576_v31 = vshll.u32 %v15830_v13, %v12815_v24 }
 0x3cb   : > { %vm3339_vm2 = vweird.f32 %v15888_v42  ;;  %v3425_v62 = vshrl.u32 %v3407_v53, %v3423_v8  ;;  %v3428_v33 = vadd.s32 127, %v3427_v30  ;;  %v3514_v37 = vsel %vm3512_vm7, %v3513_v11, %v13381_v40 }
 0x3cc   : > { %v3580_v1 = vshrl.u32 %v15833_v43, %v13047_v6  ;;  %v3515_v35 = vadd.s32 %v3514_v37, %v3510_v12  ;;  %v3575_v55 = vshrl.u32 %v15830_v13, %v13047_v6  ;;  %v3579_v32 = vshll.u32 %v15827_v0, %v12815_v24 }
 0x3cd   : > { %v3583_v20 = vshrl.u32 %v15834_v58, %v13047_v6  ;;  %v3426_v45 = vor.u32 %v3425_v62, %v3424_v14  ;;  %v3429_v36 = vshll.u32 %v3428_v33, 23  ;;  %v3578_v7 = vor.u32 %v3577_v22, %v3576_v31  ;;  %v9700_v18 = vpop.eup %9699 }
 0x3ce   : > { %v3586_v57 = vshrl.u32 %v15835_v63, %v13047_v6  ;;  %v3516_v19 = vadd.s32 536870912, %v3515_v35  ;;  %v3567_v46 = vor.u32 8388608, %v3566_v54  ;;  %v3582_v50 = vshll.u32 %v15833_v43, %v12815_v24  ;;  %v9702_v29 = vpop.eup %9701 }
 0x3cf   : > { %v3589_v25 = vshrl.u32 %v15837_v9, %v13047_v6  ;;  %v3347_v51 = vxor.u32 2147483648, %v9700_v18  ;;  %v3430_v61 = vor.u32 4788187, %v3429_v36  ;;  %v3581_v38 = vor.u32 %v3580_v1, %v3579_v32 }
 0x3d0   : > { %v3585_v40 = vshll.u32 %v15834_v58, %v12815_v24  ;;  %v3344_v48 = vxor.u32 2147483648, %v9702_v29  ;;  %v3517_v53 = vshrl.u32 %v3516_v19, 30  ;;  %v3584_v17 = vor.u32 %v3583_v20, %v3582_v50 }
 0x3d1   : > { %v3588_v8 = vshll.u32 %v15835_v63, %v12815_v24  ;;  %v3348_v30 = vsel %vm3346_vm4, %v3347_v51, %v9702_v29  ;;  %v3431_v11 = vand.u32 2147483647, %v3430_v61  ;;  %v3433_v22 = vcvt.s32.f32 %v3426_v45 }
 0x3d2   : > { %v3587_v14 = vor.u32 %v3586_v57, %v3585_v40  ;;  %vm3882_vm6 = vcmp.gt.s32.totalorder %v13399_v60, 0  ;;  %v3345_v6 = vsel %vm3343_vm1, %v9700_v18, %v3344_v48  ;;  %v3518_v12 = vshll.u32 %v3517_v53, 30 }
 0x3d3   : > { %v3590_v54 = vor.u32 %v3589_v25, %v3588_v8  ;;  %vm3591_vm13 = vcmp.lt.s32.totalorder %v12806_v4, 1  ;;  %v3349_v31 = vsel %vm3342_vm3, %v3345_v6, %v3348_v30  ;;  %v3434_v62 = vmul.f32 %v3433_v22, %v3431_v11 }
 0x3d4   : > { %vm3592_vm11 = vcmp.lt.s32.totalorder %v12806_v4, 2  ;;  %vm3593_vm8 = vcmp.lt.s32.totalorder %v12806_v4, 3  ;;  %v3350_v24 = vsel %vm3339_vm2, nan, %v3349_v31  ;;  %v13452_v33 = vsub.s32 %v3515_v35, %v3518_v12 }
 0x3d5   : > { %vm3594_vm14 = vcmp.lt.s32.totalorder %v12806_v4, 4  ;;  %v3599_v37 = vsel %vm3591_vm13, %v3578_v7, %v3581_v38  ;;  %vm15899_vm5 = vcmask 121856   ;;  %v3435_v1 = vxor.u32 2147483648, %v3434_v62 }
 0x3d6   : > { %8876 = vmatprep.mubr.msk.f32.mxu1 %vm15899_vm5, %v3350_v24  ;;  %v3541_v21 = vsub.s32 4, %v3517_v53  ;;  %v3596_v32 = vsel %vm3594_vm14, %v3584_v17, 2102212464  ;;  %v3600_v20 = vsel %vm3594_vm14, %v3587_v14, 920167782  ;;  %v3521_v45 = vsub.s32 0, %v13452_v33 }
 0x3d7   : > { %v3595_v36 = vsel %vm3591_vm13, %v3575_v55, %v3578_v7  ;;  %v3601_v42 = vsel %vm3593_vm8, %v3584_v17, %v3600_v20  ;;  %v3603_v35 = vsel %vm3591_vm13, %v3581_v38, %v3584_v17  ;;  %v3436_v57 = vsel %vm3353_vm12, %v3435_v1, %v3434_v62 }
 0x3d8   : > { %v3602_v18 = vsel %vm3592_vm11, %v3599_v37, %v3601_v42  ;;  %v3604_v19 = vsel %vm3594_vm14, %v3590_v54, 1326507024  ;;  %v3607_v50 = vshll.u32 %v3567_v46, 8  ;;  %v3439_v25 = vsel %vm13329_vm10, %v15892_v56, %v3436_v57 }
 0x3d9   : > { %v8197_v55 = vmin.u32 %v3521_v45, %v13452_v33  ;;  %v3597_v7 = vsel %vm3593_vm8, %v3581_v38, %v3596_v32  ;;  %v3605_v29 = vsel %vm3593_vm8, %v3587_v14, %v3604_v19  ;;  %9703 = vcosq.f32 %v3439_v25 }
 0x3da   : > { %v3606_v51 = vsel %vm3592_vm11, %v3603_v35, %v3605_v29  ;;  %v13479_v61 = vmul.u32.u64.low %v3607_v50, %v3602_v18  ;;  %v13480_v40 = vmul.u32.u64.high %v3607_v50, %v3602_v18, %v13479_v61  ;;  %9705 = vsinq.f32 %v3439_v25 }
 0x3db   : > { %v13484_v47 = vand.u32 3, %v13406_v52  ;;  %vm3457_vm12 = vcmp.lt.s32.totalorder %v12353_v26, 0  ;;  %v3523_v46 = vclz %v8197_v55  ;;  %v13488_v38 = vsub.s32 32, %v13391_v44 }
 0x3dc   : > { %v3542_v48 = vsel %vm3457_vm12, %v3541_v21, %v3517_v53  ;;  %v13492_v17 = vmul.u32.u64.low %v3607_v50, %v3606_v51  ;;  %v13493_v8 = vmul.u32.u64.high %v3607_v50, %v3606_v51, %v13492_v17  ;;  %v13496_v30 = vshrl.u32 %v13284_v34, 5 }
 0x3dd   : > { %v13499_v11 = vadd.s32 4294967169, %v13396_v23  ;;  %v8198_v52 = vadd.s32 4294967294, %v3523_v46  ;;  %v3598_v22 = vsel %vm3592_vm11, %v3595_v36, %v3597_v7  ;;  %v13506_v14 = vsel %vm3882_vm6, %v13399_v60, 0  ;;  %vm15904_vm6 = vmmov %vm15899_vm5 }
 0x3de   : > { %vm13510_vm10 = vcmp.le.f32.partialorder %v3455_v3, 0.7853982  ;;  %v3617_v34 = vadd.s32 1, %v13480_v40  ;;  %v3663_v23 = vand.u32 2147483647, %v12596_v28  ;;  %vm3447_vm9 = vcmp.eq.s32.totalorder %v13484_v47, 0 }
 0x3df   : > { %vm3450_vm15 = vcmp.eq.s32.totalorder %v13484_v47, 2  ;;  %vm8199_vm0 = vcmp.lt.s32.totalorder %v8198_v52, 0  ;;  %v3544_v4 = vsel %vm13510_vm10, 0, %v3542_v48  ;;  %vm3446_vm4 = vcmp.lt.s32.totalorder %v13484_v47, 2 }
 0x3e0   : > { %v3526_v60 = vsel %vm8199_vm0, 0, %v8198_v52  ;;  %v3614_v6 = vmul.u32 %v3607_v50, %v3598_v22  ;;  %vm3616_vm7 = vc.u32 %v13493_v8, %v13479_v61  ;;  %v3681_v3 = vshrl.u32 %v15827_v0, %v13488_v38 }
 0x3e1   : > { %vm3443_vm1 = vweird.f32 %v15892_v56  ;;  %v3511_v12 = vadd.s32 %v13380_v15, %v13378_v27  ;;  %v3527_v54 = vsub.s32 32, %v3526_v60  ;;  %v3531_v31 = vsub.s32 4294967266, %v3526_v60 }
 0x3e2   : > { %v3618_v62 = vsel %vm3616_vm7, %v3617_v34, %v13480_v40  ;;  %v3548_v24 = vadd.s32 3, %v3544_v4  ;;  %v13531_v1 = vand.u32 8388607, %v3663_v23  ;;  %v3680_v21 = vshll.u32 %v15830_v13, %v13391_v44 }
 0x3e3   : > { %v3619_v37 = vadd.s32 %v3618_v62, %v3614_v6  ;;  %v3528_v32 = vshll.u32 %v13452_v33, %v3526_v60  ;;  %v3529_v20 = vshrl.u32 %v3511_v12, %v3527_v54  ;;  %v3532_v45 = vadd.s32 127, %v3531_v31  ;;  %v9704_v15 = vpop.eup %9703 }
 0x3e4   : > { %v3684_v27 = vshrl.u32 %v15833_v43, %v13488_v38  ;;  %v3682_v42 = vor.u32 %v3681_v3, %v3680_v21  ;;  %v3683_v35 = vshll.u32 %v15827_v0, %v13391_v44  ;;  %v3687_v57 = vshrl.u32 %v15834_v58, %v13488_v38  ;;  %v9706_v18 = vpop.eup %9705 }
 0x3e5   : > { %v3620_v36 = vadd.s32 536870912, %v3619_v37  ;;  %v3451_v19 = vxor.u32 2147483648, %v9704_v15  ;;  %v3530_v50 = vor.u32 %v3529_v20, %v3528_v32  ;;  %v3533_v25 = vshll.u32 %v3532_v45, 23 }
 0x3e6   : > { %v3690_v33 = vshrl.u32 %v15835_v63, %v13488_v38  ;;  %v3448_v55 = vxor.u32 2147483648, %v9706_v18  ;;  %vm3561_vm3 = vcmp.lt.s32.totalorder %v12241_v5, 0  ;;  %v3686_v29 = vshll.u32 %v15833_v43, %v13391_v44 }
 0x3e7   : > { %v3621_v7 = vshrl.u32 %v3620_v36, 30  ;;  %v3693_v51 = vshrl.u32 %v15837_v9, %v13488_v38  ;;  %v3452_v40 = vsel %vm3450_vm15, %v3451_v19, %v9706_v18  ;;  %v3534_v46 = vor.u32 4788187, %v3533_v25 }
 0x3e8   : > { %v3685_v48 = vor.u32 %v3684_v27, %v3683_v35  ;;  %v3689_v17 = vshll.u32 %v15834_v58, %v13391_v44  ;;  %v3449_v52 = vsel %vm3447_vm9, %v9704_v15, %v3448_v55  ;;  %v3688_v34 = vor.u32 %v3687_v57, %v3686_v29 }
 0x3e9   : > { %v3622_v22 = vshll.u32 %v3621_v7, 30  ;;  %v3692_v4 = vshll.u32 %v15835_v63, %v13391_v44  ;;  %v3453_v60 = vsel %vm3446_vm4, %v3449_v52, %v3452_v40  ;;  %v3535_v6 = vand.u32 2147483647, %v3534_v46 }
 0x3ea   : > { %v3537_v3 = vcvt.s32.f32 %v3530_v50  ;;  %v3691_v12 = vor.u32 %v3690_v33, %v3689_v17  ;;  %v3454_v54 = vsel %vm3443_vm1, nan, %v3453_v60  ;;  %v13561_v31 = vand.u32 3, %v3548_v24 }
 0x3eb   : > { %vm13565_vm2 = vcmp.le.f32.partialorder %v3559_v59, 0.7853982  ;;  %v13569_v21 = vsub.s32 %v3619_v37, %v3622_v22  ;;  %v3694_v44 = vor.u32 %v3693_v51, %v3692_v4  ;;  %8877 = vmatmul.mubr.msk.f32.gmra.mrb[8].mxu1 %vm15904_vm6, %v3454_v54  ;;  %v3645_v32 = vsub.s32 4, %v3621_v7 }
 0x3ec   : > { %v3538_v47 = vmul.f32 %v3537_v3, %v3535_v6  ;;  %v3671_v20 = vor.u32 8388608, %v13531_v1  ;;  %v3679_v56 = vshrl.u32 %v15830_v13, %v13488_v38  ;;  %vm3695_vm13 = vcmp.lt.s32.totalorder %v13496_v30, 1 }
 0x3ed   : > { %v3625_v24 = vsub.s32 0, %v13569_v21  ;;  %vm3697_vm11 = vcmp.lt.s32.totalorder %v13496_v30, 3  ;;  %vm3698_vm8 = vcmp.lt.s32.totalorder %v13496_v30, 4  ;;  %v3703_v45 = vsel %vm3695_vm13, %v3682_v42, %v3685_v48 }
 0x3ee   : > { %v3539_v59 = vxor.u32 2147483648, %v3538_v47  ;;  %v3700_v37 = vsel %vm3698_vm8, %v3688_v34, 2102212464  ;;  %v3704_v27 = vsel %vm3698_vm8, %v3691_v12, 920167782  ;;  %v3707_v38 = vsel %vm3695_vm13, %v3685_v48, %v3688_v34 }
 0x3ef   : > { %v8201_v15 = vmin.u32 %v3625_v24, %v13569_v21  ;;  %v3705_v1 = vsel %vm3697_vm11, %v3688_v34, %v3704_v27  ;;  %v3708_v36 = vsel %vm3698_vm8, %v3694_v44, 1326507024  ;;  %v3646_v57 = vsel %vm3561_vm3, %v3645_v32, %v3621_v7 }
 0x3f0   : > { %v3540_v35 = vsel %vm3457_vm12, %v3539_v59, %v3538_v47  ;;  %vm3696_vm14 = vcmp.lt.s32.totalorder %v13496_v30, 2  ;;  %v3709_v18 = vsel %vm3697_vm11, %v3691_v12, %v3708_v36  ;;  %v3711_v33 = vshll.u32 %v3671_v20, 8 }
 0x3f1   : > { %v3543_v19 = vsel %vm13510_vm10, %v12353_v26, %v3540_v35  ;;  %v3627_v50 = vclz %v8201_v15  ;;  %v3706_v25 = vsel %vm3696_vm14, %v3703_v45, %v3705_v1  ;;  %v3699_v55 = vsel %vm3695_vm13, %v3679_v56, %v3682_v42 }
 0x3f2   : > { %9707 = vcosq.f32 %v3543_v19  ;;  %v3701_v7 = vsel %vm3697_vm11, %v3685_v48, %v3700_v37  ;;  %v3710_v29 = vsel %vm3696_vm14, %v3707_v38, %v3709_v18  ;;  %v3648_v46 = vsel %vm13565_vm2, 0, %v3646_v57 }
 0x3f3   : > { %9709 = vsinq.f32 %v3543_v19  ;;  %v8202_v51 = vadd.s32 4294967294, %v3627_v50  ;;  %v13604_v40 = vmul.u32.u64.low %v3711_v33, %v3710_v29  ;;  %v13605_v53 = vmul.u32.u64.high %v3711_v33, %v3710_v29, %v13604_v40 }
 0x3f4   : > { %v13609_v17 = vmul.u32.u64.low %v3711_v33, %v3706_v25  ;;  %v13610_v52 = vmul.u32.u64.high %v3711_v33, %v3706_v25, %v13609_v17  ;;  %v3767_v42 = vand.u32 2147483647, %v12473_v16  ;;  %v13615_v22 = vadd.s32 1, %v13499_v11 }
 0x3f5   : > { %v13618_v48 = vand.u32 31, %v13506_v14  ;;  %vm8203_vm5 = vcmp.lt.s32.totalorder %v8202_v51, 0  ;;  %v3702_v34 = vsel %vm3696_vm14, %v3699_v55, %v3701_v7  ;;  %vm3554_vm12 = vcmp.eq.s32.totalorder %v13561_v31, 2 }
 0x3f6   : > { %v3630_v4 = vsel %vm8203_vm5, 0, %v8202_v51  ;;  %v13625_v60 = vand.u32 8388607, %v3767_v42  ;;  %v3785_v6 = vshrl.u32 %v15827_v0, %v13388_v10  ;;  %vm3551_vm10 = vcmp.eq.s32.totalorder %v13561_v31, 0 }
 0x3f7   : > { %v3615_v11 = vadd.s32 %v13479_v61, %v13493_v8  ;;  %v3631_v3 = vsub.s32 32, %v3630_v4  ;;  %v3635_v12 = vsub.s32 4294967266, %v3630_v4  ;;  %v3652_v54 = vadd.s32 3, %v3648_v46 }
 0x3f8   : > { %vm3550_vm9 = vcmp.lt.s32.totalorder %v13561_v31, 2  ;;  %v3718_v30 = vmul.u32 %v3711_v33, %v3702_v34  ;;  %vm3720_vm15 = vc.u32 %v13605_v53, %v13609_v17  ;;  %v3721_v44 = vadd.s32 1, %v13610_v52 }
 0x3f9   : > { %v3784_v47 = vshll.u32 %v15830_v13, %v13266_v2  ;;  %vm3547_vm0 = vweird.f32 %v12353_v26  ;;  %v3632_v32 = vshll.u32 %v13569_v21, %v3630_v4  ;;  %v3633_v20 = vshrl.u32 %v3615_v11, %v3631_v3 }
 0x3fa   : > { %v3636_v61 = vadd.s32 127, %v3635_v12  ;;  %v3783_v8 = vshrl.u32 %v15830_v13, %v13388_v10  ;;  %v3722_v56 = vsel %vm3720_vm15, %v3721_v44, %v13610_v52  ;;  %v3775_v24 = vor.u32 8388608, %v13625_v60 }
 0x3fb   : > { %v3786_v59 = vor.u32 %v3785_v6, %v3784_v47  ;;  %v3788_v37 = vshrl.u32 %v15833_v43, %v13388_v10  ;;  %v3634_v45 = vor.u32 %v3633_v20, %v3632_v32  ;;  %v3723_v15 = vadd.s32 %v3722_v56, %v3718_v30 }
 0x3fc   : > { %v3637_v27 = vshll.u32 %v3636_v61, 23  ;;  %v3787_v1 = vshll.u32 %v15827_v0, %v13266_v2  ;;  %v9708_v21 = vpop.eup %9707  ;;  %v3791_v38 = vshrl.u32 %v15834_v58, %v13388_v10  ;;  %v3793_v36 = vshll.u32 %v15834_v58, %v13266_v2 }
 0x3fd   : > { %v3794_v35 = vshrl.u32 %v15835_v63, %v13388_v10  ;;  %v3797_v57 = vshrl.u32 %v15837_v9, %v13388_v10  ;;  %v9710_v18 = vpop.eup %9709  ;;  %v3555_v19 = vxor.u32 2147483648, %v9708_v21  ;;  %vm3665_vm4 = vcmp.lt.s32.totalorder %v12596_v28, 0 }
 0x3fe   : > { %v3638_v50 = vor.u32 4788187, %v3637_v27  ;;  %v3724_v25 = vadd.s32 536870912, %v3723_v15  ;;  %v3790_v33 = vshll.u32 %v15833_v43, %v13266_v2  ;;  %v3552_v55 = vxor.u32 2147483648, %v9710_v18 }
 0x3ff   : > { %v3789_v7 = vor.u32 %v3788_v37, %v3787_v1  ;;  %v3795_v29 = vor.u32 %v3794_v35, %v3793_v36  ;;  %v3796_v51 = vshll.u32 %v15835_v63, %v13266_v2  ;;  %v3556_v40 = vsel %vm3554_vm12, %v3555_v19, %v9710_v18 }
 0x400   : > { %v3639_v46 = vand.u32 2147483647, %v3638_v50  ;;  %v3641_v10 = vcvt.s32.f32 %v3634_v45  ;;  %v3725_v52 = vshrl.u32 %v3724_v25, 30  ;;  %vm3986_vm7 = vcmp.gt.s32.totalorder %v13615_v22, 0 }
 0x401   : > { %v3553_v34 = vsel %vm3551_vm10, %v9708_v21, %v3552_v55  ;;  %v3792_v4 = vor.u32 %v3791_v38, %v3790_v33  ;;  %v3798_v60 = vor.u32 %v3797_v57, %v3796_v51  ;;  %vm3799_vm1 = vcmp.lt.s32.totalorder %v13385_v39, 1 }
 0x402   : > { %v3557_v6 = vsel %vm3550_vm9, %v3553_v34, %v3556_v40  ;;  %v3642_v11 = vmul.f32 %v3641_v10, %v3639_v46  ;;  %v3726_v2 = vshll.u32 %v3725_v52, 30  ;;  %vm3802_vm6 = vcmp.lt.s32.totalorder %v13385_v39, 4  ;;  %v13748_v10 = vpop.f32.mrb[0].mxu1 }
 0x403   : > { %v3558_v3 = vsel %vm3547_vm0, nan, %v3557_v6  ;;  %v3749_v12 = vsub.s32 4, %v3725_v52  ;;  %v3807_v30 = vsel %vm3799_vm1, %v3786_v59, %v3789_v7  ;;  %v3808_v44 = vsel %vm3802_vm6, %v3795_v29, 920167782 }
 0x404   : > { %vm15905_vm13 = vcmask 121856   ;;  %v3643_v47 = vxor.u32 2147483648, %v3642_v11  ;;  %v13677_v32 = vand.u32 3, %v3652_v54  ;;  %v13679_v31 = vsub.s32 %v3723_v15, %v3726_v2 }
 0x405   : > { %8879 = vmatprep.mubr.msk.f32.mxu1 %vm15905_vm13, %v3558_v3  ;;  %vm3801_vm11 = vcmp.lt.s32.totalorder %v13385_v39, 3  ;;  %vm3800_vm8 = vcmp.lt.s32.totalorder %v13385_v39, 2  ;;  %v3803_v26 = vsel %vm3799_vm1, %v3783_v8, %v3786_v59  ;;  %v3804_v20 = vsel %vm3802_vm6, %v3792_v4, 2102212464  ;;  %vm15908_vm15 = vmmov %vm15905_vm13 }
 0x406   : > { %v3809_v61 = vsel %vm3801_vm11, %v3792_v4, %v3808_v44  ;;  %v3644_v56 = vsel %vm3561_vm3, %v3643_v47, %v3642_v11  ;;  %v3729_v54 = vsub.s32 0, %v13679_v31  ;;  %v3811_v45 = vsel %vm3799_vm1, %v3789_v7, %v3792_v4 }
 0x407   : > { %v3810_v37 = vsel %vm3800_vm8, %v3807_v30, %v3809_v61  ;;  %v3647_v8 = vsel %vm13565_vm2, %v12241_v5, %v3644_v56  ;;  %v3750_v59 = vsel %vm3665_vm4, %v3749_v12, %v3725_v52  ;;  %v3812_v27 = vsel %vm3802_vm6, %v3798_v60, 1326507024 }
 0x408   : > { %v3815_v15 = vshll.u32 %v3775_v24, 8  ;;  %9711 = vcosq.f32 %v3647_v8  ;;  %v8205_v1 = vmin.u32 %v3729_v54, %v13679_v31  ;;  %v3805_v21 = vsel %vm3801_vm11, %v3789_v7, %v3804_v20 }
 0x409   : > { %v3813_v38 = vsel %vm3801_vm11, %v3795_v29, %v3812_v27  ;;  %9713 = vsinq.f32 %v3647_v8  ;;  %vm13716_vm3 = vcmp.le.f32.partialorder %v3663_v23, 0.7853982  ;;  %v13728_v25 = vsel %vm3986_vm7, %v13615_v22, 0 }
 0x40a   : > { %v3814_v62 = vsel %vm3800_vm8, %v3811_v45, %v3813_v38  ;;  %v13710_v36 = vmul.u32.u64.low %v3815_v15, %v3810_v37  ;;  %v13711_v35 = vmul.u32.u64.high %v3815_v15, %v3810_v37, %v13710_v36  ;;  %v3731_v57 = vclz %v8205_v1 }
 0x40b   : > { %v3752_v18 = vsel %vm13716_vm3, 0, %v3750_v59  ;;  %v13722_v19 = vmul.u32.u64.low %v3815_v15, %v3814_v62  ;;  %v13723_v50 = vmul.u32.u64.high %v3815_v15, %v3814_v62, %v13722_v19  ;;  %v3886_v33 = vsub.s32 32, %v13618_v48 }
 0x40c   : > { %v8206_v55 = vadd.s32 4294967294, %v3731_v57  ;;  %v3806_v23 = vsel %vm3800_vm8, %v3803_v26, %v3805_v21  ;;  %v13734_v7 = vshrl.u32 %v13506_v14, 5  ;;  %vm3655_vm2 = vcmp.eq.s32.totalorder %v13677_v32, 0 }
 0x40d   : > { %v3825_v29 = vadd.s32 1, %v13711_v35  ;;  %v3871_v51 = vand.u32 2147483647, %v13037_v49  ;;  %vm3654_vm14 = vcmp.lt.s32.totalorder %v13677_v32, 2  ;;  %vm3658_vm5 = vcmp.eq.s32.totalorder %v13677_v32, 2 }
 0x40e   : > { %v3719_v22 = vadd.s32 %v13609_v17, %v13605_v53  ;;  %vm8207_vm12 = vcmp.lt.s32.totalorder %v8206_v55, 0  ;;  %v3756_v40 = vadd.s32 3, %v3752_v18  ;;  %vm3651_vm10 = vweird.f32 %v12241_v5  ;;  %v13752_v17 = vpop.f32.mrb[1].mxu1 }
 0x40f   : > { %v3734_v39 = vsel %vm8207_vm12, 0, %v8206_v55  ;;  %v3822_v14 = vmul.u32 %v3815_v15, %v3806_v23  ;;  %vm3824_vm9 = vc.u32 %v13723_v50, %v13710_v36  ;;  %v3888_v46 = vshll.u32 %v15830_v13, %v13618_v48 }
 0x410   : > { %v3735_v52 = vsub.s32 32, %v3734_v39  ;;  %v3739_v34 = vsub.s32 4294967266, %v3734_v39  ;;  %v3826_v4 = vsel %vm3824_vm9, %v3825_v29, %v13711_v35  ;;  %v3889_v53 = vshrl.u32 %v15827_v0, %v3886_v33 }
 0x411   : > { %v3827_v60 = vadd.s32 %v3826_v4, %v3822_v14  ;;  %v3878_v6 = vand.u32 8388607, %v3871_v51  ;;  %v3891_v11 = vshll.u32 %v15827_v0, %v13618_v48  ;;  %v3892_v2 = vshrl.u32 %v15833_v43, %v3886_v33 }
 0x412   : > { %v9712_v3 = vpop.eup %9711  ;;  %v3736_v12 = vshll.u32 %v13679_v31, %v3734_v39  ;;  %v3737_v30 = vshrl.u32 %v3719_v22, %v3735_v52  ;;  %v3740_v44 = vadd.s32 127, %v3739_v34  ;;  %v3894_v47 = vshll.u32 %v15833_v43, %v13618_v48 }
 0x413   : > { %v9714_v26 = vpop.eup %9713  ;;  %v3659_v20 = vxor.u32 2147483648, %v9712_v3  ;;  %v3828_v61 = vadd.s32 536870912, %v3827_v60  ;;  %v3895_v56 = vshrl.u32 %v15834_v58, %v3886_v33  ;;  %v3898_v54 = vshrl.u32 %v15835_v63, %v3886_v33 }
 0x414   : > { %v3656_v37 = vxor.u32 2147483648, %v9714_v26  ;;  %v3738_v45 = vor.u32 %v3737_v30, %v3736_v12  ;;  %v3741_v8 = vshll.u32 %v3740_v44, 23  ;;  %v3890_v59 = vor.u32 %v3889_v53, %v3888_v46 }
 0x415   : > { %v3660_v27 = vsel %vm3658_vm5, %v3659_v20, %v9714_v26  ;;  %v3829_v31 = vshrl.u32 %v3828_v61, 30  ;;  %v3897_v15 = vshll.u32 %v15834_v58, %v13618_v48  ;;  %v3901_v1 = vshrl.u32 %v15837_v9, %v3886_v33 }
 0x416   : > { %v3657_v21 = vsel %vm3655_vm2, %v9712_v3, %v3656_v37  ;;  %v3742_v38 = vor.u32 4788187, %v3741_v8  ;;  %v3893_v62 = vor.u32 %v3892_v2, %v3891_v11  ;;  %v3900_v35 = vshll.u32 %v15835_v63, %v13618_v48 }
 0x417   : > { %v3661_v57 = vsel %vm3654_vm14, %v3657_v21, %v3660_v27  ;;  %v3830_v18 = vshll.u32 %v3829_v31, 30  ;;  %v3896_v19 = vor.u32 %v3895_v56, %v3894_v47  ;;  %v3899_v55 = vor.u32 %v3898_v54, %v3897_v15 }
 0x418   : > { %v3662_v23 = vsel %vm3651_vm10, nan, %v3661_v57  ;;  %v3743_v29 = vand.u32 2147483647, %v3742_v38  ;;  %v3745_v22 = vcvt.s32.f32 %v3738_v45  ;;  %v3902_v39 = vor.u32 %v3901_v1, %v3900_v35 }
 0x419   : > { %v13778_v14 = vand.u32 31, %v13728_v25  ;;  %8880 = vmatmul.mubr.msk.f32.gmra.mrb[10].mxu1 %vm15908_vm15, %v3662_v23  ;;  %v13781_v46 = vand.u32 3, %v3756_v40  ;;  %v13783_v48 = vsub.s32 %v3827_v60, %v3830_v18  ;;  %v3887_v32 = vshrl.u32 %v15830_v13, %v3886_v33 }
 0x41a   : > { %v3746_v52 = vmul.f32 %v3745_v22, %v3743_v29  ;;  %v3879_v34 = vor.u32 8388608, %v3878_v6  ;;  %vm3903_vm0 = vcmp.lt.s32.totalorder %v13734_v7, 1  ;;  %vm3906_vm7 = vcmp.lt.s32.totalorder %v13734_v7, 4 }
 0x41b   : > { %v3833_v5 = vsub.s32 0, %v13783_v48  ;;  %vm3905_vm1 = vcmp.lt.s32.totalorder %v13734_v7, 3  ;;  %v3911_v4 = vsel %vm3903_vm0, %v3890_v59, %v3893_v62  ;;  %v3912_v53 = vsel %vm3906_vm7, %v3899_v55, 920167782 }
 0x41c   : > { %v3747_v40 = vxor.u32 2147483648, %v3746_v52  ;;  %v3913_v60 = vsel %vm3905_vm1, %v3896_v19, %v3912_v53  ;;  %v3915_v33 = vsel %vm3903_vm0, %v3893_v62, %v3896_v19  ;;  %v3916_v6 = vsel %vm3906_vm7, %v3902_v39, 1326507024 }
 0x41d   : > { %v8209_v11 = vmin.u32 %v3833_v5, %v13783_v48  ;;  %vm3904_vm6 = vcmp.lt.s32.totalorder %v13734_v7, 2  ;;  %v3908_v2 = vsel %vm3906_vm7, %v3896_v19, 2102212464  ;;  %v3917_v3 = vsel %vm3905_vm1, %v3899_v55, %v3916_v6 }
 0x41e   : > { %v3748_v12 = vsel %vm3665_vm4, %v3747_v40, %v3746_v52  ;;  %v3914_v30 = vsel %vm3904_vm6, %v3911_v4, %v3913_v60  ;;  %v3918_v44 = vsel %vm3904_vm6, %v3915_v33, %v3917_v3  ;;  %v3919_v47 = vshll.u32 %v3879_v34, 8 }
 0x41f   : > { %v3751_v26 = vsel %vm13716_vm3, %v12596_v28, %v3748_v12  ;;  %v3835_v20 = vclz %v8209_v11  ;;  %v3853_v61 = vsub.s32 4, %v3829_v31  ;;  %v3907_v56 = vsel %vm3903_vm0, %v3887_v32, %v3890_v59 }
 0x420   : > { %9715 = vcosq.f32 %v3751_v26  ;;  %v3909_v54 = vsel %vm3905_vm1, %v3893_v62, %v3908_v2  ;;  %v13813_v37 = vmul.u32.u64.low %v3919_v47, %v3918_v44  ;;  %v13814_v45 = vmul.u32.u64.high %v3919_v47, %v3918_v44, %v13813_v37 }
 0x421   : > { %9717 = vsinq.f32 %v3751_v26  ;;  %v8210_v8 = vadd.s32 4294967294, %v3835_v20  ;;  %v13816_v27 = vmul.u32.u64.low %v3919_v47, %v3914_v30  ;;  %v13817_v15 = vmul.u32.u64.high %v3919_v47, %v3914_v30, %v13816_v27 }
 0x422   : > { %v3990_v24 = vsub.s32 32, %v13778_v14  ;;  %v13822_v1 = vshrl.u32 %v13728_v25, 5  ;;  %vm3769_vm4 = vcmp.lt.s32.totalorder %v12473_v16, 0  ;;  %v3910_v59 = vsel %vm3904_vm6, %v3907_v56, %v3909_v54 }
 0x423   : > { %vm8211_vm13 = vcmp.lt.s32.totalorder %v8210_v8, 0  ;;  %vm3762_vm11 = vcmp.eq.s32.totalorder %v13781_v46, 2  ;;  %v3823_v21 = vadd.s32 %v13710_v36, %v13723_v50  ;;  %v13832_v62 = vsel %vm3769_vm4, %v3853_v61, %v3829_v31 }
 0x424   : > { %v3838_v38 = vsel %vm8211_vm13, 0, %v8210_v8  ;;  %vm3928_vm8 = vc.u32 %v13814_v45, %v13816_v27  ;;  %vm3759_vm3 = vcmp.eq.s32.totalorder %v13781_v46, 0  ;;  %v3929_v7 = vadd.s32 1, %v13817_v15 }
 0x425   : > { %v3839_v25 = vsub.s32 32, %v3838_v38  ;;  %v3843_v35 = vsub.s32 4294967266, %v3838_v38  ;;  %v3975_v57 = vand.u32 2147483647, %v13162_v41  ;;  %vm3758_vm2 = vcmp.lt.s32.totalorder %v13781_v46, 2 }
 0x426   : > { %v3926_v18 = vmul.u32 %v3919_v47, %v3910_v59  ;;  %v3991_v36 = vshrl.u32 %v15830_v13, %v3990_v24  ;;  %v3993_v50 = vshrl.u32 %v15827_v0, %v3990_v24  ;;  %v3996_v31 = vshrl.u32 %v15833_v43, %v3990_v24 }
 0x427   : > { %vm3755_vm14 = vweird.f32 %v12596_v28  ;;  %v3840_v19 = vshll.u32 %v13783_v48, %v3838_v38  ;;  %v3841_v55 = vshrl.u32 %v3823_v21, %v3839_v25  ;;  %v3844_v23 = vadd.s32 127, %v3843_v35 }
 0x428   : > { %v3930_v29 = vsel %vm3928_vm8, %v3929_v7, %v13817_v15  ;;  %v3992_v39 = vshll.u32 %v15830_v13, %v13778_v14  ;;  %v3995_v32 = vshll.u32 %v15827_v0, %v13778_v14  ;;  %v3999_v52 = vshrl.u32 %v15834_v58, %v3990_v24  ;;  %v4815_v0 = vld [vmem:[%s15391_s8 + $0x30] sm:$0xff]  ;;  %vm15911_vm8 = vmmov %vm15908_vm15 }
 0x429   : > { %v3931_v22 = vadd.s32 %v3930_v29, %v3926_v18  ;;  %v3842_v34 = vor.u32 %v3841_v55, %v3840_v19  ;;  %v3845_v5 = vshll.u32 %v3844_v23, 23  ;;  %v3982_v4 = vand.u32 8388607, %v3975_v57  ;;  %v4810_v23 = vld [vmem:[%s15391_s8 + $0x8] sm:$0xff] }
 0x42a   : > { %v4002_v48 = vshrl.u32 %v15835_v63, %v3990_v24  ;;  %v9716_v53 = vpop.eup %9715  ;;  %v3994_v60 = vor.u32 %v3993_v50, %v3992_v39  ;;  %v3997_v33 = vor.u32 %v3996_v31, %v3995_v32  ;;  %v3998_v6 = vshll.u32 %v15833_v43, %v13778_v14  ;;  %v4812_v32 = vld [vmem:[%s15391_s8 + $0x18] sm:$0xff] }
 0x42b   : > { %v3932_v40 = vadd.s32 536870912, %v3931_v22  ;;  %v9718_v13 = vpop.eup %9717  ;;  %v3763_v11 = vxor.u32 2147483648, %v9716_v53  ;;  %vm13858_vm5 = vcmp.le.f32.partialorder %v3767_v42, 0.7853982  ;;  %v3846_v2 = vor.u32 4788187, %v3845_v5 }
 0x42c   : > { %v4001_v3 = vshll.u32 %v15834_v58, %v13778_v14  ;;  %v4005_v12 = vshrl.u32 %v15837_v9, %v3990_v24  ;;  %v3760_v30 = vxor.u32 2147483648, %v9718_v13  ;;  %v4000_v47 = vor.u32 %v3999_v52, %v3998_v6  ;;  %v4809_v52 = vld [vmem:[%s15391_s8] sm:$0xff] }
 0x42d   : > { %v13865_v44 = vshrl.u32 %v3932_v40, 30  ;;  %v4004_v43 = vshll.u32 %v15835_v63, %v13778_v14  ;;  %v3764_v26 = vsel %vm3762_vm11, %v3763_v11, %v9718_v13  ;;  %v3847_v42 = vand.u32 2147483647, %v3846_v2 }
 0x42e   : > { %v3849_v20 = vcvt.s32.f32 %v3842_v34  ;;  %v4003_v61 = vor.u32 %v4002_v48, %v4001_v3  ;;  %v3761_v56 = vsel %vm3759_vm3, %v9716_v53, %v3760_v30  ;;  %v3983_v54 = vor.u32 8388608, %v3982_v4  ;;  %v4811_v34 = vld [vmem:[%s15391_s8 + $0x10] sm:$0xff]  ;;  %v4814_v48 = vld [vmem:[%s15391_s8 + $0x28] sm:$0xff]  ;;  %v4816_v53 = vld [vmem:[%s15391_s8 + $0x38] sm:$0xff] }
 0x42f   : > { %v3934_v58 = vshll.u32 %v13865_v44, 30  ;;  %vm4007_vm12 = vcmp.lt.s32.totalorder %v13822_v1, 1  ;;  %v3765_v9 = vsel %vm3758_vm2, %v3761_v56, %v3764_v26  ;;  %v4006_v8 = vor.u32 %v4005_v12, %v4004_v43  ;;  %v4818_v30 = vld [vmem:[%s15391_s8 + $0x48] sm:$0xff] }
 0x430   : > { %v3850_v37 = vmul.f32 %v3849_v20, %v3847_v42  ;;  %vm4008_vm10 = vcmp.lt.s32.totalorder %v13822_v1, 2  ;;  %v3766_v63 = vsel %vm3755_vm14, nan, %v3765_v9  ;;  %vm4010_vm9 = vcmp.lt.s32.totalorder %v13822_v1, 4 }
 0x431   : > { %v13880_v14 = vsub.s32 %v3931_v22, %v3934_v58  ;;  %v4015_v15 = vsel %vm4007_vm12, %v3994_v60, %v3997_v33  ;;  %8882 = vmatprep.mubr.msk.f32.mxu1 %vm15908_vm15, %v3766_v63  ;;  %vm4009_vm0 = vcmp.lt.s32.totalorder %v13822_v1, 3  ;;  %v4012_v46 = vsel %vm4010_vm9, %v4000_v47, 2102212464  ;;  %v4820_v1 = vld [vmem:[%s15391_s8 + $0x58] sm:$0xff]  ;;  %vm15915_vm15 = vmmov %vm15911_vm8 }
 0x432   : > { %v3851_v24 = vxor.u32 2147483648, %v3850_v37  ;;  %v4016_v59 = vsel %vm4010_vm9, %v4003_v61, 920167782  ;;  %v4011_v28 = vsel %vm4007_vm12, %v3991_v36, %v3994_v60  ;;  %v4019_v25 = vsel %vm4007_vm12, %v3997_v33, %v4000_v47  ;;  %v4824_v63 = vld [vmem:[%s15391_s8 + $0x78] sm:$0xff] }
 0x433   : > { %v3937_v21 = vsub.s32 0, %v13880_v14  ;;  %v4017_v38 = vsel %vm4009_vm0, %v4000_v47, %v4016_v59  ;;  %v4020_v18 = vsel %vm4010_vm9, %v4006_v8, 1326507024  ;;  %v4023_v50 = vshll.u32 %v3983_v54, 8  ;;  %v4817_v54 = vld [vmem:[%s15391_s8 + $0x40] sm:$0xff]  ;;  %v4822_v8 = vld [vmem:[%s15391_s8 + $0x68] sm:$0xff] }
 0x434   : > { %v3852_v35 = vsel %vm3769_vm4, %v3851_v24, %v3850_v37  ;;  %v4018_v7 = vsel %vm4008_vm10, %v4015_v15, %v4017_v38  ;;  %v4013_v55 = vsel %vm4009_vm0, %v3997_v33, %v4012_v46  ;;  %v4021_v36 = vsel %vm4009_vm0, %v4003_v61, %v4020_v18 }
 0x435   : > { %v3855_v31 = vsel %vm13858_vm5, %v12473_v16, %v3852_v35  ;;  %v8213_v19 = vmin.u32 %v3937_v21, %v13880_v14  ;;  %v4022_v29 = vsel %vm4008_vm10, %v4019_v25, %v4021_v36  ;;  %v3856_v5 = vsel %vm13858_vm5, 0, %v13832_v62  ;;  %v4813_v62 = vld [vmem:[%s15391_s8 + $0x20] sm:$0xff]  ;;  %v4826_v36 = vld [vmem:[%s15391_s8 + $0x88] sm:$0xff] }
 0x436   : > { %9719 = vcosq.f32 %v3855_v31  ;;  %v13905_v22 = vmul.u32.u64.low %v4023_v50, %v4018_v7  ;;  %v13906_v39 = vmul.u32.u64.high %v4023_v50, %v4018_v7, %v13905_v22  ;;  %v4014_v6 = vsel %vm4008_vm10, %v4011_v28, %v4013_v55 }
 0x437   : > { %9721 = vsinq.f32 %v3855_v31  ;;  %v3939_v4 = vclz %v8213_v19  ;;  %v13927_v40 = vmul.u32.u64.low %v4023_v50, %v4022_v29  ;;  %v13928_v60 = vmul.u32.u64.high %v4023_v50, %v4022_v29, %v13927_v40  ;;  %v4821_v31 = vld [vmem:[%s15391_s8 + $0x60] sm:$0xff] }
 0x438   : > { %v9100_v13 = vpack.c.bf16 %v4812_v32, %v4810_v23  ;;  %v9102_v11 = vpack.c.bf16 %v4811_v34, %v4809_v52  ;;  %v3860_v2 = vadd.s32 3, %v3856_v5  ;;  %v4033_v3 = vadd.s32 1, %v13906_v39  ;;  %v4828_v23 = vld [vmem:[%s15391_s8 + $0x98] sm:$0xff]  ;;  %v4825_v40 = vld [vmem:[%s15391_s8 + $0x80] sm:$0xff] }
 0x439   : > { %v8214_v33 = vadd.s32 4294967294, %v3939_v4  ;;  %v9104_v12 = vpack.c.bf16 %v4816_v53, %v4814_v48  ;;  %v3927_v47 = vadd.s32 %v13816_v27, %v13814_v45  ;;  %v4030_v26 = vmul.u32 %v4023_v50, %v4014_v6  ;;  %v4819_v45 = vld [vmem:[%s15391_s8 + $0x50] sm:$0xff]  ;;  %v13956_v27 = vpop.f32.mrb[2].mxu1 }
 0x43a   : > { %9101 = vmatprep.subr.bf16.mxu0 %v9100_v13  ;;  %vm4032_vm1 = vc.u32 %v13928_v60, %v13905_v22  ;;  %v9106_v42 = vpack.c.bf16 %v4815_v0, %v4813_v62  ;;  %v9108_v58 = vpack.c.bf16 %v4820_v1, %v4818_v30  ;;  %v3861_v9 = vand.u32 3, %v3860_v2  ;;  %v13964_v15 = vpop.f32.mrb[3].mxu1  ;;  %v4832_v62 = vld [vmem:[%s15391_s8 + $0xb8] sm:$0xff]  ;;  %v4829_v1 = vld [vmem:[%s15391_s8 + $0xa0] sm:$0xff] }
 0x43b   : > { %vm8215_vm7 = vcmp.lt.s32.totalorder %v8214_v33, 0  ;;  %9103 = vmatpush1.bf16.msra.mxu0 %v9102_v11  ;;  %v4034_v56 = vsel %vm4032_vm1, %v4033_v3, %v13906_v39  ;;  %v9110_v38 = vpack.c.bf16 %v4819_v45, %v4817_v54  ;;  %v9112_v50 = vpack.c.bf16 %v4824_v63, %v4822_v8  ;;  %v4830_v11 = vld [vmem:[%s15391_s8 + $0xa8] sm:$0xff] }
 0x43c   : > { %v3942_v43 = vsel %vm8215_vm7, 0, %v8214_v33  ;;  %9105 = vmatprep.subr.bf16.mxu0 %v9104_v12  ;;  %v4035_v37 = vadd.s32 %v4034_v56, %v4030_v26  ;;  %vm3866_vm6 = vcmp.eq.s32.totalorder %v3861_v9, 2  ;;  %vm3859_vm4 = vweird.f32 %v12473_v16  ;;  %v4827_v33 = vld [vmem:[%s15391_s8 + $0x90] sm:$0xff]  ;;  %v4834_v26 = vld [vmem:[%s15391_s8 + $0xc8] sm:$0xff] }
 0x43d   : > { %v3943_v20 = vsub.s32 32, %v3942_v43  ;;  %v3947_v61 = vsub.s32 4294967266, %v3942_v43  ;;  %v3944_v24 = vshll.u32 %v13880_v14, %v3942_v43  ;;  %v4823_v14 = vld [vmem:[%s15391_s8 + $0x70] sm:$0xff]  ;;  %vm3863_vm13 = vcmp.eq.s32.totalorder %v3861_v9, 0 }
 0x43e   : > { %v4036_v28 = vadd.s32 536870912, %v4035_v37  ;;  %vm3862_vm11 = vcmp.lt.s32.totalorder %v3861_v9, 2  ;;  %v9114_v34 = vpack.c.bf16 %v4823_v14, %v4821_v31  ;;  %v9116_v53 = vpack.c.bf16 %v4828_v23, %v4826_v36 }
 0x43f   : > { %v3945_v46 = vshrl.u32 %v3927_v47, %v3943_v20  ;;  %v3948_v59 = vadd.s32 127, %v3947_v61  ;;  %9107 = vmatpush1.bf16.msra.mxu0 %v9106_v42  ;;  %v3957_v2 = vsub.s32 4, %v13865_v44  ;;  %v9118_v12 = vpack.c.bf16 %v4827_v33, %v4825_v40  ;;  %v4831_v47 = vld [vmem:[%s15391_s8 + $0xb0] sm:$0xff]  ;;  %v4836_v42 = vld [vmem:[%s15391_s8 + $0xd8] sm:$0xff] }
 0x440   : > { %v9720_v21 = vpop.eup %9719  ;;  %9109 = vmatprep.subr.bf16.mxu0 %v9108_v58  ;;  %v13973_v55 = vshrl.u32 %v4036_v28, 30  ;;  %v9120_v16 = vpack.c.bf16 %v4832_v62, %v4830_v11  ;;  %vm3873_vm3 = vcmp.lt.s32.totalorder %v13037_v49, 0  ;;  %vm14014_vm2 = vcmp.le.f32.partialorder %v3871_v51, 0.7853982  ;;  %v4833_v51 = vld [vmem:[%s15391_s8 + $0xc0] sm:$0xff]  ;;  %v4840_v28 = vld [vmem:[%s15391_s8 + $0xf8] sm:$0xff] }
 0x441   : > { %v9722_v25 = vpop.eup %9721  ;;  %v3867_v35 = vxor.u32 2147483648, %v9720_v21  ;;  %v3946_v7 = vor.u32 %v3945_v46, %v3944_v24  ;;  %v3949_v18 = vshll.u32 %v3948_v59, 23  ;;  %v3958_v56 = vsel %vm3873_vm3, %v3957_v2, %v13865_v44 }
 0x442   : > { %v3864_v19 = vxor.u32 2147483648, %v9722_v25  ;;  %v4038_v52 = vshll.u32 %v13973_v55, 30  ;;  %v9122_v45 = vpack.c.bf16 %v4831_v47, %v4829_v1  ;;  %v9124_v9 = vpack.c.bf16 %v4836_v42, %v4834_v26 }
 0x443   : > { %v3868_v29 = vsel %vm3866_vm6, %v3867_v35, %v9722_v25  ;;  %v3950_v39 = vor.u32 4788187, %v3949_v18  ;;  %9111 = vmatpush1.bf16.msra.mxu0 %v9110_v38  ;;  %v3953_v48 = vcvt.s32.f32 %v3946_v7  ;;  %v3960_v44 = vsel %vm14014_vm2, 0, %v3958_v56  ;;  %v4837_v18 = vld [vmem:[%s15391_s8 + $0xe0] sm:$0xff] }
 0x444   : > { %v3865_v32 = vsel %vm3863_vm13, %v9720_v21, %v3864_v19  ;;  %9113 = vmatprep.subr.bf16.mxu0 %v9112_v50  ;;  %v4039_v13 = vsub.s32 %v4035_v37, %v4038_v52  ;;  %v4835_v37 = vld [vmem:[%s15391_s8 + $0xd0] sm:$0xff]  ;;  %v3964_v24 = vadd.s32 3, %v3960_v44  ;;  %v4709_v59 = vlaneseq  ;;  %v4838_v21 = vld [vmem:[%s15391_s8 + $0xe8] sm:$0xff] }
 0x445   : > { %v3869_v5 = vsel %vm3862_vm11, %v3865_v32, %v3868_v29  ;;  %v3951_v4 = vand.u32 2147483647, %v3950_v39  ;;  %v9126_v63 = vpack.c.bf16 %v4835_v37, %v4833_v51  ;;  %v4031_v38 = vadd.s32 %v13905_v22, %v13928_v60  ;;  %v4839_v50 = vld [vmem:[%s15391_s8 + $0xf0] sm:$0xff]  ;;  %vm15916_vm11 = vmmov %vm15911_vm8 }
 0x446   : > { %v3870_v6 = vsel %vm3859_vm4, nan, %v3869_v5  ;;  %v4041_v3 = vsub.s32 0, %v4039_v13  ;;  %v9128_v7 = vpack.c.bf16 %v4840_v28, %v4838_v21  ;;  %v9130_v36 = vpack.c.bf16 %v4839_v50, %v4837_v18 }
 0x447   : > { %8883 = vmatmul.mubr.msk.f32.gmra.mrb[12].mxu1 %vm15911_vm8, %v3870_v6  ;;  %v3954_v0 = vmul.f32 %v3953_v48, %v3951_v4  ;;  %9115 = vmatpush1.bf16.msra.mxu0 %v9114_v34  ;;  %v3965_v23 = vand.u32 3, %v3964_v24  ;;  %v14044_v60 = vshrl.u32 %v4709_v59, 7  ;;  %v518_v6 = vld [vmem:[%s15395_s12] sm:$0xff]  ;;  %vm3963_vm9 = vweird.f32 %v13037_v49 }
 0x448   : > { %9117 = vmatprep.subr.bf16.mxu0 %v9116_v53  ;;  %v8217_v43 = vmin.u32 %v4041_v3, %v4039_v13  ;;  %v4061_v62 = vsub.s32 4, %v13973_v55  ;;  %vm3977_vm0 = vcmp.lt.s32.totalorder %v13162_v41, 0  ;;  %vm3976_vm7 = vcmp.le.f32.partialorder %v3975_v57, 0.7853982 }
 0x449   : > { %v3955_v30 = vxor.u32 2147483648, %v3954_v0  ;;  %15914 = vst [vmem:[#allocation8_spill] sm:$0xff] %v14044_v60  ;;  %vm3967_vm5 = vcmp.eq.s32.totalorder %v3965_v23, 0  ;;  %vm3970_vm12 = vcmp.eq.s32.totalorder %v3965_v23, 2  ;;  %v15574_v40 = vsub.s32 0, %v14044_v60 }
 0x44a   : > { %v4043_v54 = vclz %v8217_v43  ;;  %vm3966_vm10 = vcmp.lt.s32.totalorder %v3965_v23, 2  ;;  %vm4067_vm13 = vweird.f32 %v13162_v41  ;;  %vm6374_vm8 = vcmask 1043456  }
 0x44b   : > { %v3956_v61 = vsel %vm3873_vm3, %v3955_v30, %v3954_v0  ;;  %9119 = vmatpush1.bf16.msra.mxu0 %v9118_v12  ;;  %v14055_v3 = vrot.slane %v518_v6, %v15574_v40  ;;  %vm6325_vm3 = vcmask 31744  }
 0x44c   : > { %v3959_v58 = vsel %vm14014_vm2, %v13037_v49, %v3956_v61  ;;  %9121 = vmatprep.subr.bf16.mxu0 %v9120_v16  ;;  %v8218_v8 = vadd.s32 4294967294, %v4043_v54  ;;  %v4062_v49 = vsel %vm3977_vm0, %v4061_v62, %v13973_v55  ;;  %vm7939_vm2 = vcmask 203776  }
 0x44d   : > { %9723 = vcosq.f32 %v3959_v58  ;;  %v4713_v16 = vadd.f32 %v14055_v3, %v13752_v17  ;;  %v4064_v1 = vsel %vm3976_vm7, 0, %v4062_v49 }
 0x44e   : > { %9725 = vsinq.f32 %v3959_v58  ;;  %vm8219_vm14 = vcmp.lt.s32.totalorder %v8218_v8, 0  ;;  %v4068_v47 = vadd.s32 3, %v4064_v1  ;;  %v4841_v1 = vld [vmem:[#allocation2] sm:$0xff] }
 0x44f   : > { %9123 = vmatpush1.bf16.msra.mxu0 %v9122_v45  ;;  %v4046_v46 = vsel %vm8219_vm14, 0, %v8218_v8  ;;  %v4745_v43 = vmul.f32 0.70710677, %v4713_v16  ;;  %v4729_v37 = vmul.f32 0.5, %v4713_v16  ;;  %v10201_v8 = vmov 0.0   ;;  %v4858_v16 = vld [vmem:[#allocation2 + $0x88] sm:$0xff] }
 0x450   : > { %9125 = vmatprep.subr.bf16.mxu0 %v9124_v9  ;;  %v4047_v25 = vsub.s32 32, %v4046_v46  ;;  %v4051_v35 = vsub.s32 4294967266, %v4046_v46  ;;  %v4048_v31 = vshll.u32 %v4039_v13, %v4046_v46  ;;  %v4069_v42 = vand.u32 3, %v4068_v47  ;;  %4937 = vmatprep.mubr.f32.mxu0 %v10201_v8 }
 0x452   : > { %v4049_v14 = vshrl.u32 %v4031_v38, %v4047_v25  ;;  %v4052_v19 = vadd.s32 127, %v4051_v35  ;;  %vm4074_vm1 = vcmp.eq.s32.totalorder %v4069_v42, 2  ;;  %vm4071_vm6 = vcmp.eq.s32.totalorder %v4069_v42, 0 }
 0x453   : > { %9127 = vmatpush1.bf16.msra.mxu0 %v9126_v63  ;;  %vm4070_vm4 = vcmp.lt.s32.totalorder %v4069_v42, 2  ;;  %v4715_v25 = vadd.f32 %v14055_v3, %v13964_v15  ;;  %v4859_v42 = vld [vmem:[#allocation2 + $0x90] sm:$0xff] }
 0x454   : > { %9129 = vmatprep.subr.bf16.mxu0 %v9128_v7  ;;  %v4050_v29 = vor.u32 %v4049_v14, %v4048_v31  ;;  %v4053_v22 = vshll.u32 %v4052_v19, 23 }
 0x455   : > { %v4747_v7 = vmul.f32 0.70710677, %v4715_v25 }
 0x456   : > { %v4054_v34 = vor.u32 4788187, %v4053_v22  ;;  %v4057_v53 = vcvt.s32.f32 %v4050_v29 }
 0x457   : > { %v9724_v39 = vpop.eup %9723  ;;  %9131 = vmatpush1.bf16.msra.mxu0 %v9130_v36 }
 0x458   : > { %v9726_v32 = vpop.eup %9725  ;;  %v3971_v52 = vxor.u32 2147483648, %v9724_v39  ;;  %v4055_v48 = vand.u32 2147483647, %v4054_v34 }
 0x459   : > { %v3968_v5 = vxor.u32 2147483648, %v9726_v32 }
 0x45a   : > { %v3972_v4 = vsel %vm3970_vm12, %v3971_v52, %v9726_v32  ;;  %v4058_v11 = vmul.f32 %v4057_v53, %v4055_v48  ;;  %v4731_v32 = vmul.f32 0.5, %v4715_v25 }
 0x45b   : > { %v3969_v33 = vsel %vm3967_vm5, %v9724_v39, %v3968_v5 }
 0x45c   : > { %v3973_v13 = vsel %vm3966_vm10, %v3969_v33, %v3972_v4  ;;  %v4059_v2 = vxor.u32 2147483648, %v4058_v11 }
 0x45d   : > { %v3974_v0 = vsel %vm3963_vm9, nan, %v3973_v13 }
 0x45e   : > { %8885 = vmatprep.mubr.msk.f32.mxu1 %vm15915_vm15, %v3974_v0  ;;  %v4060_v12 = vsel %vm3977_vm0, %v4059_v2, %v4058_v11 }
 0x45f   : > { %v4063_v30 = vsel %vm3976_vm7, %v13162_v41, %v4060_v12  ;;  %v4714_v41 = vadd.f32 %v13748_v10, %v14055_v3  ;;  %v4716_v10 = vadd.f32 %v13956_v27, %v14055_v3 }
 0x460   : > { %9727 = vcosq.f32 %v4063_v30 }
 0x461   : > { %9729 = vsinq.f32 %v4063_v30  ;;  %v8872_v26 = vpop.f32.mrb[4].mxu1  ;;  %v4746_v46 = vmul.f32 0.70710677, %v4714_v41  ;;  %v4730_v28 = vmul.f32 0.5, %v4714_v41  ;;  %v4748_v50 = vmul.f32 0.70710677, %v4716_v10 }
 0x462   : > { %9731 = verf.f32 %v4745_v43  ;;  %v4634_v20 = vpop.f32.mrb[5].mxu1  ;;  %v4718_v14 = vadd.f32 %v8872_v26, %v14055_v3  ;;  %v4732_v53 = vmul.f32 0.5, %v4716_v10  ;;  %v4857_v30 = vld [vmem:[#allocation2 + $0x80] sm:$0xff]  ;;  %v4842_v26 = vld [vmem:[#allocation2 + $0x8] sm:$0xff] }
 0x463   : > { %9733 = verf.f32 %v4746_v46  ;;  %v4717_v31 = vadd.f32 %v14055_v3, %v4634_v20  ;;  %v9132_v43 = vpack.c.bf16 %v4858_v16, %v4857_v30  ;;  %v4860_v20 = vld [vmem:[#allocation2 + $0x98] sm:$0xff]  ;;  %v4851_v30 = vld [vmem:[#allocation2 + $0x50] sm:$0xff] }
 0x464   : > { %9735 = verf.f32 %v4747_v7  ;;  %v4750_v36 = vmul.f32 0.70710677, %v4718_v14  ;;  %v4852_v16 = vld [vmem:[#allocation2 + $0x58] sm:$0xff] }
 0x465   : > { %9737 = verf.f32 %v4748_v50  ;;  %v4749_v19 = vmul.f32 0.70710677, %v4717_v31  ;;  %v4733_v0 = vmul.f32 0.5, %v4717_v31  ;;  %9133 = vmatprep.subr.bf16.mxu0 %v9132_v43  ;;  %v4848_v50 = vld [vmem:[#allocation2 + $0x38] sm:$0xff]  ;;  %v4869_v43 = vld [vmem:[#allocation2 + $0xe0] sm:$0xff] }
 0x467   : > { %9739 = verf.f32 %v4749_v19  ;;  %v4866_v19 = vld [vmem:[#allocation2 + $0xc8] sm:$0xff] }
 0x468   : > { %9741 = verf.f32 %v4750_v36 }
 0x46a   : > { %v9728_v61 = vpop.eup %9727 }
 0x46b   : > { %v9730_v56 = vpop.eup %9729  ;;  %v4075_v57 = vxor.u32 2147483648, %v9728_v61 }
 0x46c   : > { %v4072_v58 = vxor.u32 2147483648, %v9730_v56  ;;  %v9732_v9 = vpop.eup %9731 }
 0x46d   : > { %v4076_v55 = vsel %vm4074_vm1, %v4075_v57, %v9730_v56  ;;  %v4777_v51 = vadd.f32 1.0, %v9732_v9  ;;  %v9734_v59 = vpop.eup %9733  ;;  %v9134_v56 = vpack.c.bf16 %v4842_v26, %v4841_v1  ;;  %v9136_v57 = vpack.c.bf16 %v4860_v20, %v4859_v42  ;;  %v4870_v26 = vld [vmem:[#allocation2 + $0xe8] sm:$0xff] }
 0x46e   : > { %v4073_v54 = vsel %vm4071_vm6, %v9728_v61, %v4072_v58  ;;  %v4778_v21 = vadd.f32 1.0, %v9734_v59  ;;  %v9736_v29 = vpop.eup %9735  ;;  %v4734_v61 = vmul.f32 0.5, %v4718_v14  ;;  %v4843_v58 = vld [vmem:[#allocation2 + $0x10] sm:$0xff]  ;;  %v4865_v14 = vld [vmem:[#allocation2 + $0xc0] sm:$0xff]  ;;  %v9154_v20 = vpack.c.bf16 %v4852_v16, %v4851_v30 }
 0x46f   : > { %v4077_v17 = vsel %vm4070_vm4, %v4073_v54, %v4076_v55  ;;  %v14066_v44 = vmul.f32 %v4777_v51, %v4729_v37  ;;  %v4779_v22 = vadd.f32 1.0, %v9736_v29  ;;  %v9738_v39 = vpop.eup %9737  ;;  %v4844_v55 = vld [vmem:[#allocation2 + $0x18] sm:$0xff]  ;;  %v4861_v54 = vld [vmem:[#allocation2 + $0xa0] sm:$0xff]  ;;  %v4863_v59 = vld [vmem:[#allocation2 + $0xb0] sm:$0xff] }
 0x470   : > { %v4078_v45 = vsel %vm4067_vm13, nan, %v4077_v17  ;;  %v14074_v38 = vmul.f32 %v4778_v21, %v4730_v28  ;;  %v4780_v5 = vadd.f32 1.0, %v9738_v39  ;;  %v4862_v17 = vld [vmem:[#allocation2 + $0xa8] sm:$0xff]  ;;  %v9138_v51 = vpack.c.bf16 %v4844_v55, %v4843_v58  ;;  %v4864_v21 = vld [vmem:[#allocation2 + $0xb8] sm:$0xff]  ;;  %v4849_v39 = vld [vmem:[#allocation2 + $0x40] sm:$0xff] }
 0x471   : > { %8886 = vmatmul.mubr.msk.f32.gmra.mrb[14].mxu1 %vm15916_vm11, %v4078_v45  ;;  %4938 = vmatmul.mubr.f32.vlgmr.msra.gmra.mrb[16].mxu0 %v14066_v44  ;;  %v14092_v4 = vmul.f32 %v4779_v22, %v4731_v32  ;;  %v9740_v48 = vpop.eup %9739  ;;  %v9140_v41 = vpack.c.bf16 %v4862_v17, %v4861_v54  ;;  %v9144_v7 = vpack.c.bf16 %v4864_v21, %v4863_v59  ;;  %v4850_v32 = vld [vmem:[#allocation2 + $0x48] sm:$0xff] }
 0x472   : > { %5686 = vmatprep.mubr.f32.mxu1 %v10201_v8  ;;  %4943 = vmatprep.mubr.f32.mxu0 %v10201_v8  ;;  %v4781_v13 = vadd.f32 1.0, %v9740_v48  ;;  %v14100_v11 = vmul.f32 %v4780_v5, %v4732_v53  ;;  %v9742_v62 = vpop.eup %9741  ;;  %v9148_v22 = vpack.c.bf16 %v4866_v19, %v4865_v14  ;;  %v4868_v48 = vld [vmem:[#allocation2 + $0xd8] sm:$0xff] }
 0x473   : > { %v4782_v12 = vadd.f32 1.0, %v9742_v62  ;;  %9135 = vmatpush3.bf16.msra.mxu0 %v9134_v56 }
 0x474   : > { %v14105_v49 = vmul.f32 %v4781_v13, %v4733_v0  ;;  %9137 = vmatprep.subr.bf16.mxu0 %v9136_v57 }
 0x475   : > { %4944 = vmatmul.mubr.f32.gmra.mrb[18].mxu0 %v14074_v38  ;;  %v14109_v9 = vmul.f32 %v4782_v12, %v4734_v61  ;;  %v9156_v61 = vpack.c.bf16 %v4870_v26, %v4869_v43 }
 0x476   : > { %4949 = vmatprep.mubr.f32.mxu0 %v10201_v8 }
 0x477   : > { %9139 = vmatpush3.bf16.msra.mxu0 %v9138_v51  ;;  %v4853_v51 = vld [vmem:[#allocation2 + $0x60] sm:$0xff] }
 0x478   : > { %9141 = vmatprep.subr.bf16.mxu0 %v9140_v41 }
 0x479   : > { %4950 = vmatmul.mubr.f32.gmra.mrb[20].mxu0 %v14092_v4 }
 0x47a   : > { %4955 = vmatprep.mubr.f32.mxu0 %v10201_v8 }
 0x47d   : > { %4956 = vmatmul.mubr.f32.gmra.mrb[22].mxu0 %v14100_v11 }
 0x47e   : > { %4961 = vmatprep.mubr.f32.mxu0 %v10201_v8 }
 0x481   : > { %4962 = vmatmul.mubr.f32.gmra.mrb[24].mxu0 %v14105_v49 }
 0x482   : > { %4967 = vmatprep.mubr.f32.mxu0 %v10201_v8 }
 0x485   : > { %4968 = vmatmul.mubr.f32.gmra.mrb[26].mxu0 %v14109_v9 }
 0x486   : > { %4973 = vmatprep.mubr.f32.mxu0 %v10201_v8 }
 0x48f   : > { %v8875_v63 = vpop.f32.mrb[6].mxu1 }
 0x490   : > { %v4644_v24 = vpop.f32.mrb[7].mxu1  ;;  %v14086_v15 = vadd.f32 %v8875_v63, %v14055_v3  ;;  %v4845_v63 = vld [vmem:[#allocation2 + $0x20] sm:$0xff] }
 0x491   : > { %v4719_v23 = vadd.f32 %v14055_v3, %v4644_v24  ;;  %v4846_v24 = vld [vmem:[#allocation2 + $0x28] sm:$0xff] }
 0x492   : > { %v4752_v52 = vmul.f32 0.70710677, %v14086_v15  ;;  %v4736_v31 = vmul.f32 0.5, %v14086_v15  ;;  %v4867_v15 = vld [vmem:[#allocation2 + $0xd0] sm:$0xff] }
 0x493   : > { %v4751_v27 = vmul.f32 0.70710677, %v4719_v23  ;;  %v4735_v46 = vmul.f32 0.5, %v4719_v23 }
 0x495   : > { %9743 = verf.f32 %v4751_v27 }
 0x496   : > { %9745 = verf.f32 %v4752_v52 }
 0x49f   : > { %v9744_v47 = vpop.eup %9743 }
 0x4a0   : > { %v4783_v45 = vadd.f32 1.0, %v9744_v47  ;;  %v9746_v37 = vpop.eup %9745 }
 0x4a1   : > { %v4784_v28 = vadd.f32 1.0, %v9746_v37  ;;  %v4854_v37 = vld [vmem:[#allocation2 + $0x68] sm:$0xff] }
 0x4a2   : > { %v14113_v25 = vmul.f32 %v4783_v45, %v4735_v46  ;;  %v9158_v41 = vpack.c.bf16 %v4854_v37, %v4853_v51 }
 0x4a3   : > { %v14118_v23 = vmul.f32 %v4784_v28, %v4736_v31 }
 0x4a4   : > { %4974 = vmatmul.mubr.f32.gmra.mrb[28].mxu0 %v14113_v25 }
 0x4a5   : > { %4979 = vmatprep.mubr.f32.mxu0 %v10201_v8 }
 0x4a8   : > { %4980 = vmatmul.mubr.f32.gmra.mrb[30].mxu0 %v14118_v23 }
 0x4a9   : > { %4985 = vmatprep.mubr.f32.mxu0 %v10201_v8 }
 0x4be   : > { %v8878_v35 = vpop.f32.mrb[8].mxu1 }
 0x4bf   : > { %v4654_v18 = vpop.f32.mrb[9].mxu1  ;;  %v14096_v33 = vadd.f32 %v8878_v35, %v14055_v3  ;;  %v9142_v35 = vpack.c.bf16 %v4846_v24, %v4845_v63 }
 0x4c0   : > { %v14090_v34 = vadd.f32 %v14055_v3, %v4654_v18  ;;  %v4847_v18 = vld [vmem:[#allocation2 + $0x30] sm:$0xff] }
 0x4c1   : > { %v4754_v2 = vmul.f32 0.70710677, %v14096_v33  ;;  %9143 = vmatpush3.bf16.msra.mxu0 %v9142_v35  ;;  %v9146_v29 = vpack.c.bf16 %v4848_v50, %v4847_v18  ;;  %v4738_v1 = vmul.f32 0.5, %v14096_v33 }
 0x4c2   : > { %v4753_v6 = vmul.f32 0.70710677, %v14090_v34  ;;  %9145 = vmatprep.subr.bf16.mxu0 %v9144_v7  ;;  %v4737_v52 = vmul.f32 0.5, %v14090_v34  ;;  %v9152_v34 = vpack.c.bf16 %v4868_v48, %v4867_v15 }
 0x4c4   : > { %9747 = verf.f32 %v4753_v6 }
 0x4c5   : > { %9749 = verf.f32 %v4754_v2  ;;  %9147 = vmatpush3.bf16.msra.mxu0 %v9146_v29  ;;  %v9150_v2 = vpack.c.bf16 %v4850_v32, %v4849_v39  ;;  %v4872_v29 = vld [vmem:[#allocation2 + $0xf8] sm:$0xff] }
 0x4c6   : > { %9149 = vmatprep.subr.bf16.mxu0 %v9148_v22  ;;  %v4855_v22 = vld [vmem:[#allocation2 + $0x70] sm:$0xff]  ;;  %v4856_v39 = vld [vmem:[#allocation2 + $0x78] sm:$0xff] }
 0x4c7   : > { %v9162_v32 = vpack.c.bf16 %v4856_v39, %v4855_v22 }
 0x4c9   : > { %9151 = vmatpush3.bf16.msra.mxu0 %v9150_v2 }
 0x4ca   : > { %9153 = vmatprep.subr.bf16.mxu0 %v9152_v34 }
 0x4cd   : > { %9155 = vmatpush3.bf16.msra.mxu0 %v9154_v20 }
 0x4ce   : > { %v9748_v10 = vpop.eup %9747  ;;  %9157 = vmatprep.subr.bf16.mxu0 %v9156_v61 }
 0x4cf   : > { %v4785_v36 = vadd.f32 1.0, %v9748_v10  ;;  %v9750_v27 = vpop.eup %9749 }
 0x4d0   : > { %v4786_v13 = vadd.f32 1.0, %v9750_v27 }
 0x4d1   : > { %v14125_v0 = vmul.f32 %v4785_v36, %v4737_v52  ;;  %9159 = vmatpush3.bf16.msra.mxu0 %v9158_v41  ;;  %v4871_v36 = vld [vmem:[#allocation2 + $0xf0] sm:$0xff] }
 0x4d2   : > { %v14130_v42 = vmul.f32 %v4786_v13, %v4738_v1  ;;  %v9160_v27 = vpack.c.bf16 %v4872_v29, %v4871_v36 }
 0x4d3   : > { %4986 = vmatmul.mubr.f32.gmra.mrb[32].mxu0 %v14125_v0 }
 0x4d4   : > { %4991 = vmatprep.mubr.f32.mxu0 %v10201_v8  ;;  %9161 = vmatprep.subr.bf16.mxu0 %v9160_v27 }
 0x4d5   : > { %9163 = vmatpush3.bf16.msra.mxu0 %v9162_v32 }
 0x4d7   : > { %4992 = vmatmul.mubr.f32.gmra.mrb[34].mxu0 %v14130_v42 }
 0x4d8   : > { %4997 = vmatprep.mubr.f32.mxu0 %v10201_v8 }
 0x4ec   : > { %v8881_v5 = vpop.f32.mrb[10].mxu1 }
 0x4ed   : > { %v4724_v53 = vadd.f32 %v8881_v5, %v14055_v3  ;;  %v4664_v6 = vpop.f32.mrb[11].mxu1 }
 0x4ee   : > { %v4723_v62 = vadd.f32 %v14055_v3, %v4664_v6 }
 0x4ef   : > { %v4756_v12 = vmul.f32 0.70710677, %v4724_v53  ;;  %v4740_v17 = vmul.f32 0.5, %v4724_v53 }
 0x4f0   : > { %v4755_v47 = vmul.f32 0.70710677, %v4723_v62  ;;  %v4739_v57 = vmul.f32 0.5, %v4723_v62 }
 0x4f1   : > { %9751 = verf.f32 %v4756_v12 }
 0x4f2   : > { %9753 = verf.f32 %v4755_v47 }
 0x4fb   : > { %v9752_v33 = vpop.eup %9751 }
 0x4fc   : > { %v9754_v56 = vpop.eup %9753  ;;  %v4788_v55 = vadd.f32 1.0, %v9752_v33 }
 0x4fd   : > { %v4787_v58 = vadd.f32 1.0, %v9754_v56 }
 0x4fe   : > { %v14138_v45 = vmul.f32 %v4788_v55, %v4740_v17 }
 0x4ff   : > { %v14134_v54 = vmul.f32 %v4787_v58, %v4739_v57 }
 0x501   : > { %4998 = vmatmul.mubr.f32.gmra.mrb[36].mxu0 %v14134_v54 }
 0x502   : > { %5003 = vmatprep.mubr.f32.mxu0 %v10201_v8 }
 0x505   : > { %5004 = vmatmul.mubr.f32.gmra.mrb[38].mxu0 %v14138_v45 }
 0x506   : > { %5009 = vmatprep.mubr.f32.mxu0 %v10201_v8 }
 0x51a   : > { %v8884_v63 = vpop.f32.mrb[12].mxu1 }
 0x51b   : > { %v4726_v24 = vadd.f32 %v8884_v63, %v14055_v3  ;;  %v4674_v46 = vpop.f32.mrb[13].mxu1 }
 0x51c   : > { %v4725_v59 = vadd.f32 %v14055_v3, %v4674_v46 }
 0x51d   : > { %v4758_v21 = vmul.f32 0.70710677, %v4726_v24  ;;  %v4742_v14 = vmul.f32 0.5, %v4726_v24 }
 0x51e   : > { %v4757_v28 = vmul.f32 0.70710677, %v4725_v59  ;;  %v4741_v7 = vmul.f32 0.5, %v4725_v59 }
 0x51f   : > { %9755 = verf.f32 %v4758_v21 }
 0x520   : > { %9757 = verf.f32 %v4757_v28 }
 0x529   : > { %v9756_v35 = vpop.eup %9755 }
 0x52a   : > { %v9758_v10 = vpop.eup %9757  ;;  %v4790_v50 = vadd.f32 1.0, %v9756_v35 }
 0x52b   : > { %v4789_v18 = vadd.f32 1.0, %v9758_v10 }
 0x52c   : > { %v14148_v19 = vmul.f32 %v4790_v50, %v4742_v14 }
 0x52d   : > { %v14144_v31 = vmul.f32 %v4789_v18, %v4741_v7 }
 0x52f   : > { %5010 = vmatmul.mubr.f32.gmra.mrb[40].mxu0 %v14144_v31 }
 0x530   : > { %5015 = vmatprep.mubr.f32.mxu0 %v10201_v8 }
 0x533   : > { %5016 = vmatmul.mubr.f32.gmra.mrb[42].mxu0 %v14148_v19 }
 0x534   : > { %5021 = vmatprep.mubr.f32.mxu0 %v10201_v8 }
 0x544   : > { %v8887_v52 = vpop.f32.mrb[14].mxu1  ;;  %v4939_v13 = vpop.f32.mrb[16].mxu0 }
 0x545   : > { %v4728_v5 = vadd.f32 %v8887_v52, %v14055_v3  ;;  %v4684_v15 = vpop.f32.mrb[15].mxu1  ;;  %v5066_v62 = vmul.f32 0.70710677, %v4939_v13  ;;  %v4941_v2 = vpop.f32.mrb[17].mxu0  ;;  %v5034_v58 = vmul.f32 0.5, %v4939_v13 }
 0x546   : > { %v4727_v48 = vadd.f32 %v14055_v3, %v4684_v15  ;;  %v5067_v12 = vmul.f32 0.70710677, %v4941_v2  ;;  %v5035_v56 = vmul.f32 0.5, %v4941_v2 }
 0x547   : > { %v4760_v53 = vmul.f32 0.70710677, %v4728_v5  ;;  %v4744_v26 = vmul.f32 0.5, %v4728_v5 }
 0x548   : > { %v4759_v6 = vmul.f32 0.70710677, %v4727_v48  ;;  %v4743_v16 = vmul.f32 0.5, %v4727_v48  ;;  %v4945_v51 = vpop.f32.mrb[18].mxu0 }
 0x549   : > { %9759 = verf.f32 %v4760_v53  ;;  %v5068_v37 = vmul.f32 0.70710677, %v4945_v51  ;;  %v4947_v41 = vpop.f32.mrb[19].mxu0  ;;  %v5036_v35 = vmul.f32 0.5, %v4945_v51 }
 0x54a   : > { %9761 = verf.f32 %v4759_v6  ;;  %v5069_v63 = vmul.f32 0.70710677, %v4947_v41  ;;  %v5037_v21 = vmul.f32 0.5, %v4947_v41 }
 0x54b   : > { %9763 = verf.f32 %v5066_v62 }
 0x54c   : > { %9765 = verf.f32 %v5067_v12  ;;  %v4951_v18 = vpop.f32.mrb[20].mxu0 }
 0x54d   : > { %9767 = verf.f32 %v5068_v37  ;;  %v5070_v50 = vmul.f32 0.70710677, %v4951_v18  ;;  %v4953_v14 = vpop.f32.mrb[21].mxu0 }
 0x54e   : > { %9769 = verf.f32 %v5069_v63  ;;  %v5071_v36 = vmul.f32 0.70710677, %v4953_v14 }
 0x54f   : > { %9771 = verf.f32 %v5070_v50 }
 0x550   : > { %9773 = verf.f32 %v5071_v36  ;;  %v4957_v29 = vpop.f32.mrb[22].mxu0 }
 0x551   : > { %v5072_v27 = vmul.f32 0.70710677, %v4957_v29  ;;  %v4959_v22 = vpop.f32.mrb[23].mxu0  ;;  %v5040_v51 = vmul.f32 0.5, %v4957_v29 }
 0x552   : > { %v5073_v39 = vmul.f32 0.70710677, %v4959_v22 }
 0x553   : > { %v9760_v34 = vpop.eup %9759  ;;  %9775 = verf.f32 %v5072_v27 }
 0x554   : > { %v9762_v30 = vpop.eup %9761  ;;  %v4792_v47 = vadd.f32 1.0, %v9760_v34  ;;  %9777 = verf.f32 %v5073_v39  ;;  %v4963_v32 = vpop.f32.mrb[24].mxu0  ;;  %v5039_v34 = vmul.f32 0.5, %v4953_v14 }
 0x555   : > { %v4791_v1 = vadd.f32 1.0, %v9762_v30  ;;  %v9764_v20 = vpop.eup %9763  ;;  %v5074_v52 = vmul.f32 0.70710677, %v4963_v32  ;;  %v4965_v5 = vpop.f32.mrb[25].mxu0 }
 0x556   : > { %v14158_v3 = vmul.f32 %v4792_v47, %v4744_v26  ;;  %v9766_v61 = vpop.eup %9765  ;;  %v5130_v33 = vadd.f32 1.0, %v9764_v20  ;;  %v5075_v15 = vmul.f32 0.70710677, %v4965_v5 }
 0x557   : > { %v14154_v43 = vmul.f32 %v4791_v1, %v4743_v16  ;;  %v5131_v57 = vadd.f32 1.0, %v9766_v61  ;;  %v9768_v24 = vpop.eup %9767  ;;  %9779 = verf.f32 %v5074_v52  ;;  %v5038_v16 = vmul.f32 0.5, %v4951_v18 }
 0x558   : > { %v5162_v17 = vmul.f32 %v5130_v33, %v5034_v58  ;;  %v9770_v46 = vpop.eup %9769  ;;  %v5132_v59 = vadd.f32 1.0, %v9768_v24  ;;  %9781 = verf.f32 %v5075_v15  ;;  %v4969_v48 = vpop.f32.mrb[26].mxu0  ;;  %v5042_v18 = vmul.f32 0.5, %v4963_v32 }
 0x559   : > { %5022 = vmatmul.mubr.f32.gmra.mrb[44].mxu0 %v14154_v43  ;;  %v5163_v55 = vmul.f32 %v5131_v57, %v5035_v56  ;;  %v5133_v28 = vadd.f32 1.0, %v9770_v46  ;;  %v9772_v53 = vpop.eup %9771  ;;  %v5076_v6 = vmul.f32 0.70710677, %v4969_v48  ;;  %v4971_v13 = vpop.f32.mrb[27].mxu0 }
 0x55a   : > { %5027 = vmatprep.mubr.f32.mxu0 %v10201_v8  ;;  %v5164_v7 = vmul.f32 %v5132_v59, %v5036_v35  ;;  %v9774_v62 = vpop.eup %9773  ;;  %v5134_v2 = vadd.f32 1.0, %v9772_v53  ;;  %v5077_v12 = vmul.f32 0.70710677, %v4971_v13  ;;  %v5045_v53 = vmul.f32 0.5, %v4971_v13 }
 0x55b   : > { %v5165_v10 = vmul.f32 %v5133_v28, %v5037_v21  ;;  %v5135_v30 = vadd.f32 1.0, %v9774_v62  ;;  %9783 = verf.f32 %v5076_v6 }
 0x55c   : > { %9785 = verf.f32 %v5077_v12  ;;  %v5166_v56 = vmul.f32 %v5134_v2, %v5038_v16 }
 0x55d   : > { %5028 = vmatmul.mubr.f32.gmra.mrb[46].mxu0 %v14158_v3  ;;  %v9776_v47 = vpop.eup %9775  ;;  %v5167_v26 = vmul.f32 %v5135_v30, %v5039_v34 }
 0x55e   : > { %5258 = vmatprep.mubr.f32.mxu0 %v5163_v55  ;;  %v9778_v33 = vpop.eup %9777  ;;  %v5136_v57 = vadd.f32 1.0, %v9776_v47  ;;  %v5041_v55 = vmul.f32 0.5, %v4959_v22 }
 0x560   : > { %v5168_v21 = vmul.f32 %v5136_v57, %v5040_v51 }
 0x561   : > { %5259 = vmatmul.mubr.f32.vlgmr.msra.gmra.mrb[48].mxu0 %v5162_v17  ;;  %v5137_v17 = vadd.f32 1.0, %v9778_v33  ;;  %v9780_v41 = vpop.eup %9779 }
 0x562   : > { %5263 = vmatprep.mubr.f32.mxu0 %v5165_v10  ;;  %v9782_v59 = vpop.eup %9781  ;;  %v5138_v28 = vadd.f32 1.0, %v9780_v41  ;;  %v5043_v10 = vmul.f32 0.5, %v4965_v5  ;;  %v5044_v5 = vmul.f32 0.5, %v4969_v48 }
 0x563   : > { %v5169_v63 = vmul.f32 %v5137_v17, %v5041_v55 }
 0x564   : > { %v5170_v39 = vmul.f32 %v5138_v28, %v5042_v18 }
 0x565   : > { %5264 = vmatmul.mubr.f32.gmra.mrb[50].mxu0 %v5164_v7  ;;  %v5139_v7 = vadd.f32 1.0, %v9782_v59  ;;  %v9784_v14 = vpop.eup %9783 }
 0x566   : > { %5268 = vmatprep.mubr.f32.mxu0 %v5167_v26  ;;  %v9786_v22 = vpop.eup %9785  ;;  %v5140_v52 = vadd.f32 1.0, %v9784_v14 }
 0x567   : > { %v5171_v36 = vmul.f32 %v5139_v7, %v5043_v10  ;;  %v5141_v6 = vadd.f32 1.0, %v9786_v22 }
 0x568   : > { %v5172_v16 = vmul.f32 %v5140_v52, %v5044_v5 }
 0x569   : > { %5269 = vmatmul.mubr.f32.gmra.mrb[52].mxu0 %v5166_v56  ;;  %v5173_v2 = vmul.f32 %v5141_v6, %v5045_v53 }
 0x56a   : > { %5273 = vmatprep.mubr.f32.mxu0 %v5169_v63 }
 0x56d   : > { %5274 = vmatmul.mubr.f32.gmra.mrb[54].mxu0 %v5168_v21 }
 0x56e   : > { %5278 = vmatprep.mubr.f32.mxu0 %v5171_v36 }
 0x571   : > { %5279 = vmatmul.mubr.f32.gmra.mrb[56].mxu0 %v5170_v39 }
 0x572   : > { %5283 = vmatprep.mubr.f32.mxu0 %v5173_v2 }
 0x575   : > { %5284 = vmatmul.mubr.f32.gmra.mrb[58].mxu0 %v5172_v16 }
 0x577   : > { %v4975_v1 = vpop.f32.mrb[28].mxu0 }
 0x578   : > { %v5078_v20 = vmul.f32 0.70710677, %v4975_v1  ;;  %v4977_v61 = vpop.f32.mrb[29].mxu0  ;;  %v5046_v13 = vmul.f32 0.5, %v4975_v1 }
 0x579   : > { %v5079_v58 = vmul.f32 0.70710677, %v4977_v61 }
 0x57a   : > { %9787 = verf.f32 %v5078_v20  ;;  %v5047_v20 = vmul.f32 0.5, %v4977_v61 }
 0x57b   : > { %9789 = verf.f32 %v5079_v58  ;;  %v4981_v37 = vpop.f32.mrb[30].mxu0 }
 0x57c   : > { %v5080_v24 = vmul.f32 0.70710677, %v4981_v37  ;;  %v4983_v46 = vpop.f32.mrb[31].mxu0  ;;  %v5048_v41 = vmul.f32 0.5, %v4981_v37 }
 0x57d   : > { %v5081_v35 = vmul.f32 0.70710677, %v4983_v46  ;;  %v5049_v17 = vmul.f32 0.5, %v4983_v46 }
 0x57e   : > { %9791 = verf.f32 %v5080_v24 }
 0x57f   : > { %9793 = verf.f32 %v5081_v35 }
 0x584   : > { %v9788_v32 = vpop.eup %9787 }
 0x585   : > { %v9790_v30 = vpop.eup %9789  ;;  %v5142_v47 = vadd.f32 1.0, %v9788_v32 }
 0x586   : > { %v5143_v33 = vadd.f32 1.0, %v9790_v30 }
 0x587   : > { %v5174_v58 = vmul.f32 %v5142_v47, %v5046_v13 }
 0x588   : > { %v9792_v56 = vpop.eup %9791  ;;  %v5175_v48 = vmul.f32 %v5143_v33, %v5047_v20 }
 0x589   : > { %v9794_v57 = vpop.eup %9793  ;;  %v5144_v55 = vadd.f32 1.0, %v9792_v56 }
 0x58a   : > { %v5145_v51 = vadd.f32 1.0, %v9794_v57  ;;  %5288 = vmatprep.mubr.f32.mxu0 %v5175_v48 }
 0x58b   : > { %5289 = vmatmul.mubr.f32.gmra.mrb[60].mxu0 %v5174_v58  ;;  %v5176_v61 = vmul.f32 %v5144_v55, %v5048_v41 }
 0x58c   : > { %v5177_v24 = vmul.f32 %v5145_v51, %v5049_v17 }
 0x58e   : > { %5293 = vmatprep.mubr.f32.mxu0 %v5177_v24 }
 0x58f   : > { %5294 = vmatmul.mubr.f32.gmra.mrb[62].mxu0 %v5176_v61 }
 0x5a6   : > { %v4987_v50 = vpop.f32.mrb[32].mxu0 }
 0x5a7   : > { %v5082_v29 = vmul.f32 0.70710677, %v4987_v50  ;;  %v4989_v27 = vpop.f32.mrb[33].mxu0  ;;  %v5050_v1 = vmul.f32 0.5, %v4987_v50 }
 0x5a8   : > { %v5083_v15 = vmul.f32 0.70710677, %v4989_v27  ;;  %v5051_v28 = vmul.f32 0.5, %v4989_v27 }
 0x5a9   : > { %9795 = verf.f32 %v5082_v29 }
 0x5aa   : > { %9797 = verf.f32 %v5083_v15  ;;  %v4993_v62 = vpop.f32.mrb[34].mxu0 }
 0x5ab   : > { %v5084_v12 = vmul.f32 0.70710677, %v4993_v62  ;;  %v4995_v34 = vpop.f32.mrb[35].mxu0  ;;  %v5052_v15 = vmul.f32 0.5, %v4993_v62 }
 0x5ac   : > { %v5085_v26 = vmul.f32 0.70710677, %v4995_v34  ;;  %v5053_v37 = vmul.f32 0.5, %v4995_v34 }
 0x5ad   : > { %9799 = verf.f32 %v5084_v12 }
 0x5ae   : > { %9801 = verf.f32 %v5085_v26 }
 0x5b3   : > { %v9796_v63 = vpop.eup %9795 }
 0x5b4   : > { %v9798_v59 = vpop.eup %9797  ;;  %v5146_v21 = vadd.f32 1.0, %v9796_v63 }
 0x5b5   : > { %v5147_v35 = vadd.f32 1.0, %v9798_v59 }
 0x5b6   : > { %v5178_v36 = vmul.f32 %v5146_v21, %v5050_v1 }
 0x5b7   : > { %v9800_v10 = vpop.eup %9799  ;;  %v5179_v7 = vmul.f32 %v5147_v35, %v5051_v28 }
 0x5b8   : > { %v9802_v14 = vpop.eup %9801  ;;  %v5148_v46 = vadd.f32 1.0, %v9800_v10 }
 0x5b9   : > { %v5149_v39 = vadd.f32 1.0, %v9802_v14  ;;  %5298 = vmatprep.mubr.f32.mxu0 %v5179_v7 }
 0x5ba   : > { %5299 = vmatmul.mubr.f32.gmra.mrb[64].mxu0 %v5178_v36  ;;  %v5180_v50 = vmul.f32 %v5148_v46, %v5052_v15 }
 0x5bb   : > { %v5181_v27 = vmul.f32 %v5149_v39, %v5053_v37 }
 0x5bd   : > { %5303 = vmatprep.mubr.f32.mxu0 %v5181_v27 }
 0x5be   : > { %5304 = vmatmul.mubr.f32.gmra.mrb[66].mxu0 %v5180_v50 }
 0x5d4   : > { %v4999_v18 = vpop.f32.mrb[36].mxu0 }
 0x5d5   : > { %v5086_v29 = vmul.f32 0.70710677, %v4999_v18  ;;  %v5001_v22 = vpop.f32.mrb[37].mxu0  ;;  %v5054_v47 = vmul.f32 0.5, %v4999_v18 }
 0x5d6   : > { %v5087_v52 = vmul.f32 0.70710677, %v5001_v22  ;;  %v5055_v30 = vmul.f32 0.5, %v5001_v22 }
 0x5d7   : > { %9803 = verf.f32 %v5086_v29 }
 0x5d8   : > { %9805 = verf.f32 %v5087_v52  ;;  %v5005_v53 = vpop.f32.mrb[38].mxu0 }
 0x5d9   : > { %v5088_v6 = vmul.f32 0.70710677, %v5005_v53  ;;  %v5007_v5 = vpop.f32.mrb[39].mxu0  ;;  %v5056_v57 = vmul.f32 0.5, %v5005_v53 }
 0x5da   : > { %v5089_v32 = vmul.f32 0.70710677, %v5007_v5  ;;  %v5057_v56 = vmul.f32 0.5, %v5007_v5 }
 0x5db   : > { %9807 = verf.f32 %v5088_v6 }
 0x5dc   : > { %9809 = verf.f32 %v5089_v32 }
 0x5e1   : > { %v9804_v2 = vpop.eup %9803 }
 0x5e2   : > { %v9806_v12 = vpop.eup %9805  ;;  %v5150_v34 = vadd.f32 1.0, %v9804_v2 }
 0x5e3   : > { %v5151_v16 = vadd.f32 1.0, %v9806_v12 }
 0x5e4   : > { %v5182_v33 = vmul.f32 %v5150_v34, %v5054_v47 }
 0x5e5   : > { %v9808_v62 = vpop.eup %9807  ;;  %v5183_v26 = vmul.f32 %v5151_v16, %v5055_v30 }
 0x5e6   : > { %v9810_v20 = vpop.eup %9809  ;;  %v5152_v13 = vadd.f32 1.0, %v9808_v62 }
 0x5e7   : > { %v5153_v48 = vadd.f32 1.0, %v9810_v20  ;;  %5308 = vmatprep.mubr.f32.mxu0 %v5183_v26 }
 0x5e8   : > { %5309 = vmatmul.mubr.f32.gmra.mrb[68].mxu0 %v5182_v33  ;;  %v5184_v55 = vmul.f32 %v5152_v13, %v5056_v57 }
 0x5e9   : > { %v5185_v58 = vmul.f32 %v5153_v48, %v5057_v56 }
 0x5eb   : > { %5313 = vmatprep.mubr.f32.mxu0 %v5185_v58 }
 0x5ec   : > { %5314 = vmatmul.mubr.f32.gmra.mrb[70].mxu0 %v5184_v55 }
 0x602   : > { %v5011_v17 = vpop.f32.mrb[40].mxu0 }
 0x603   : > { %v5090_v51 = vmul.f32 0.70710677, %v5011_v17  ;;  %v5013_v41 = vpop.f32.mrb[41].mxu0  ;;  %v5058_v18 = vmul.f32 0.5, %v5011_v17 }
 0x604   : > { %v5091_v63 = vmul.f32 0.70710677, %v5013_v41  ;;  %v5059_v10 = vmul.f32 0.5, %v5013_v41 }
 0x605   : > { %9811 = verf.f32 %v5090_v51 }
 0x606   : > { %9813 = verf.f32 %v5091_v63  ;;  %v5017_v24 = vpop.f32.mrb[42].mxu0 }
 0x607   : > { %v5092_v59 = vmul.f32 0.70710677, %v5017_v24  ;;  %v5019_v61 = vpop.f32.mrb[43].mxu0  ;;  %v5060_v52 = vmul.f32 0.5, %v5017_v24 }
 0x608   : > { %v5093_v21 = vmul.f32 0.70710677, %v5019_v61  ;;  %v5061_v37 = vmul.f32 0.5, %v5019_v61 }
 0x609   : > { %9815 = verf.f32 %v5092_v59 }
 0x60a   : > { %9817 = verf.f32 %v5093_v21 }
 0x60f   : > { %v9812_v28 = vpop.eup %9811 }
 0x610   : > { %v9814_v35 = vpop.eup %9813  ;;  %v5154_v1 = vadd.f32 1.0, %v9812_v28 }
 0x611   : > { %v5155_v7 = vadd.f32 1.0, %v9814_v35 }
 0x612   : > { %v5186_v29 = vmul.f32 %v5154_v1, %v5058_v18 }
 0x613   : > { %v9816_v14 = vpop.eup %9815  ;;  %v5187_v36 = vmul.f32 %v5155_v7, %v5059_v10 }
 0x614   : > { %v9818_v46 = vpop.eup %9817  ;;  %v5156_v22 = vadd.f32 1.0, %v9816_v14 }
 0x615   : > { %v5157_v39 = vadd.f32 1.0, %v9818_v46  ;;  %5318 = vmatprep.mubr.f32.mxu0 %v5187_v36 }
 0x616   : > { %5319 = vmatmul.mubr.f32.gmra.mrb[72].mxu0 %v5186_v29  ;;  %v5188_v27 = vmul.f32 %v5156_v22, %v5060_v52 }
 0x617   : > { %v5189_v15 = vmul.f32 %v5157_v39, %v5061_v37 }
 0x619   : > { %5323 = vmatprep.mubr.f32.mxu0 %v5189_v15 }
 0x61a   : > { %5324 = vmatmul.mubr.f32.gmra.mrb[74].mxu0 %v5188_v27 }
 0x62c   : > { %v5023_v53 = vpop.f32.mrb[44].mxu0 }
 0x62d   : > { %v5094_v50 = vmul.f32 0.70710677, %v5023_v53  ;;  %v5025_v6 = vpop.f32.mrb[45].mxu0  ;;  %v5062_v48 = vmul.f32 0.5, %v5023_v53 }
 0x62e   : > { %v5095_v5 = vmul.f32 0.70710677, %v5025_v6  ;;  %v5063_v33 = vmul.f32 0.5, %v5025_v6 }
 0x62f   : > { %9819 = verf.f32 %v5094_v50 }
 0x630   : > { %9821 = verf.f32 %v5095_v5  ;;  %v5029_v32 = vpop.f32.mrb[46].mxu0 }
 0x631   : > { %v5096_v2 = vmul.f32 0.70710677, %v5029_v32  ;;  %v5031_v12 = vpop.f32.mrb[47].mxu0  ;;  %v5064_v24 = vmul.f32 0.5, %v5029_v32 }
 0x632   : > { %v5097_v34 = vmul.f32 0.70710677, %v5031_v12  ;;  %v5065_v41 = vmul.f32 0.5, %v5031_v12 }
 0x633   : > { %9823 = verf.f32 %v5096_v2 }
 0x634   : > { %9825 = verf.f32 %v5097_v34  ;;  %v8457_v30 = vpop.f32.mrb[48].mxu0 }
 0x635   : > { %v8458_v16 = vpop.f32.mrb[49].mxu0 }
 0x636   : > { %v8459_v62 = vadd.f32 %v8458_v16, %v8457_v30 }
 0x638   : > { %v14162_v56 = vadd.f32 %v8459_v62, %v14066_v44  ;;  %v8460_v21 = vpop.f32.mrb[50].mxu0 }
 0x639   : > { %v9820_v47 = vpop.eup %9819  ;;  %v8461_v44 = vpop.f32.mrb[51].mxu0 }
 0x63a   : > { %v9822_v26 = vpop.eup %9821  ;;  %v5158_v20 = vadd.f32 1.0, %v9820_v47  ;;  %5339 = vadd.xlane.f32.xlu0 %v14162_v56  ;;  %v8462_v28 = vadd.f32 %v8461_v44, %v8460_v21 }
 0x63b   : > { %v5159_v13 = vadd.f32 1.0, %v9822_v26 }
 0x63c   : > { %v5190_v17 = vmul.f32 %v5158_v20, %v5062_v48  ;;  %v14166_v35 = vadd.f32 %v8462_v28, %v14074_v38  ;;  %v8463_v1 = vpop.f32.mrb[52].mxu0 }
 0x63d   : > { %v9824_v57 = vpop.eup %9823  ;;  %v5191_v58 = vmul.f32 %v5159_v13, %v5063_v33  ;;  %v8464_v10 = vpop.f32.mrb[53].mxu0 }
 0x63e   : > { %v9826_v55 = vpop.eup %9825  ;;  %v5160_v51 = vadd.f32 1.0, %v9824_v57  ;;  %5341 = vadd.xlane.f32.xlu0 %v14166_v35  ;;  %v8465_v7 = vadd.f32 %v8464_v10, %v8463_v1 }
 0x63f   : > { %v5161_v63 = vadd.f32 1.0, %v9826_v55  ;;  %5328 = vmatprep.mubr.f32.mxu0 %v5191_v58 }
 0x640   : > { %5329 = vmatmul.mubr.f32.gmra.mrb[76].mxu0 %v5190_v17  ;;  %v5192_v61 = vmul.f32 %v5160_v51, %v5064_v24  ;;  %v8466_v18 = vpop.f32.mrb[54].mxu0  ;;  %v14170_v14 = vadd.f32 %v8465_v7, %v14092_v4 }
 0x641   : > { %v5193_v59 = vmul.f32 %v5161_v63, %v5065_v41  ;;  %v8467_v36 = vpop.f32.mrb[55].mxu0 }
 0x642   : > { %v8468_v46 = vadd.f32 %v8467_v36, %v8466_v18  ;;  %5343 = vadd.xlane.f32.xlu1 %v14170_v14 }
 0x643   : > { %5333 = vmatprep.mubr.f32.mxu0 %v5193_v59 }
 0x644   : > { %5334 = vmatmul.mubr.f32.gmra.mrb[78].mxu0 %v5192_v61  ;;  %v8469_v29 = vpop.f32.mrb[56].mxu0  ;;  %v14174_v22 = vadd.f32 %v8468_v46, %v14100_v11 }
 0x645   : > { %v8470_v37 = vpop.f32.mrb[57].mxu0 }
 0x646   : > { %v8471_v38 = vadd.f32 %v8470_v37, %v8469_v29  ;;  %5345 = vadd.xlane.f32.xlu1 %v14174_v22 }
 0x648   : > { %v8472_v39 = vpop.f32.mrb[58].mxu0  ;;  %v14178_v52 = vadd.f32 %v8471_v38, %v14105_v49 }
 0x649   : > { %v8473_v15 = vpop.f32.mrb[59].mxu0 }
 0x64a   : > { %v8474_v27 = vadd.f32 %v8473_v15, %v8472_v39  ;;  %5347 = vadd.xlane.f32.xlu0 %v14178_v52 }
 0x64c   : > { %v14182_v53 = vadd.f32 %v8474_v27, %v14109_v9 }
 0x64e   : > { %5349 = vadd.xlane.f32.xlu1 %v14182_v53 }
 0x65e   : > { %v8475_v4 = vpop.f32.mrb[60].mxu0 }
 0x65f   : > { %v8476_v50 = vpop.f32.mrb[61].mxu0 }
 0x660   : > { %v8477_v6 = vadd.f32 %v8476_v50, %v8475_v4 }
 0x662   : > { %v8478_v11 = vpop.f32.mrb[62].mxu0  ;;  %v14186_v5 = vadd.f32 %v8477_v6, %v14113_v25 }
 0x663   : > { %v8479_v32 = vpop.f32.mrb[63].mxu0 }
 0x664   : > { %v8480_v2 = vadd.f32 %v8479_v32, %v8478_v11  ;;  %5351 = vadd.xlane.f32.xlu0 %v14186_v5  ;;  %v8274_v32 = vld [vmem:[%s15391_s8 + $0x118] sm:$0xff] }
 0x666   : > { %v14190_v12 = vadd.f32 %v8480_v2, %v14118_v23  ;;  %v8271_v2 = vld [vmem:[%s15391_s8 + $0x100] sm:$0xff] }
 0x668   : > { %5353 = vadd.xlane.f32.xlu1 %v14190_v12 }
 0x68d   : > { %v8481_v49 = vpop.f32.mrb[64].mxu0 }
 0x68e   : > { %v8482_v34 = vpop.f32.mrb[65].mxu0 }
 0x68f   : > { %v8483_v30 = vadd.f32 %v8482_v34, %v8481_v49  ;;  %v8273_v49 = vld [vmem:[%s15391_s8 + $0x110] sm:$0xff]  ;;  %v8276_v34 = vld [vmem:[%s15391_s8 + $0x128] sm:$0xff] }
 0x691   : > { %v8484_v9 = vpop.f32.mrb[66].mxu0  ;;  %v14194_v16 = vadd.f32 %v8483_v30, %v14125_v0  ;;  %v8278_v30 = vld [vmem:[%s15391_s8 + $0x138] sm:$0xff] }
 0x692   : > { %v8485_v47 = vpop.f32.mrb[67].mxu0 }
 0x693   : > { %v8486_v62 = vadd.f32 %v8485_v47, %v8484_v9  ;;  %5355 = vadd.xlane.f32.xlu0 %v14194_v16  ;;  %v9166_v47 = vpack.c.bf16 %v8273_v49, %v8271_v2  ;;  %v8298_v49 = vld [vmem:[%s15391_s8 + $0x1d8] sm:$0xff] }
 0x695   : > { %v14198_v25 = vadd.f32 %v8486_v62, %v14130_v42  ;;  %v9168_v62 = vpack.c.bf16 %v8278_v30, %v8276_v34 }
 0x697   : > { %5357 = vadd.xlane.f32.xlu1 %v14198_v25 }
 0x6bb   : > { %v8487_v26 = vpop.f32.mrb[68].mxu0 }
 0x6bc   : > { %v8488_v23 = vpop.f32.mrb[69].mxu0 }
 0x6bd   : > { %v8489_v20 = vadd.f32 %v8488_v23, %v8487_v26  ;;  %v8275_v26 = vld [vmem:[%s15391_s8 + $0x120] sm:$0xff]  ;;  %v8277_v23 = vld [vmem:[%s15391_s8 + $0x130] sm:$0xff] }
 0x6bf   : > { %v8490_v33 = vpop.f32.mrb[70].mxu0  ;;  %v14202_v13 = vadd.f32 %v8489_v20, %v14134_v54  ;;  %v8280_v20 = vld [vmem:[%s15391_s8 + $0x148] sm:$0xff] }
 0x6c0   : > { %v8491_v48 = vpop.f32.mrb[71].mxu0 }
 0x6c1   : > { %v8492_v57 = vadd.f32 %v8491_v48, %v8490_v33  ;;  %5359 = vadd.xlane.f32.xlu0 %v14202_v13 }
 0x6c3   : > { %v14206_v0 = vadd.f32 %v8492_v57, %v14138_v45 }
 0x6c5   : > { %5361 = vadd.xlane.f32.xlu1 %v14206_v0 }
 0x6c7   : > { %v5340_v45 = vpop.xlane.xlu0 %5339 }
 0x6c8   : > { %v5372_v24 = vmul.f32 0.0078125, %v5340_v45 }
 0x6ca   : > { %v14218_v28 = vsub.f32 %v14162_v56, %v5372_v24 }
 0x6cb   : > { %v5342_v59 = vpop.xlane.xlu0 %5341 }
 0x6cc   : > { %v5404_v36 = vmul.f32 %v14218_v28, %v14218_v28 }
 0x6cf   : > { %v5344_v56 = vpop.xlane.xlu1 %5343 }
 0x6d0   : > { %v5374_v29 = vmul.f32 0.0078125, %v5344_v56 }
 0x6d2   : > { %v14236_v37 = vsub.f32 %v14170_v14, %v5374_v29 }
 0x6d4   : > { %v5406_v39 = vmul.f32 %v14236_v37, %v14236_v37 }
 0x6d7   : > { %v5348_v15 = vpop.xlane.xlu0 %5347 }
 0x6d8   : > { %v5376_v27 = vmul.f32 0.0078125, %v5348_v15  ;;  %v8292_v15 = vld [vmem:[%s15391_s8 + $0x1a8] sm:$0xff] }
 0x6da   : > { %v14246_v50 = vsub.f32 %v14178_v52, %v5376_v27  ;;  %v8294_v27 = vld [vmem:[%s15391_s8 + $0x1b8] sm:$0xff] }
 0x6dc   : > { %v5408_v11 = vmul.f32 %v14246_v50, %v14246_v50 }
 0x6e9   : > { %v8493_v42 = vpop.f32.mrb[72].mxu0 }
 0x6ea   : > { %v8494_v58 = vpop.f32.mrb[73].mxu0 }
 0x6eb   : > { %v8495_v55 = vadd.f32 %v8494_v58, %v8493_v42  ;;  %v9170_v42 = vpack.c.bf16 %v8277_v23, %v8275_v26  ;;  %v8300_v26 = vld [vmem:[%s15391_s8 + $0x1e8] sm:$0xff]  ;;  %v8302_v23 = vld [vmem:[%s15391_s8 + $0x1f8] sm:$0xff] }
 0x6ed   : > { %v8496_v17 = vpop.f32.mrb[74].mxu0  ;;  %v14210_v51 = vadd.f32 %v8495_v55, %v14144_v31  ;;  %v5373_v31 = vmul.f32 0.0078125, %v5342_v59  ;;  %v8279_v55 = vld [vmem:[%s15391_s8 + $0x140] sm:$0xff] }
 0x6ee   : > { %v8497_v41 = vpop.f32.mrb[75].mxu0 }
 0x6ef   : > { %v8498_v63 = vadd.f32 %v8497_v41, %v8496_v17  ;;  %5363 = vadd.xlane.f32.xlu0 %v14210_v51  ;;  %v8281_v17 = vld [vmem:[%s15391_s8 + $0x150] sm:$0xff] }
 0x6f0   : > { %v9174_v59 = vpack.c.bf16 %v8281_v17, %v8279_v55  ;;  %v14374_v55 = vld [vmem:[%s15390_s7] sm:$0xf] }
 0x6f1   : > { %v14214_v54 = vadd.f32 %v8498_v63, %v14148_v19  ;;  %v14225_v19 = vsub.f32 %v14166_v35, %v5373_v31  ;;  %v5346_v35 = vpop.xlane.xlu1 %5345  ;;  %v5352_v33 = vpop.xlane.xlu0 %5351 }
 0x6f2   : > { %v5375_v38 = vmul.f32 0.0078125, %v5346_v35  ;;  %v5378_v48 = vmul.f32 0.0078125, %v5352_v33  ;;  %v8287_v35 = vld [vmem:[%s15391_s8 + $0x180] sm:$0xff]  ;;  %v9192_v33 = vpack.c.bf16 %v8302_v23, %v8300_v26 }
 0x6f3   : > { %5365 = vadd.xlane.f32.xlu1 %v14214_v54 }
 0x6f4   : > { %v14292_v41 = vsub.f32 %v14186_v5, %v5378_v48  ;;  %v8283_v5 = vld [vmem:[%s15391_s8 + $0x160] sm:$0xff]  ;;  %v8301_v48 = vld [vmem:[%s15391_s8 + $0x1f0] sm:$0xff] }
 0x6f5   : > { %v5350_v14 = vpop.xlane.xlu1 %5349 }
 0x6f6   : > { %v5377_v6 = vmul.f32 0.0078125, %v5350_v14  ;;  %v5410_v24 = vmul.f32 %v14292_v41, %v14292_v41 }
 0x6f8   : > { %v14269_v9 = vsub.f32 %v14182_v53, %v5377_v6  ;;  %v8282_v53 = vld [vmem:[%s15391_s8 + $0x158] sm:$0xff] }
 0x6f9   : > { %v9172_v58 = vpack.c.bf16 %v8282_v53, %v8280_v20  ;;  %v5354_v63 = vpop.xlane.xlu1 %5353  ;;  %v8299_v53 = vld [vmem:[%s15391_s8 + $0x1e0] sm:$0xff] }
 0x6fa   : > { %v5409_v57 = vmul.f32 %v14269_v9, %v14269_v9  ;;  %v5379_v45 = vmul.f32 0.0078125, %v5354_v63 }
 0x713   : > { %v8499_v61 = vpop.f32.mrb[76].mxu0 }
 0x714   : > { %v8500_v21 = vpop.f32.mrb[77].mxu0 }
 0x715   : > { %v8501_v44 = vadd.f32 %v8500_v21, %v8499_v61  ;;  %v8284_v61 = vld [vmem:[%s15391_s8 + $0x168] sm:$0xff]  ;;  %v8286_v21 = vld [vmem:[%s15391_s8 + $0x178] sm:$0xff] }
 0x716   : > { %v9176_v31 = vpack.c.bf16 %v8286_v21, %v8284_v61 }
 0x717   : > { %v8502_v1 = vpop.f32.mrb[78].mxu0  ;;  %v14221_v10 = vadd.f32 %v8501_v44, %v14154_v43  ;;  %v5405_v43 = vmul.f32 %v14225_v19, %v14225_v19  ;;  %v14306_v44 = vsub.f32 %v14190_v12, %v5379_v45 }
 0x718   : > { %v8503_v7 = vpop.f32.mrb[79].mxu0 }
 0x719   : > { %v8504_v18 = vadd.f32 %v8503_v7, %v8502_v1  ;;  %5367 = vadd.xlane.f32.xlu0 %v14221_v10  ;;  %v8285_v1 = vld [vmem:[%s15391_s8 + $0x170] sm:$0xff]  ;;  %v8288_v7 = vld [vmem:[%s15391_s8 + $0x188] sm:$0xff]  ;;  %v5411_v12 = vmul.f32 %v14306_v44, %v14306_v44 }
 0x71a   : > { %v9178_v56 = vpack.c.bf16 %v8285_v1, %v8283_v5 }
 0x71b   : > { %v14230_v46 = vadd.f32 %v8504_v18, %v14158_v3  ;;  %v14241_v3 = vsub.f32 %v14174_v22, %v5375_v38  ;;  %v8272_v22 = vld [vmem:[%s15391_s8 + $0x108] sm:$0xff]  ;;  %v8290_v18 = vld [vmem:[%s15391_s8 + $0x198] sm:$0xff]  ;;  %v8289_v38 = vld [vmem:[%s15391_s8 + $0x190] sm:$0xff] }
 0x71c   : > { %v9164_v52 = vpack.c.bf16 %v8274_v32, %v8272_v22  ;;  %v9180_v29 = vpack.c.bf16 %v8290_v18, %v8288_v7  ;;  %v9184_v22 = vpack.c.bf16 %v8294_v27, %v8292_v15  ;;  %v8293_v32 = vld [vmem:[%s15391_s8 + $0x1b0] sm:$0xff] }
 0x71d   : > { %5369 = vadd.xlane.f32.xlu1 %v14230_v46  ;;  %5420 = vadd.xlane.f32.xlu0 %v5404_v36  ;;  %v5407_v4 = vmul.f32 %v14241_v3, %v14241_v3 }
 0x71e   : > { %9165 = vmatprep.subr.bf16.mxu1 %v9164_v52  ;;  %v8296_v52 = vld [vmem:[%s15391_s8 + $0x1c8] sm:$0xff] }
 0x71f   : > { %9167 = vmatpush1.bf16.msra.mxu1 %v9166_v47  ;;  %v9188_v47 = vpack.c.bf16 %v8298_v49, %v8296_v52 }
 0x720   : > { %9169 = vmatprep.subr.bf16.mxu1 %v9168_v62  ;;  %v5356_v36 = vpop.xlane.xlu0 %5355  ;;  %v8297_v62 = vld [vmem:[%s15391_s8 + $0x1d0] sm:$0xff] }
 0x721   : > { %5422 = vadd.xlane.f32.xlu1 %v5405_v43  ;;  %5424 = vadd.xlane.f32.xlu0 %v5406_v39  ;;  %v5380_v43 = vmul.f32 0.0078125, %v5356_v36 }
 0x723   : > { %9171 = vmatpush1.bf16.msra.mxu1 %v9170_v42  ;;  %v14326_v39 = vsub.f32 %v14194_v16, %v5380_v43  ;;  %v8291_v16 = vld [vmem:[%s15391_s8 + $0x1a0] sm:$0xff]  ;;  %v9194_v42 = vpack.c.bf16 %v8301_v48, %v8299_v53 }
 0x724   : > { %9173 = vmatprep.subr.bf16.mxu1 %v9172_v58  ;;  %v9186_v30 = vpack.c.bf16 %v8293_v32, %v8291_v16 }
 0x725   : > { %5426 = vadd.xlane.f32.xlu1 %v5407_v4  ;;  %5428 = vadd.xlane.f32.xlu0 %v5408_v11  ;;  %v5358_v4 = vpop.xlane.xlu1 %5357  ;;  %v5412_v6 = vmul.f32 %v14326_v39, %v14326_v39  ;;  %v9182_v11 = vpack.c.bf16 %v8289_v38, %v8287_v35 }
 0x726   : > { %v5381_v14 = vmul.f32 0.0078125, %v5358_v4 }
 0x727   : > { %9175 = vmatpush1.bf16.msra.mxu1 %v9174_v59 }
 0x728   : > { %9177 = vmatprep.subr.bf16.mxu1 %v9176_v31  ;;  %v14343_v2 = vsub.f32 %v14198_v25, %v5381_v14  ;;  %v8295_v25 = vld [vmem:[%s15391_s8 + $0x1c0] sm:$0xff] }
 0x729   : > { %5430 = vadd.xlane.f32.xlu1 %v5409_v57  ;;  %5432 = vadd.xlane.f32.xlu0 %v5410_v24  ;;  %v9190_v20 = vpack.c.bf16 %v8297_v62, %v8295_v25 }
 0x72a   : > { %v5413_v34 = vmul.f32 %v14343_v2, %v14343_v2 }
 0x72b   : > { %9179 = vmatpush1.bf16.msra.mxu1 %v9178_v56 }
 0x72c   : > { %9181 = vmatprep.subr.bf16.mxu1 %v9180_v29 }
 0x72d   : > { %5434 = vadd.xlane.f32.xlu1 %v5411_v12  ;;  %5436 = vadd.xlane.f32.xlu0 %v5412_v6  ;;  %v5518_v6 = vsub.s32 4, %v14044_v60 }
 0x72f   : > { %9183 = vmatpush1.bf16.msra.mxu1 %v9182_v11  ;;  %v5538_v11 = vsub.s32 5, %v14044_v60 }
 0x730   : > { %9185 = vmatprep.subr.bf16.mxu1 %v9184_v22 }
 0x731   : > { %5438 = vadd.xlane.f32.xlu1 %v5413_v34 }
 0x733   : > { %9187 = vmatpush1.bf16.msra.mxu1 %v9186_v30 }
 0x734   : > { %9189 = vmatprep.subr.bf16.mxu1 %v9188_v47 }
 0x737   : > { %9191 = vmatpush1.bf16.msra.mxu1 %v9190_v20 }
 0x738   : > { %9193 = vmatprep.subr.bf16.mxu1 %v9192_v33 }
 0x73b   : > { %9195 = vmatpush1.bf16.msra.mxu1 %v9194_v42 }
 0x73c   : > { %8888 = vmatprep.subr.msk.mxu1 %vm6374_vm8, %v14374_v55 }
 0x74e   : > { %v5360_v57 = vpop.xlane.xlu0 %5359 }
 0x74f   : > { %v5382_v58 = vmul.f32 0.0078125, %v5360_v57 }
 0x751   : > { %v14377_v17 = vsub.f32 %v14202_v13, %v5382_v58 }
 0x752   : > { %v5362_v63 = vpop.xlane.xlu1 %5361 }
 0x753   : > { %v5383_v45 = vmul.f32 0.0078125, %v5362_v63  ;;  %v5414_v24 = vmul.f32 %v14377_v17, %v14377_v17 }
 0x755   : > { %v14384_v59 = vsub.f32 %v14206_v0, %v5383_v45  ;;  %5440 = vadd.xlane.f32.xlu0 %v5414_v24 }
 0x757   : > { %v5415_v61 = vmul.f32 %v14384_v59, %v14384_v59 }
 0x759   : > { %5442 = vadd.xlane.f32.xlu1 %v5415_v61 }
 0x77c   : > { %v5364_v21 = vpop.xlane.xlu0 %5363 }
 0x77d   : > { %v5384_v13 = vmul.f32 0.0078125, %v5364_v21 }
 0x77f   : > { %v14389_v5 = vsub.f32 %v14210_v51, %v5384_v13 }
 0x780   : > { %v5366_v31 = vpop.xlane.xlu1 %5365 }
 0x781   : > { %v5385_v1 = vmul.f32 0.0078125, %v5366_v31  ;;  %v5416_v7 = vmul.f32 %v14389_v5, %v14389_v5 }
 0x783   : > { %v14394_v18 = vsub.f32 %v14214_v54, %v5385_v1  ;;  %5444 = vadd.xlane.f32.xlu0 %v5416_v7 }
 0x785   : > { %v5417_v0 = vmul.f32 %v14394_v18, %v14394_v18 }
 0x787   : > { %5446 = vadd.xlane.f32.xlu1 %v5417_v0 }
 0x7a6   : > { %v5368_v36 = vpop.xlane.xlu0 %5367 }
 0x7a7   : > { %v5386_v43 = vmul.f32 0.0078125, %v5368_v36 }
 0x7a9   : > { %v14399_v12 = vsub.f32 %v14221_v10, %v5386_v43 }
 0x7aa   : > { %v5370_v51 = vpop.xlane.xlu1 %5369  ;;  %v5421_v56 = vpop.xlane.xlu0 %5420 }
 0x7ab   : > { %v5387_v29 = vmul.f32 0.0078125, %v5370_v51  ;;  %v5418_v35 = vmul.f32 %v14399_v12, %v14399_v12  ;;  %v5452_v38 = vmul.f32 0.0078125, %v5421_v56 }
 0x7ad   : > { %v14404_v54 = vsub.f32 %v14230_v46, %v5387_v29  ;;  %5448 = vadd.xlane.f32.xlu0 %v5418_v35  ;;  %v5468_v15 = vadd.f32 1e-05, %v5452_v38  ;;  %v10115_v46 = vld [vmem:[%s15395_s12] sm:$0xff] }
 0x7ae   : > { %v5423_v27 = vpop.xlane.xlu1 %5422  ;;  %v5425_v22 = vpop.xlane.xlu0 %5424  ;;  %v14413_v16 = vrot.slane %v10115_v46, %v5518_v6  ;;  %v14416_v34 = vrot.slane %v10115_v46, %v5538_v11 }
 0x7af   : > { %v5419_v4 = vmul.f32 %v14404_v54, %v14404_v54  ;;  %9827 = vrsqrt.f32 %v5468_v15  ;;  %v5453_v14 = vmul.f32 0.0078125, %v5423_v27  ;;  %v5454_v52 = vmul.f32 0.0078125, %v5425_v22 }
 0x7b1   : > { %5450 = vadd.xlane.f32.xlu1 %v5419_v4  ;;  %v5469_v10 = vadd.f32 1e-05, %v5453_v14  ;;  %v5470_v30 = vadd.f32 1e-05, %v5454_v52 }
 0x7b2   : > { %v5427_v47 = vpop.xlane.xlu1 %5426  ;;  %v5429_v53 = vpop.xlane.xlu0 %5428 }
 0x7b3   : > { %9829 = vrsqrt.f32 %v5469_v10  ;;  %v5455_v26 = vmul.f32 0.0078125, %v5427_v47  ;;  %v5456_v48 = vmul.f32 0.0078125, %v5429_v53 }
 0x7b4   : > { %9831 = vrsqrt.f32 %v5470_v30 }
 0x7b5   : > { %v5471_v33 = vadd.f32 1e-05, %v5455_v26  ;;  %v5472_v42 = vadd.f32 1e-05, %v5456_v48 }
 0x7b6   : > { %v5431_v58 = vpop.xlane.xlu1 %5430  ;;  %v5433_v24 = vpop.xlane.xlu0 %5432 }
 0x7b7   : > { %9833 = vrsqrt.f32 %v5471_v33 }
 0x7b8   : > { %9835 = vrsqrt.f32 %v5472_v42 }
 0x7b9   : > { %v9828_v32 = vpop.eup %9827 }
 0x7ba   : > { %v5500_v49 = vmul.f32 %v9828_v32, %v14218_v28  ;;  %v5435_v1 = vpop.xlane.xlu1 %5434  ;;  %v5437_v56 = vpop.xlane.xlu0 %5436 }
 0x7bb   : > { %v5459_v36 = vmul.f32 0.0078125, %v5435_v1  ;;  %v5460_v38 = vmul.f32 0.0078125, %v5437_v56 }
 0x7bc   : > { %v5520_v25 = vmul.f32 %v14413_v16, %v5500_v49 }
 0x7bd   : > { %v9830_v62 = vpop.eup %9829  ;;  %v5476_v27 = vadd.f32 1e-05, %v5460_v38  ;;  %v5593_v38 = vld [vmem:[#allocation2 + $0x118] sm:$0xff] }
 0x7be   : > { %v14420_v23 = vadd.f32 %v14416_v34, %v5520_v25  ;;  %v5501_v20 = vmul.f32 %v9830_v62, %v14225_v19  ;;  %v5457_v19 = vmul.f32 0.0078125, %v5431_v58  ;;  %v9832_v63 = vpop.eup %9831  ;;  %v5439_v4 = vpop.xlane.xlu1 %5438 }
 0x7bf   : > { %v5502_v61 = vmul.f32 %v9832_v63, %v14236_v37  ;;  %v5475_v37 = vadd.f32 1e-05, %v5459_v36  ;;  %v5461_v6 = vmul.f32 0.0078125, %v5439_v4  ;;  %v5591_v36 = vld [vmem:[#allocation2 + $0x108] sm:$0xff] }
 0x7c0   : > { %5687 = vmatmul.mubr.f32.vlgmr.msra.gmra.mrb[16].mxu1 %v14420_v23  ;;  %v5521_v28 = vmul.f32 %v14413_v16, %v5501_v20  ;;  %v5473_v45 = vadd.f32 1e-05, %v5457_v19 }
 0x7c1   : > { %8889 = vmatpush3.msk.msra.mxu1 %vm6374_vm8, %v14374_v55  ;;  %5692 = vmatprep.mubr.f32.mxu1 %v10201_v8  ;;  %v5458_v55 = vmul.f32 0.0078125, %v5433_v24  ;;  %v5522_v21 = vmul.f32 %v14413_v16, %v5502_v61  ;;  %v9834_v13 = vpop.eup %9833  ;;  %v5477_v22 = vadd.f32 1e-05, %v5461_v6  ;;  %v5595_v6 = vld [vmem:[#allocation2 + $0x128] sm:$0xff] }
 0x7c2   : > { %v14429_v57 = vadd.f32 %v14416_v34, %v5521_v28  ;;  %9837 = vrsqrt.f32 %v5473_v45  ;;  %v5503_v0 = vmul.f32 %v9834_v13, %v14241_v3  ;;  %v9836_v51 = vpop.eup %9835  ;;  %v5590_v13 = vld [vmem:[#allocation2 + $0x100] sm:$0xff] }
 0x7c3   : > { %v5474_v31 = vadd.f32 1e-05, %v5458_v55  ;;  %v14436_v7 = vadd.f32 %v14416_v34, %v5522_v21  ;;  %v5504_v35 = vmul.f32 %v9836_v51, %v14246_v50  ;;  %v5606_v55 = vld [vmem:[#allocation2 + $0x180] sm:$0xff]  ;;  %v5607_v21 = vld [vmem:[#allocation2 + $0x188] sm:$0xff]  ;;  %v5609_v51 = vld [vmem:[#allocation2 + $0x198] sm:$0xff] }
 0x7c4   : > { %5693 = vmatmul.mubr.f32.gmra.mrb[18].mxu1 %v14429_v57  ;;  %v5523_v43 = vmul.f32 %v14413_v16, %v5503_v0  ;;  %v9196_v0 = vpack.c.bf16 %v5607_v21, %v5606_v55  ;;  %v5616_v21 = vld [vmem:[#allocation2 + $0x1d0] sm:$0xff] }
 0x7c5   : > { %5698 = vmatprep.mubr.f32.mxu1 %v10201_v8  ;;  %9839 = vrsqrt.f32 %v5474_v31  ;;  %v5524_v3 = vmul.f32 %v14413_v16, %v5504_v35  ;;  %v5592_v35 = vld [vmem:[#allocation2 + $0x110] sm:$0xff] }
 0x7c6   : > { %v14443_v29 = vadd.f32 %v14416_v34, %v5523_v43  ;;  %9841 = vrsqrt.f32 %v5475_v37  ;;  %v5608_v43 = vld [vmem:[#allocation2 + $0x190] sm:$0xff]  ;;  %v9198_v37 = vpack.c.bf16 %v5591_v36, %v5590_v13  ;;  %9197 = vmatprep.subr.bf16.mxu0 %v9196_v0  ;;  %v5617_v13 = vld [vmem:[#allocation2 + $0x1d8] sm:$0xff] }
 0x7c7   : > { %v14450_v14 = vadd.f32 %v14416_v34, %v5524_v3  ;;  %9843 = vrsqrt.f32 %v5476_v27  ;;  %v9200_v56 = vpack.c.bf16 %v5609_v51, %v5608_v43  ;;  %v9202_v27 = vpack.c.bf16 %v5593_v38, %v5592_v35  ;;  %v5600_v0 = vld [vmem:[#allocation2 + $0x150] sm:$0xff]  ;;  %v5601_v36 = vld [vmem:[#allocation2 + $0x158] sm:$0xff]  ;;  %v5618_v51 = vld [vmem:[#allocation2 + $0x1e0] sm:$0xff] }
 0x7c8   : > { %5699 = vmatmul.mubr.f32.gmra.mrb[20].mxu1 %v14436_v7  ;;  %9845 = vrsqrt.f32 %v5477_v22  ;;  %9199 = vmatpush3.bf16.msra.mxu0 %v9198_v37  ;;  %v9218_v43 = vpack.c.bf16 %v5601_v36, %v5600_v0  ;;  %v5619_v37 = vld [vmem:[#allocation2 + $0x1e8] sm:$0xff]  ;;  %v5602_v35 = vld [vmem:[#allocation2 + $0x160] sm:$0xff] }
 0x7c9   : > { %5704 = vmatprep.mubr.f32.mxu1 %v10201_v8  ;;  %9201 = vmatprep.subr.bf16.mxu0 %v9200_v56  ;;  %v9220_v56 = vpack.c.bf16 %v5619_v37, %v5618_v51  ;;  %v5603_v38 = vld [vmem:[#allocation2 + $0x168] sm:$0xff]  ;;  %v8320_v36 = vld [vmem:[%s15391_s8 + $0x200] sm:$0xff] }
 0x7cc   : > { %5705 = vmatmul.mubr.f32.gmra.mrb[22].mxu1 %v14443_v29  ;;  %v9838_v15 = vpop.eup %9837  ;;  %9203 = vmatpush3.bf16.msra.mxu0 %v9202_v27 }
 0x7cd   : > { %5710 = vmatprep.mubr.f32.mxu1 %v10201_v8  ;;  %v5505_v10 = vmul.f32 %v9838_v15, %v14269_v9  ;;  %v5611_v15 = vld [vmem:[#allocation2 + $0x1a8] sm:$0xff] }
 0x7cf   : > { %v5525_v50 = vmul.f32 %v14413_v16, %v5505_v10  ;;  %v9840_v11 = vpop.eup %9839  ;;  %v5594_v10 = vld [vmem:[#allocation2 + $0x120] sm:$0xff] }
 0x7d0   : > { %5711 = vmatmul.mubr.f32.gmra.mrb[24].mxu1 %v14450_v14  ;;  %v5506_v32 = vmul.f32 %v9840_v11, %v14292_v41  ;;  %v9842_v52 = vpop.eup %9841 }
 0x7d1   : > { %5716 = vmatprep.mubr.f32.mxu1 %v10201_v8  ;;  %v14457_v46 = vadd.f32 %v14416_v34, %v5525_v50  ;;  %v5507_v30 = vmul.f32 %v9842_v52, %v14306_v44  ;;  %v9844_v25 = vpop.eup %9843  ;;  %v9206_v50 = vpack.c.bf16 %v5595_v6, %v5594_v10  ;;  %v5604_v10 = vld [vmem:[#allocation2 + $0x170] sm:$0xff]  ;;  %v5605_v6 = vld [vmem:[#allocation2 + $0x178] sm:$0xff] }
 0x7d2   : > { %v5526_v9 = vmul.f32 %v14413_v16, %v5506_v32  ;;  %v5508_v62 = vmul.f32 %v9844_v25, %v14326_v39  ;;  %v9846_v53 = vpop.eup %9845 }
 0x7d3   : > { %v5527_v47 = vmul.f32 %v14413_v16, %v5507_v30  ;;  %v5509_v48 = vmul.f32 %v9846_v53, %v14343_v2  ;;  %v5612_v53 = vld [vmem:[#allocation2 + $0x1b0] sm:$0xff] }
 0x7d4   : > { %5717 = vmatmul.mubr.f32.gmra.mrb[26].mxu1 %v14457_v46  ;;  %v14464_v49 = vadd.f32 %v14416_v34, %v5526_v9  ;;  %v5528_v33 = vmul.f32 %v14413_v16, %v5508_v62 }
 0x7d5   : > { %5722 = vmatprep.mubr.f32.mxu1 %v10201_v8  ;;  %v14471_v41 = vadd.f32 %v14416_v34, %v5527_v47  ;;  %v5529_v39 = vmul.f32 %v14413_v16, %v5509_v48 }
 0x7d6   : > { %v14478_v28 = vadd.f32 %v14416_v34, %v5528_v33 }
 0x7d7   : > { %v14485_v63 = vadd.f32 %v14416_v34, %v5529_v39  ;;  %v5597_v39 = vld [vmem:[#allocation2 + $0x138] sm:$0xff] }
 0x7d8   : > { %5723 = vmatmul.mubr.f32.gmra.mrb[28].mxu1 %v14464_v49 }
 0x7d9   : > { %5728 = vmatprep.mubr.f32.mxu1 %v10201_v8  ;;  %15917 = vst [vmem:[#allocation23_spill] sm:$0xff] %v14485_v63 }
 0x7dc   : > { %5729 = vmatmul.mubr.f32.gmra.mrb[30].mxu1 %v14471_v41 }
 0x7dd   : > { %5734 = vmatprep.mubr.f32.mxu1 %v10201_v8 }
 0x7e0   : > { %5735 = vmatmul.mubr.f32.gmra.mrb[32].mxu1 %v14478_v28 }
 0x7e1   : > { %5740 = vmatprep.mubr.f32.mxu1 %v10201_v8 }
 0x7e2   : > { %v5441_v26 = vpop.xlane.xlu0 %5440 }
 0x7e3   : > { %v5462_v20 = vmul.f32 0.0078125, %v5441_v26 }
 0x7e4   : > { %5741 = vmatmul.mubr.f32.gmra.mrb[34].mxu1 %v14485_v63 }
 0x7e5   : > { %v5478_v44 = vadd.f32 1e-05, %v5462_v20  ;;  %5746 = vmatprep.mubr.f32.mxu1 %v10201_v8 }
 0x7e6   : > { %v5443_v42 = vpop.xlane.xlu1 %5442 }
 0x7e7   : > { %9847 = vrsqrt.f32 %v5478_v44  ;;  %v5463_v58 = vmul.f32 0.0078125, %v5443_v42  ;;  %v5613_v44 = vld [vmem:[#allocation2 + $0x1b8] sm:$0xff] }
 0x7e8   : > { %v9208_v42 = vpack.c.bf16 %v5613_v44, %v5612_v53  ;;  %v6304_v53 = vld [vmem:[%s14527_s21] sm:$0xff]  ;;  %v6305_v44 = vld [vmem:[%s14527_s21 + $0x8] sm:$0xff] }
 0x7e9   : > { %v5479_v19 = vadd.f32 1e-05, %v5463_v58  ;;  %v5596_v58 = vld [vmem:[#allocation2 + $0x130] sm:$0xff] }
 0x7eb   : > { %9849 = vrsqrt.f32 %v5479_v19 }
 0x7f1   : > { %v9848_v45 = vpop.eup %9847 }
 0x7f2   : > { %v5510_v2 = vmul.f32 %v9848_v45, %v14377_v17  ;;  %v5610_v17 = vld [vmem:[#allocation2 + $0x1a0] sm:$0xff] }
 0x7f3   : > { %v9204_v4 = vpack.c.bf16 %v5611_v15, %v5610_v17  ;;  %v5614_v45 = vld [vmem:[#allocation2 + $0x1c0] sm:$0xff]  ;;  %v9222_v17 = vpack.c.bf16 %v5603_v38, %v5602_v35  ;;  %v5621_v15 = vld [vmem:[#allocation2 + $0x1f8] sm:$0xff] }
 0x7f4   : > { %v5530_v24 = vmul.f32 %v14413_v16, %v5510_v2  ;;  %v5615_v2 = vld [vmem:[#allocation2 + $0x1c8] sm:$0xff] }
 0x7f5   : > { %v9850_v61 = vpop.eup %9849  ;;  %9205 = vmatprep.subr.bf16.mxu0 %v9204_v4 }
 0x7f6   : > { %v14492_v31 = vadd.f32 %v14416_v34, %v5530_v24  ;;  %v5511_v1 = vmul.f32 %v9850_v61, %v14384_v59  ;;  %9207 = vmatpush3.bf16.msra.mxu0 %v9206_v50  ;;  %v5598_v24 = vld [vmem:[#allocation2 + $0x140] sm:$0xff]  ;;  %v5599_v61 = vld [vmem:[#allocation2 + $0x148] sm:$0xff] }
 0x7f7   : > { %9209 = vmatprep.subr.bf16.mxu0 %v9208_v42  ;;  %v9214_v55 = vpack.c.bf16 %v5599_v61, %v5598_v24  ;;  %v6309_v42 = vld [vmem:[%s14527_s21 + $0x28] sm:$0xff]  ;;  %v6316_v24 = vld [vmem:[%s14527_s21 + $0x60] sm:$0xff] }
 0x7f8   : > { %15918 = vst [vmem:[#allocation20_spill] sm:$0xff] %v14492_v31  ;;  %5747 = vmatmul.mubr.f32.gmra.mrb[36].mxu1 %v14492_v31  ;;  %v5531_v3 = vmul.f32 %v14413_v16, %v5511_v1  ;;  %v9216_v1 = vpack.c.bf16 %v5617_v13, %v5616_v21  ;;  %v6317_v61 = vld [vmem:[%s14527_s21 + $0x68] sm:$0xff]  ;;  %v6319_v21 = vld [vmem:[%s14527_s21 + $0x78] sm:$0xff] }
 0x7f9   : > { %5752 = vmatprep.mubr.f32.mxu1 %v10201_v8  ;;  %v8321_v13 = vld [vmem:[%s15391_s8 + $0x208] sm:$0xff] }
 0x7fa   : > { %v14499_v59 = vadd.f32 %v14416_v34, %v5531_v3  ;;  %v5620_v3 = vld [vmem:[#allocation2 + $0x1f0] sm:$0xff] }
 0x7fb   : > { %v9224_v4 = vpack.c.bf16 %v5621_v15, %v5620_v3 }
 0x7fc   : > { %15919 = vst [vmem:[#allocation41_spill] sm:$0xff] %v14499_v59  ;;  %5753 = vmatmul.mubr.f32.gmra.mrb[38].mxu1 %v14499_v59 }
 0x7fd   : > { %5758 = vmatprep.mubr.f32.mxu1 %v10201_v8 }
 0x810   : > { %v5445_v11 = vpop.xlane.xlu0 %5444 }
 0x811   : > { %v5464_v22 = vmul.f32 0.0078125, %v5445_v11  ;;  %v9226_v11 = vpack.c.bf16 %v5605_v6, %v5604_v10 }
 0x813   : > { %v5480_v32 = vadd.f32 1e-05, %v5464_v22 }
 0x814   : > { %v5447_v9 = vpop.xlane.xlu1 %5446 }
 0x815   : > { %9851 = vrsqrt.f32 %v5480_v32  ;;  %v5465_v52 = vmul.f32 0.0078125, %v5447_v9 }
 0x817   : > { %v5481_v30 = vadd.f32 1e-05, %v5465_v52 }
 0x819   : > { %9853 = vrsqrt.f32 %v5481_v30 }
 0x81f   : > { %v9852_v47 = vpop.eup %9851 }
 0x820   : > { %v5512_v25 = vmul.f32 %v9852_v47, %v14389_v5  ;;  %v9210_v5 = vpack.c.bf16 %v5597_v39, %v5596_v58  ;;  %v6310_v58 = vld [vmem:[%s14527_s21 + $0x30] sm:$0xff]  ;;  %v6311_v39 = vld [vmem:[%s14527_s21 + $0x38] sm:$0xff] }
 0x822   : > { %v5532_v62 = vmul.f32 %v14413_v16, %v5512_v25  ;;  %9211 = vmatpush3.bf16.msra.mxu0 %v9210_v5  ;;  %v6312_v5 = vld [vmem:[%s14527_s21 + $0x40] sm:$0xff] }
 0x823   : > { %v9854_v26 = vpop.eup %9853 }
 0x824   : > { %v14506_v20 = vadd.f32 %v14416_v34, %v5532_v62  ;;  %v5513_v33 = vmul.f32 %v9854_v26, %v14394_v18  ;;  %v9212_v18 = vpack.c.bf16 %v5615_v2, %v5614_v45  ;;  %v6313_v45 = vld [vmem:[%s14527_s21 + $0x48] sm:$0xff]  ;;  %v6314_v2 = vld [vmem:[%s14527_s21 + $0x50] sm:$0xff] }
 0x826   : > { %15920 = vst [vmem:[#allocation33_spill] sm:$0xff] %v14506_v20  ;;  %5759 = vmatmul.mubr.f32.gmra.mrb[40].mxu1 %v14506_v20  ;;  %v5533_v48 = vmul.f32 %v14413_v16, %v5513_v33  ;;  %9213 = vmatprep.subr.bf16.mxu0 %v9212_v18  ;;  %v6315_v18 = vld [vmem:[%s14527_s21 + $0x58] sm:$0xff] }
 0x827   : > { %5764 = vmatprep.mubr.f32.mxu1 %v10201_v8  ;;  %9215 = vmatpush3.bf16.msra.mxu0 %v9214_v55  ;;  %v6318_v55 = vld [vmem:[%s14527_s21 + $0x70] sm:$0xff] }
 0x828   : > { %v14513_v19 = vadd.f32 %v14416_v34, %v5533_v48  ;;  %9217 = vmatprep.subr.bf16.mxu0 %v9216_v1  ;;  %v6306_v48 = vld [vmem:[%s14527_s21 + $0x10] sm:$0xff]  ;;  %v8323_v1 = vld [vmem:[%s15391_s8 + $0x218] sm:$0xff] }
 0x829   : > { %v9228_v0 = vpack.c.bf16 %v8323_v1, %v8321_v13 }
 0x82a   : > { %15921 = vst [vmem:[#allocation11_spill] sm:$0xff] %v14513_v19  ;;  %5765 = vmatmul.mubr.f32.gmra.mrb[42].mxu1 %v14513_v19 }
 0x82b   : > { %5770 = vmatprep.mubr.f32.mxu1 %v10201_v8  ;;  %9219 = vmatpush3.bf16.msra.mxu0 %v9218_v43  ;;  %v8322_v43 = vld [vmem:[%s15391_s8 + $0x210] sm:$0xff] }
 0x82c   : > { %9221 = vmatprep.subr.bf16.mxu0 %v9220_v56  ;;  %v9230_v51 = vpack.c.bf16 %v8322_v43, %v8320_v36  ;;  %9229 = vmatprep.subr.bf16.mxu1 %v9228_v0 }
 0x82f   : > { %9223 = vmatpush3.bf16.msra.mxu0 %v9222_v17 }
 0x830   : > { %9225 = vmatprep.subr.bf16.mxu0 %v9224_v4 }
 0x833   : > { %9227 = vmatpush3.bf16.msra.mxu0 %v9226_v11 }
 0x83a   : > { %v5449_v27 = vpop.xlane.xlu0 %5448 }
 0x83b   : > { %v5466_v50 = vmul.f32 0.0078125, %v5449_v27 }
 0x83d   : > { %v5482_v22 = vadd.f32 1e-05, %v5466_v50 }
 0x83e   : > { %v5451_v32 = vpop.xlane.xlu1 %5450 }
 0x83f   : > { %9855 = vrsqrt.f32 %v5482_v22  ;;  %v5467_v9 = vmul.f32 0.0078125, %v5451_v32 }
 0x841   : > { %v5483_v52 = vadd.f32 1e-05, %v5467_v9 }
 0x843   : > { %9857 = vrsqrt.f32 %v5483_v52 }
 0x849   : > { %v9856_v30 = vpop.eup %9855 }
 0x84a   : > { %v5514_v47 = vmul.f32 %v9856_v30, %v14399_v12 }
 0x84c   : > { %v5534_v25 = vmul.f32 %v14413_v16, %v5514_v47 }
 0x84d   : > { %v9858_v62 = vpop.eup %9857 }
 0x84e   : > { %v14520_v26 = vadd.f32 %v14416_v34, %v5534_v25  ;;  %v5515_v33 = vmul.f32 %v9858_v62, %v14404_v54 }
 0x850   : > { %15922 = vst [vmem:[#allocation43_spill] sm:$0xff] %v14520_v26  ;;  %5771 = vmatmul.mubr.f32.gmra.mrb[44].mxu1 %v14520_v26  ;;  %v5535_v12 = vmul.f32 %v14413_v16, %v5515_v33  ;;  %v6307_v16 = vld [vmem:[%s14527_s21 + $0x18] sm:$0xff] }
 0x851   : > { %5776 = vmatprep.mubr.f32.mxu1 %v10201_v8 }
 0x852   : > { %v14533_v54 = vadd.f32 %v14416_v34, %v5535_v12  ;;  %v6308_v34 = vld [vmem:[%s14527_s21 + $0x20] sm:$0xff]  ;;  %s15346_s21 = scalar_lea.vmem %s15396_s13, %s10359_s29 }
 0x854   : > { %15923 = vst [vmem:[#allocation19_spill] sm:$0xff] %v14533_v54  ;;  %5777 = vmatmul.mubr.f32.gmra.mrb[46].mxu1 %v14533_v54 }
 0x855   : > { %8890 = vmatprep.mubr.msk.f32.mxu1 %vm6325_vm3, %v6304_v53 }
 0x858   : > { %8891 = vmatmul.mubr.msk.f32.vlgmr.msra.gmra.mrb[48].mxu1 %vm6325_vm3, %v6305_v44 }
 0x859   : > { %8893 = vmatprep.mubr.msk.f32.mxu1 %vm6325_vm3, %v6306_v48  ;;  %9231 = vmatpush1.bf16.msra.mxu1 %v9230_v51 }
 0x85c   : > { %8894 = vmatmul.mubr.msk.f32.gmra.mrb[50].mxu1 %vm6325_vm3, %v6307_v16 }
 0x85d   : > { %8896 = vmatprep.mubr.msk.f32.mxu1 %vm6325_vm3, %v6308_v34 }
 0x860   : > { %8897 = vmatmul.mubr.msk.f32.gmra.mrb[52].mxu1 %vm6325_vm3, %v6309_v42 }
 0x861   : > { %8899 = vmatprep.mubr.msk.f32.mxu1 %vm6325_vm3, %v6310_v58 }
 0x864   : > { %8900 = vmatmul.mubr.msk.f32.gmra.mrb[54].mxu1 %vm6325_vm3, %v6311_v39 }
 0x865   : > { %8902 = vmatprep.mubr.msk.f32.mxu1 %vm6325_vm3, %v6312_v5 }
 0x868   : > { %8903 = vmatmul.mubr.msk.f32.gmra.mrb[56].mxu1 %vm6325_vm3, %v6313_v45 }
 0x869   : > { %8905 = vmatprep.mubr.msk.f32.mxu1 %vm6325_vm3, %v6314_v2 }
 0x86c   : > { %8906 = vmatmul.mubr.msk.f32.gmra.mrb[58].mxu1 %vm6325_vm3, %v6315_v18 }
 0x86d   : > { %8908 = vmatprep.mubr.msk.f32.mxu1 %vm6325_vm3, %v6316_v24 }
 0x870   : > { %8909 = vmatmul.mubr.msk.f32.gmra.mrb[60].mxu1 %vm6325_vm3, %v6317_v61 }
 0x871   : > { %8911 = vmatprep.mubr.msk.f32.mxu1 %vm6325_vm3, %v6318_v55 }
 0x874   : > { %8912 = vmatmul.mubr.msk.f32.gmra.mrb[62].mxu1 %vm6325_vm3, %v6319_v21 }
 0x875   : > { %6733 = vmatprep.mubr.f32.mxu1 %v10201_v8 }
 0x893   : > { %v5688_v37 = vpop.f32.mrb[16].mxu1 }
 0x894   : > { %v5815_v56 = vmul.f32 0.70710677, %v5688_v37  ;;  %v5690_v35 = vpop.f32.mrb[17].mxu1  ;;  %v5783_v52 = vmul.f32 0.5, %v5688_v37 }
 0x895   : > { %v5816_v38 = vmul.f32 0.70710677, %v5690_v35  ;;  %v5784_v11 = vmul.f32 0.5, %v5690_v35 }
 0x896   : > { %9859 = verf.f32 %v5815_v56 }
 0x897   : > { %9861 = verf.f32 %v5816_v38  ;;  %v5694_v17 = vpop.f32.mrb[18].mxu1 }
 0x898   : > { %v5817_v3 = vmul.f32 0.70710677, %v5694_v17  ;;  %v5696_v15 = vpop.f32.mrb[19].mxu1  ;;  %v5785_v42 = vmul.f32 0.5, %v5694_v17 }
 0x899   : > { %v5818_v27 = vmul.f32 0.70710677, %v5696_v15  ;;  %v5786_v44 = vmul.f32 0.5, %v5696_v15 }
 0x89a   : > { %9863 = verf.f32 %v5817_v3 }
 0x89b   : > { %9865 = verf.f32 %v5818_v27  ;;  %v5700_v50 = vpop.f32.mrb[20].mxu1 }
 0x89c   : > { %v5819_v32 = vmul.f32 0.70710677, %v5700_v50  ;;  %v5702_v9 = vpop.f32.mrb[21].mxu1  ;;  %v5787_v37 = vmul.f32 0.5, %v5700_v50  ;;  %v8327_v50 = vld [vmem:[%s15391_s8 + $0x238] sm:$0xff] }
 0x89d   : > { %v5820_v30 = vmul.f32 0.70710677, %v5702_v9  ;;  %v5788_v43 = vmul.f32 0.5, %v5702_v9  ;;  %v8324_v9 = vld [vmem:[%s15391_s8 + $0x220] sm:$0xff] }
 0x89e   : > { %9867 = verf.f32 %v5819_v32 }
 0x89f   : > { %9869 = verf.f32 %v5820_v30  ;;  %v5706_v53 = vpop.f32.mrb[22].mxu1 }
 0x8a0   : > { %v9860_v4 = vpop.eup %9859  ;;  %v5821_v16 = vmul.f32 0.70710677, %v5706_v53  ;;  %v5708_v34 = vpop.f32.mrb[23].mxu1  ;;  %v5789_v30 = vmul.f32 0.5, %v5706_v53  ;;  %v8329_v53 = vld [vmem:[%s15391_s8 + $0x248] sm:$0xff] }
 0x8a1   : > { %v9862_v10 = vpop.eup %9861  ;;  %v5879_v6 = vadd.f32 1.0, %v9860_v4  ;;  %v5822_v58 = vmul.f32 0.70710677, %v5708_v34 }
 0x8a2   : > { %v5880_v22 = vadd.f32 1.0, %v9862_v10  ;;  %9871 = verf.f32 %v5821_v16 }
 0x8a3   : > { %v5911_v33 = vmul.f32 %v5879_v6, %v5783_v52  ;;  %9873 = verf.f32 %v5822_v58  ;;  %v5712_v45 = vpop.f32.mrb[24].mxu1  ;;  %v8325_v6 = vld [vmem:[%s15391_s8 + $0x228] sm:$0xff]  ;;  %v8326_v52 = vld [vmem:[%s15391_s8 + $0x230] sm:$0xff]  ;;  %v8331_v58 = vld [vmem:[%s15391_s8 + $0x258] sm:$0xff] }
 0x8a4   : > { %v9864_v47 = vpop.eup %9863  ;;  %v5912_v25 = vmul.f32 %v5880_v22, %v5784_v11  ;;  %v5823_v2 = vmul.f32 0.70710677, %v5712_v45  ;;  %v5714_v18 = vpop.f32.mrb[25].mxu1  ;;  %v5790_v11 = vmul.f32 0.5, %v5708_v34  ;;  %v9232_v32 = vpack.c.bf16 %v8327_v50, %v8325_v6 }
 0x8a5   : > { %v9866_v62 = vpop.eup %9865  ;;  %v5881_v12 = vadd.f32 1.0, %v9864_v47  ;;  %v5824_v24 = vmul.f32 0.70710677, %v5714_v18 }
 0x8a6   : > { %v5882_v48 = vadd.f32 1.0, %v9866_v62  ;;  %6007 = vmatprep.mubr.f32.mxu0 %v5912_v25  ;;  %9875 = verf.f32 %v5823_v2  ;;  %v9234_v25 = vpack.c.bf16 %v8326_v52, %v8324_v9  ;;  %9233 = vmatprep.subr.bf16.mxu1 %v9232_v32  ;;  %v9236_v2 = vpack.c.bf16 %v8331_v58, %v8329_v53  ;;  %v8334_v52 = vld [vmem:[%s15391_s8 + $0x270] sm:$0xff]  ;;  %v8336_v53 = vld [vmem:[%s15391_s8 + $0x280] sm:$0xff] }
 0x8a7   : > { %6008 = vmatmul.mubr.f32.vlgmr.msra.gmra.mrb[80].mxu0 %v5911_v33  ;;  %v5913_v5 = vmul.f32 %v5881_v12, %v5785_v42  ;;  %9877 = verf.f32 %v5824_v24  ;;  %v14581_v61 = vpop.f32.mrb[26].mxu1  ;;  %v8328_v24 = vld [vmem:[%s15391_s8 + $0x240] sm:$0xff]  ;;  %v8338_v58 = vld [vmem:[%s15391_s8 + $0x290] sm:$0xff] }
 0x8a8   : > { %v5914_v39 = vmul.f32 %v5882_v48, %v5786_v44  ;;  %v9868_v55 = vpop.eup %9867  ;;  %v5825_v21 = vmul.f32 0.70710677, %v14581_v61  ;;  %v14584_v13 = vpop.f32.mrb[27].mxu1  ;;  %9235 = vmatpush1.bf16.msra.mxu1 %v9234_v25  ;;  %v5793_v6 = vmul.f32 0.5, %v14581_v61 }
 0x8a9   : > { %v9870_v1 = vpop.eup %9869  ;;  %v5883_v0 = vadd.f32 1.0, %v9868_v55  ;;  %v5826_v36 = vmul.f32 0.70710677, %v14584_v13  ;;  %v8330_v55 = vld [vmem:[%s15391_s8 + $0x250] sm:$0xff]  ;;  %9237 = vmatprep.subr.bf16.mxu1 %v9236_v2 }
 0x8aa   : > { %6012 = vmatprep.mubr.f32.mxu0 %v5914_v39  ;;  %v5884_v51 = vadd.f32 1.0, %v9870_v1  ;;  %9879 = verf.f32 %v5825_v21  ;;  %v5792_v39 = vmul.f32 0.5, %v5714_v18  ;;  %v5791_v21 = vmul.f32 0.5, %v5712_v45  ;;  %v8333_v45 = vld [vmem:[%s15391_s8 + $0x268] sm:$0xff] }
 0x8ab   : > { %6013 = vmatmul.mubr.f32.gmra.mrb[82].mxu0 %v5913_v5  ;;  %9881 = verf.f32 %v5826_v36  ;;  %v14587_v56 = vpop.f32.mrb[28].mxu1  ;;  %v5915_v27 = vmul.f32 %v5883_v0, %v5787_v37  ;;  %v9238_v0 = vpack.c.bf16 %v8330_v55, %v8328_v24 }
 0x8ac   : > { %v9872_v35 = vpop.eup %9871  ;;  %v5916_v38 = vmul.f32 %v5884_v51, %v5788_v43  ;;  %v5827_v17 = vmul.f32 0.70710677, %v14587_v56  ;;  %v14590_v3 = vpop.f32.mrb[29].mxu1 }
 0x8ad   : > { %v9874_v15 = vpop.eup %9873  ;;  %v5885_v4 = vadd.f32 1.0, %v9872_v35  ;;  %v5828_v10 = vmul.f32 0.70710677, %v14590_v3  ;;  %9239 = vmatpush1.bf16.msra.mxu1 %v9238_v0  ;;  %v8341_v0 = vld [vmem:[%s15391_s8 + $0x2a8] sm:$0xff] }
 0x8ae   : > { %v5886_v22 = vadd.f32 1.0, %v9874_v15  ;;  %9883 = verf.f32 %v5827_v17  ;;  %6017 = vmatprep.mubr.f32.mxu0 %v5916_v38  ;;  %v8335_v15 = vld [vmem:[%s15391_s8 + $0x278] sm:$0xff] }
 0x8af   : > { %9885 = verf.f32 %v5828_v10  ;;  %v14605_v47 = vpop.f32.mrb[30].mxu1  ;;  %6018 = vmatmul.mubr.f32.gmra.mrb[84].mxu0 %v5915_v27  ;;  %v5917_v16 = vmul.f32 %v5885_v4, %v5789_v30  ;;  %v5794_v27 = vmul.f32 0.5, %v14584_v13  ;;  %v9240_v10 = vpack.c.bf16 %v8335_v15, %v8333_v45  ;;  %v8332_v13 = vld [vmem:[%s15391_s8 + $0x260] sm:$0xff] }
 0x8b0   : > { %v9876_v62 = vpop.eup %9875  ;;  %v5918_v33 = vmul.f32 %v5886_v22, %v5790_v11  ;;  %v5829_v12 = vmul.f32 0.70710677, %v14605_v47  ;;  %v14608_v44 = vpop.f32.mrb[31].mxu1 }
 0x8b1   : > { %v9878_v48 = vpop.eup %9877  ;;  %v5887_v34 = vadd.f32 1.0, %v9876_v62  ;;  %v5830_v42 = vmul.f32 0.70710677, %v14608_v44  ;;  %9241 = vmatprep.subr.bf16.mxu1 %v9240_v10  ;;  %v8345_v10 = vld [vmem:[%s15391_s8 + $0x2c8] sm:$0xff] }
 0x8b2   : > { %v5888_v5 = vadd.f32 1.0, %v9878_v48  ;;  %9887 = verf.f32 %v5829_v12  ;;  %6022 = vmatprep.mubr.f32.mxu0 %v5918_v33  ;;  %v9242_v33 = vpack.c.bf16 %v8334_v52, %v8332_v13  ;;  %v8337_v12 = vld [vmem:[%s15391_s8 + $0x288] sm:$0xff]  ;;  %v8339_v48 = vld [vmem:[%s15391_s8 + $0x298] sm:$0xff]  ;;  %v8346_v13 = vld [vmem:[%s15391_s8 + $0x2d0] sm:$0xff] }
 0x8b3   : > { %9889 = verf.f32 %v5830_v42  ;;  %v14623_v1 = vpop.f32.mrb[32].mxu1  ;;  %6023 = vmatmul.mubr.f32.gmra.mrb[86].mxu0 %v5917_v16  ;;  %v5919_v35 = vmul.f32 %v5887_v34, %v5791_v21  ;;  %v5796_v16 = vmul.f32 0.5, %v14590_v3  ;;  %v9244_v42 = vpack.c.bf16 %v8339_v48, %v8337_v12  ;;  %v8349_v52 = vld [vmem:[%s15391_s8 + $0x2e8] sm:$0xff]  ;;  %v8348_v48 = vld [vmem:[%s15391_s8 + $0x2e0] sm:$0xff] }
 0x8b4   : > { %v9880_v36 = vpop.eup %9879  ;;  %v5920_v18 = vmul.f32 %v5888_v5, %v5792_v39  ;;  %v5831_v43 = vmul.f32 0.70710677, %v14623_v1  ;;  %v14626_v51 = vpop.f32.mrb[33].mxu1  ;;  %v5795_v39 = vmul.f32 0.5, %v14587_v56  ;;  %9243 = vmatpush1.bf16.msra.mxu1 %v9242_v33  ;;  %v9246_v5 = vpack.c.bf16 %v8338_v58, %v8336_v53 }
 0x8b5   : > { %v9882_v37 = vpop.eup %9881  ;;  %v5889_v38 = vadd.f32 1.0, %v9880_v36  ;;  %v5832_v17 = vmul.f32 0.70710677, %v14626_v51  ;;  %9245 = vmatprep.subr.bf16.mxu1 %v9244_v42  ;;  %v8343_v36 = vld [vmem:[%s15391_s8 + $0x2b8] sm:$0xff]  ;;  %v5798_v56 = vmul.f32 0.5, %v14608_v44 }
 0x8b6   : > { %v5890_v4 = vadd.f32 1.0, %v9882_v37  ;;  %9891 = verf.f32 %v5831_v43  ;;  %6027 = vmatprep.mubr.f32.mxu0 %v5920_v18  ;;  %v9248_v43 = vpack.c.bf16 %v8343_v36, %v8341_v0  ;;  %v8340_v37 = vld [vmem:[%s15391_s8 + $0x2a0] sm:$0xff] }
 0x8b7   : > { %9893 = verf.f32 %v5832_v17  ;;  %v14637_v50 = vpop.f32.mrb[34].mxu1  ;;  %6028 = vmatmul.mubr.f32.gmra.mrb[88].mxu0 %v5919_v35  ;;  %v5921_v30 = vmul.f32 %v5889_v38, %v5793_v6  ;;  %v8342_v35 = vld [vmem:[%s15391_s8 + $0x2b0] sm:$0xff]  ;;  %v5797_v38 = vmul.f32 0.5, %v14605_v47  ;;  %v8347_v6 = vld [vmem:[%s15391_s8 + $0x2d8] sm:$0xff] }
 0x8b8   : > { %v9884_v11 = vpop.eup %9883  ;;  %v5922_v22 = vmul.f32 %v5890_v4, %v5794_v27  ;;  %v5833_v32 = vmul.f32 0.70710677, %v14637_v50  ;;  %v14640_v9 = vpop.f32.mrb[35].mxu1  ;;  %9247 = vmatpush1.bf16.msra.mxu1 %v9246_v5  ;;  %v9250_v17 = vpack.c.bf16 %v8342_v35, %v8340_v37 }
 0x8b9   : > { %v9886_v61 = vpop.eup %9885  ;;  %v5891_v25 = vadd.f32 1.0, %v9884_v11  ;;  %v5834_v62 = vmul.f32 0.70710677, %v14640_v9  ;;  %9249 = vmatprep.subr.bf16.mxu1 %v9248_v43  ;;  %v5800_v11 = vmul.f32 0.5, %v14626_v51 }
 0x8ba   : > { %v5892_v34 = vadd.f32 1.0, %v9886_v61  ;;  %9895 = verf.f32 %v5833_v32  ;;  %6032 = vmatprep.mubr.f32.mxu0 %v5922_v22  ;;  %v9252_v22 = vpack.c.bf16 %v8347_v6, %v8345_v10  ;;  %v8344_v32 = vld [vmem:[%s15391_s8 + $0x2c0] sm:$0xff]  ;;  %v5799_v61 = vmul.f32 0.5, %v14623_v1  ;;  %v8350_v1 = vld [vmem:[%s15391_s8 + $0x2f0] sm:$0xff] }
 0x8bb   : > { %9897 = verf.f32 %v5834_v62  ;;  %6033 = vmatmul.mubr.f32.gmra.mrb[90].mxu0 %v5921_v30  ;;  %v5923_v55 = vmul.f32 %v5891_v25, %v5795_v39  ;;  %v9254_v51 = vpack.c.bf16 %v8346_v13, %v8344_v32  ;;  %v8351_v30 = vld [vmem:[%s15391_s8 + $0x2f8] sm:$0xff]  ;;  %v5802_v39 = vmul.f32 0.5, %v14640_v9 }
 0x8bc   : > { %v9888_v2 = vpop.eup %9887  ;;  %v5924_v3 = vmul.f32 %v5892_v34, %v5796_v16  ;;  %9251 = vmatpush1.bf16.msra.mxu1 %v9250_v17  ;;  %v9256_v12 = vpack.c.bf16 %v8351_v30, %v8349_v52 }
 0x8bd   : > { %v9890_v24 = vpop.eup %9889  ;;  %v5893_v21 = vadd.f32 1.0, %v9888_v2  ;;  %9253 = vmatprep.subr.bf16.mxu1 %v9252_v22 }
 0x8be   : > { %v5894_v18 = vadd.f32 1.0, %v9890_v24  ;;  %6037 = vmatprep.mubr.f32.mxu0 %v5924_v3  ;;  %v5801_v3 = vmul.f32 0.5, %v14637_v50  ;;  %v9258_v24 = vpack.c.bf16 %v8350_v1, %v8348_v48 }
 0x8bf   : > { %6038 = vmatmul.mubr.f32.gmra.mrb[92].mxu0 %v5923_v55  ;;  %v5925_v27 = vmul.f32 %v5893_v21, %v5797_v38 }
 0x8c0   : > { %v9892_v45 = vpop.eup %9891  ;;  %v5926_v15 = vmul.f32 %v5894_v18, %v5798_v56  ;;  %9255 = vmatpush1.bf16.msra.mxu1 %v9254_v51 }
 0x8c1   : > { %v9894_v44 = vpop.eup %9893  ;;  %v5895_v4 = vadd.f32 1.0, %v9892_v45  ;;  %9257 = vmatprep.subr.bf16.mxu1 %v9256_v12 }
 0x8c2   : > { %v5896_v47 = vadd.f32 1.0, %v9894_v44  ;;  %6042 = vmatprep.mubr.f32.mxu0 %v5926_v15 }
 0x8c3   : > { %6043 = vmatmul.mubr.f32.gmra.mrb[94].mxu0 %v5925_v27  ;;  %v5927_v34 = vmul.f32 %v5895_v4, %v5799_v61 }
 0x8c4   : > { %v9896_v25 = vpop.eup %9895  ;;  %v5928_v62 = vmul.f32 %v5896_v47, %v5800_v11  ;;  %9259 = vmatpush1.bf16.msra.mxu1 %v9258_v24 }
 0x8c5   : > { %v9898_v16 = vpop.eup %9897  ;;  %v5897_v42 = vadd.f32 1.0, %v9896_v25 }
 0x8c6   : > { %v5898_v5 = vadd.f32 1.0, %v9898_v16  ;;  %6047 = vmatprep.mubr.f32.mxu0 %v5928_v62 }
 0x8c7   : > { %6048 = vmatmul.mubr.f32.gmra.mrb[96].mxu0 %v5927_v34  ;;  %v5929_v0 = vmul.f32 %v5897_v42, %v5801_v3 }
 0x8c8   : > { %v5930_v55 = vmul.f32 %v5898_v5, %v5802_v39 }
 0x8ca   : > { %6052 = vmatprep.mubr.f32.mxu0 %v5930_v55 }
 0x8cb   : > { %v5748_v33 = vpop.f32.mrb[36].mxu1  ;;  %6053 = vmatmul.mubr.f32.gmra.mrb[98].mxu0 %v5929_v0  ;;  %v6654_v0 = vld [vmem:[#allocation2 + $0x288] sm:$0xff] }
 0x8cc   : > { %v5835_v53 = vmul.f32 0.70710677, %v5748_v33  ;;  %v5750_v58 = vpop.f32.mrb[37].mxu1  ;;  %v5803_v38 = vmul.f32 0.5, %v5748_v33 }
 0x8cd   : > { %v5836_v2 = vmul.f32 0.70710677, %v5750_v58  ;;  %v5804_v37 = vmul.f32 0.5, %v5750_v58 }
 0x8ce   : > { %9899 = verf.f32 %v5835_v53 }
 0x8cf   : > { %9901 = verf.f32 %v5836_v2  ;;  %v5754_v21 = vpop.f32.mrb[38].mxu1 }
 0x8d0   : > { %v5837_v36 = vmul.f32 0.70710677, %v5754_v21  ;;  %v5756_v56 = vpop.f32.mrb[39].mxu1  ;;  %v5805_v6 = vmul.f32 0.5, %v5754_v21  ;;  %v6653_v21 = vld [vmem:[#allocation2 + $0x280] sm:$0xff] }
 0x8d1   : > { %v5838_v18 = vmul.f32 0.70710677, %v5756_v56  ;;  %v5806_v4 = vmul.f32 0.5, %v5756_v56  ;;  %v6637_v56 = vld [vmem:[#allocation2 + $0x200] sm:$0xff] }
 0x8d2   : > { %9903 = verf.f32 %v5837_v36  ;;  %v9260_v36 = vpack.c.bf16 %v6654_v0, %v6653_v21 }
 0x8d3   : > { %9905 = verf.f32 %v5838_v18  ;;  %v6638_v18 = vld [vmem:[#allocation2 + $0x208] sm:$0xff] }
 0x8d4   : > { %9261 = vmatprep.subr.bf16.mxu0 %v9260_v36 }
 0x8d8   : > { %v9900_v9 = vpop.eup %9899 }
 0x8d9   : > { %v9902_v43 = vpop.eup %9901  ;;  %v5899_v50 = vadd.f32 1.0, %v9900_v9  ;;  %v9262_v9 = vpack.c.bf16 %v6638_v18, %v6637_v56 }
 0x8da   : > { %v5900_v35 = vadd.f32 1.0, %v9902_v43  ;;  %v6655_v43 = vld [vmem:[#allocation2 + $0x290] sm:$0xff] }
 0x8db   : > { %v5931_v44 = vmul.f32 %v5899_v50, %v5803_v38  ;;  %9263 = vmatpush3.bf16.msra.mxu0 %v9262_v9  ;;  %v6656_v50 = vld [vmem:[#allocation2 + $0x298] sm:$0xff] }
 0x8dc   : > { %v9904_v17 = vpop.eup %9903  ;;  %v5932_v45 = vmul.f32 %v5900_v35, %v5804_v37  ;;  %v9264_v37 = vpack.c.bf16 %v6656_v50, %v6655_v43  ;;  %v6639_v35 = vld [vmem:[#allocation2 + $0x210] sm:$0xff]  ;;  %v6640_v38 = vld [vmem:[#allocation2 + $0x218] sm:$0xff] }
 0x8dd   : > { %v9906_v15 = vpop.eup %9905  ;;  %v5901_v27 = vadd.f32 1.0, %v9904_v17  ;;  %v9266_v17 = vpack.c.bf16 %v6640_v38, %v6639_v35  ;;  %v6659_v38 = vld [vmem:[#allocation2 + $0x2b0] sm:$0xff] }
 0x8de   : > { %v5902_v10 = vadd.f32 1.0, %v9906_v15  ;;  %6057 = vmatprep.mubr.f32.mxu0 %v5932_v45  ;;  %9265 = vmatprep.subr.bf16.mxu0 %v9264_v37 }
 0x8df   : > { %6058 = vmatmul.mubr.f32.gmra.mrb[100].mxu0 %v5931_v44  ;;  %v5933_v47 = vmul.f32 %v5901_v27, %v5805_v6  ;;  %v15573_v27 = vsub.s32 1, %v14044_v60 }
 0x8e0   : > { %v5934_v11 = vmul.f32 %v5902_v10, %v5806_v4  ;;  %9267 = vmatpush3.bf16.msra.mxu0 %v9266_v17  ;;  %v6657_v4 = vld [vmem:[#allocation2 + $0x2a0] sm:$0xff]  ;;  %v6658_v10 = vld [vmem:[#allocation2 + $0x2a8] sm:$0xff]  ;;  %v6660_v17 = vld [vmem:[#allocation2 + $0x2b8] sm:$0xff] }
 0x8e2   : > { %6062 = vmatprep.mubr.f32.mxu0 %v5934_v11  ;;  %v9268_v11 = vpack.c.bf16 %v6658_v10, %v6657_v4 }
 0x8e3   : > { %6063 = vmatmul.mubr.f32.gmra.mrb[102].mxu0 %v5933_v47  ;;  %v6641_v47 = vld [vmem:[#allocation2 + $0x220] sm:$0xff] }
 0x8e4   : > { %9269 = vmatprep.subr.bf16.mxu0 %v9268_v11  ;;  %v6644_v11 = vld [vmem:[#allocation2 + $0x238] sm:$0xff] }
 0x8f9   : > { %v5760_v22 = vpop.f32.mrb[40].mxu1 }
 0x8fa   : > { %v5839_v32 = vmul.f32 0.70710677, %v5760_v22  ;;  %v5762_v13 = vpop.f32.mrb[41].mxu1  ;;  %v5807_v16 = vmul.f32 0.5, %v5760_v22  ;;  %v6642_v22 = vld [vmem:[#allocation2 + $0x228] sm:$0xff] }
 0x8fb   : > { %v5840_v52 = vmul.f32 0.70710677, %v5762_v13  ;;  %v5808_v48 = vmul.f32 0.5, %v5762_v13  ;;  %v9270_v13 = vpack.c.bf16 %v6642_v22, %v6641_v47 }
 0x8fc   : > { %9907 = verf.f32 %v5839_v32 }
 0x8fd   : > { %9909 = verf.f32 %v5840_v52  ;;  %v5766_v61 = vpop.f32.mrb[42].mxu1  ;;  %9271 = vmatpush3.bf16.msra.mxu0 %v9270_v13 }
 0x8fe   : > { %v5841_v51 = vmul.f32 0.70710677, %v5766_v61  ;;  %v5768_v30 = vpop.f32.mrb[43].mxu1  ;;  %v5809_v3 = vmul.f32 0.5, %v5766_v61 }
 0x8ff   : > { %v5842_v25 = vmul.f32 0.70710677, %v5768_v30  ;;  %v5810_v5 = vmul.f32 0.5, %v5768_v30 }
 0x900   : > { %9911 = verf.f32 %v5841_v51  ;;  %v10116_v51 = vld [vmem:[%s15395_s12] sm:$0xff] }
 0x901   : > { %9913 = verf.f32 %v5842_v25  ;;  %v14711_v30 = vrot.slane %v10116_v51, %v15573_v27 }
 0x906   : > { %v9908_v62 = vpop.eup %9907 }
 0x907   : > { %v9910_v33 = vpop.eup %9909  ;;  %v5903_v12 = vadd.f32 1.0, %v9908_v62 }
 0x908   : > { %v5904_v1 = vadd.f32 1.0, %v9910_v33 }
 0x909   : > { %v5935_v58 = vmul.f32 %v5903_v12, %v5807_v16 }
 0x90a   : > { %v9912_v34 = vpop.eup %9911  ;;  %v5936_v42 = vmul.f32 %v5904_v1, %v5808_v48 }
 0x90b   : > { %v9914_v53 = vpop.eup %9913  ;;  %v5905_v39 = vadd.f32 1.0, %v9912_v34 }
 0x90c   : > { %v5906_v2 = vadd.f32 1.0, %v9914_v53  ;;  %6067 = vmatprep.mubr.f32.mxu0 %v5936_v42 }
 0x90d   : > { %6068 = vmatmul.mubr.f32.gmra.mrb[104].mxu0 %v5935_v58  ;;  %v5937_v55 = vmul.f32 %v5905_v39, %v5809_v3 }
 0x90e   : > { %v5938_v24 = vmul.f32 %v5906_v2, %v5810_v5 }
 0x910   : > { %6072 = vmatprep.mubr.f32.mxu0 %v5938_v24 }
 0x911   : > { %6073 = vmatmul.mubr.f32.gmra.mrb[106].mxu0 %v5937_v55 }
 0x923   : > { %v5772_v45 = vpop.f32.mrb[44].mxu1 }
 0x924   : > { %v5843_v15 = vmul.f32 0.70710677, %v5772_v45  ;;  %v5774_v44 = vpop.f32.mrb[45].mxu1  ;;  %v5811_v55 = vmul.f32 0.5, %v5772_v45  ;;  %v9272_v45 = vpack.c.bf16 %v6660_v17, %v6659_v38 }
 0x925   : > { %v5844_v6 = vmul.f32 0.70710677, %v5774_v44  ;;  %v5812_v3 = vmul.f32 0.5, %v5774_v44 }
 0x926   : > { %9915 = verf.f32 %v5843_v15  ;;  %9273 = vmatprep.subr.bf16.mxu0 %v9272_v45 }
 0x927   : > { %9917 = verf.f32 %v5844_v6  ;;  %v5778_v32 = vpop.f32.mrb[46].mxu1  ;;  %v6643_v6 = vld [vmem:[#allocation2 + $0x230] sm:$0xff] }
 0x928   : > { %v5845_v52 = vmul.f32 0.70710677, %v5778_v32  ;;  %v5780_v61 = vpop.f32.mrb[47].mxu1  ;;  %v5813_v4 = vmul.f32 0.5, %v5778_v32  ;;  %v9274_v13 = vpack.c.bf16 %v6644_v11, %v6643_v6 }
 0x929   : > { %v5846_v25 = vmul.f32 0.70710677, %v5780_v61  ;;  %v5814_v15 = vmul.f32 0.5, %v5780_v61 }
 0x92a   : > { %9919 = verf.f32 %v5845_v52  ;;  %9275 = vmatpush3.bf16.msra.mxu0 %v9274_v13 }
 0x92b   : > { %9921 = verf.f32 %v5846_v25  ;;  %v8892_v62 = vpop.f32.mrb[48].mxu1 }
 0x92c   : > { %v6450_v33 = vadd.f32 %v8892_v62, %v14711_v30  ;;  %v6444_v12 = vpop.f32.mrb[49].mxu1 }
 0x92d   : > { %v6445_v48 = vadd.f32 %v6444_v12, %v14711_v30 }
 0x92e   : > { %v6540_v1 = vmul.f32 0.70710677, %v6450_v33 }
 0x92f   : > { %v6539_v16 = vmul.f32 0.70710677, %v6445_v48  ;;  %v8895_v34 = vpop.f32.mrb[50].mxu1  ;;  %v6523_v12 = vmul.f32 0.5, %v6445_v48 }
 0x930   : > { %v9916_v42 = vpop.eup %9915  ;;  %9923 = verf.f32 %v6540_v1  ;;  %v14716_v53 = vadd.f32 %v8895_v34, %v14711_v30  ;;  %v6454_v58 = vpop.f32.mrb[51].mxu1 }
 0x931   : > { %v9918_v39 = vpop.eup %9917  ;;  %v5907_v5 = vadd.f32 1.0, %v9916_v42  ;;  %9925 = verf.f32 %v6539_v16  ;;  %v6455_v2 = vadd.f32 %v6454_v58, %v14711_v30 }
 0x932   : > { %v5908_v24 = vadd.f32 1.0, %v9918_v39  ;;  %v6542_v18 = vmul.f32 0.70710677, %v14716_v53 }
 0x933   : > { %v6541_v21 = vmul.f32 0.70710677, %v6455_v2  ;;  %v8898_v0 = vpop.f32.mrb[52].mxu1  ;;  %v5939_v50 = vmul.f32 %v5907_v5, %v5811_v55 }
 0x934   : > { %v9920_v36 = vpop.eup %9919  ;;  %v5940_v56 = vmul.f32 %v5908_v24, %v5812_v3  ;;  %v6464_v9 = vpop.f32.mrb[53].mxu1  ;;  %v6470_v51 = vadd.f32 %v8898_v0, %v14711_v30  ;;  %v6524_v24 = vmul.f32 0.5, %v6450_v33 }
 0x935   : > { %v9922_v43 = vpop.eup %9921  ;;  %v5909_v37 = vadd.f32 1.0, %v9920_v36  ;;  %9927 = verf.f32 %v6541_v21  ;;  %v14721_v35 = vadd.f32 %v6464_v9, %v14711_v30  ;;  %v6525_v9 = vmul.f32 0.5, %v6455_v2 }
 0x936   : > { %v5910_v44 = vadd.f32 1.0, %v9922_v43  ;;  %6077 = vmatprep.mubr.f32.mxu0 %v5940_v56  ;;  %9929 = verf.f32 %v6542_v18  ;;  %v6544_v34 = vmul.f32 0.70710677, %v6470_v51 }
 0x937   : > { %6078 = vmatmul.mubr.f32.gmra.mrb[108].mxu0 %v5939_v50  ;;  %v8901_v10 = vpop.f32.mrb[54].mxu1  ;;  %v5941_v52 = vmul.f32 %v5909_v37, %v5813_v4  ;;  %v6543_v25 = vmul.f32 0.70710677, %v14721_v35 }
 0x938   : > { %v5942_v47 = vmul.f32 %v5910_v44, %v5814_v15  ;;  %v6474_v22 = vpop.f32.mrb[55].mxu1  ;;  %v6480_v21 = vadd.f32 %v8901_v10, %v14711_v30  ;;  %v6526_v44 = vmul.f32 0.5, %v14716_v53 }
 0x939   : > { %9931 = verf.f32 %v6543_v25  ;;  %v6475_v42 = vadd.f32 %v6474_v22, %v14711_v30 }
 0x93a   : > { %v9924_v62 = vpop.eup %9923  ;;  %6082 = vmatprep.mubr.f32.mxu0 %v5942_v47  ;;  %9933 = verf.f32 %v6544_v34  ;;  %v6546_v50 = vmul.f32 0.70710677, %v6480_v21  ;;  %v6527_v47 = vmul.f32 0.5, %v14721_v35 }
 0x93b   : > { %v9926_v61 = vpop.eup %9925  ;;  %6083 = vmatmul.mubr.f32.gmra.mrb[110].mxu0 %v5941_v52  ;;  %v8904_v32 = vpop.f32.mrb[56].mxu1  ;;  %v6572_v58 = vadd.f32 1.0, %v9924_v62  ;;  %v6545_v0 = vmul.f32 0.70710677, %v6475_v42  ;;  %v6528_v62 = vmul.f32 0.5, %v6470_v51  ;;  %v6530_v51 = vmul.f32 0.5, %v6480_v21 }
 0x93c   : > { %v6571_v1 = vadd.f32 1.0, %v9926_v61  ;;  %v6484_v16 = vpop.f32.mrb[57].mxu1  ;;  %v6490_v2 = vadd.f32 %v8904_v32, %v14711_v30 }
 0x93d   : > { %v14731_v36 = vmul.f32 %v6572_v58, %v6524_v24  ;;  %9935 = verf.f32 %v6545_v0  ;;  %v6485_v33 = vadd.f32 %v6484_v16, %v14711_v30  ;;  %v6529_v16 = vmul.f32 0.5, %v6475_v42 }
 0x93e   : > { %v14726_v39 = vmul.f32 %v6571_v1, %v6523_v12  ;;  %9937 = verf.f32 %v6546_v50  ;;  %v6548_v22 = vmul.f32 0.70710677, %v6490_v2  ;;  %v6532_v50 = vmul.f32 0.5, %v6490_v2 }
 0x93f   : > { %v9928_v5 = vpop.eup %9927  ;;  %v8907_v3 = vpop.f32.mrb[58].mxu1  ;;  %v6547_v4 = vmul.f32 0.70710677, %v6485_v33  ;;  %v6531_v42 = vmul.f32 0.5, %v6485_v33 }
 0x940   : > { %6734 = vmatmul.mubr.f32.vlgmr.msra.gmra.mrb[64].mxu1 %v14726_v39  ;;  %v6494_v55 = vpop.f32.mrb[59].mxu1  ;;  %v6573_v48 = vadd.f32 1.0, %v9928_v5  ;;  %v9930_v56 = vpop.eup %9929  ;;  %v6500_v61 = vadd.f32 %v8907_v3, %v14711_v30 }
 0x941   : > { %6739 = vmatprep.mubr.f32.mxu1 %v10201_v8  ;;  %v6574_v37 = vadd.f32 1.0, %v9930_v56  ;;  %9939 = verf.f32 %v6547_v4  ;;  %v6495_v53 = vadd.f32 %v6494_v55, %v14711_v30 }
 0x942   : > { %v14736_v38 = vmul.f32 %v6573_v48, %v6525_v9  ;;  %9941 = verf.f32 %v6548_v22  ;;  %v6550_v34 = vmul.f32 0.70710677, %v6500_v61 }
 0x943   : > { %v8910_v18 = vpop.f32.mrb[60].mxu1  ;;  %v9932_v17 = vpop.eup %9931  ;;  %v14742_v6 = vmul.f32 %v6574_v37, %v6526_v44  ;;  %v6549_v32 = vmul.f32 0.70710677, %v6495_v53  ;;  %v6533_v4 = vmul.f32 0.5, %v6495_v53 }
 0x944   : > { %6740 = vmatmul.mubr.f32.gmra.mrb[66].mxu1 %v14731_v36  ;;  %v6504_v43 = vpop.f32.mrb[61].mxu1  ;;  %v6575_v10 = vadd.f32 1.0, %v9932_v17  ;;  %v9934_v11 = vpop.eup %9933  ;;  %v6510_v55 = vadd.f32 %v8910_v18, %v14711_v30 }
 0x945   : > { %6745 = vmatprep.mubr.f32.mxu1 %v10201_v8  ;;  %v6576_v13 = vadd.f32 1.0, %v9934_v11  ;;  %9943 = verf.f32 %v6549_v32  ;;  %v6505_v58 = vadd.f32 %v6504_v43, %v14711_v30 }
 0x946   : > { %v14748_v52 = vmul.f32 %v6575_v10, %v6527_v47  ;;  %9945 = verf.f32 %v6550_v34  ;;  %v6552_v21 = vmul.f32 0.70710677, %v6510_v55  ;;  %v6662_v47 = vld [vmem:[#allocation2 + $0x2c8] sm:$0xff] }
 0x947   : > { %v8913_v15 = vpop.f32.mrb[62].mxu1  ;;  %v9936_v25 = vpop.eup %9935  ;;  %v14753_v12 = vmul.f32 %v6576_v13, %v6528_v62  ;;  %v6551_v0 = vmul.f32 0.70710677, %v6505_v58  ;;  %v6645_v13 = vld [vmem:[#allocation2 + $0x240] sm:$0xff] }
 0x948   : > { %6746 = vmatmul.mubr.f32.gmra.mrb[68].mxu1 %v14736_v38  ;;  %v6514_v45 = vpop.f32.mrb[63].mxu1  ;;  %v6577_v35 = vadd.f32 1.0, %v9936_v25  ;;  %v9938_v1 = vpop.eup %9937  ;;  %v6520_v33 = vadd.f32 %v8913_v15, %v14711_v30  ;;  %v6646_v25 = vld [vmem:[#allocation2 + $0x248] sm:$0xff]  ;;  %v6534_v15 = vmul.f32 0.5, %v6500_v61  ;;  %v6536_v61 = vmul.f32 0.5, %v6510_v55 }
 0x949   : > { %6751 = vmatprep.mubr.f32.mxu1 %v10201_v8  ;;  %v6578_v5 = vadd.f32 1.0, %v9938_v1  ;;  %9947 = verf.f32 %v6551_v0  ;;  %v6515_v43 = vadd.f32 %v6514_v45, %v14711_v30  ;;  %v6661_v45 = vld [vmem:[#allocation2 + $0x2c0] sm:$0xff]  ;;  %v9278_v30 = vpack.c.bf16 %v6646_v25, %v6645_v13 }
 0x94a   : > { %v14758_v24 = vmul.f32 %v6577_v35, %v6529_v16  ;;  %9949 = verf.f32 %v6552_v21  ;;  %v9276_v2 = vpack.c.bf16 %v6662_v47, %v6661_v45  ;;  %v6554_v62 = vmul.f32 0.70710677, %v6520_v33 }
 0x94b   : > { %v9940_v3 = vpop.eup %9939  ;;  %v14763_v56 = vmul.f32 %v6578_v5, %v6530_v51  ;;  %v6553_v44 = vmul.f32 0.70710677, %v6515_v43  ;;  %v6535_v1 = vmul.f32 0.5, %v6505_v58  ;;  %v6538_v21 = vmul.f32 0.5, %v6520_v33 }
 0x94c   : > { %6752 = vmatmul.mubr.f32.gmra.mrb[70].mxu1 %v14742_v6  ;;  %v6579_v48 = vadd.f32 1.0, %v9940_v3  ;;  %v9942_v9 = vpop.eup %9941  ;;  %9277 = vmatprep.subr.bf16.mxu0 %v9276_v2 }
 0x94d   : > { %6757 = vmatprep.mubr.f32.mxu1 %v10201_v8  ;;  %v6580_v37 = vadd.f32 1.0, %v9942_v9  ;;  %9951 = verf.f32 %v6553_v44  ;;  %9279 = vmatpush3.bf16.msra.mxu0 %v9278_v30 }
 0x94e   : > { %v14768_v17 = vmul.f32 %v6579_v48, %v6531_v42  ;;  %9953 = verf.f32 %v6554_v62  ;;  %v6537_v42 = vmul.f32 0.5, %v6515_v43  ;;  %v6664_v62 = vld [vmem:[#allocation2 + $0x2d8] sm:$0xff] }
 0x94f   : > { %v9944_v18 = vpop.eup %9943  ;;  %v14773_v11 = vmul.f32 %v6580_v37, %v6532_v50 }
 0x950   : > { %6758 = vmatmul.mubr.f32.gmra.mrb[72].mxu1 %v14748_v52  ;;  %v6581_v10 = vadd.f32 1.0, %v9944_v18  ;;  %v9946_v22 = vpop.eup %9945 }
 0x951   : > { %6763 = vmatprep.mubr.f32.mxu1 %v10201_v8  ;;  %v6582_v32 = vadd.f32 1.0, %v9946_v22 }
 0x952   : > { %v14777_v53 = vmul.f32 %v6581_v10, %v6533_v4 }
 0x953   : > { %v9948_v35 = vpop.eup %9947  ;;  %v14781_v34 = vmul.f32 %v6582_v32, %v6534_v15  ;;  %v6647_v32 = vld [vmem:[#allocation2 + $0x250] sm:$0xff] }
 0x954   : > { %6764 = vmatmul.mubr.f32.gmra.mrb[74].mxu1 %v14753_v12  ;;  %v6583_v16 = vadd.f32 1.0, %v9948_v35  ;;  %v9950_v51 = vpop.eup %9949  ;;  %v6648_v35 = vld [vmem:[#allocation2 + $0x258] sm:$0xff] }
 0x955   : > { %6769 = vmatprep.mubr.f32.mxu1 %v10201_v8  ;;  %v6584_v5 = vadd.f32 1.0, %v9950_v51 }
 0x956   : > { %v14785_v3 = vmul.f32 %v6583_v16, %v6535_v1  ;;  %v9282_v16 = vpack.c.bf16 %v6648_v35, %v6647_v32  ;;  %v6667_v35 = vld [vmem:[#allocation2 + $0x2f0] sm:$0xff] }
 0x957   : > { %v9952_v0 = vpop.eup %9951  ;;  %v14789_v58 = vmul.f32 %v6584_v5, %v6536_v61 }
 0x958   : > { %6770 = vmatmul.mubr.f32.gmra.mrb[76].mxu1 %v14758_v24  ;;  %v6585_v48 = vadd.f32 1.0, %v9952_v0  ;;  %v9954_v9 = vpop.eup %9953 }
 0x959   : > { %6775 = vmatprep.mubr.f32.mxu1 %v10201_v8  ;;  %v6586_v50 = vadd.f32 1.0, %v9954_v9 }
 0x95a   : > { %v14793_v55 = vmul.f32 %v6585_v48, %v6537_v42 }
 0x95b   : > { %v14797_v37 = vmul.f32 %v6586_v50, %v6538_v21 }
 0x95c   : > { %6776 = vmatmul.mubr.f32.gmra.mrb[78].mxu1 %v14763_v56 }
 0x95d   : > { %6781 = vmatprep.mubr.f32.mxu1 %v10201_v8 }
 0x960   : > { %6782 = vmatmul.mubr.f32.gmra.mrb[80].mxu1 %v14768_v17 }
 0x961   : > { %6787 = vmatprep.mubr.f32.mxu1 %v10201_v8 }
 0x964   : > { %6788 = vmatmul.mubr.f32.gmra.mrb[82].mxu1 %v14773_v11 }
 0x965   : > { %6793 = vmatprep.mubr.f32.mxu1 %v10201_v8 }
 0x968   : > { %6794 = vmatmul.mubr.f32.gmra.mrb[84].mxu1 %v14777_v53 }
 0x969   : > { %6799 = vmatprep.mubr.f32.mxu1 %v10201_v8 }
 0x96c   : > { %6800 = vmatmul.mubr.f32.gmra.mrb[86].mxu1 %v14781_v34 }
 0x96d   : > { %6805 = vmatprep.mubr.f32.mxu1 %v10201_v8 }
 0x970   : > { %6806 = vmatmul.mubr.f32.gmra.mrb[88].mxu1 %v14785_v3 }
 0x971   : > { %6811 = vmatprep.mubr.f32.mxu1 %v10201_v8 }
 0x974   : > { %6812 = vmatmul.mubr.f32.gmra.mrb[90].mxu1 %v14789_v58 }
 0x975   : > { %6817 = vmatprep.mubr.f32.mxu1 %v10201_v8 }
 0x978   : > { %6818 = vmatmul.mubr.f32.gmra.mrb[92].mxu1 %v14793_v55 }
 0x979   : > { %6823 = vmatprep.mubr.f32.mxu1 %v10201_v8  ;;  %v6663_v8 = vld [vmem:[#allocation2 + $0x2d0] sm:$0xff] }
 0x97a   : > { %v8537_v18 = vpop.f32.mrb[80].mxu0  ;;  %v9280_v30 = vpack.c.bf16 %v6664_v62, %v6663_v8 }
 0x97b   : > { %v8538_v43 = vpop.f32.mrb[81].mxu0 }
 0x97c   : > { %6824 = vmatmul.mubr.f32.gmra.mrb[94].mxu1 %v14797_v37  ;;  %v14800_v44 = vadd.f32 %v8538_v43, %v8537_v18  ;;  %9281 = vmatprep.subr.bf16.mxu0 %v9280_v30  ;;  %v6649_v30 = vld [vmem:[#allocation2 + $0x260] sm:$0xff] }
 0x97d   : > { %9283 = vmatpush3.bf16.msra.mxu0 %v9282_v16 }
 0x97e   : > { %v8540_v4 = vpop.f32.mrb[82].mxu0 }
 0x97f   : > { %v8541_v10 = vpop.f32.mrb[83].mxu0 }
 0x980   : > { %v14802_v45 = vadd.f32 %v8541_v10, %v8540_v4 }
 0x982   : > { %v8543_v33 = vpop.f32.mrb[84].mxu0 }
 0x983   : > { %v8544_v47 = vpop.f32.mrb[85].mxu0 }
 0x984   : > { %v14804_v22 = vadd.f32 %v8544_v47, %v8543_v33  ;;  %v6665_v47 = vld [vmem:[#allocation2 + $0x2e0] sm:$0xff] }
 0x986   : > { %v8546_v2 = vpop.f32.mrb[86].mxu0 }
 0x987   : > { %v8547_v13 = vpop.f32.mrb[87].mxu0 }
 0x988   : > { %v14806_v25 = vadd.f32 %v8547_v13, %v8546_v2  ;;  %v6666_v2 = vld [vmem:[#allocation2 + $0x2e8] sm:$0xff] }
 0x989   : > { %v9284_v8 = vpack.c.bf16 %v6666_v2, %v6665_v47 }
 0x98a   : > { %v8549_v15 = vpop.f32.mrb[88].mxu0 }
 0x98b   : > { %v8550_v1 = vpop.f32.mrb[89].mxu0  ;;  %9285 = vmatprep.subr.bf16.mxu0 %v9284_v8 }
 0x98c   : > { %v14808_v51 = vadd.f32 %v8550_v1, %v8549_v15  ;;  %v6650_v15 = vld [vmem:[#allocation2 + $0x268] sm:$0xff]  ;;  %v6668_v1 = vld [vmem:[#allocation2 + $0x2f8] sm:$0xff] }
 0x98d   : > { %v9286_v32 = vpack.c.bf16 %v6650_v15, %v6649_v30  ;;  %v9288_v16 = vpack.c.bf16 %v6668_v1, %v6667_v35 }
 0x98e   : > { %v8552_v61 = vpop.f32.mrb[90].mxu0 }
 0x98f   : > { %v8553_v5 = vpop.f32.mrb[91].mxu0  ;;  %9287 = vmatpush3.bf16.msra.mxu0 %v9286_v32 }
 0x990   : > { %v14810_v0 = vadd.f32 %v8553_v5, %v8552_v61  ;;  %9289 = vmatprep.subr.bf16.mxu0 %v9288_v16  ;;  %v6651_v61 = vld [vmem:[#allocation2 + $0x270] sm:$0xff]  ;;  %v6652_v5 = vld [vmem:[#allocation2 + $0x278] sm:$0xff] }
 0x992   : > { %v8555_v42 = vpop.f32.mrb[92].mxu0 }
 0x993   : > { %v8556_v48 = vpop.f32.mrb[93].mxu0 }
 0x994   : > { %v14812_v9 = vadd.f32 %v8556_v48, %v8555_v42  ;;  %v9290_v42 = vpack.c.bf16 %v6652_v5, %v6651_v61 }
 0x996   : > { %v8558_v21 = vpop.f32.mrb[94].mxu0  ;;  %9291 = vmatpush3.bf16.msra.mxu0 %v9290_v42 }
 0x997   : > { %v8559_v50 = vpop.f32.mrb[95].mxu0 }
 0x998   : > { %v14814_v18 = vadd.f32 %v8559_v50, %v8558_v21 }
 0x99a   : > { %v8561_v43 = vpop.f32.mrb[96].mxu0 }
 0x99b   : > { %v8562_v4 = vpop.f32.mrb[97].mxu0 }
 0x99c   : > { %v14816_v10 = vadd.f32 %v8562_v4, %v8561_v43 }
 0x99e   : > { %v8564_v33 = vpop.f32.mrb[98].mxu0 }
 0x99f   : > { %v8565_v13 = vpop.f32.mrb[99].mxu0 }
 0x9a0   : > { %v14818_v62 = vadd.f32 %v8565_v13, %v8564_v33 }
 0x9a2   : > { %15924 = vst [vmem:[#allocation60_spill] sm:$0xff] %v14818_v62 }
 0x9b2   : > { %v8567_v48 = vpop.f32.mrb[100].mxu0 }
 0x9b3   : > { %v8568_v21 = vpop.f32.mrb[101].mxu0 }
 0x9b4   : > { %v14820_v50 = vadd.f32 %v8568_v21, %v8567_v48 }
 0x9b6   : > { %15925 = vst [vmem:[#allocation59_spill] sm:$0xff] %v14820_v50  ;;  %v8570_v43 = vpop.f32.mrb[102].mxu0 }
 0x9b7   : > { %v8571_v4 = vpop.f32.mrb[103].mxu0 }
 0x9b8   : > { %v14822_v33 = vadd.f32 %v8571_v4, %v8570_v43 }
 0x9ba   : > { %15926 = vst [vmem:[#allocation10_spill] sm:$0xff] %v14822_v33 }
 0x9e0   : > { %v8573_v47 = vpop.f32.mrb[104].mxu0 }
 0x9e1   : > { %v8574_v2 = vpop.f32.mrb[105].mxu0 }
 0x9e2   : > { %v14824_v13 = vadd.f32 %v8574_v2, %v8573_v47 }
 0x9e4   : > { %15927 = vst [vmem:[#allocation42_spill] sm:$0xff] %v14824_v13  ;;  %v8576_v8 = vpop.f32.mrb[106].mxu0 }
 0x9e5   : > { %v8577_v30 = vpop.f32.mrb[107].mxu0 }
 0x9e6   : > { %v14826_v15 = vadd.f32 %v8577_v30, %v8576_v8 }
 0x9e8   : > { %15928 = vst [vmem:[#allocation40_spill] sm:$0xff] %v14826_v15 }
 0xa0a   : > { %v8579_v32 = vpop.f32.mrb[108].mxu0 }
 0xa0b   : > { %v8580_v35 = vpop.f32.mrb[109].mxu0 }
 0xa0c   : > { %v14828_v1 = vadd.f32 %v8580_v35, %v8579_v32 }
 0xa0e   : > { %15929 = vst [vmem:[#allocation56_spill] sm:$0xff] %v14828_v1  ;;  %v8582_v16 = vpop.f32.mrb[110].mxu0 }
 0xa0f   : > { %v8583_v61 = vpop.f32.mrb[111].mxu0 }
 0xa10   : > { %v14830_v5 = vadd.f32 %v8583_v61, %v8582_v16 }
 0xa12   : > { %15930 = vst [vmem:[#allocation46_spill] sm:$0xff] %v14830_v5 }
 0xa13   : > { %v6735_v42 = vpop.f32.mrb[64].mxu1 }
 0xa14   : > { %v6862_v48 = vmul.f32 0.70710677, %v6735_v42  ;;  %v6737_v21 = vpop.f32.mrb[65].mxu1  ;;  %v6830_v26 = vmul.f32 0.5, %v6735_v42 }
 0xa15   : > { %v6863_v43 = vmul.f32 0.70710677, %v6737_v21 }
 0xa16   : > { %9955 = verf.f32 %v6862_v48 }
 0xa17   : > { %9957 = verf.f32 %v6863_v43  ;;  %v6741_v4 = vpop.f32.mrb[66].mxu1  ;;  %v6831_v43 = vmul.f32 0.5, %v6737_v21 }
 0xa18   : > { %v6864_v47 = vmul.f32 0.70710677, %v6741_v4  ;;  %v6743_v2 = vpop.f32.mrb[67].mxu1 }
 0xa19   : > { %v6865_v27 = vmul.f32 0.70710677, %v6743_v2  ;;  %v6833_v59 = vmul.f32 0.5, %v6743_v2 }
 0xa1a   : > { %9959 = verf.f32 %v6864_v47 }
 0xa1b   : > { %9961 = verf.f32 %v6865_v27  ;;  %v6747_v8 = vpop.f32.mrb[68].mxu1 }
 0xa1c   : > { %v6866_v30 = vmul.f32 0.70710677, %v6747_v8  ;;  %v6749_v32 = vpop.f32.mrb[69].mxu1 }
 0xa1d   : > { %v6867_v35 = vmul.f32 0.70710677, %v6749_v32  ;;  %v6835_v63 = vmul.f32 0.5, %v6749_v32 }
 0xa1e   : > { %9963 = verf.f32 %v6866_v30 }
 0xa1f   : > { %9965 = verf.f32 %v6867_v35  ;;  %v6753_v16 = vpop.f32.mrb[70].mxu1 }
 0xa20   : > { %v9956_v61 = vpop.eup %9955  ;;  %v6868_v40 = vmul.f32 0.70710677, %v6753_v16  ;;  %v6755_v60 = vpop.f32.mrb[71].mxu1  ;;  %v6836_v32 = vmul.f32 0.5, %v6753_v16 }
 0xa21   : > { %v9958_v5 = vpop.eup %9957  ;;  %v6926_v54 = vadd.f32 1.0, %v9956_v61  ;;  %v6869_v48 = vmul.f32 0.70710677, %v6755_v60  ;;  %v6832_v61 = vmul.f32 0.5, %v6741_v4 }
 0xa22   : > { %v6927_v1 = vadd.f32 1.0, %v9958_v5  ;;  %9967 = verf.f32 %v6868_v40 }
 0xa23   : > { %9969 = verf.f32 %v6869_v48  ;;  %v6759_v47 = vpop.f32.mrb[72].mxu1  ;;  %v6958_v30 = vmul.f32 %v6926_v54, %v6830_v26  ;;  %v6834_v54 = vmul.f32 0.5, %v6747_v8 }
 0xa24   : > { %v9960_v27 = vpop.eup %9959  ;;  %v6959_v15 = vmul.f32 %v6927_v1, %v6831_v43  ;;  %v6870_v19 = vmul.f32 0.70710677, %v6759_v47  ;;  %v6761_v13 = vpop.f32.mrb[73].mxu1 }
 0xa25   : > { %v9962_v20 = vpop.eup %9961  ;;  %v6928_v35 = vadd.f32 1.0, %v9960_v27  ;;  %v6871_v33 = vmul.f32 0.70710677, %v6761_v13 }
 0xa26   : > { %v6929_v50 = vadd.f32 1.0, %v9962_v20  ;;  %9971 = verf.f32 %v6870_v19  ;;  %7054 = vmatprep.mubr.f32.mxu0 %v6959_v15 }
 0xa27   : > { %9973 = verf.f32 %v6871_v33  ;;  %v6765_v21 = vpop.f32.mrb[74].mxu1  ;;  %7055 = vmatmul.mubr.f32.vlgmr.msra.gmra.mrb[112].mxu0 %v6958_v30  ;;  %v6960_v1 = vmul.f32 %v6928_v35, %v6832_v61  ;;  %v6837_v30 = vmul.f32 0.5, %v6755_v60  ;;  %v6838_v60 = vmul.f32 0.5, %v6759_v47 }
 0xa28   : > { %v9964_v40 = vpop.eup %9963  ;;  %v6961_v5 = vmul.f32 %v6929_v50, %v6833_v59  ;;  %v6872_v42 = vmul.f32 0.70710677, %v6765_v21  ;;  %v6767_v48 = vpop.f32.mrb[75].mxu1 }
 0xa29   : > { %v9966_v31 = vpop.eup %9965  ;;  %v6930_v43 = vadd.f32 1.0, %v9964_v40  ;;  %v6873_v62 = vmul.f32 0.70710677, %v6767_v48 }
 0xa2a   : > { %v6931_v26 = vadd.f32 1.0, %v9966_v31  ;;  %9975 = verf.f32 %v6872_v42  ;;  %7059 = vmatprep.mubr.f32.mxu0 %v6961_v5 }
 0xa2b   : > { %9977 = verf.f32 %v6873_v62  ;;  %v6771_v20 = vpop.f32.mrb[76].mxu1  ;;  %7060 = vmatmul.mubr.f32.gmra.mrb[114].mxu0 %v6960_v1  ;;  %v6962_v59 = vmul.f32 %v6930_v43, %v6834_v54 }
 0xa2c   : > { %v9968_v19 = vpop.eup %9967  ;;  %v6963_v33 = vmul.f32 %v6931_v26, %v6835_v63  ;;  %v6874_v15 = vmul.f32 0.70710677, %v6771_v20  ;;  %v6773_v4 = vpop.f32.mrb[77].mxu1  ;;  %v6839_v26 = vmul.f32 0.5, %v6761_v13  ;;  %v6840_v13 = vmul.f32 0.5, %v6765_v21 }
 0xa2d   : > { %v9970_v2 = vpop.eup %9969  ;;  %v6932_v50 = vadd.f32 1.0, %v9968_v19  ;;  %v6875_v27 = vmul.f32 0.70710677, %v6773_v4 }
 0xa2e   : > { %v6933_v35 = vadd.f32 1.0, %v9970_v2  ;;  %9979 = verf.f32 %v6874_v15  ;;  %7064 = vmatprep.mubr.f32.mxu0 %v6963_v33 }
 0xa2f   : > { %9981 = verf.f32 %v6875_v27  ;;  %v6777_v31 = vpop.f32.mrb[78].mxu1  ;;  %7065 = vmatmul.mubr.f32.gmra.mrb[116].mxu0 %v6962_v59  ;;  %v6964_v63 = vmul.f32 %v6932_v50, %v6836_v32 }
 0xa30   : > { %v9972_v8 = vpop.eup %9971  ;;  %v6965_v62 = vmul.f32 %v6933_v35, %v6837_v30  ;;  %v6876_v61 = vmul.f32 0.70710677, %v6777_v31  ;;  %v6779_v40 = vpop.f32.mrb[79].mxu1  ;;  %v6841_v35 = vmul.f32 0.5, %v6767_v48  ;;  %v6842_v48 = vmul.f32 0.5, %v6771_v20 }
 0xa31   : > { %v9974_v5 = vpop.eup %9973  ;;  %v6934_v42 = vadd.f32 1.0, %v9972_v8  ;;  %v6877_v1 = vmul.f32 0.70710677, %v6779_v40 }
 0xa32   : > { %v6935_v43 = vadd.f32 1.0, %v9974_v5  ;;  %9983 = verf.f32 %v6876_v61  ;;  %7069 = vmatprep.mubr.f32.mxu0 %v6965_v62 }
 0xa33   : > { %9985 = verf.f32 %v6877_v1  ;;  %v6783_v54 = vpop.f32.mrb[80].mxu1  ;;  %7070 = vmatmul.mubr.f32.gmra.mrb[118].mxu0 %v6964_v63  ;;  %v6966_v59 = vmul.f32 %v6934_v42, %v6838_v60 }
 0xa34   : > { %v9976_v16 = vpop.eup %9975  ;;  %v6967_v19 = vmul.f32 %v6935_v43, %v6839_v26  ;;  %v6878_v33 = vmul.f32 0.70710677, %v6783_v54  ;;  %v6785_v15 = vpop.f32.mrb[81].mxu1  ;;  %v6843_v43 = vmul.f32 0.5, %v6773_v4  ;;  %v6844_v4 = vmul.f32 0.5, %v6777_v31 }
 0xa35   : > { %v9978_v2 = vpop.eup %9977  ;;  %v6936_v27 = vadd.f32 1.0, %v9976_v16  ;;  %v6879_v30 = vmul.f32 0.70710677, %v6785_v15 }
 0xa36   : > { %v6937_v50 = vadd.f32 1.0, %v9978_v2  ;;  %9987 = verf.f32 %v6878_v33  ;;  %7074 = vmatprep.mubr.f32.mxu0 %v6967_v19 }
 0xa37   : > { %9989 = verf.f32 %v6879_v30  ;;  %v6789_v32 = vpop.f32.mrb[82].mxu1  ;;  %7075 = vmatmul.mubr.f32.gmra.mrb[120].mxu0 %v6966_v59  ;;  %v6968_v63 = vmul.f32 %v6936_v27, %v6840_v13 }
 0xa38   : > { %v9980_v47 = vpop.eup %9979  ;;  %v6969_v8 = vmul.f32 %v6937_v50, %v6841_v35  ;;  %v6880_v62 = vmul.f32 0.70710677, %v6789_v32  ;;  %v6791_v61 = vpop.f32.mrb[83].mxu1  ;;  %v6845_v50 = vmul.f32 0.5, %v6779_v40  ;;  %v6846_v40 = vmul.f32 0.5, %v6783_v54 }
 0xa39   : > { %v9982_v5 = vpop.eup %9981  ;;  %v6938_v1 = vadd.f32 1.0, %v9980_v47  ;;  %v6881_v26 = vmul.f32 0.70710677, %v6791_v61 }
 0xa3a   : > { %v6939_v42 = vadd.f32 1.0, %v9982_v5  ;;  %9991 = verf.f32 %v6880_v62  ;;  %7079 = vmatprep.mubr.f32.mxu0 %v6969_v8 }
 0xa3b   : > { %9993 = verf.f32 %v6881_v26  ;;  %v6795_v60 = vpop.f32.mrb[84].mxu1  ;;  %7080 = vmatmul.mubr.f32.gmra.mrb[122].mxu0 %v6968_v63  ;;  %v6970_v59 = vmul.f32 %v6938_v1, %v6842_v48 }
 0xa3c   : > { %v9984_v21 = vpop.eup %9983  ;;  %v6971_v16 = vmul.f32 %v6939_v42, %v6843_v43  ;;  %v6882_v19 = vmul.f32 0.70710677, %v6795_v60  ;;  %v6797_v33 = vpop.f32.mrb[85].mxu1  ;;  %v6847_v42 = vmul.f32 0.5, %v6785_v15  ;;  %v6848_v15 = vmul.f32 0.5, %v6789_v32 }
 0xa3d   : > { %v9986_v2 = vpop.eup %9985  ;;  %v6940_v30 = vadd.f32 1.0, %v9984_v21  ;;  %v6883_v35 = vmul.f32 0.70710677, %v6797_v33 }
 0xa3e   : > { %v6941_v27 = vadd.f32 1.0, %v9986_v2  ;;  %9995 = verf.f32 %v6882_v19  ;;  %7084 = vmatprep.mubr.f32.mxu0 %v6971_v16 }
 0xa3f   : > { %9997 = verf.f32 %v6883_v35  ;;  %v6801_v13 = vpop.f32.mrb[86].mxu1  ;;  %7085 = vmatmul.mubr.f32.gmra.mrb[124].mxu0 %v6970_v59  ;;  %v6972_v63 = vmul.f32 %v6940_v30, %v6844_v4 }
 0xa40   : > { %v9988_v20 = vpop.eup %9987  ;;  %v6973_v47 = vmul.f32 %v6941_v27, %v6845_v50  ;;  %v6884_v8 = vmul.f32 0.70710677, %v6801_v13  ;;  %v6803_v62 = vpop.f32.mrb[87].mxu1  ;;  %v6849_v27 = vmul.f32 0.5, %v6791_v61  ;;  %v6850_v61 = vmul.f32 0.5, %v6795_v60 }
 0xa41   : > { %v9990_v5 = vpop.eup %9989  ;;  %v6942_v26 = vadd.f32 1.0, %v9988_v20  ;;  %v6885_v43 = vmul.f32 0.70710677, %v6803_v62 }
 0xa42   : > { %v6943_v1 = vadd.f32 1.0, %v9990_v5  ;;  %9999 = verf.f32 %v6884_v8  ;;  %7089 = vmatprep.mubr.f32.mxu0 %v6973_v47 }
 0xa43   : > { %10001 = verf.f32 %v6885_v43  ;;  %v6807_v48 = vpop.f32.mrb[88].mxu1  ;;  %7090 = vmatmul.mubr.f32.gmra.mrb[126].mxu0 %v6972_v63  ;;  %v6974_v59 = vmul.f32 %v6942_v26, %v6846_v40 }
 0xa44   : > { %v9992_v31 = vpop.eup %9991  ;;  %v6975_v21 = vmul.f32 %v6943_v1, %v6847_v42  ;;  %v6886_v16 = vmul.f32 0.70710677, %v6807_v48  ;;  %v6809_v19 = vpop.f32.mrb[89].mxu1  ;;  %v6851_v1 = vmul.f32 0.5, %v6797_v33  ;;  %v6852_v33 = vmul.f32 0.5, %v6801_v13 }
 0xa45   : > { %v9994_v2 = vpop.eup %9993  ;;  %v6944_v35 = vadd.f32 1.0, %v9992_v31  ;;  %v6887_v50 = vmul.f32 0.70710677, %v6809_v19 }
 0xa46   : > { %v6945_v30 = vadd.f32 1.0, %v9994_v2  ;;  %10003 = verf.f32 %v6886_v16  ;;  %7094 = vmatprep.mubr.f32.mxu0 %v6975_v21 }
 0xa47   : > { %10005 = verf.f32 %v6887_v50  ;;  %v6813_v4 = vpop.f32.mrb[90].mxu1  ;;  %7095 = vmatmul.mubr.f32.gmra.mrb[128].mxu0 %v6974_v59  ;;  %v6976_v63 = vmul.f32 %v6944_v35, %v6848_v15 }
 0xa48   : > { %v9996_v54 = vpop.eup %9995  ;;  %v6977_v20 = vmul.f32 %v6945_v30, %v6849_v27  ;;  %v6888_v47 = vmul.f32 0.70710677, %v6813_v4  ;;  %v6815_v8 = vpop.f32.mrb[91].mxu1  ;;  %v6853_v30 = vmul.f32 0.5, %v6803_v62  ;;  %v6854_v62 = vmul.f32 0.5, %v6807_v48 }
 0xa49   : > { %v9998_v5 = vpop.eup %9997  ;;  %v6946_v43 = vadd.f32 1.0, %v9996_v54  ;;  %v6889_v42 = vmul.f32 0.70710677, %v6815_v8 }
 0xa4a   : > { %v6947_v26 = vadd.f32 1.0, %v9998_v5  ;;  %10007 = verf.f32 %v6888_v47  ;;  %7099 = vmatprep.mubr.f32.mxu0 %v6977_v20 }
 0xa4b   : > { %10009 = verf.f32 %v6889_v42  ;;  %v6819_v40 = vpop.f32.mrb[92].mxu1  ;;  %7100 = vmatmul.mubr.f32.gmra.mrb[130].mxu0 %v6976_v63  ;;  %v6978_v59 = vmul.f32 %v6946_v43, %v6850_v61 }
 0xa4c   : > { %v10000_v32 = vpop.eup %9999  ;;  %v6979_v31 = vmul.f32 %v6947_v26, %v6851_v1  ;;  %v6890_v21 = vmul.f32 0.70710677, %v6819_v40  ;;  %v6821_v16 = vpop.f32.mrb[93].mxu1  ;;  %v6855_v26 = vmul.f32 0.5, %v6809_v19  ;;  %v6858_v48 = vmul.f32 0.5, %v6819_v40 }
 0xa4d   : > { %v10002_v2 = vpop.eup %10001  ;;  %v6948_v50 = vadd.f32 1.0, %v10000_v32  ;;  %v6891_v27 = vmul.f32 0.70710677, %v6821_v16 }
 0xa4e   : > { %v6949_v35 = vadd.f32 1.0, %v10002_v2  ;;  %10011 = verf.f32 %v6890_v21  ;;  %7104 = vmatprep.mubr.f32.mxu0 %v6979_v31  ;;  %v6857_v2 = vmul.f32 0.5, %v6815_v8 }
 0xa4f   : > { %10013 = verf.f32 %v6891_v27  ;;  %v6825_v15 = vpop.f32.mrb[94].mxu1  ;;  %7105 = vmatmul.mubr.f32.gmra.mrb[132].mxu0 %v6978_v59  ;;  %v6980_v63 = vmul.f32 %v6948_v50, %v6852_v33  ;;  %v6856_v27 = vmul.f32 0.5, %v6813_v4 }
 0xa50   : > { %v10004_v60 = vpop.eup %10003  ;;  %v6981_v54 = vmul.f32 %v6949_v35, %v6853_v30  ;;  %v6892_v20 = vmul.f32 0.70710677, %v6825_v15  ;;  %v6827_v47 = vpop.f32.mrb[95].mxu1  ;;  %v6860_v4 = vmul.f32 0.5, %v6825_v15 }
 0xa51   : > { %v10006_v5 = vpop.eup %10005  ;;  %v6950_v42 = vadd.f32 1.0, %v10004_v60  ;;  %v6893_v1 = vmul.f32 0.70710677, %v6827_v47  ;;  %v6859_v60 = vmul.f32 0.5, %v6821_v16  ;;  %v6861_v8 = vmul.f32 0.5, %v6827_v47 }
 0xa52   : > { %v6951_v43 = vadd.f32 1.0, %v10006_v5  ;;  %10015 = verf.f32 %v6892_v20  ;;  %7109 = vmatprep.mubr.f32.mxu0 %v6981_v54 }
 0xa53   : > { %10017 = verf.f32 %v6893_v1  ;;  %7110 = vmatmul.mubr.f32.gmra.mrb[134].mxu0 %v6980_v63  ;;  %v6982_v31 = vmul.f32 %v6950_v42, %v6854_v62 }
 0xa54   : > { %v10008_v61 = vpop.eup %10007  ;;  %v6983_v13 = vmul.f32 %v6951_v43, %v6855_v26 }
 0xa55   : > { %v10010_v32 = vpop.eup %10009  ;;  %v6952_v21 = vadd.f32 1.0, %v10008_v61 }
 0xa56   : > { %v6953_v59 = vadd.f32 1.0, %v10010_v32  ;;  %7114 = vmatprep.mubr.f32.mxu0 %v6983_v13 }
 0xa57   : > { %7115 = vmatmul.mubr.f32.gmra.mrb[136].mxu0 %v6982_v31  ;;  %v6984_v19 = vmul.f32 %v6952_v21, %v6856_v27 }
 0xa58   : > { %v10012_v50 = vpop.eup %10011  ;;  %v6985_v30 = vmul.f32 %v6953_v59, %v6857_v2 }
 0xa59   : > { %v10014_v35 = vpop.eup %10013  ;;  %v6954_v33 = vadd.f32 1.0, %v10012_v50 }
 0xa5a   : > { %v6955_v54 = vadd.f32 1.0, %v10014_v35  ;;  %7119 = vmatprep.mubr.f32.mxu0 %v6985_v30 }
 0xa5b   : > { %7120 = vmatmul.mubr.f32.gmra.mrb[138].mxu0 %v6984_v19  ;;  %v6986_v42 = vmul.f32 %v6954_v33, %v6858_v48 }
 0xa5c   : > { %v10016_v20 = vpop.eup %10015  ;;  %v6987_v5 = vmul.f32 %v6955_v54, %v6859_v60 }
 0xa5d   : > { %v10018_v63 = vpop.eup %10017  ;;  %v6956_v1 = vadd.f32 1.0, %v10016_v20 }
 0xa5e   : > { %v6957_v26 = vadd.f32 1.0, %v10018_v63  ;;  %7124 = vmatprep.mubr.f32.mxu0 %v6987_v5 }
 0xa5f   : > { %7125 = vmatmul.mubr.f32.gmra.mrb[140].mxu0 %v6986_v42  ;;  %v6988_v62 = vmul.f32 %v6956_v1, %v6860_v4 }
 0xa60   : > { %v6989_v43 = vmul.f32 %v6957_v26, %v6861_v8 }
 0xa62   : > { %7129 = vmatprep.mubr.f32.mxu0 %v6989_v43 }
 0xa63   : > { %7130 = vmatmul.mubr.f32.gmra.mrb[142].mxu0 %v6988_v62 }
 0xafa   : > { %v8634_v61 = vpop.f32.mrb[112].mxu0 }
 0xafb   : > { %v8635_v16 = vpop.f32.mrb[113].mxu0 }
 0xafc   : > { %v8636_v13 = vadd.f32 %v8635_v16, %v8634_v61 }
 0xafe   : > { %v8637_v32 = vpop.f32.mrb[114].mxu0  ;;  %v14833_v40 = vadd.f32 %v8636_v13, %v14726_v39 }
 0xaff   : > { %v8638_v31 = vpop.f32.mrb[115].mxu0 }
 0xb00   : > { %v8639_v21 = vadd.f32 %v8638_v31, %v8637_v32  ;;  %7135 = vadd.xlane.f32.xlu0 %v14833_v40 }
 0xb02   : > { %v8640_v47 = vpop.f32.mrb[116].mxu0  ;;  %v14837_v2 = vadd.f32 %v8639_v21, %v14731_v36 }
 0xb03   : > { %v8641_v15 = vpop.f32.mrb[117].mxu0 }
 0xb04   : > { %v8642_v59 = vadd.f32 %v8641_v15, %v8640_v47  ;;  %7137 = vadd.xlane.f32.xlu1 %v14837_v2 }
 0xb06   : > { %v8643_v27 = vpop.f32.mrb[118].mxu0  ;;  %v14841_v50 = vadd.f32 %v8642_v59, %v14736_v38 }
 0xb07   : > { %v8644_v30 = vpop.f32.mrb[119].mxu0 }
 0xb08   : > { %v8645_v35 = vadd.f32 %v8644_v30, %v8643_v27  ;;  %7139 = vadd.xlane.f32.xlu0 %v14841_v50 }
 0xb0a   : > { %v8646_v39 = vpop.f32.mrb[120].mxu0  ;;  %v14845_v19 = vadd.f32 %v8645_v35, %v14742_v6 }
 0xb0b   : > { %v8647_v33 = vpop.f32.mrb[121].mxu0 }
 0xb0c   : > { %v8648_v60 = vadd.f32 %v8647_v33, %v8646_v39  ;;  %7141 = vadd.xlane.f32.xlu1 %v14845_v19 }
 0xb0e   : > { %v8649_v36 = vpop.f32.mrb[122].mxu0  ;;  %v14849_v54 = vadd.f32 %v8648_v60, %v14748_v52 }
 0xb0f   : > { %v8650_v48 = vpop.f32.mrb[123].mxu0 }
 0xb10   : > { %v8651_v20 = vadd.f32 %v8650_v48, %v8649_v36  ;;  %7143 = vadd.xlane.f32.xlu0 %v14849_v54 }
 0xb12   : > { %v8652_v38 = vpop.f32.mrb[124].mxu0  ;;  %v14853_v5 = vadd.f32 %v8651_v20, %v14753_v12 }
 0xb13   : > { %v8653_v63 = vpop.f32.mrb[125].mxu0 }
 0xb14   : > { %v8654_v42 = vadd.f32 %v8653_v63, %v8652_v38  ;;  %7145 = vadd.xlane.f32.xlu1 %v14853_v5 }
 0xb16   : > { %v8655_v6 = vpop.f32.mrb[126].mxu0  ;;  %v14857_v1 = vadd.f32 %v8654_v42, %v14758_v24 }
 0xb17   : > { %v8656_v8 = vpop.f32.mrb[127].mxu0 }
 0xb18   : > { %v8657_v26 = vadd.f32 %v8656_v8, %v8655_v6  ;;  %7147 = vadd.xlane.f32.xlu0 %v14857_v1  ;;  %v14897_v6 = vadd.f32 %v14800_v44, %v14420_v23  ;;  %v14913_v23 = vadd.f32 %v14806_v25, %v14443_v29  ;;  %v14933_v29 = vadd.f32 %v14814_v18, %v14471_v41  ;;  %v15932_v44 = vld [vmem:[#allocation60_spill] sm:$0xff]  ;;  %v15935_v41 = vld [vmem:[#allocation41_spill] sm:$0xff] }
 0xb19   : > { %v15940_v8 = vld [vmem:[#allocation40_spill] sm:$0xff] }
 0xb1a   : > { %v8658_v52 = vpop.f32.mrb[128].mxu0  ;;  %v14861_v4 = vadd.f32 %v8657_v26, %v14763_v56 }
 0xb1b   : > { %v8659_v43 = vpop.f32.mrb[129].mxu0 }
 0xb1c   : > { %v8660_v62 = vadd.f32 %v8659_v43, %v8658_v52  ;;  %7149 = vadd.xlane.f32.xlu1 %v14861_v4  ;;  %v15941_v52 = vld [vmem:[#allocation43_spill] sm:$0xff]  ;;  %v15942_v43 = vld [vmem:[#allocation56_spill] sm:$0xff] }
 0xb1e   : > { %v8661_v12 = vpop.f32.mrb[130].mxu0  ;;  %v14865_v61 = vadd.f32 %v8660_v62, %v14768_v17  ;;  %v14967_v62 = vadd.f32 %v15942_v43, %v15941_v52  ;;  %v7372_v52 = vld [vmem:[#allocation4 + $0xa0] sm:$0xff]  ;;  %v7373_v43 = vld [vmem:[#allocation4 + $0xa8] sm:$0xff] }
 0xb1f   : > { %v8662_v16 = vpop.f32.mrb[131].mxu0 }
 0xb20   : > { %v8663_v13 = vadd.f32 %v8662_v16, %v8661_v12  ;;  %7151 = vadd.xlane.f32.xlu0 %v14865_v61  ;;  %v15943_v12 = vld [vmem:[#allocation19_spill] sm:$0xff]  ;;  %v15944_v16 = vld [vmem:[#allocation46_spill] sm:$0xff] }
 0xb22   : > { %v8664_v24 = vpop.f32.mrb[132].mxu0  ;;  %v14869_v32 = vadd.f32 %v8663_v13, %v14773_v11  ;;  %v14973_v13 = vadd.f32 %v15944_v16, %v15943_v12  ;;  %v9300_v12 = vpack.c.bf16 %v7373_v43, %v7372_v52 }
 0xb23   : > { %v8665_v31 = vpop.f32.mrb[133].mxu0 }
 0xb24   : > { %v8666_v21 = vadd.f32 %v8665_v31, %v8664_v24  ;;  %7153 = vadd.xlane.f32.xlu1 %v14869_v32  ;;  %v7368_v24 = vld [vmem:[#allocation4 + $0x80] sm:$0xff]  ;;  %v7369_v31 = vld [vmem:[#allocation4 + $0x88] sm:$0xff] }
 0xb26   : > { %v8667_v56 = vpop.f32.mrb[134].mxu0  ;;  %v14873_v47 = vadd.f32 %v8666_v21, %v14777_v53  ;;  %v7370_v21 = vld [vmem:[#allocation4 + $0x90] sm:$0xff] }
 0xb27   : > { %v8668_v15 = vpop.f32.mrb[135].mxu0 }
 0xb28   : > { %v8669_v59 = vadd.f32 %v8668_v15, %v8667_v56  ;;  %7155 = vadd.xlane.f32.xlu0 %v14873_v47  ;;  %v9292_v56 = vpack.c.bf16 %v7369_v31, %v7368_v24  ;;  %v7371_v15 = vld [vmem:[#allocation4 + $0x98] sm:$0xff] }
 0xb2a   : > { %v8670_v17 = vpop.f32.mrb[136].mxu0  ;;  %v14877_v27 = vadd.f32 %v8669_v59, %v14781_v34  ;;  %v9296_v59 = vpack.c.bf16 %v7371_v15, %v7370_v21  ;;  %9293 = vmatprep.subr.bf16.mxu1 %v9292_v56 }
 0xb2b   : > { %v8671_v30 = vpop.f32.mrb[137].mxu0  ;;  %9295 = vmatpush3.bf16.msra.mxu1 %v9292_v56 }
 0xb2c   : > { %v8672_v35 = vadd.f32 %v8671_v30, %v8670_v17  ;;  %7157 = vadd.xlane.f32.xlu1 %v14877_v27  ;;  %9297 = vmatprep.subr.bf16.mxu1 %v9296_v59 }
 0xb2e   : > { %v8673_v11 = vpop.f32.mrb[138].mxu0  ;;  %v14881_v39 = vadd.f32 %v8672_v35, %v14785_v3 }
 0xb2f   : > { %v8674_v33 = vpop.f32.mrb[139].mxu0  ;;  %9299 = vmatpush3.bf16.msra.mxu1 %v9296_v59 }
 0xb30   : > { %v8675_v60 = vadd.f32 %v8674_v33, %v8673_v11  ;;  %7159 = vadd.xlane.f32.xlu0 %v14881_v39  ;;  %9301 = vmatprep.subr.bf16.mxu1 %v9300_v12 }
 0xb32   : > { %v8676_v53 = vpop.f32.mrb[140].mxu0  ;;  %v14885_v36 = vadd.f32 %v8675_v60, %v14789_v58  ;;  %v14903_v58 = vadd.f32 %v14802_v45, %v14429_v57  ;;  %v14923_v57 = vadd.f32 %v14810_v0, %v14457_v46  ;;  %v15931_v46 = vld [vmem:[#allocation23_spill] sm:$0xff]  ;;  %v15933_v45 = vld [vmem:[#allocation20_spill] sm:$0xff]  ;;  %v15937_v0 = vld [vmem:[#allocation33_spill] sm:$0xff] }
 0xb33   : > { %v8677_v48 = vpop.f32.mrb[141].mxu0  ;;  %9303 = vmatpush3.bf16.msra.mxu1 %v9300_v12  ;;  %v7382_v12 = vld [vmem:[#allocation4 + $0xf0] sm:$0xff] }
 0xb34   : > { %v8678_v20 = vadd.f32 %v8677_v48, %v8676_v53  ;;  %7161 = vadd.xlane.f32.xlu1 %v14885_v36 }
 0xb36   : > { %v8679_v34 = vpop.f32.mrb[142].mxu0  ;;  %v14889_v38 = vadd.f32 %v8678_v20, %v14793_v55  ;;  %v14907_v55 = vadd.f32 %v14804_v22, %v14436_v7  ;;  %v14927_v7 = vadd.f32 %v14812_v9, %v14464_v49  ;;  %v14943_v49 = vadd.f32 %v15932_v44, %v15931_v46  ;;  %v15934_v22 = vld [vmem:[#allocation59_spill] sm:$0xff]  ;;  %v15938_v9 = vld [vmem:[#allocation42_spill] sm:$0xff] }
 0xb37   : > { %v8680_v63 = vpop.f32.mrb[143].mxu0  ;;  %v14947_v25 = vadd.f32 %v15934_v22, %v15933_v45  ;;  %v14957_v18 = vadd.f32 %v15938_v9, %v15937_v0 }
 0xb38   : > { %v8681_v42 = vadd.f32 %v8680_v63, %v8679_v34  ;;  %7163 = vadd.xlane.f32.xlu0 %v14889_v38 }
 0xb3a   : > { %v14893_v3 = vadd.f32 %v8681_v42, %v14797_v37  ;;  %v14917_v37 = vadd.f32 %v14808_v51, %v14450_v14  ;;  %v14937_v14 = vadd.f32 %v14816_v10, %v14478_v28  ;;  %v15936_v51 = vld [vmem:[#allocation10_spill] sm:$0xff]  ;;  %v15939_v10 = vld [vmem:[#allocation11_spill] sm:$0xff] }
 0xb3b   : > { %v14953_v28 = vadd.f32 %v15936_v51, %v15935_v41  ;;  %v14963_v26 = vadd.f32 %v15940_v8, %v15939_v10 }
 0xb3c   : > { %7165 = vadd.xlane.f32.xlu1 %v14893_v3  ;;  %6088 = vadd.xlane.f32.xlu0 %v14897_v6 }
 0xb40   : > { %6090 = vadd.xlane.f32.xlu1 %v14903_v58  ;;  %6092 = vadd.xlane.f32.xlu0 %v14907_v55 }
 0xb44   : > { %6094 = vadd.xlane.f32.xlu1 %v14913_v23  ;;  %6096 = vadd.xlane.f32.xlu0 %v14917_v37 }
 0xb48   : > { %6098 = vadd.xlane.f32.xlu1 %v14923_v57  ;;  %6100 = vadd.xlane.f32.xlu0 %v14927_v7 }
 0xb4c   : > { %6102 = vadd.xlane.f32.xlu1 %v14933_v29  ;;  %6104 = vadd.xlane.f32.xlu0 %v14937_v14 }
 0xb50   : > { %6106 = vadd.xlane.f32.xlu1 %v14943_v49  ;;  %6108 = vadd.xlane.f32.xlu0 %v14947_v25 }
 0xb54   : > { %6110 = vadd.xlane.f32.xlu1 %v14953_v28  ;;  %6112 = vadd.xlane.f32.xlu0 %v14957_v18 }
 0xb58   : > { %6114 = vadd.xlane.f32.xlu1 %v14963_v26  ;;  %6116 = vadd.xlane.f32.xlu0 %v14967_v62 }
 0xb5c   : > { %6118 = vadd.xlane.f32.xlu1 %v14973_v13 }
 0xb8d   : > { %v7136_v17 = vpop.xlane.xlu0 %7135 }
 0xb8e   : > { %v7167_v30 = vmul.f32 0.0078125, %v7136_v17 }
 0xb90   : > { %v14977_v35 = vsub.f32 %v14833_v40, %v7167_v30 }
 0xb91   : > { %v7138_v11 = vpop.xlane.xlu1 %7137 }
 0xb92   : > { %v7168_v33 = vmul.f32 0.0078125, %v7138_v11  ;;  %v7199_v60 = vmul.f32 %v14977_v35, %v14977_v35 }
 0xb94   : > { %v14982_v53 = vsub.f32 %v14837_v2, %v7168_v33  ;;  %7215 = vadd.xlane.f32.xlu0 %v7199_v60  ;;  %v7374_v33 = vld [vmem:[#allocation4 + $0xb0] sm:$0xff]  ;;  %v7375_v60 = vld [vmem:[#allocation4 + $0xb8] sm:$0xff] }
 0xb95   : > { %v7140_v48 = vpop.xlane.xlu0 %7139 }
 0xb96   : > { %v7169_v20 = vmul.f32 0.0078125, %v7140_v48  ;;  %v7200_v34 = vmul.f32 %v14982_v53, %v14982_v53  ;;  %v7376_v48 = vld [vmem:[#allocation4 + $0xc0] sm:$0xff] }
 0xb98   : > { %v14987_v63 = vsub.f32 %v14841_v50, %v7169_v20  ;;  %7217 = vadd.xlane.f32.xlu1 %v7200_v34 }
 0xb99   : > { %v7142_v40 = vpop.xlane.xlu1 %7141 }
 0xb9a   : > { %v7170_v42 = vmul.f32 0.0078125, %v7142_v40  ;;  %v7201_v46 = vmul.f32 %v14987_v63, %v14987_v63  ;;  %v7377_v40 = vld [vmem:[#allocation4 + $0xc8] sm:$0xff] }
 0xb9c   : > { %v14992_v44 = vsub.f32 %v14845_v19, %v7170_v42  ;;  %7219 = vadd.xlane.f32.xlu0 %v7201_v46  ;;  %v9308_v42 = vpack.c.bf16 %v7377_v40, %v7376_v48  ;;  %v7378_v46 = vld [vmem:[#allocation4 + $0xd0] sm:$0xff] }
 0xb9d   : > { %v7144_v2 = vpop.xlane.xlu0 %7143 }
 0xb9e   : > { %v7171_v45 = vmul.f32 0.0078125, %v7144_v2  ;;  %v7202_v22 = vmul.f32 %v14992_v44, %v14992_v44  ;;  %v7379_v2 = vld [vmem:[#allocation4 + $0xd8] sm:$0xff] }
 0xba0   : > { %v14997_v41 = vsub.f32 %v14849_v54, %v7171_v45  ;;  %7221 = vadd.xlane.f32.xlu1 %v7202_v22 }
 0xba1   : > { %v7146_v50 = vpop.xlane.xlu1 %7145 }
 0xba2   : > { %v7172_v51 = vmul.f32 0.0078125, %v7146_v50  ;;  %v7203_v0 = vmul.f32 %v14997_v41, %v14997_v41 }
 0xba4   : > { %v15002_v9 = vsub.f32 %v14853_v5, %v7172_v51  ;;  %7223 = vadd.xlane.f32.xlu0 %v7203_v0  ;;  %v9312_v51 = vpack.c.bf16 %v7379_v2, %v7378_v46  ;;  %v7380_v0 = vld [vmem:[#allocation4 + $0xe0] sm:$0xff] }
 0xba5   : > { %v7148_v19 = vpop.xlane.xlu0 %7147 }
 0xba6   : > { %v7173_v10 = vmul.f32 0.0078125, %v7148_v19  ;;  %v7204_v8 = vmul.f32 %v15002_v9, %v15002_v9  ;;  %v7381_v19 = vld [vmem:[#allocation4 + $0xe8] sm:$0xff] }
 0xba7   : > { %v9316_v43 = vpack.c.bf16 %v7381_v19, %v7380_v0 }
 0xba8   : > { %v15007_v54 = vsub.f32 %v14857_v1, %v7173_v10  ;;  %7225 = vadd.xlane.f32.xlu1 %v7204_v8 }
 0xba9   : > { %v7150_v16 = vpop.xlane.xlu1 %7149 }
 0xbaa   : > { %v7174_v24 = vmul.f32 0.0078125, %v7150_v16  ;;  %v7205_v5 = vmul.f32 %v15007_v54, %v15007_v54  ;;  %v7383_v16 = vld [vmem:[#allocation4 + $0xf8] sm:$0xff] }
 0xbac   : > { %v15012_v31 = vsub.f32 %v14861_v4, %v7174_v24  ;;  %7227 = vadd.xlane.f32.xlu0 %v7205_v5 }
 0xbad   : > { %v7152_v21 = vpop.xlane.xlu0 %7151 }
 0xbae   : > { %v7175_v56 = vmul.f32 0.0078125, %v7152_v21  ;;  %v7206_v15 = vmul.f32 %v15012_v31, %v15012_v31 }
 0xbb0   : > { %v15017_v1 = vsub.f32 %v14865_v61, %v7175_v56  ;;  %7229 = vadd.xlane.f32.xlu1 %v7206_v15  ;;  %v9304_v61 = vpack.c.bf16 %v7375_v60, %v7374_v33  ;;  %v9320_v56 = vpack.c.bf16 %v7383_v16, %v7382_v12 }
 0xbb1   : > { %v7154_v59 = vpop.xlane.xlu1 %7153 }
 0xbb2   : > { %v7176_v17 = vmul.f32 0.0078125, %v7154_v59  ;;  %v7207_v30 = vmul.f32 %v15017_v1, %v15017_v1  ;;  %9305 = vmatprep.subr.bf16.mxu1 %v9304_v61 }
 0xbb3   : > { %9307 = vmatpush3.bf16.msra.mxu1 %v9304_v61 }
 0xbb4   : > { %v15022_v11 = vsub.f32 %v14869_v32, %v7176_v17  ;;  %7231 = vadd.xlane.f32.xlu0 %v7207_v30  ;;  %9309 = vmatprep.subr.bf16.mxu1 %v9308_v42 }
 0xbb5   : > { %v7156_v4 = vpop.xlane.xlu0 %7155 }
 0xbb6   : > { %v7177_v20 = vmul.f32 0.0078125, %v7156_v4  ;;  %v7208_v34 = vmul.f32 %v15022_v11, %v15022_v11 }
 0xbb7   : > { %9311 = vmatpush3.bf16.msra.mxu1 %v9308_v42 }
 0xbb8   : > { %v15027_v45 = vsub.f32 %v14873_v47, %v7177_v20  ;;  %7233 = vadd.xlane.f32.xlu1 %v7208_v34  ;;  %9313 = vmatprep.subr.bf16.mxu1 %v9312_v51 }
 0xbb9   : > { %v7158_v32 = vpop.xlane.xlu1 %7157 }
 0xbba   : > { %v7178_v22 = vmul.f32 0.0078125, %v7158_v32  ;;  %v7209_v50 = vmul.f32 %v15027_v45, %v15027_v45 }
 0xbbb   : > { %9315 = vmatpush3.bf16.msra.mxu1 %v9312_v51 }
 0xbbc   : > { %v15032_v10 = vsub.f32 %v14877_v27, %v7178_v22  ;;  %7235 = vadd.xlane.f32.xlu0 %v7209_v50  ;;  %9317 = vmatprep.subr.bf16.mxu1 %v9316_v43 }
 0xbbd   : > { %v7160_v8 = vpop.xlane.xlu0 %7159 }
 0xbbe   : > { %v7179_v47 = vmul.f32 0.0078125, %v7160_v8  ;;  %v7210_v52 = vmul.f32 %v15032_v10, %v15032_v10 }
 0xbbf   : > { %9319 = vmatpush3.bf16.msra.mxu1 %v9316_v43 }
 0xbc0   : > { %v15037_v24 = vsub.f32 %v14881_v39, %v7179_v47  ;;  %7237 = vadd.xlane.f32.xlu1 %v7210_v52  ;;  %9321 = vmatprep.subr.bf16.mxu1 %v9320_v56 }
 0xbc1   : > { %v7162_v5 = vpop.xlane.xlu1 %7161 }
 0xbc2   : > { %v7180_v21 = vmul.f32 0.0078125, %v7162_v5  ;;  %v7211_v27 = vmul.f32 %v15037_v24, %v15037_v24 }
 0xbc3   : > { %9323 = vmatpush3.bf16.msra.mxu1 %v9320_v56 }
 0xbc4   : > { %v15042_v15 = vsub.f32 %v14885_v36, %v7180_v21  ;;  %7239 = vadd.xlane.f32.xlu0 %v7211_v27 }
 0xbc5   : > { %v7164_v59 = vpop.xlane.xlu0 %7163 }
 0xbc6   : > { %v7181_v17 = vmul.f32 0.0078125, %v7164_v59  ;;  %v7212_v39 = vmul.f32 %v15042_v15, %v15042_v15 }
 0xbc8   : > { %v15047_v30 = vsub.f32 %v14889_v38, %v7181_v17  ;;  %7241 = vadd.xlane.f32.xlu1 %v7212_v39  ;;  %v7351_v39 = vld [vmem:[#allocation4] sm:$0xff] }
 0xbc9   : > { %v7166_v4 = vpop.xlane.xlu1 %7165  ;;  %v6089_v33 = vpop.xlane.xlu0 %6088 }
 0xbca   : > { %v7182_v60 = vmul.f32 0.0078125, %v7166_v4  ;;  %v6120_v48 = vmul.f32 0.0078125, %v6089_v33  ;;  %v7213_v36 = vmul.f32 %v15047_v30, %v15047_v30  ;;  %v7352_v4 = vld [vmem:[#allocation4 + $0x8] sm:$0xff] }
 0xbcb   : > { %v15091_v33 = vpack.c.bf16 %v7352_v4, %v7351_v39  ;;  %v7778_v39 = vld [vmem:[%s15394_s11 + $0x20] sm:$0xff]  ;;  %v7779_v4 = vld [vmem:[%s15394_s11 + $0x28] sm:$0xff] }
 0xbcc   : > { %v15052_v20 = vsub.f32 %v14893_v3, %v7182_v60  ;;  %v15055_v34 = vsub.f32 %v14897_v6, %v6120_v48  ;;  %7243 = vadd.xlane.f32.xlu0 %v7213_v36 }
 0xbcd   : > { %v6091_v61 = vpop.xlane.xlu1 %6090  ;;  %v6093_v40 = vpop.xlane.xlu0 %6092  ;;  %9325 = vmatprep.subr.bf16.mxu1 %v15091_v33 }
 0xbce   : > { %v6121_v38 = vmul.f32 0.0078125, %v6091_v61  ;;  %v6122_v42 = vmul.f32 0.0078125, %v6093_v40  ;;  %v6152_v46 = vmul.f32 %v15055_v34, %v15055_v34  ;;  %v7214_v2 = vmul.f32 %v15052_v20, %v15052_v20 }
 0xbd0   : > { %v15062_v32 = vsub.f32 %v14903_v58, %v6121_v38  ;;  %v15065_v3 = vsub.f32 %v14907_v55, %v6122_v42  ;;  %6168 = vadd.xlane.f32.xlu0 %v6152_v46  ;;  %7245 = vadd.xlane.f32.xlu1 %v7214_v2 }
 0xbd1   : > { %v6095_v6 = vpop.xlane.xlu1 %6094  ;;  %v6097_v22 = vpop.xlane.xlu0 %6096 }
 0xbd2   : > { %v6123_v50 = vmul.f32 0.0078125, %v6095_v6  ;;  %v6124_v51 = vmul.f32 0.0078125, %v6097_v22  ;;  %v6154_v0 = vmul.f32 %v15065_v3, %v15065_v3  ;;  %v6153_v19 = vmul.f32 %v15062_v32, %v15062_v32 }
 0xbd4   : > { %v15072_v8 = vsub.f32 %v14913_v23, %v6123_v50  ;;  %v15075_v58 = vsub.f32 %v14917_v37, %v6124_v51  ;;  %6172 = vadd.xlane.f32.xlu0 %v6154_v0  ;;  %6170 = vadd.xlane.f32.xlu1 %v6153_v19 }
 0xbd5   : > { %v6099_v55 = vpop.xlane.xlu1 %6098  ;;  %v6101_v47 = vpop.xlane.xlu0 %6100 }
 0xbd6   : > { %v6125_v52 = vmul.f32 0.0078125, %v6099_v55  ;;  %v6126_v43 = vmul.f32 0.0078125, %v6101_v47  ;;  %v6156_v12 = vmul.f32 %v15075_v58, %v15075_v58  ;;  %v6155_v16 = vmul.f32 %v15072_v8, %v15072_v8 }
 0xbd8   : > { %v15082_v5 = vsub.f32 %v14923_v57, %v6125_v52  ;;  %v15085_v23 = vsub.f32 %v14927_v7, %v6126_v43  ;;  %6176 = vadd.xlane.f32.xlu0 %v6156_v12  ;;  %6174 = vadd.xlane.f32.xlu1 %v6155_v16 }
 0xbd9   : > { %v6103_v37 = vpop.xlane.xlu1 %6102  ;;  %v6105_v21 = vpop.xlane.xlu0 %6104 }
 0xbda   : > { %v6127_v27 = vmul.f32 0.0078125, %v6103_v37  ;;  %v6128_v56 = vmul.f32 0.0078125, %v6105_v21  ;;  %v6158_v59 = vmul.f32 %v15085_v23, %v15085_v23  ;;  %v6157_v17 = vmul.f32 %v15082_v5, %v15082_v5 }
 0xbdc   : > { %v15094_v57 = vsub.f32 %v14933_v29, %v6127_v27  ;;  %v15097_v7 = vsub.f32 %v14937_v14, %v6128_v56  ;;  %6180 = vadd.xlane.f32.xlu0 %v6158_v59  ;;  %6178 = vadd.xlane.f32.xlu1 %v6157_v17  ;;  %v7775_v27 = vld [vmem:[%s15394_s11 + $0x8] sm:$0xff]  ;;  %v7776_v56 = vld [vmem:[%s15394_s11 + $0x10] sm:$0xff]  ;;  %v7777_v59 = vld [vmem:[%s15394_s11 + $0x18] sm:$0xff] }
 0xbdd   : > { %v6107_v60 = vpop.xlane.xlu1 %6106  ;;  %v6109_v48 = vpop.xlane.xlu0 %6108  ;;  %v9360_v17 = vpack.c.bf16 %v7777_v59, %v7776_v56 }
 0xbde   : > { %v6129_v36 = vmul.f32 0.0078125, %v6107_v60  ;;  %v6130_v61 = vmul.f32 0.0078125, %v6109_v48  ;;  %v6160_v40 = vmul.f32 %v15097_v7, %v15097_v7  ;;  %v6159_v38 = vmul.f32 %v15094_v57, %v15094_v57  ;;  %v7780_v48 = vld [vmem:[%s15394_s11 + $0x30] sm:$0xff] }
 0xbdf   : > { %v9364_v60 = vpack.c.bf16 %v7779_v4, %v7778_v39 }
 0xbe0   : > { %v15105_v29 = vsub.f32 %v14943_v49, %v6129_v36  ;;  %v15108_v14 = vsub.f32 %v14947_v25, %v6130_v61  ;;  %6184 = vadd.xlane.f32.xlu0 %v6160_v40  ;;  %6182 = vadd.xlane.f32.xlu1 %v6159_v38  ;;  %v7781_v36 = vld [vmem:[%s15394_s11 + $0x38] sm:$0xff]  ;;  %v7782_v40 = vld [vmem:[%s15394_s11 + $0x40] sm:$0xff]  ;;  %v7783_v38 = vld [vmem:[%s15394_s11 + $0x48] sm:$0xff] }
 0xbe1   : > { %v6111_v42 = vpop.xlane.xlu1 %6110  ;;  %v6113_v46 = vpop.xlane.xlu0 %6112  ;;  %v9368_v61 = vpack.c.bf16 %v7781_v36, %v7780_v48 }
 0xbe2   : > { %v6131_v2 = vmul.f32 0.0078125, %v6111_v42  ;;  %v6132_v6 = vmul.f32 0.0078125, %v6113_v46  ;;  %v6162_v22 = vmul.f32 %v15108_v14, %v15108_v14  ;;  %v6161_v50 = vmul.f32 %v15105_v29, %v15105_v29 }
 0xbe4   : > { %v15115_v51 = vsub.f32 %v14953_v28, %v6131_v2  ;;  %v15118_v49 = vsub.f32 %v14957_v18, %v6132_v6  ;;  %6188 = vadd.xlane.f32.xlu0 %v6162_v22  ;;  %6186 = vadd.xlane.f32.xlu1 %v6161_v50  ;;  %v9372_v2 = vpack.c.bf16 %v7783_v38, %v7782_v40  ;;  %v7784_v6 = vld [vmem:[%s15394_s11 + $0x50] sm:$0xff]  ;;  %v7785_v22 = vld [vmem:[%s15394_s11 + $0x58] sm:$0xff] }
 0xbe5   : > { %v6115_v25 = vpop.xlane.xlu1 %6114  ;;  %v6117_v0 = vpop.xlane.xlu0 %6116 }
 0xbe6   : > { %v6133_v19 = vmul.f32 0.0078125, %v6115_v25  ;;  %v6134_v55 = vmul.f32 0.0078125, %v6117_v0  ;;  %v6164_v47 = vmul.f32 %v15118_v49, %v15118_v49  ;;  %v6163_v52 = vmul.f32 %v15115_v51, %v15115_v51 }
 0xbe8   : > { %v15125_v43 = vsub.f32 %v14963_v26, %v6133_v19  ;;  %v15128_v28 = vsub.f32 %v14967_v62, %v6134_v55  ;;  %6192 = vadd.xlane.f32.xlu0 %v6164_v47  ;;  %6190 = vadd.xlane.f32.xlu1 %v6163_v52  ;;  %v7774_v62 = vld [vmem:[%s15394_s11] sm:$0xff]  ;;  %v9376_v19 = vpack.c.bf16 %v7785_v22, %v7784_v6  ;;  %v7354_v6 = vld [vmem:[#allocation4 + $0x18] sm:$0xff] }
 0xbe9   : > { %v6119_v18 = vpop.xlane.xlu1 %6118 }
 0xbea   : > { %v6135_v12 = vmul.f32 0.0078125, %v6119_v18  ;;  %v6166_v16 = vmul.f32 %v15128_v28, %v15128_v28  ;;  %v6165_v37 = vmul.f32 %v15125_v43, %v15125_v43  ;;  %v519_v18 = vld [vmem:[%s15395_s12 + $0x8] sm:$0xff] }
 0xbec   : > { %v15135_v21 = vsub.f32 %v14973_v13, %v6135_v12  ;;  %6196 = vadd.xlane.f32.xlu0 %v6166_v16  ;;  %6194 = vadd.xlane.f32.xlu1 %v6165_v37  ;;  %v9356_v13 = vpack.c.bf16 %v7775_v27, %v7774_v62 }
 0xbee   : > { %v6167_v26 = vmul.f32 %v15135_v21, %v15135_v21  ;;  %9357 = vmatprep.subr.bf16.mxu0 %v9356_v13 }
 0xbef   : > { %9359 = vmatpush3.bf16.msra.mxu0 %v9356_v13 }
 0xbf0   : > { %6198 = vadd.xlane.f32.xlu1 %v6167_v26  ;;  %9361 = vmatprep.subr.bf16.mxu0 %v9360_v17  ;;  %v15945_v26 = vld [vmem:[#allocation8_spill] sm:$0xff] }
 0xbf1   : > { %v15946_v62 = vsub.s32 0, %v15945_v26  ;;  %v15947_v39 = vsub.s32 1, %v15945_v26 }
 0xbf3   : > { %9363 = vmatpush3.bf16.msra.mxu0 %v9360_v17  ;;  %v15180_v27 = vrot.slane %v519_v18, %v15946_v62  ;;  %v15185_v4 = vrot.slane %v519_v18, %v15947_v39 }
 0xbf4   : > { %9365 = vmatprep.subr.bf16.mxu0 %v9364_v60 }
 0xbf7   : > { %9367 = vmatpush3.bf16.msra.mxu0 %v9364_v60 }
 0xbf8   : > { %9369 = vmatprep.subr.bf16.mxu0 %v9368_v61 }
 0xbfb   : > { %9371 = vmatpush3.bf16.msra.mxu0 %v9368_v61 }
 0xbfc   : > { %9373 = vmatprep.subr.bf16.mxu0 %v9372_v2 }
 0xbff   : > { %9375 = vmatpush3.bf16.msra.mxu0 %v9372_v2  ;;  %v7353_v2 = vld [vmem:[#allocation4 + $0x10] sm:$0xff] }
 0xc00   : > { %9377 = vmatprep.subr.bf16.mxu0 %v9376_v19 }
 0xc03   : > { %9379 = vmatpush3.bf16.msra.mxu0 %v9376_v19 }
 0xc21   : > { %v7216_v42 = vpop.xlane.xlu0 %7215 }
 0xc22   : > { %v7247_v46 = vmul.f32 0.0078125, %v7216_v42 }
 0xc24   : > { %v7263_v50 = vadd.f32 1e-05, %v7247_v46 }
 0xc25   : > { %v7218_v25 = vpop.xlane.xlu1 %7217 }
 0xc26   : > { %10019 = vrsqrt.f32 %v7263_v50  ;;  %v7248_v0 = vmul.f32 0.0078125, %v7218_v25 }
 0xc28   : > { %v7264_v55 = vadd.f32 1e-05, %v7248_v0 }
 0xc29   : > { %v7220_v47 = vpop.xlane.xlu0 %7219 }
 0xc2a   : > { %10021 = vrsqrt.f32 %v7264_v55  ;;  %v7249_v52 = vmul.f32 0.0078125, %v7220_v47  ;;  %v9328_v55 = vpack.c.bf16 %v7354_v6, %v7353_v2  ;;  %v7355_v47 = vld [vmem:[#allocation4 + $0x20] sm:$0xff] }
 0xc2c   : > { %v7265_v12 = vadd.f32 1e-05, %v7249_v52  ;;  %v7356_v52 = vld [vmem:[#allocation4 + $0x28] sm:$0xff] }
 0xc2d   : > { %v7222_v16 = vpop.xlane.xlu1 %7221 }
 0xc2e   : > { %10023 = vrsqrt.f32 %v7265_v12  ;;  %v7250_v37 = vmul.f32 0.0078125, %v7222_v16 }
 0xc30   : > { %v10020_v56 = vpop.eup %10019  ;;  %v7266_v13 = vadd.f32 1e-05, %v7250_v37 }
 0xc31   : > { %v7224_v59 = vpop.xlane.xlu0 %7223  ;;  %v7295_v17 = vmul.f32 %v10020_v56, %v14977_v35 }
 0xc32   : > { %10025 = vrsqrt.f32 %v7266_v13  ;;  %v7251_v60 = vmul.f32 0.0078125, %v7224_v59  ;;  %v9332_v13 = vpack.c.bf16 %v7356_v52, %v7355_v47  ;;  %v7357_v59 = vld [vmem:[#allocation4 + $0x30] sm:$0xff] }
 0xc33   : > { %v7315_v48 = vmul.f32 %v15180_v27, %v7295_v17  ;;  %v7358_v17 = vld [vmem:[#allocation4 + $0x38] sm:$0xff] }
 0xc34   : > { %v10022_v36 = vpop.eup %10021  ;;  %v7267_v61 = vadd.f32 1e-05, %v7251_v60 }
 0xc35   : > { %v7296_v40 = vmul.f32 %v10022_v36, %v14982_v53  ;;  %v7226_v38 = vpop.xlane.xlu1 %7225  ;;  %v7335_v42 = vadd.f32 %v15185_v4, %v7315_v48 }
 0xc36   : > { %10027 = vrsqrt.f32 %v7267_v61  ;;  %v7252_v46 = vmul.f32 0.0078125, %v7226_v38  ;;  %v7359_v38 = vld [vmem:[#allocation4 + $0x40] sm:$0xff] }
 0xc37   : > { %8946 = vmatprep.mubr.f32.mxu1 %v7335_v42  ;;  %v7316_v35 = vmul.f32 %v15180_v27, %v7296_v40  ;;  %v9336_v40 = vpack.c.bf16 %v7358_v17, %v7357_v59  ;;  %v7360_v42 = vld [vmem:[#allocation4 + $0x48] sm:$0xff] }
 0xc38   : > { %v10024_v22 = vpop.eup %10023  ;;  %v7268_v50 = vadd.f32 1e-05, %v7252_v46 }
 0xc39   : > { %v7228_v25 = vpop.xlane.xlu0 %7227  ;;  %v7336_v0 = vadd.f32 %v15185_v4, %v7316_v35  ;;  %v7297_v19 = vmul.f32 %v10024_v22, %v14987_v63 }
 0xc3a   : > { %10029 = vrsqrt.f32 %v7268_v50  ;;  %v7253_v53 = vmul.f32 0.0078125, %v7228_v25  ;;  %v9340_v25 = vpack.c.bf16 %v7360_v42, %v7359_v38 }
 0xc3b   : > { %8947 = vmatmul.mubr.f32.vlgmr.msra.gmra.mrb[96].mxu1 %v7336_v0  ;;  %v7317_v18 = vmul.f32 %v15180_v27, %v7297_v19  ;;  %v7361_v0 = vld [vmem:[#allocation4 + $0x50] sm:$0xff]  ;;  %v7362_v19 = vld [vmem:[#allocation4 + $0x58] sm:$0xff] }
 0xc3c   : > { %v10026_v12 = vpop.eup %10025  ;;  %v7269_v16 = vadd.f32 1e-05, %v7253_v53  ;;  %9327 = vmatpush3.bf16.msra.mxu1 %v15091_v33 }
 0xc3d   : > { %v7230_v37 = vpop.xlane.xlu1 %7229  ;;  %v7337_v62 = vadd.f32 %v15185_v4, %v7317_v18  ;;  %v7298_v56 = vmul.f32 %v10026_v12, %v14992_v44  ;;  %9329 = vmatprep.subr.bf16.mxu1 %v9328_v55 }
 0xc3e   : > { %10031 = vrsqrt.f32 %v7269_v16  ;;  %v7254_v63 = vmul.f32 0.0078125, %v7230_v37  ;;  %v9344_v16 = vpack.c.bf16 %v7362_v19, %v7361_v0  ;;  %v7363_v37 = vld [vmem:[#allocation4 + $0x60] sm:$0xff] }
 0xc3f   : > { %8949 = vmatprep.mubr.f32.mxu1 %v7337_v62  ;;  %v7318_v39 = vmul.f32 %v15180_v27, %v7298_v56  ;;  %v7364_v62 = vld [vmem:[#allocation4 + $0x68] sm:$0xff] }
 0xc40   : > { %v10028_v60 = vpop.eup %10027  ;;  %v7270_v48 = vadd.f32 1e-05, %v7254_v63  ;;  %9331 = vmatpush3.bf16.msra.mxu1 %v9328_v55 }
 0xc41   : > { %v7232_v36 = vpop.xlane.xlu0 %7231  ;;  %v7338_v33 = vadd.f32 %v15185_v4, %v7318_v39  ;;  %v7299_v61 = vmul.f32 %v10028_v60, %v14997_v41  ;;  %9333 = vmatprep.subr.bf16.mxu1 %v9332_v13  ;;  %v9348_v60 = vpack.c.bf16 %v7364_v62, %v7363_v37 }
 0xc42   : > { %10033 = vrsqrt.f32 %v7270_v48  ;;  %v7255_v44 = vmul.f32 0.0078125, %v7232_v36  ;;  %v7365_v48 = vld [vmem:[#allocation4 + $0x70] sm:$0xff]  ;;  %v7366_v36 = vld [vmem:[#allocation4 + $0x78] sm:$0xff] }
 0xc43   : > { %8950 = vmatmul.mubr.f32.gmra.mrb[98].mxu1 %v7338_v33  ;;  %v7319_v46 = vmul.f32 %v15180_v27, %v7299_v61 }
 0xc44   : > { %v10030_v2 = vpop.eup %10029  ;;  %v7271_v6 = vadd.f32 1e-05, %v7255_v44  ;;  %9335 = vmatpush3.bf16.msra.mxu1 %v9332_v13 }
 0xc45   : > { %v7234_v35 = vpop.xlane.xlu1 %7233  ;;  %v7339_v22 = vadd.f32 %v15185_v4, %v7319_v46  ;;  %v7300_v50 = vmul.f32 %v10030_v2, %v15002_v9  ;;  %9337 = vmatprep.subr.bf16.mxu1 %v9336_v40  ;;  %v9352_v46 = vpack.c.bf16 %v7366_v36, %v7365_v48 }
 0xc46   : > { %10035 = vrsqrt.f32 %v7271_v6  ;;  %v7256_v41 = vmul.f32 0.0078125, %v7234_v35 }
 0xc47   : > { %8952 = vmatprep.mubr.f32.mxu1 %v7339_v22  ;;  %v7320_v55 = vmul.f32 %v15180_v27, %v7300_v50 }
 0xc48   : > { %v10032_v53 = vpop.eup %10031  ;;  %v7272_v47 = vadd.f32 1e-05, %v7256_v41  ;;  %9339 = vmatpush3.bf16.msra.mxu1 %v9336_v40 }
 0xc49   : > { %v7236_v52 = vpop.xlane.xlu0 %7235  ;;  %v7340_v18 = vadd.f32 %v15185_v4, %v7320_v55  ;;  %v7301_v12 = vmul.f32 %v10032_v53, %v15007_v54  ;;  %9341 = vmatprep.subr.bf16.mxu1 %v9340_v25 }
 0xc4a   : > { %10037 = vrsqrt.f32 %v7272_v47  ;;  %v7257_v9 = vmul.f32 0.0078125, %v7236_v52 }
 0xc4b   : > { %8953 = vmatmul.mubr.f32.gmra.mrb[100].mxu1 %v7340_v18  ;;  %v7321_v56 = vmul.f32 %v15180_v27, %v7301_v12 }
 0xc4c   : > { %v10034_v13 = vpop.eup %10033  ;;  %v7273_v63 = vadd.f32 1e-05, %v7257_v9  ;;  %9343 = vmatpush3.bf16.msra.mxu1 %v9340_v25 }
 0xc4d   : > { %v7238_v59 = vpop.xlane.xlu1 %7237  ;;  %v7341_v17 = vadd.f32 %v15185_v4, %v7321_v56  ;;  %v7302_v39 = vmul.f32 %v10034_v13, %v15012_v31  ;;  %9345 = vmatprep.subr.bf16.mxu1 %v9344_v16 }
 0xc4e   : > { %10039 = vrsqrt.f32 %v7273_v63  ;;  %v7258_v54 = vmul.f32 0.0078125, %v7238_v59 }
 0xc4f   : > { %8955 = vmatprep.mubr.f32.mxu1 %v7341_v17  ;;  %v7322_v33 = vmul.f32 %v15180_v27, %v7302_v39 }
 0xc50   : > { %v10036_v61 = vpop.eup %10035  ;;  %v7274_v40 = vadd.f32 1e-05, %v7258_v54  ;;  %9347 = vmatpush3.bf16.msra.mxu1 %v9344_v16 }
 0xc51   : > { %v7240_v44 = vpop.xlane.xlu0 %7239  ;;  %v7342_v38 = vadd.f32 %v15185_v4, %v7322_v33  ;;  %v7303_v42 = vmul.f32 %v10036_v61, %v15017_v1  ;;  %9349 = vmatprep.subr.bf16.mxu1 %v9348_v60 }
 0xc52   : > { %10041 = vrsqrt.f32 %v7274_v40  ;;  %v7259_v31 = vmul.f32 0.0078125, %v7240_v44 }
 0xc53   : > { %8956 = vmatmul.mubr.f32.gmra.mrb[102].mxu1 %v7342_v38  ;;  %v7323_v2 = vmul.f32 %v15180_v27, %v7303_v42 }
 0xc54   : > { %v10038_v6 = vpop.eup %10037  ;;  %v7275_v35 = vadd.f32 1e-05, %v7259_v31  ;;  %9351 = vmatpush3.bf16.msra.mxu1 %v9348_v60 }
 0xc55   : > { %v7242_v22 = vpop.xlane.xlu1 %7241  ;;  %v7343_v50 = vadd.f32 %v15185_v4, %v7323_v2  ;;  %v7304_v25 = vmul.f32 %v10038_v6, %v15022_v11  ;;  %9353 = vmatprep.subr.bf16.mxu1 %v9352_v46 }
 0xc56   : > { %10043 = vrsqrt.f32 %v7275_v35  ;;  %v7260_v41 = vmul.f32 0.0078125, %v7242_v22  ;;  %v6266_v35 = vsub.s32 6, %v15945_v26 }
 0xc57   : > { %8958 = vmatprep.mubr.f32.mxu1 %v7343_v50  ;;  %v7324_v1 = vmul.f32 %v15180_v27, %v7304_v25 }
 0xc58   : > { %v10040_v0 = vpop.eup %10039  ;;  %v7276_v19 = vadd.f32 1e-05, %v7260_v41  ;;  %9355 = vmatpush3.bf16.msra.mxu1 %v9352_v46 }
 0xc59   : > { %v7244_v55 = vpop.xlane.xlu0 %7243  ;;  %v7344_v53 = vadd.f32 %v15185_v4, %v7324_v1  ;;  %v7305_v47 = vmul.f32 %v10040_v0, %v15027_v45 }
 0xc5a   : > { %10045 = vrsqrt.f32 %v7276_v19  ;;  %v7261_v52 = vmul.f32 0.0078125, %v7244_v55 }
 0xc5b   : > { %8959 = vmatmul.mubr.f32.gmra.mrb[104].mxu1 %v7344_v53  ;;  %v7325_v18 = vmul.f32 %v15180_v27, %v7305_v47 }
 0xc5c   : > { %v10042_v11 = vpop.eup %10041  ;;  %v7277_v12 = vadd.f32 1e-05, %v7261_v52  ;;  %v15236_v52 = vld [vmem:[%s15395_s12] sm:$0xff] }
 0xc5d   : > { %v6169_v16 = vpop.xlane.xlu0 %6168  ;;  %v7246_v9 = vpop.xlane.xlu1 %7245  ;;  %v7345_v37 = vadd.f32 %v15185_v4, %v7325_v18  ;;  %v7306_v62 = vmul.f32 %v10042_v11, %v15032_v10  ;;  %v15239_v18 = vrot.slane %v15236_v52, %v6266_v35 }
 0xc5e   : > { %10047 = vrsqrt.f32 %v7277_v12  ;;  %v6200_v56 = vmul.f32 0.0078125, %v6169_v16  ;;  %v7262_v13 = vmul.f32 0.0078125, %v7246_v9 }
 0xc5f   : > { %8961 = vmatprep.mubr.f32.mxu1 %v7345_v37  ;;  %v7326_v63 = vmul.f32 %v15180_v27, %v7306_v62 }
 0xc60   : > { %v10044_v45 = vpop.eup %10043  ;;  %v6216_v59 = vadd.f32 1e-05, %v6200_v56  ;;  %v7278_v17 = vadd.f32 1e-05, %v7262_v13 }
 0xc61   : > { %v6173_v39 = vpop.xlane.xlu0 %6172  ;;  %v6171_v60 = vpop.xlane.xlu1 %6170  ;;  %v7346_v54 = vadd.f32 %v15185_v4, %v7326_v63  ;;  %v7307_v48 = vmul.f32 %v10044_v45, %v15037_v24 }
 0xc62   : > { %10049 = vrsqrt.f32 %v6216_v59  ;;  %v6202_v36 = vmul.f32 0.0078125, %v6173_v39  ;;  %v6201_v33 = vmul.f32 0.0078125, %v6171_v60 }
 0xc63   : > { %10051 = vrsqrt.f32 %v7278_v17  ;;  %8962 = vmatmul.mubr.f32.gmra.mrb[106].mxu1 %v7346_v54  ;;  %v7327_v10 = vmul.f32 %v15180_v27, %v7307_v48 }
 0xc64   : > { %v10046_v61 = vpop.eup %10045  ;;  %v6218_v40 = vadd.f32 1e-05, %v6202_v36  ;;  %v6217_v44 = vadd.f32 1e-05, %v6201_v33 }
 0xc65   : > { %v6177_v38 = vpop.xlane.xlu0 %6176  ;;  %v6175_v42 = vpop.xlane.xlu1 %6174  ;;  %v7347_v46 = vadd.f32 %v15185_v4, %v7327_v10  ;;  %v7308_v31 = vmul.f32 %v10046_v61, %v15042_v15  ;;  %v6286_v15 = vsub.s32 7, %v15945_v26 }
 0xc66   : > { %10053 = vrsqrt.f32 %v6218_v40  ;;  %v6204_v2 = vmul.f32 0.0078125, %v6177_v38  ;;  %v6203_v6 = vmul.f32 0.0078125, %v6175_v42 }
 0xc67   : > { %10055 = vrsqrt.f32 %v6217_v44  ;;  %8964 = vmatprep.mubr.f32.mxu1 %v7347_v46  ;;  %v7328_v24 = vmul.f32 %v15180_v27, %v7308_v31  ;;  %v15244_v13 = vrot.slane %v15236_v52, %v6286_v15 }
 0xc68   : > { %v10048_v22 = vpop.eup %10047  ;;  %v6220_v50 = vadd.f32 1e-05, %v6204_v2  ;;  %v6219_v25 = vadd.f32 1e-05, %v6203_v6 }
 0xc69   : > { %v6181_v41 = vpop.xlane.xlu0 %6180  ;;  %v6179_v1 = vpop.xlane.xlu1 %6178  ;;  %v7348_v0 = vadd.f32 %v15185_v4, %v7328_v24  ;;  %v7309_v19 = vmul.f32 %v10048_v22, %v15047_v30 }
 0xc6a   : > { %10057 = vrsqrt.f32 %v6220_v50  ;;  %v6206_v55 = vmul.f32 0.0078125, %v6181_v41  ;;  %v6205_v53 = vmul.f32 0.0078125, %v6179_v1 }
 0xc6b   : > { %10059 = vrsqrt.f32 %v6219_v25  ;;  %8965 = vmatmul.mubr.f32.gmra.mrb[108].mxu1 %v7348_v0  ;;  %v7329_v47 = vmul.f32 %v15180_v27, %v7309_v19 }
 0xc6c   : > { %v10050_v11 = vpop.eup %10049  ;;  %v6222_v12 = vadd.f32 1e-05, %v6206_v55  ;;  %v6221_v30 = vadd.f32 1e-05, %v6205_v53 }
 0xc6d   : > { %v10052_v16 = vpop.eup %10051  ;;  %v6185_v9 = vpop.xlane.xlu0 %6184  ;;  %v7349_v62 = vadd.f32 %v15185_v4, %v7329_v47  ;;  %v6248_v56 = vmul.f32 %v10050_v11, %v15055_v34 }
 0xc6e   : > { %v6183_v37 = vpop.xlane.xlu1 %6182  ;;  %10061 = vrsqrt.f32 %v6222_v12  ;;  %v6208_v63 = vmul.f32 0.0078125, %v6185_v9  ;;  %v7310_v59 = vmul.f32 %v10052_v16, %v15052_v20 }
 0xc6f   : > { %v6207_v45 = vmul.f32 0.0078125, %v6183_v37  ;;  %10063 = vrsqrt.f32 %v6221_v30  ;;  %8967 = vmatprep.mubr.f32.mxu1 %v7349_v62  ;;  %v6268_v17 = vmul.f32 %v15239_v18, %v6248_v56 }
 0xc70   : > { %v10054_v39 = vpop.eup %10053  ;;  %v6224_v60 = vadd.f32 1e-05, %v6208_v63  ;;  %v7330_v48 = vmul.f32 %v15180_v27, %v7310_v59 }
 0xc71   : > { %v6223_v54 = vadd.f32 1e-05, %v6207_v45  ;;  %v10056_v36 = vpop.eup %10055  ;;  %v6189_v33 = vpop.xlane.xlu0 %6188  ;;  %v6288_v10 = vadd.f32 %v15244_v13, %v6268_v17  ;;  %v6250_v61 = vmul.f32 %v10054_v39, %v15065_v3 }
 0xc72   : > { %v6187_v34 = vpop.xlane.xlu1 %6186  ;;  %v6249_v40 = vmul.f32 %v10056_v36, %v15062_v32  ;;  %10065 = vrsqrt.f32 %v6224_v60  ;;  %v6210_v20 = vmul.f32 0.0078125, %v6189_v33  ;;  %v7350_v38 = vadd.f32 %v15185_v4, %v7330_v48 }
 0xc73   : > { %v6209_v44 = vmul.f32 0.0078125, %v6187_v34  ;;  %10067 = vrsqrt.f32 %v6223_v54  ;;  %v6270_v42 = vmul.f32 %v15239_v18, %v6250_v61 }
 0xc74   : > { %v10058_v46 = vpop.eup %10057  ;;  %v6226_v31 = vadd.f32 1e-05, %v6210_v20  ;;  %v6269_v2 = vmul.f32 %v15239_v18, %v6249_v40  ;;  %8968 = vmatmul.mubr.f32.gmra.mrb[110].mxu1 %v7350_v38 }
 0xc75   : > { %v6225_v27 = vadd.f32 1e-05, %v6209_v44  ;;  %v10060_v6 = vpop.eup %10059  ;;  %v6193_v24 = vpop.xlane.xlu0 %6192  ;;  %v6290_v3 = vadd.f32 %v15244_v13, %v6270_v42  ;;  %v6252_v32 = vmul.f32 %v10058_v46, %v15075_v58  ;;  %9002 = vmatprep.mubr.f32.mxu1 %v6288_v10 }
 0xc76   : > { %v6191_v35 = vpop.xlane.xlu1 %6190  ;;  %10069 = vrsqrt.f32 %v6226_v31  ;;  %v6212_v22 = vmul.f32 0.0078125, %v6193_v24  ;;  %v6289_v4 = vadd.f32 %v15244_v13, %v6269_v2  ;;  %v6251_v25 = vmul.f32 %v10060_v6, %v15072_v8 }
 0xc77   : > { %v6211_v50 = vmul.f32 0.0078125, %v6191_v35  ;;  %10071 = vrsqrt.f32 %v6225_v27  ;;  %v6272_v41 = vmul.f32 %v15239_v18, %v6252_v32 }
 0xc78   : > { %v10062_v1 = vpop.eup %10061  ;;  %v6228_v0 = vadd.f32 1e-05, %v6212_v22  ;;  %9003 = vmatmul.mubr.f32.vlgmr.msra.gmra.mrb[96].mxu1 %v6289_v4  ;;  %v6271_v58 = vmul.f32 %v15239_v18, %v6251_v25 }
 0xc79   : > { %v6227_v19 = vadd.f32 1e-05, %v6211_v50  ;;  %v10064_v15 = vpop.eup %10063  ;;  %v6197_v55 = vpop.xlane.xlu0 %6196  ;;  %v6292_v47 = vadd.f32 %v15244_v13, %v6272_v41  ;;  %v6254_v11 = vmul.f32 %v10062_v1, %v15085_v23  ;;  %9005 = vmatprep.mubr.f32.mxu1 %v6290_v3 }
 0xc7a   : > { %v6195_v53 = vpop.xlane.xlu1 %6194  ;;  %10073 = vrsqrt.f32 %v6228_v0  ;;  %v6214_v12 = vmul.f32 0.0078125, %v6197_v55  ;;  %v6253_v8 = vmul.f32 %v10064_v15, %v15082_v5  ;;  %v6291_v16 = vadd.f32 %v15244_v13, %v6271_v58 }
 0xc7b   : > { %v6213_v30 = vmul.f32 0.0078125, %v6195_v53  ;;  %10075 = vrsqrt.f32 %v6227_v19  ;;  %v6274_v9 = vmul.f32 %v15239_v18, %v6254_v11  ;;  %v7676_v19 = vsub.s32 2, %v15945_v26 }
 0xc7c   : > { %v10066_v37 = vpop.eup %10065  ;;  %v6230_v62 = vadd.f32 1e-05, %v6214_v12  ;;  %v6273_v63 = vmul.f32 %v15239_v18, %v6253_v8  ;;  %9006 = vmatmul.mubr.f32.gmra.mrb[98].mxu1 %v6291_v16 }
 0xc7d   : > { %v6229_v56 = vadd.f32 1e-05, %v6213_v30  ;;  %v10068_v45 = vpop.eup %10067  ;;  %v6294_v23 = vadd.f32 %v15244_v13, %v6274_v9  ;;  %v6256_v17 = vmul.f32 %v10066_v37, %v15097_v7  ;;  %9008 = vmatprep.mubr.f32.mxu1 %v6292_v47  ;;  %v15310_v15 = vrot.slane %v15236_v52, %v7676_v19 }
 0xc7e   : > { %v6199_v59 = vpop.xlane.xlu1 %6198  ;;  %10077 = vrsqrt.f32 %v6230_v62  ;;  %v6293_v39 = vadd.f32 %v15244_v13, %v6273_v63  ;;  %v6255_v60 = vmul.f32 %v10068_v45, %v15094_v57 }
 0xc7f   : > { %v6215_v5 = vmul.f32 0.0078125, %v6199_v59  ;;  %10079 = vrsqrt.f32 %v6229_v56  ;;  %v6276_v54 = vmul.f32 %v15239_v18, %v6256_v17 }
 0xc80   : > { %v10070_v48 = vpop.eup %10069  ;;  %v6275_v33 = vmul.f32 %v15239_v18, %v6255_v60  ;;  %9009 = vmatmul.mubr.f32.gmra.mrb[100].mxu1 %v6293_v39 }
 0xc81   : > { %v6231_v36 = vadd.f32 1e-05, %v6215_v5  ;;  %v10072_v34 = vpop.eup %10071  ;;  %v6258_v10 = vmul.f32 %v10070_v48, %v15108_v14  ;;  %9011 = vmatprep.mubr.f32.mxu1 %v6294_v23  ;;  %v6296_v61 = vadd.f32 %v15244_v13, %v6276_v54 }
 0xc82   : > { %v6295_v7 = vadd.f32 %v15244_v13, %v6275_v33  ;;  %v6257_v40 = vmul.f32 %v10072_v34, %v15105_v29 }
 0xc83   : > { %10081 = vrsqrt.f32 %v6231_v36  ;;  %v6278_v57 = vmul.f32 %v15239_v18, %v6258_v10 }
 0xc84   : > { %v10074_v20 = vpop.eup %10073  ;;  %v6277_v44 = vmul.f32 %v15239_v18, %v6257_v40  ;;  %9012 = vmatmul.mubr.f32.gmra.mrb[102].mxu1 %v6295_v7 }
 0xc85   : > { %v10076_v38 = vpop.eup %10075  ;;  %v6260_v42 = vmul.f32 %v10074_v20, %v15118_v49  ;;  %9014 = vmatprep.mubr.f32.mxu1 %v6296_v61  ;;  %v6298_v46 = vadd.f32 %v15244_v13, %v6278_v57 }
 0xc86   : > { %v6297_v14 = vadd.f32 %v15244_v13, %v6277_v44  ;;  %v6259_v31 = vmul.f32 %v10076_v38, %v15115_v51 }
 0xc87   : > { %v6280_v27 = vmul.f32 %v15239_v18, %v6260_v42 }
 0xc88   : > { %v10078_v2 = vpop.eup %10077  ;;  %v6279_v29 = vmul.f32 %v15239_v18, %v6259_v31  ;;  %9015 = vmatmul.mubr.f32.gmra.mrb[104].mxu1 %v6297_v14 }
 0xc89   : > { %v10080_v6 = vpop.eup %10079  ;;  %v6262_v24 = vmul.f32 %v10078_v2, %v15128_v28  ;;  %9017 = vmatprep.mubr.f32.mxu1 %v6298_v46  ;;  %v6300_v49 = vadd.f32 %v15244_v13, %v6280_v27 }
 0xc8a   : > { %v6299_v35 = vadd.f32 %v15244_v13, %v6279_v29  ;;  %v6261_v3 = vmul.f32 %v10080_v6, %v15125_v43  ;;  %v7786_v43 = vld [vmem:[%s15394_s11 + $0x60] sm:$0xff] }
 0xc8b   : > { %v6282_v32 = vmul.f32 %v15239_v18, %v6262_v24 }
 0xc8c   : > { %v6281_v51 = vmul.f32 %v15239_v18, %v6261_v3  ;;  %9018 = vmatmul.mubr.f32.gmra.mrb[106].mxu1 %v6299_v35 }
 0xc8d   : > { %v10082_v22 = vpop.eup %10081  ;;  %9020 = vmatprep.mubr.f32.mxu1 %v6300_v49  ;;  %v6302_v28 = vadd.f32 %v15244_v13, %v6282_v32 }
 0xc8e   : > { %v6263_v50 = vmul.f32 %v10082_v22, %v15135_v21  ;;  %v6301_v4 = vadd.f32 %v15244_v13, %v6281_v51  ;;  %v7787_v21 = vld [vmem:[%s15394_s11 + $0x68] sm:$0xff] }
 0xc8f   : > { %v9380_v1 = vpack.c.bf16 %v7787_v21, %v7786_v43 }
 0xc90   : > { %v6283_v25 = vmul.f32 %v15239_v18, %v6263_v50  ;;  %9021 = vmatmul.mubr.f32.gmra.mrb[108].mxu1 %v6301_v4  ;;  %v7788_v18 = vld [vmem:[%s15394_s11 + $0x70] sm:$0xff] }
 0xc91   : > { %9023 = vmatprep.mubr.f32.mxu1 %v6302_v28  ;;  %9381 = vmatprep.subr.bf16.mxu0 %v9380_v1 }
 0xc92   : > { %v6303_v41 = vadd.f32 %v15244_v13, %v6283_v25  ;;  %9383 = vmatpush3.bf16.msra.mxu0 %v9380_v1  ;;  %v7789_v13 = vld [vmem:[%s15394_s11 + $0x78] sm:$0xff] }
 0xc93   : > { %v9384_v0 = vpack.c.bf16 %v7789_v13, %v7788_v18 }
 0xc94   : > { %9024 = vmatmul.mubr.f32.gmra.mrb[110].mxu1 %v6303_v41 }
 0xc95   : > { %9385 = vmatprep.subr.bf16.mxu0 %v9384_v0 }
 0xc96   : > { %9387 = vmatpush3.bf16.msra.mxu0 %v9384_v0 }
 0xd4b   : > { %v9004_v55 = vpop.f32.mrb[96].mxu1 }
 0xd4c   : > { %v7679_v53 = vadd.f32 %v9004_v55, %v15310_v15  ;;  %v7595_v58 = vpop.f32.mrb[97].mxu1 }
 0xd4d   : > { %v7678_v47 = vadd.f32 %v15310_v15, %v7595_v58 }
 0xd4e   : > { %v7711_v11 = vmul.f32 0.70710677, %v7679_v53  ;;  %v7695_v44 = vmul.f32 0.5, %v7679_v53 }
 0xd4f   : > { %v7710_v12 = vmul.f32 0.70710677, %v7678_v47  ;;  %v9007_v30 = vpop.f32.mrb[98].mxu1  ;;  %v7694_v61 = vmul.f32 0.5, %v7678_v47 }
 0xd50   : > { %10083 = verf.f32 %v7711_v11  ;;  %v7681_v8 = vadd.f32 %v9007_v30, %v15310_v15  ;;  %v7605_v16 = vpop.f32.mrb[99].mxu1 }
 0xd51   : > { %10085 = verf.f32 %v7710_v12  ;;  %v7680_v9 = vadd.f32 %v15310_v15, %v7605_v16 }
 0xd52   : > { %v7713_v37 = vmul.f32 0.70710677, %v7681_v8  ;;  %v7697_v32 = vmul.f32 0.5, %v7681_v8 }
 0xd53   : > { %v7712_v62 = vmul.f32 0.70710677, %v7680_v9  ;;  %v9010_v56 = vpop.f32.mrb[100].mxu1  ;;  %v7696_v24 = vmul.f32 0.5, %v7680_v9 }
 0xd54   : > { %10087 = verf.f32 %v7713_v37  ;;  %v7683_v63 = vadd.f32 %v9010_v56, %v15310_v15  ;;  %v7615_v45 = vpop.f32.mrb[101].mxu1 }
 0xd55   : > { %10089 = verf.f32 %v7712_v62  ;;  %v7682_v59 = vadd.f32 %v15310_v15, %v7615_v45 }
 0xd56   : > { %v7715_v23 = vmul.f32 0.70710677, %v7683_v63  ;;  %v7699_v19 = vmul.f32 0.5, %v7683_v63 }
 0xd57   : > { %v7714_v17 = vmul.f32 0.70710677, %v7682_v59  ;;  %v9013_v5 = vpop.f32.mrb[102].mxu1  ;;  %v7698_v1 = vmul.f32 0.5, %v7682_v59 }
 0xd58   : > { %10091 = verf.f32 %v7715_v23  ;;  %v15319_v39 = vadd.f32 %v9013_v5, %v15310_v15  ;;  %v7625_v60 = vpop.f32.mrb[103].mxu1 }
 0xd59   : > { %10093 = verf.f32 %v7714_v17  ;;  %v7684_v54 = vadd.f32 %v15310_v15, %v7625_v60 }
 0xd5a   : > { %v10084_v48 = vpop.eup %10083  ;;  %v7717_v36 = vmul.f32 0.70710677, %v15319_v39  ;;  %v7701_v63 = vmul.f32 0.5, %v15319_v39 }
 0xd5b   : > { %v10086_v33 = vpop.eup %10085  ;;  %v7743_v34 = vadd.f32 1.0, %v10084_v48  ;;  %v7716_v10 = vmul.f32 0.70710677, %v7684_v54  ;;  %v9016_v7 = vpop.f32.mrb[104].mxu1  ;;  %v7700_v9 = vmul.f32 0.5, %v7684_v54 }
 0xd5c   : > { %v7742_v40 = vadd.f32 1.0, %v10086_v33  ;;  %10095 = verf.f32 %v7717_v36  ;;  %v15324_v57 = vadd.f32 %v9016_v7, %v15310_v15  ;;  %v7635_v20 = vpop.f32.mrb[105].mxu1 }
 0xd5d   : > { %10097 = verf.f32 %v7716_v10  ;;  %v7686_v38 = vadd.f32 %v15310_v15, %v7635_v20  ;;  %v7759_v27 = vmul.f32 %v7743_v34, %v7695_v44 }
 0xd5e   : > { %v10088_v42 = vpop.eup %10087  ;;  %v7719_v14 = vmul.f32 0.70710677, %v15324_v57  ;;  %v7758_v46 = vmul.f32 %v7742_v40, %v7694_v61  ;;  %v7703_v34 = vmul.f32 0.5, %v15324_v57 }
 0xd5f   : > { %v10090_v31 = vpop.eup %10089  ;;  %v7745_v2 = vadd.f32 1.0, %v10088_v42  ;;  %v7718_v29 = vmul.f32 0.70710677, %v7686_v38  ;;  %v9019_v6 = vpop.f32.mrb[106].mxu1  ;;  %v7702_v54 = vmul.f32 0.5, %v7686_v38 }
 0xd60   : > { %v7744_v35 = vadd.f32 1.0, %v10090_v31  ;;  %10099 = verf.f32 %v7719_v14  ;;  %v15329_v49 = vadd.f32 %v9019_v6, %v15310_v15  ;;  %v7645_v3 = vpop.f32.mrb[107].mxu1  ;;  %9058 = vmatprep.mubr.f32.mxu0 %v7758_v46 }
 0xd61   : > { %10101 = verf.f32 %v7718_v29  ;;  %v7688_v22 = vadd.f32 %v15310_v15, %v7645_v3  ;;  %9059 = vmatmul.mubr.f32.vlgmr.msra.gmra.mrb[144].mxu0 %v7759_v27  ;;  %v7761_v21 = vmul.f32 %v7745_v2, %v7697_v32 }
 0xd62   : > { %v10092_v51 = vpop.eup %10091  ;;  %v7721_v50 = vmul.f32 0.70710677, %v15329_v49  ;;  %v7760_v4 = vmul.f32 %v7744_v35, %v7696_v24  ;;  %v7705_v44 = vmul.f32 0.5, %v15329_v49 }
 0xd63   : > { %v10094_v28 = vpop.eup %10093  ;;  %v7747_v25 = vadd.f32 1.0, %v10092_v51  ;;  %v7720_v41 = vmul.f32 0.70710677, %v7688_v22  ;;  %v9022_v43 = vpop.f32.mrb[108].mxu1  ;;  %v7704_v40 = vmul.f32 0.5, %v7688_v22 }
 0xd64   : > { %v7746_v18 = vadd.f32 1.0, %v10094_v28  ;;  %10103 = verf.f32 %v7721_v50  ;;  %v7691_v13 = vadd.f32 %v9022_v43, %v15310_v15  ;;  %v7655_v0 = vpop.f32.mrb[109].mxu1  ;;  %9061 = vmatprep.mubr.f32.mxu0 %v7760_v4  ;;  %v7792_v4 = vsub.s32 3, %v15945_v26 }
 0xd65   : > { %10105 = verf.f32 %v7720_v41  ;;  %v7690_v55 = vadd.f32 %v15310_v15, %v7655_v0  ;;  %9062 = vmatmul.mubr.f32.gmra.mrb[146].mxu0 %v7761_v21  ;;  %v7763_v16 = vmul.f32 %v7747_v25, %v7699_v19 }
 0xd66   : > { %v10096_v53 = vpop.eup %10095  ;;  %v7723_v58 = vmul.f32 0.70710677, %v7691_v13  ;;  %v7762_v47 = vmul.f32 %v7746_v18, %v7698_v1  ;;  %v7707_v2 = vmul.f32 0.5, %v7691_v13  ;;  %v7793_v28 = vrot.slane %v15236_v52, %v7792_v4 }
 0xd67   : > { %v10098_v11 = vpop.eup %10097  ;;  %v7749_v12 = vadd.f32 1.0, %v10096_v53  ;;  %v7722_v30 = vmul.f32 0.70710677, %v7690_v55  ;;  %v9025_v8 = vpop.f32.mrb[110].mxu1  ;;  %v7706_v27 = vmul.f32 0.5, %v7690_v55 }
 0xd68   : > { %v7748_v37 = vadd.f32 1.0, %v10098_v11  ;;  %10107 = verf.f32 %v7723_v58  ;;  %v7693_v62 = vadd.f32 %v9025_v8, %v15310_v15  ;;  %v7665_v56 = vpop.f32.mrb[111].mxu1  ;;  %9064 = vmatprep.mubr.f32.mxu0 %v7762_v47 }
 0xd69   : > { %10109 = verf.f32 %v7722_v30  ;;  %v7692_v45 = vadd.f32 %v15310_v15, %v7665_v56  ;;  %9065 = vmatmul.mubr.f32.gmra.mrb[148].mxu0 %v7763_v16  ;;  %v7765_v36 = vmul.f32 %v7749_v12, %v7701_v63 }
 0xd6a   : > { %v10100_v59 = vpop.eup %10099  ;;  %v7725_v23 = vmul.f32 0.70710677, %v7693_v62  ;;  %v7764_v17 = vmul.f32 %v7748_v37, %v7700_v9  ;;  %v7709_v49 = vmul.f32 0.5, %v7693_v62 }
 0xd6b   : > { %v10102_v5 = vpop.eup %10101  ;;  %v7751_v60 = vadd.f32 1.0, %v10100_v59  ;;  %v7724_v48 = vmul.f32 0.70710677, %v7692_v45  ;;  %v7708_v32 = vmul.f32 0.5, %v7692_v45 }
 0xd6c   : > { %v7750_v33 = vadd.f32 1.0, %v10102_v5  ;;  %10111 = verf.f32 %v7725_v23  ;;  %9067 = vmatprep.mubr.f32.mxu0 %v7764_v17 }
 0xd6d   : > { %10113 = verf.f32 %v7724_v48  ;;  %9068 = vmatmul.mubr.f32.gmra.mrb[150].mxu0 %v7765_v36  ;;  %v7767_v61 = vmul.f32 %v7751_v60, %v7703_v34 }
 0xd6e   : > { %v10104_v39 = vpop.eup %10103  ;;  %v7766_v10 = vmul.f32 %v7750_v33, %v7702_v54 }
 0xd6f   : > { %v10106_v7 = vpop.eup %10105  ;;  %v7753_v15 = vadd.f32 1.0, %v10104_v39 }
 0xd70   : > { %v7752_v20 = vadd.f32 1.0, %v10106_v7  ;;  %9070 = vmatprep.mubr.f32.mxu0 %v7766_v10 }
 0xd71   : > { %9071 = vmatmul.mubr.f32.gmra.mrb[152].mxu0 %v7767_v61  ;;  %v7769_v31 = vmul.f32 %v7753_v15, %v7705_v44 }
 0xd72   : > { %v10108_v42 = vpop.eup %10107  ;;  %v7768_v38 = vmul.f32 %v7752_v20, %v7704_v40 }
 0xd73   : > { %v10110_v14 = vpop.eup %10109  ;;  %v7755_v46 = vadd.f32 1.0, %v10108_v42 }
 0xd74   : > { %v7754_v57 = vadd.f32 1.0, %v10110_v14  ;;  %9073 = vmatprep.mubr.f32.mxu0 %v7768_v38 }
 0xd75   : > { %9074 = vmatmul.mubr.f32.gmra.mrb[154].mxu0 %v7769_v31  ;;  %v7771_v3 = vmul.f32 %v7755_v46, %v7707_v2 }
 0xd76   : > { %v10112_v29 = vpop.eup %10111  ;;  %v7770_v6 = vmul.f32 %v7754_v57, %v7706_v27 }
 0xd77   : > { %v10114_v24 = vpop.eup %10113  ;;  %v7757_v35 = vadd.f32 1.0, %v10112_v29 }
 0xd78   : > { %v7756_v22 = vadd.f32 1.0, %v10114_v24  ;;  %9076 = vmatprep.mubr.f32.mxu0 %v7770_v6 }
 0xd79   : > { %9077 = vmatmul.mubr.f32.gmra.mrb[156].mxu0 %v7771_v3  ;;  %v7773_v50 = vmul.f32 %v7757_v35, %v7709_v49 }
 0xd7a   : > { %v7772_v51 = vmul.f32 %v7756_v22, %v7708_v32 }
 0xd7c   : > { %9079 = vmatprep.mubr.f32.mxu0 %v7772_v51 }
 0xd7d   : > { %9080 = vmatmul.mubr.f32.gmra.mrb[158].mxu0 %v7773_v50 }
 0xe34   : > { %v9060_v25 = vpop.f32.mrb[144].mxu0 }
 0xe35   : > { %v7866_v41 = vadd.f32 %v9060_v25, %v7793_v28  ;;  %v7860_v43 = vpop.f32.mrb[145].mxu0 }
 0xe36   : > { %v7861_v21 = vadd.f32 %v7860_v43, %v7793_v28 }
 0xe37   : > { %7941 = vst.msk [vmem:[%s15346_s21 + $0x8] sm:$0xff] %vm7939_vm2, %v7866_v41 }
 0xe38   : > { %7940 = vst.msk [vmem:[%s15346_s21] sm:$0xff] %vm7939_vm2, %v7861_v21  ;;  %v9063_v26 = vpop.f32.mrb[146].mxu0 }
 0xe39   : > { %v7876_v52 = vadd.f32 %v9063_v26, %v7793_v28  ;;  %v7870_v1 = vpop.f32.mrb[147].mxu0 }
 0xe3a   : > { %v7871_v18 = vadd.f32 %v7870_v1, %v7793_v28 }
 0xe3b   : > { %7943 = vst.msk [vmem:[%s15346_s21 + $0x18] sm:$0xff] %vm7939_vm2, %v7876_v52 }
 0xe3c   : > { %7942 = vst.msk [vmem:[%s15346_s21 + $0x10] sm:$0xff] %vm7939_vm2, %v7871_v18  ;;  %v9066_v13 = vpop.f32.mrb[148].mxu0 }
 0xe3d   : > { %v7886_v0 = vadd.f32 %v9066_v13, %v7793_v28  ;;  %v7880_v19 = vpop.f32.mrb[149].mxu0 }
 0xe3e   : > { %v7881_v55 = vadd.f32 %v7880_v19, %v7793_v28 }
 0xe3f   : > { %7945 = vst.msk [vmem:[%s15346_s21 + $0x28] sm:$0xff] %vm7939_vm2, %v7886_v0 }
 0xe40   : > { %7944 = vst.msk [vmem:[%s15346_s21 + $0x20] sm:$0xff] %vm7939_vm2, %v7881_v55  ;;  %v9069_v53 = vpop.f32.mrb[150].mxu0 }
 0xe41   : > { %v7896_v58 = vadd.f32 %v9069_v53, %v7793_v28  ;;  %v7890_v47 = vpop.f32.mrb[151].mxu0 }
 0xe42   : > { %v7891_v11 = vadd.f32 %v7890_v47, %v7793_v28 }
 0xe43   : > { %7947 = vst.msk [vmem:[%s15346_s21 + $0x38] sm:$0xff] %vm7939_vm2, %v7896_v58 }
 0xe44   : > { %7946 = vst.msk [vmem:[%s15346_s21 + $0x30] sm:$0xff] %vm7939_vm2, %v7891_v11  ;;  %v9072_v12 = vpop.f32.mrb[152].mxu0 }
 0xe45   : > { %v7906_v30 = vadd.f32 %v9072_v12, %v7793_v28  ;;  %v7900_v8 = vpop.f32.mrb[153].mxu0 }
 0xe46   : > { %v7901_v16 = vadd.f32 %v7900_v8, %v7793_v28 }
 0xe47   : > { %7949 = vst.msk [vmem:[%s15346_s21 + $0x48] sm:$0xff] %vm7939_vm2, %v7906_v30 }
 0xe48   : > { %7948 = vst.msk [vmem:[%s15346_s21 + $0x40] sm:$0xff] %vm7939_vm2, %v7901_v16  ;;  %v9075_v9 = vpop.f32.mrb[154].mxu0 }
 0xe49   : > { %v7916_v37 = vadd.f32 %v9075_v9, %v7793_v28  ;;  %v7910_v62 = vpop.f32.mrb[155].mxu0 }
 0xe4a   : > { %v7911_v56 = vadd.f32 %v7910_v62, %v7793_v28 }
 0xe4b   : > { %7951 = vst.msk [vmem:[%s15346_s21 + $0x58] sm:$0xff] %vm7939_vm2, %v7916_v37 }
 0xe4c   : > { %7950 = vst.msk [vmem:[%s15346_s21 + $0x50] sm:$0xff] %vm7939_vm2, %v7911_v56  ;;  %v9078_v63 = vpop.f32.mrb[156].mxu0 }
 0xe4d   : > { %v7926_v45 = vadd.f32 %v9078_v63, %v7793_v28  ;;  %v7920_v59 = vpop.f32.mrb[157].mxu0 }
 0xe4e   : > { %v7921_v23 = vadd.f32 %v7920_v59, %v7793_v28 }
 0xe4f   : > { %7953 = vst.msk [vmem:[%s15346_s21 + $0x68] sm:$0xff] %vm7939_vm2, %v7926_v45 }
 0xe50   : > { %7952 = vst.msk [vmem:[%s15346_s21 + $0x60] sm:$0xff] %vm7939_vm2, %v7921_v23  ;;  %v9081_v17 = vpop.f32.mrb[158].mxu0 }
 0xe51   : > { %v7936_v5 = vadd.f32 %v9081_v17, %v7793_v28  ;;  %v7930_v60 = vpop.f32.mrb[159].mxu0 }
 0xe52   : > { %v7931_v48 = vadd.f32 %v7930_v60, %v7793_v28 }
 0xe53   : > { %7955 = vst.msk [vmem:[%s15346_s21 + $0x78] sm:$0xff] %vm7939_vm2, %v7936_v5 }
 0xe54   : > { %7954 = vst.msk [vmem:[%s15346_s21 + $0x70] sm:$0xff] %vm7939_vm2, %v7931_v48 }
 0xe55 PF: > { %s25_s25 = sadd.s32 1, %s10188_s25  }
 0xe56   : > { %p22_p5 = scmp.ge.s32.totalorder %s25_s25, 4  }
 0xe58   :  { %24 = sbr.rel (!%p22_p5) target bundleno = 2 (0x2), region = 122 }
 0xe5f   :  { %7978 = vsyncpa [#allocation3], 1 }
 0xe60   :  { %7980 = vsyncpa [#allocation3 + $0x1], 1 }
 0xe61   :  { %7981 = vsyncpa [#allocation5], 1 }

</bundles_post_ra>
